<compile_context>
chip_gen: v7x
topology: tpu7x:2x2x1
jax: 0.10.0
libtpu: 0.0.40
codegen_flags: <defaults>
</compile_context>

<pallas_src>
import functools
import math

import jax
import jax.numpy as jnp
from jax.experimental import pallas as pl
from jax.experimental.pallas import tpu as pltpu

EPS = 1e-5
# Above the 16/32 MiB scoped-VMEM defaults (v5e/v6e), safely below v7x's 64 MiB.
VMEM_LIMIT_BYTES = 48 * 1024 * 1024


# ------------------------- in-kernel math helpers ------------------------- #

def _wdot(a, w):
    """a @ w with a bf16-streamed weight; f32 accumulation on the MXU."""
    return jnp.dot(a, w.astype(jnp.float32), preferred_element_type=jnp.float32)


def _ln_rows(x, gamma, beta, eps=EPS):
    """LayerNorm over the last (lane) axis; gamma/beta are (1, F) rows."""
    mu = jnp.mean(x, axis=-1, keepdims=True)
    var = jnp.mean((x - mu) ** 2, axis=-1, keepdims=True)
    return (x - mu) * jax.lax.rsqrt(var + eps) * gamma + beta


def _ln_cols(xt, gamma_col, beta_col, eps=EPS):
    """Same LayerNorm on a transposed (F, B) activation; params are (F, 1)."""
    mu = jnp.mean(xt, axis=0, keepdims=True)
    var = jnp.mean((xt - mu) ** 2, axis=0, keepdims=True)
    return (xt - mu) * jax.lax.rsqrt(var + eps) * gamma_col + beta_col


def _attention_core(q, kT, v, r_scr):
    """Single-head attention over the feature axis (PyTorch `attention`).

    q: (B, D) rows, ALREADY scaled by 1/sqrt(D);  kT: (D, B) columns;
    v: (B, D) rows;  r_scr: (B, D) f32 VMEM scratch.  Returns r: (B, D).
    Per batch row b:  r_i = sum_j softmax_j(q_i * k_j) * v_j.
    Uses the transposed score matrix sT[j,i] = k_j * q_i; the row max over j
    is computed analytically from the rank-1 structure (q_i*kmax / q_i*kmin).
    """
    batch = q.shape[0]
    for b in range(batch):                       # B is tiny and static
        q_row = q[b:b + 1, :]                    # (1, D)
        k_col = kT[:, b:b + 1]                   # (D, 1)
        v_row = v[b:b + 1, :]                    # (1, D)
        k_max = jnp.max(k_col, axis=0, keepdims=True)   # (1, 1)
        k_min = jnp.min(k_col, axis=0, keepdims=True)   # (1, 1)
        m_row = jnp.where(q_row >= 0.0, q_row * k_max, q_row * k_min)  # (1, D)
        pT = jnp.exp(k_col * q_row - m_row)      # (D, D): pT[j, i]
        den = jnp.sum(pT, axis=0, keepdims=True)                       # (1, D)
        num = jnp.dot(v_row, pT, preferred_element_type=jnp.float32)   # (1, D)
        r_scr[b:b + 1, :] = num * pl.reciprocal(den, approx=True)
    return r_scr[...]


def _self_attn_sublayer(x, xt, g, be, gc, bec, wq, bq, wkt, bkc, wv, bv,
                        scale, r_scr):
    """x + SelfAttn(LN(x)); q, v from the row view, k from the column view."""
    xn = _ln_rows(x, g, be)
    xnt = _ln_cols(xt, gc, bec)
    q = (_wdot(xn, wq) + bq) * scale                      # scale folded into q
    v = _wdot(xn, wv) + bv
    kT = jnp.dot(wkt.astype(jnp.float32), xnt,
                 preferred_element_type=jnp.float32) + bkc          # (D, B)
    return x + _attention_core(q, kT, v, r_scr)


def _cross_attn_sublayer(x, mem, memt, g, be, wq, bq, wkt, bkc, wv, bv,
                         scale, r_scr):
    """x + CrossAttn(LN(x), memory, memory) -- memory is NOT normalized."""
    xn = _ln_rows(x, g, be)
    q = (_wdot(xn, wq) + bq) * scale
    v = _wdot(mem, wv) + bv
    kT = jnp.dot(wkt.astype(jnp.float32), memt,
                 preferred_element_type=jnp.float32) + bkc           # (D, B)
    return x + _attention_core(q, kT, v, r_scr)


def _ff_sublayer(x, g, be, w1, b1, w2, b2, go, bo):
    """LN_out(x + Linear2(ReLU(Linear1(LN(x)))))."""
    h = _ln_rows(x, g, be)
    h = _wdot(h, w1) + b1
    h = jnp.maximum(h, 0.0)
    h = _wdot(h, w2) + b2
    return _ln_rows(x + h, go, bo)


# ------------------------------ Pallas kernels ----------------------------- #

def _make_mlp_block_kernel(softplus):
    """input/output block: Linear -> LN -> ReLU -> Linear [-> Softplus].

    pmid rows: 0 = b1, 1 = ln_g, 2 = ln_b.  The grid (if any) streams Fout
    tiles of w2/b2; the cheap hidden activation is recomputed per tile.
    """
    def kernel(x_ref, w1_ref, pmid_ref, w2_ref, b2_ref, o_ref):
        pmid = pmid_ref[...]
        h = _wdot(x_ref[...], w1_ref[...]) + pmid[0:1, :]
        h = _ln_rows(h, pmid[1:2, :], pmid[2:3, :])
        h = jnp.maximum(h, 0.0)
        y = _wdot(h, w2_ref[...]) + b2_ref[...]
        if softplus:
            y = jnp.logaddexp(y, 0.0)
        o_ref[...] = y.astype(o_ref.dtype)
    return kernel


def _make_encoder_kernel(d_model):
    scale = 1.0 / math.sqrt(d_model)

    # rowp rows: 0 ln1_g, 1 ln1_b, 2 bq, 3 bv, 4 ln2_g, 5 ln2_b, 6 ff_b2,
    #            7 lno_g, 8 lno_b
    # colp cols: 0 ln1_gc, 1 ln1_bc, 2 bk_c
    def kernel(x_ref, xt_ref, rowp_ref, colp_ref,
               wq_ref, wkt_ref, wv_ref, wf1_ref, bf1_ref, wf2_ref,
               o_ref, r_scr):
        rowp = rowp_ref[...]
        colp = colp_ref[...]
        x = x_ref[...]
        x1 = _self_attn_sublayer(
            x, xt_ref[...],
            rowp[0:1, :], rowp[1:2, :], colp[:, 0:1], colp[:, 1:2],
            wq_ref[...], rowp[2:3, :], wkt_ref[...], colp[:, 2:3],
            wv_ref[...], rowp[3:4, :], scale, r_scr)
        y = _ff_sublayer(x1, rowp[4:5, :], rowp[5:6, :],
                         wf1_ref[...], bf1_ref[...], wf2_ref[...], rowp[6:7, :],
                         rowp[7:8, :], rowp[8:9, :])
        o_ref[...] = y.astype(o_ref.dtype)
    return kernel


def _make_decoder_kernel(d_model):
    scale = 1.0 / math.sqrt(d_model)

    # rowp rows: 0 ln1_g, 1 ln1_b, 2 s_bq, 3 s_bv, 4 ln2_g, 5 ln2_b, 6 c_bq,
    #            7 c_bv, 8 ln3_g, 9 ln3_b, 10 ff_b2, 11 lno_g, 12 lno_b
    # colp cols: 0 ln1_gc, 1 ln1_bc, 2 s_bk_c, 3 c_bk_c
    def kernel(x_ref, xt_ref, mem_ref, memt_ref, rowp_ref, colp_ref,
               swq_ref, swkt_ref, swv_ref,
               cwq_ref, cwkt_ref, cwv_ref,
               wf1_ref, bf1_ref, wf2_ref,
               o_ref, r_scr):
        rowp = rowp_ref[...]
        colp = colp_ref[...]
        x = x_ref[...]
        x1 = _self_attn_sublayer(
            x, xt_ref[...],
            rowp[0:1, :], rowp[1:2, :], colp[:, 0:1], colp[:, 1:2],
            swq_ref[...], rowp[2:3, :], swkt_ref[...], colp[:, 2:3],
            swv_ref[...], rowp[3:4, :], scale, r_scr)
        x2 = _cross_attn_sublayer(
            x1, mem_ref[...], memt_ref[...],
            rowp[4:5, :], rowp[5:6, :],
            cwq_ref[...], rowp[6:7, :], cwkt_ref[...], colp[:, 3:4],
            cwv_ref[...], rowp[7:8, :], scale, r_scr)
        y = _ff_sublayer(x2, rowp[8:9, :], rowp[9:10, :],
                         wf1_ref[...], bf1_ref[...], wf2_ref[...],
                         rowp[10:11, :], rowp[11:12, :], rowp[12:13, :])
        o_ref[...] = y.astype(o_ref.dtype)
    return kernel


# ------------------------------ pallas wrappers ----------------------------- #

def _fused_call(kernel, inputs, out_shape, out_dtype, scratch_shapes=()):
    """Single-block pallas_call: every (2-D) operand is one full-array VMEM block."""
    return pl.pallas_call(
        kernel,
        grid=(1,),
        out_shape=jax.ShapeDtypeStruct(out_shape, out_dtype),
        in_specs=[pl.BlockSpec(a.shape, lambda i: (0, 0)) for a in inputs],
        out_specs=pl.BlockSpec(out_shape, lambda i: (0, 0)),
        scratch_shapes=list(scratch_shapes),
        compiler_params=pltpu.CompilerParams(
            dimension_semantics=("arbitrary",),
            vmem_limit_bytes=VMEM_LIMIT_BYTES),
    )(*inputs)


def _fout_tile(fout):
    """Output-projection lane tile: 512-lane stream when it divides, else full."""
    if fout > 512 and fout % 512 == 0:
        return 512
    return fout


def mlp_block(x, kp, *, softplus):
    batch = x.shape[0]
    fout = kp["w2"].shape[1]
    tn = _fout_tile(fout)
    return pl.pallas_call(
        _make_mlp_block_kernel(softplus),
        grid=(pl.cdiv(fout, tn),),
        out_shape=jax.ShapeDtypeStruct((batch, fout), jnp.float32),
        in_specs=[
            pl.BlockSpec(x.shape, lambda j: (0, 0)),
            pl.BlockSpec(kp["w1"].shape, lambda j: (0, 0)),
            pl.BlockSpec(kp["pmid"].shape, lambda j: (0, 0)),
            pl.BlockSpec((kp["w2"].shape[0], tn), lambda j: (0, j)),
            pl.BlockSpec((1, tn), lambda j: (0, j)),
        ],
        out_specs=pl.BlockSpec((batch, tn), lambda j: (0, j)),
        compiler_params=pltpu.CompilerParams(
            dimension_semantics=("parallel",),        # megacore on v7x
            vmem_limit_bytes=VMEM_LIMIT_BYTES),
    )(x, kp["w1"], kp["pmid"], kp["w2"], kp["b2"])


def encoder_block(x, kp, d_model):
    xt = x.T  # tiny (B x d_model) XLA-side transpose; avoids in-kernel relayout
    inputs = [x, xt, kp["rowp"], kp["colp"],
              kp["wq"], kp["wkt"], kp["wv"],
              kp["wf1"], kp["bf1"], kp["wf2"]]
    return _fused_call(_make_encoder_kernel(d_model), inputs, x.shape, x.dtype,
                       scratch_shapes=[pltpu.VMEM(x.shape, jnp.float32)])


def decoder_block(x, memory, kp, d_model):
    xt, memt = x.T, memory.T
    inputs = [x, xt, memory, memt, kp["rowp"], kp["colp"],
              kp["swq"], kp["swkt"], kp["swv"],
              kp["cwq"], kp["cwkt"], kp["cwv"],
              kp["wf1"], kp["bf1"], kp["wf2"]]
    return _fused_call(_make_decoder_kernel(d_model), inputs, x.shape, x.dtype,
                       scratch_shapes=[pltpu.VMEM(x.shape, jnp.float32)])


def transformer_forward(source, target, kparams, *, d_model, reverse=False):
    """Pallas forward of Transformer.forward (inference: dropout = identity).

    # TODO(synk): multi-head (head_number > 1) path incl. concat_layer is not
    # implemented; the module default head_number=1 is what this covers.
    """
    source_emb = mlp_block(source, kparams["inp0"], softplus=False)
    target_emb = mlp_block(target, kparams["inp1"], softplus=False)
    if reverse:
        memory = encoder_block(target_emb, kparams["enc"], d_model)
        dec_out = decoder_block(source_emb, memory, kparams["dec"], d_model)
    else:
        memory = encoder_block(source_emb, kparams["enc"], d_model)
        dec_out = decoder_block(target_emb, memory, kparams["dec"], d_model)
    return mlp_block(dec_out, kparams["out"], softplus=True)


# ------------------------------ initialization ------------------------------ #

def init_transformer_params(key, input_size, d_mid, d_model, d_ff):
    """PyTorch-style init. Weight matrices are stored bf16 (streamed bf16 into
    the kernels); biases / LayerNorm params stay f32."""
    keys = iter(jax.random.split(key, 40))

    def linear(fin, fout):
        kw, kb = jax.random.split(next(keys))
        bound = 1.0 / math.sqrt(fin)
        w = jax.random.uniform(kw, (fin, fout), jnp.float32, -bound, bound)
        b = jax.random.uniform(kb, (1, fout), jnp.float32, -bound, bound)
        return w.astype(jnp.bfloat16), b

    def layer_norm(f):
        return jnp.ones((1, f), jnp.float32), jnp.zeros((1, f), jnp.float32)

    def mlp_params(fin, fmid, fout):
        w1, b1 = linear(fin, fmid)
        g, be = layer_norm(fmid)
        w2, b2 = linear(fmid, fout)
        return dict(w1=w1, b1=b1, ln_g=g, ln_b=be, w2=w2, b2=b2)

    def attn_params(d):
        wq, bq = linear(d, d)
        wk, bk = linear(d, d)
        wv, bv = linear(d, d)
        return dict(wq=wq, bq=bq, wk=wk, bk=bk, wv=wv, bv=bv)

    def encoder_params(d, dff):
        g1, b1 = layer_norm(d)
        g2, b2 = layer_norm(d)
        go, bo = layer_norm(d)
        w1, bb1 = linear(d, dff)
        w2, bb2 = linear(dff, d)
        return dict(ln1_g=g1, ln1_b=b1, attn=attn_params(d),
                    ln2_g=g2, ln2_b=b2, w1=w1, b1=bb1, w2=w2, b2=bb2,
                    lno_g=go, lno_b=bo)

    def decoder_params(d, dff):
        g1, b1 = layer_norm(d)
        g2, b2 = layer_norm(d)
        g3, b3 = layer_norm(d)
        go, bo = layer_norm(d)
        w1, bb1 = linear(d, dff)
        w2, bb2 = linear(dff, d)
        return dict(ln1_g=g1, ln1_b=b1, self_attn=attn_params(d),
                    ln2_g=g2, ln2_b=b2, cross_attn=attn_params(d),
                    ln3_g=g3, ln3_b=b3, w1=w1, b1=bb1, w2=w2, b2=bb2,
                    lno_g=go, lno_b=bo)

    return dict(inp0=mlp_params(input_size, d_mid, d_model),
                inp1=mlp_params(input_size, d_mid, d_model),
                enc=encoder_params(d_model, d_ff),
                dec=decoder_params(d_model, d_ff),
                out=mlp_params(d_model, d_mid, input_size))


def pack_params(p):
    """Host-side packing of the small LN/bias params into stacked operands and
    (out,in)-layout copies of the k-projection weights (one-time, outside jit)."""
    def pack_mlp(bp):
        return dict(w1=bp["w1"],
                    pmid=jnp.concatenate([bp["b1"], bp["ln_g"], bp["ln_b"]], 0),
                    w2=bp["w2"], b2=bp["b2"])

    def pack_enc(ep):
        a = ep["attn"]
        rowp = jnp.concatenate([ep["ln1_g"], ep["ln1_b"], a["bq"], a["bv"],
                                ep["ln2_g"], ep["ln2_b"], ep["b2"],
                                ep["lno_g"], ep["lno_b"]], 0)
        colp = jnp.concatenate([ep["ln1_g"].T, ep["ln1_b"].T, a["bk"].T], 1)
        return dict(rowp=rowp, colp=colp,
                    wq=a["wq"], wkt=a["wk"].T, wv=a["wv"],
                    wf1=ep["w1"], bf1=ep["b1"], wf2=ep["w2"])

    def pack_dec(dp):
        sa, ca = dp["self_attn"], dp["cross_attn"]
        rowp = jnp.concatenate([dp["ln1_g"], dp["ln1_b"], sa["bq"], sa["bv"],
                                dp["ln2_g"], dp["ln2_b"], ca["bq"], ca["bv"],
                                dp["ln3_g"], dp["ln3_b"], dp["b2"],
                                dp["lno_g"], dp["lno_b"]], 0)
        colp = jnp.concatenate([dp["ln1_g"].T, dp["ln1_b"].T,
                                sa["bk"].T, ca["bk"].T], 1)
        return dict(rowp=rowp, colp=colp,
                    swq=sa["wq"], swkt=sa["wk"].T, swv=sa["wv"],
                    cwq=ca["wq"], cwkt=ca["wk"].T, cwv=ca["wv"],
                    wf1=dp["w1"], bf1=dp["b1"], wf2=dp["w2"])

    return dict(inp0=pack_mlp(p["inp0"]), inp1=pack_mlp(p["inp1"]),
                enc=pack_enc(p["enc"]), dec=pack_dec(p["dec"]),
                out=pack_mlp(p["out"]))


# --------------------------------- reference -------------------------------- #

def reference_forward(source, target, params, *, d_model, reverse=False, eps=EPS):
    hi = jax.lax.Precision.HIGHEST

    def mm(a, b):
        return jnp.dot(a, b.astype(jnp.float32), precision=hi)

    def ln(x, g, b):
        mu = jnp.mean(x, -1, keepdims=True)
        var = jnp.mean((x - mu) ** 2, -1, keepdims=True)
        return (x - mu) * jax.lax.rsqrt(var + eps) * g + b

    def mlp(x, bp, softplus):
        h = mm(x, bp["w1"]) + bp["b1"]
        h = ln(h, bp["ln_g"], bp["ln_b"])
        h = jnp.maximum(h, 0.0)
        y = mm(h, bp["w2"]) + bp["b2"]
        return jnp.logaddexp(y, 0.0) if softplus else y

    def attention(q, k, v):
        s = q[:, :, None] * k[:, None, :] / math.sqrt(d_model)
        s = s - jnp.max(s, axis=-1, keepdims=True)
        p = jnp.exp(s)
        p = p / jnp.sum(p, axis=-1, keepdims=True)
        return jnp.sum(p * v[:, None, :], axis=-1)

    def attn_model(qi, ki, vi, ap):
        q = mm(qi, ap["wq"]) + ap["bq"]
        k = mm(ki, ap["wk"]) + ap["bk"]
        v = mm(vi, ap["wv"]) + ap["bv"]
        return attention(q, k, v)

    def feed_forward(x, p_):
        h = mm(x, p_["w1"]) + p_["b1"]
        h = jnp.maximum(h, 0.0)
        return mm(h, p_["w2"]) + p_["b2"]

    def enc(x, ep):
        xn = ln(x, ep["ln1_g"], ep["ln1_b"])
        x = x + attn_model(xn, xn, xn, ep["attn"])
        y = x + feed_forward(ln(x, ep["ln2_g"], ep["ln2_b"]), ep)
        return ln(y, ep["lno_g"], ep["lno_b"])

    def dec(x, mem, dp):
        xn = ln(x, dp["ln1_g"], dp["ln1_b"])
        x = x + attn_model(xn, xn, xn, dp["self_attn"])
        xn = ln(x, dp["ln2_g"], dp["ln2_b"])
        x = x + attn_model(xn, mem, mem, dp["cross_attn"])
        y = x + feed_forward(ln(x, dp["ln3_g"], dp["ln3_b"]), dp)
        return ln(y, dp["lno_g"], dp["lno_b"])

    s_emb = mlp(source, params["inp0"], False)
    t_emb = mlp(target, params["inp1"], False)
    if reverse:
        memory = enc(t_emb, params["enc"])
        d_out = dec(s_emb, memory, params["dec"])
    else:
        memory = enc(s_emb, params["enc"])
        d_out = dec(t_emb, memory, params["dec"])
    return mlp(d_out, params["out"], True)


# ----------------------------------- main ----------------------------------- #

if __name__ == "__main__":
    B = 2
    INPUT_SIZE = 32      # AE-style feature input
    D_MID = 256          # stand-in for 5000
    D_MODEL = 128        # stand-in for 1024
    D_FF = 256           # stand-in for 2048

    key = jax.random.PRNGKey(0)
    key, ks, kt, kp = jax.random.split(key, 4)
    source = jax.random.normal(ks, (B, INPUT_SIZE), jnp.float32)
    target = jax.random.normal(kt, (B, INPUT_SIZE), jnp.float32)
    params = init_transformer_params(kp, INPUT_SIZE, D_MID, D_MODEL, D_FF)
    kparams = pack_params(params)   # one-time host-side packing

    fwd = jax.jit(functools.partial(transformer_forward,
                                    d_model=D_MODEL, reverse=False))
    out = jax.block_until_ready(fwd(source, target, kparams))

    ref = reference_forward(source, target, params, d_model=D_MODEL, reverse=False)
    assert out.shape == (B, INPUT_SIZE), out.shape
    assert bool(jnp.all(jnp.isfinite(out)))
    max_err = float(jnp.max(jnp.abs(out - ref)))
    assert jnp.allclose(out, ref, rtol=1e-2, atol=1e-2), max_err

    print("KERNEL_OK")
</pallas_src>

<mosaic_0001>
module attributes {stable_mosaic.version = 11 : i64} {
  func.func @kernel(%arg0: i32, %arg1: memref<2x128xf32, #tpu.memory_space<vmem>>, %arg2: memref<128x2xf32, #tpu.memory_space<vmem>>, %arg3: memref<9x128xf32, #tpu.memory_space<vmem>>, %arg4: memref<128x3xf32, #tpu.memory_space<vmem>>, %arg5: memref<128x128xbf16, #tpu.memory_space<vmem>>, %arg6: memref<128x128xbf16, #tpu.memory_space<vmem>>, %arg7: memref<128x128xbf16, #tpu.memory_space<vmem>>, %arg8: memref<128x256xbf16, #tpu.memory_space<vmem>>, %arg9: memref<1x256xf32, #tpu.memory_space<vmem>>, %arg10: memref<256x128xbf16, #tpu.memory_space<vmem>>, %arg11: memref<2x128xf32, #tpu.memory_space<vmem>>, %arg12: memref<2x128xf32, #tpu.memory_space<vmem>>) attributes {dimension_semantics = [#tpu.dimension_semantics<arbitrary>], iteration_bounds = array<i64: 1>, scalar_prefetch = 0 : i64, scratch_operands = 1 : i64, tpu.core_type = #tpu.core_type<tc>, window_params = [{pipeline_mode = #tpu.pipeline_mode<synchronous>, transform_indices = @transform_0, window_bounds = array<i64: 2, 128>}, {pipeline_mode = #tpu.pipeline_mode<synchronous>, transform_indices = @transform_1, window_bounds = array<i64: 128, 2>}, {pipeline_mode = #tpu.pipeline_mode<synchronous>, transform_indices = @transform_2, window_bounds = array<i64: 9, 128>}, {pipeline_mode = #tpu.pipeline_mode<synchronous>, transform_indices = @transform_3, window_bounds = array<i64: 128, 3>}, {pipeline_mode = #tpu.pipeline_mode<synchronous>, transform_indices = @transform_4, window_bounds = array<i64: 128, 128>}, {pipeline_mode = #tpu.pipeline_mode<synchronous>, transform_indices = @transform_5, window_bounds = array<i64: 128, 128>}, {pipeline_mode = #tpu.pipeline_mode<synchronous>, transform_indices = @transform_6, window_bounds = array<i64: 128, 128>}, {pipeline_mode = #tpu.pipeline_mode<synchronous>, transform_indices = @transform_7, window_bounds = array<i64: 128, 256>}, {pipeline_mode = #tpu.pipeline_mode<synchronous>, transform_indices = @transform_8, window_bounds = array<i64: 1, 256>}, {pipeline_mode = #tpu.pipeline_mode<synchronous>, transform_indices = @transform_9, window_bounds = array<i64: 256, 128>}, {pipeline_mode = #tpu.pipeline_mode<synchronous>, transform_indices = @transform_10, window_bounds = array<i64: 2, 128>}]} {
    %c0 = arith.constant 0 : index
    %c0_0 = arith.constant 0 : index
    %0 = vector.load %arg3[%c0, %c0_0] : memref<9x128xf32, #tpu.memory_space<vmem>>, vector<9x128xf32>
    %c0_1 = arith.constant 0 : index
    %c0_2 = arith.constant 0 : index
    %1 = vector.load %arg4[%c0_1, %c0_2] : memref<128x3xf32, #tpu.memory_space<vmem>>, vector<128x3xf32>
    %c0_3 = arith.constant 0 : index
    %c0_4 = arith.constant 0 : index
    %2 = vector.load %arg1[%c0_3, %c0_4] : memref<2x128xf32, #tpu.memory_space<vmem>>, vector<2x128xf32>
    %c0_5 = arith.constant 0 : index
    %c0_6 = arith.constant 0 : index
    %3 = vector.load %arg2[%c0_5, %c0_6] : memref<128x2xf32, #tpu.memory_space<vmem>>, vector<128x2xf32>
    %4 = vector.extract_strided_slice %0 {offsets = [0, 0], sizes = [1, 128], strides = [1, 1]} : vector<9x128xf32> to vector<1x128xf32>
    %5 = vector.extract_strided_slice %0 {offsets = [1, 0], sizes = [1, 128], strides = [1, 1]} : vector<9x128xf32> to vector<1x128xf32>
    %6 = vector.extract_strided_slice %1 {offsets = [0, 0], sizes = [128, 1], strides = [1, 1]} : vector<128x3xf32> to vector<128x1xf32>
    %7 = vector.extract_strided_slice %1 {offsets = [0, 1], sizes = [128, 1], strides = [1, 1]} : vector<128x3xf32> to vector<128x1xf32>
    %c0_7 = arith.constant 0 : index
    %c0_8 = arith.constant 0 : index
    %8 = vector.load %arg5[%c0_7, %c0_8] : memref<128x128xbf16, #tpu.memory_space<vmem>>, vector<128x128xbf16>
    %9 = vector.extract_strided_slice %0 {offsets = [2, 0], sizes = [1, 128], strides = [1, 1]} : vector<9x128xf32> to vector<1x128xf32>
    %c0_9 = arith.constant 0 : index
    %c0_10 = arith.constant 0 : index
    %10 = vector.load %arg6[%c0_9, %c0_10] : memref<128x128xbf16, #tpu.memory_space<vmem>>, vector<128x128xbf16>
    %11 = vector.extract_strided_slice %1 {offsets = [0, 2], sizes = [128, 1], strides = [1, 1]} : vector<128x3xf32> to vector<128x1xf32>
    %c0_11 = arith.constant 0 : index
    %c0_12 = arith.constant 0 : index
    %12 = vector.load %arg7[%c0_11, %c0_12] : memref<128x128xbf16, #tpu.memory_space<vmem>>, vector<128x128xbf16>
    %13 = vector.extract_strided_slice %0 {offsets = [3, 0], sizes = [1, 128], strides = [1, 1]} : vector<9x128xf32> to vector<1x128xf32>
    %cst = arith.constant dense<0.000000e+00> : vector<2xf32>
    %14 = vector.multi_reduction <add>, %2, %cst [1] : vector<2x128xf32> to vector<2xf32>
    %15 = vector.shape_cast %14 : vector<2xf32> to vector<2x1xf32>
    %cst_13 = arith.constant 1.280000e+02 : f32
    %16 = vector.broadcast %cst_13 : f32 to vector<2x1xf32>
    %17 = arith.divf %15, %16 : vector<2x1xf32>
    %18 = vector.broadcast %17 : vector<2x1xf32> to vector<2x128xf32>
    %19 = arith.subf %2, %18 : vector<2x128xf32>
    %20 = arith.mulf %19, %19 : vector<2x128xf32>
    %cst_14 = arith.constant dense<0.000000e+00> : vector<2xf32>
    %21 = vector.multi_reduction <add>, %20, %cst_14 [1] : vector<2x128xf32> to vector<2xf32>
    %22 = vector.shape_cast %21 : vector<2xf32> to vector<2x1xf32>
    %cst_15 = arith.constant 1.280000e+02 : f32
    %23 = vector.broadcast %cst_15 : f32 to vector<2x1xf32>
    %24 = arith.divf %22, %23 : vector<2x1xf32>
    %25 = vector.broadcast %17 : vector<2x1xf32> to vector<2x128xf32>
    %26 = arith.subf %2, %25 : vector<2x128xf32>
    %cst_16 = arith.constant 9.99999974E-6 : f32
    %27 = vector.broadcast %cst_16 : f32 to vector<2x1xf32>
    %28 = arith.addf %24, %27 : vector<2x1xf32>
    %29 = math.rsqrt %28 : vector<2x1xf32>
    %30 = vector.broadcast %29 : vector<2x1xf32> to vector<2x128xf32>
    %31 = arith.mulf %26, %30 : vector<2x128xf32>
    %32 = vector.broadcast %4 : vector<1x128xf32> to vector<2x128xf32>
    %33 = arith.mulf %31, %32 : vector<2x128xf32>
    %34 = vector.broadcast %5 : vector<1x128xf32> to vector<2x128xf32>
    %35 = arith.addf %33, %34 : vector<2x128xf32>
    %cst_17 = arith.constant dense<0.000000e+00> : vector<2xf32>
    %36 = vector.multi_reduction <add>, %3, %cst_17 [0] : vector<128x2xf32> to vector<2xf32>
    %37 = vector.shape_cast %36 : vector<2xf32> to vector<1x2xf32>
    %cst_18 = arith.constant 1.280000e+02 : f32
    %38 = vector.broadcast %cst_18 : f32 to vector<1x2xf32>
    %39 = arith.divf %37, %38 : vector<1x2xf32>
    %40 = vector.broadcast %39 : vector<1x2xf32> to vector<128x2xf32>
    %41 = arith.subf %3, %40 : vector<128x2xf32>
    %42 = arith.mulf %41, %41 : vector<128x2xf32>
    %cst_19 = arith.constant dense<0.000000e+00> : vector<2xf32>
    %43 = vector.multi_reduction <add>, %42, %cst_19 [0] : vector<128x2xf32> to vector<2xf32>
    %44 = vector.shape_cast %43 : vector<2xf32> to vector<1x2xf32>
    %cst_20 = arith.constant 1.280000e+02 : f32
    %45 = vector.broadcast %cst_20 : f32 to vector<1x2xf32>
    %46 = arith.divf %44, %45 : vector<1x2xf32>
    %47 = vector.broadcast %39 : vector<1x2xf32> to vector<128x2xf32>
    %48 = arith.subf %3, %47 : vector<128x2xf32>
    %cst_21 = arith.constant 9.99999974E-6 : f32
    %49 = vector.broadcast %cst_21 : f32 to vector<1x2xf32>
    %50 = arith.addf %46, %49 : vector<1x2xf32>
    %51 = math.rsqrt %50 : vector<1x2xf32>
    %52 = vector.broadcast %51 : vector<1x2xf32> to vector<128x2xf32>
    %53 = arith.mulf %48, %52 : vector<128x2xf32>
    %54 = vector.broadcast %6 : vector<128x1xf32> to vector<128x2xf32>
    %55 = arith.mulf %53, %54 : vector<128x2xf32>
    %56 = vector.broadcast %7 : vector<128x1xf32> to vector<128x2xf32>
    %57 = arith.addf %55, %56 : vector<128x2xf32>
    %58 = arith.extf %8 : vector<128x128xbf16> to vector<128x128xf32>
    %cst_22 = arith.constant dense<0.000000e+00> : vector<2x128xf32>
    %59 = tpu.matmul %35, %58, %cst_22 {dimension_numbers = #tpu.dot_dimension_numbers<[1], [0], [0], [1], [0, 0, 1, 1], [], []>} : vector<2x128xf32>, vector<128x128xf32>, vector<2x128xf32> -> vector<2x128xf32>
    %60 = vector.broadcast %9 : vector<1x128xf32> to vector<2x128xf32>
    %61 = arith.addf %59, %60 : vector<2x128xf32>
    %cst_23 = arith.constant 0.0883883461 : f32
    %62 = vector.broadcast %cst_23 : f32 to vector<2x128xf32>
    %63 = arith.mulf %61, %62 : vector<2x128xf32>
    %64 = arith.extf %12 : vector<128x128xbf16> to vector<128x128xf32>
    %cst_24 = arith.constant dense<0.000000e+00> : vector<2x128xf32>
    %65 = tpu.matmul %35, %64, %cst_24 {dimension_numbers = #tpu.dot_dimension_numbers<[1], [0], [0], [1], [0, 0, 1, 1], [], []>} : vector<2x128xf32>, vector<128x128xf32>, vector<2x128xf32> -> vector<2x128xf32>
    %66 = vector.broadcast %13 : vector<1x128xf32> to vector<2x128xf32>
    %67 = arith.addf %65, %66 : vector<2x128xf32>
    %68 = arith.extf %10 : vector<128x128xbf16> to vector<128x128xf32>
    %cst_25 = arith.constant dense<0.000000e+00> : vector<128x2xf32>
    %69 = tpu.matmul %68, %57, %cst_25 {dimension_numbers = #tpu.dot_dimension_numbers<[1], [0], [0], [1], [0, 0, 1, 1], [], []>} : vector<128x128xf32>, vector<128x2xf32>, vector<128x2xf32> -> vector<128x2xf32>
    %70 = vector.broadcast %11 : vector<128x1xf32> to vector<128x2xf32>
    %71 = arith.addf %69, %70 : vector<128x2xf32>
    %72 = vector.extract_strided_slice %63 {offsets = [0, 0], sizes = [1, 128], strides = [1, 1]} : vector<2x128xf32> to vector<1x128xf32>
    %73 = vector.extract_strided_slice %71 {offsets = [0, 0], sizes = [128, 1], strides = [1, 1]} : vector<128x2xf32> to vector<128x1xf32>
    %74 = vector.extract_strided_slice %67 {offsets = [0, 0], sizes = [1, 128], strides = [1, 1]} : vector<2x128xf32> to vector<1x128xf32>
    %cst_26 = arith.constant dense<0xFF800000> : vector<1xf32>
    %75 = vector.multi_reduction <maximumf>, %73, %cst_26 [0] : vector<128x1xf32> to vector<1xf32>
    %76 = vector.shape_cast %75 : vector<1xf32> to vector<1x1xf32>
    %cst_27 = arith.constant dense<0x7F800000> : vector<1xf32>
    %77 = vector.multi_reduction <minimumf>, %73, %cst_27 [0] : vector<128x1xf32> to vector<1xf32>
    %78 = vector.shape_cast %77 : vector<1xf32> to vector<1x1xf32>
    %cst_28 = arith.constant 0.000000e+00 : f32
    %79 = vector.broadcast %cst_28 : f32 to vector<1x128xf32>
    %80 = arith.cmpf oge, %72, %79 : vector<1x128xf32>
    %81 = vector.broadcast %76 : vector<1x1xf32> to vector<1x128xf32>
    %82 = arith.mulf %72, %81 : vector<1x128xf32>
    %83 = vector.broadcast %78 : vector<1x1xf32> to vector<1x128xf32>
    %84 = arith.mulf %72, %83 : vector<1x128xf32>
    %85 = arith.select %80, %82, %84 : vector<1x128xi1>, vector<1x128xf32>
    %86 = vector.broadcast %73 : vector<128x1xf32> to vector<128x128xf32>
    %87 = vector.broadcast %72 : vector<1x128xf32> to vector<128x128xf32>
    %88 = arith.mulf %86, %87 : vector<128x128xf32>
    %89 = vector.broadcast %85 : vector<1x128xf32> to vector<128x128xf32>
    %90 = arith.subf %88, %89 : vector<128x128xf32>
    %91 = math.exp %90 : vector<128x128xf32>
    %cst_29 = arith.constant dense<0.000000e+00> : vector<128xf32>
    %92 = vector.multi_reduction <add>, %91, %cst_29 [0] : vector<128x128xf32> to vector<128xf32>
    %93 = vector.shape_cast %92 : vector<128xf32> to vector<1x128xf32>
    %cst_30 = arith.constant dense<0.000000e+00> : vector<1x128xf32>
    %94 = tpu.matmul %74, %91, %cst_30 {dimension_numbers = #tpu.dot_dimension_numbers<[1], [0], [0], [1], [0, 0, 1, 1], [], []>} : vector<1x128xf32>, vector<128x128xf32>, vector<1x128xf32> -> vector<1x128xf32>
    %95 = tpu.reciprocal %93 {approx = true} : vector<1x128xf32> -> vector<1x128xf32>
    %96 = arith.mulf %94, %95 : vector<1x128xf32>
    %c0_31 = arith.constant 0 : index
    %c0_32 = arith.constant 0 : index
    %97 = vector.load %arg12[%c0_31, %c0_32] : memref<2x128xf32, #tpu.memory_space<vmem>>, vector<1x128xf32>
    tpu.vector_store %arg12[%c0_31, %c0_32], %96 {strides = array<i32>} : memref<2x128xf32, #tpu.memory_space<vmem>>, vector<1x128xf32>,
    %98 = vector.extract_strided_slice %63 {offsets = [1, 0], sizes = [1, 128], strides = [1, 1]} : vector<2x128xf32> to vector<1x128xf32>
    %99 = vector.extract_strided_slice %71 {offsets = [0, 1], sizes = [128, 1], strides = [1, 1]} : vector<128x2xf32> to vector<128x1xf32>
    %100 = vector.extract_strided_slice %67 {offsets = [1, 0], sizes = [1, 128], strides = [1, 1]} : vector<2x128xf32> to vector<1x128xf32>
    %cst_33 = arith.constant dense<0xFF800000> : vector<1xf32>
    %101 = vector.multi_reduction <maximumf>, %99, %cst_33 [0] : vector<128x1xf32> to vector<1xf32>
    %102 = vector.shape_cast %101 : vector<1xf32> to vector<1x1xf32>
    %cst_34 = arith.constant dense<0x7F800000> : vector<1xf32>
    %103 = vector.multi_reduction <minimumf>, %99, %cst_34 [0] : vector<128x1xf32> to vector<1xf32>
    %104 = vector.shape_cast %103 : vector<1xf32> to vector<1x1xf32>
    %cst_35 = arith.constant 0.000000e+00 : f32
    %105 = vector.broadcast %cst_35 : f32 to vector<1x128xf32>
    %106 = arith.cmpf oge, %98, %105 : vector<1x128xf32>
    %107 = vector.broadcast %102 : vector<1x1xf32> to vector<1x128xf32>
    %108 = arith.mulf %98, %107 : vector<1x128xf32>
    %109 = vector.broadcast %104 : vector<1x1xf32> to vector<1x128xf32>
    %110 = arith.mulf %98, %109 : vector<1x128xf32>
    %111 = arith.select %106, %108, %110 : vector<1x128xi1>, vector<1x128xf32>
    %112 = vector.broadcast %99 : vector<128x1xf32> to vector<128x128xf32>
    %113 = vector.broadcast %98 : vector<1x128xf32> to vector<128x128xf32>
    %114 = arith.mulf %112, %113 : vector<128x128xf32>
    %115 = vector.broadcast %111 : vector<1x128xf32> to vector<128x128xf32>
    %116 = arith.subf %114, %115 : vector<128x128xf32>
    %117 = math.exp %116 : vector<128x128xf32>
    %cst_36 = arith.constant dense<0.000000e+00> : vector<128xf32>
    %118 = vector.multi_reduction <add>, %117, %cst_36 [0] : vector<128x128xf32> to vector<128xf32>
    %119 = vector.shape_cast %118 : vector<128xf32> to vector<1x128xf32>
    %cst_37 = arith.constant dense<0.000000e+00> : vector<1x128xf32>
    %120 = tpu.matmul %100, %117, %cst_37 {dimension_numbers = #tpu.dot_dimension_numbers<[1], [0], [0], [1], [0, 0, 1, 1], [], []>} : vector<1x128xf32>, vector<128x128xf32>, vector<1x128xf32> -> vector<1x128xf32>
    %121 = tpu.reciprocal %119 {approx = true} : vector<1x128xf32> -> vector<1x128xf32>
    %122 = arith.mulf %120, %121 : vector<1x128xf32>
    %c1 = arith.constant 1 : index
    %c0_38 = arith.constant 0 : index
    %123 = vector.load %arg12[%c1, %c0_38] : memref<2x128xf32, #tpu.memory_space<vmem>>, vector<1x128xf32>
    tpu.vector_store %arg12[%c1, %c0_38], %122 {strides = array<i32>} : memref<2x128xf32, #tpu.memory_space<vmem>>, vector<1x128xf32>,
    %c0_39 = arith.constant 0 : index
    %c0_40 = arith.constant 0 : index
    %124 = vector.load %arg12[%c0_39, %c0_40] : memref<2x128xf32, #tpu.memory_space<vmem>>, vector<2x128xf32>
    %125 = arith.addf %2, %124 : vector<2x128xf32>
    %126 = vector.extract_strided_slice %0 {offsets = [4, 0], sizes = [1, 128], strides = [1, 1]} : vector<9x128xf32> to vector<1x128xf32>
    %127 = vector.extract_strided_slice %0 {offsets = [5, 0], sizes = [1, 128], strides = [1, 1]} : vector<9x128xf32> to vector<1x128xf32>
    %c0_41 = arith.constant 0 : index
    %c0_42 = arith.constant 0 : index
    %128 = vector.load %arg8[%c0_41, %c0_42] : memref<128x256xbf16, #tpu.memory_space<vmem>>, vector<128x256xbf16>
    %c0_43 = arith.constant 0 : index
    %c0_44 = arith.constant 0 : index
    %129 = vector.load %arg9[%c0_43, %c0_44] : memref<1x256xf32, #tpu.memory_space<vmem>>, vector<1x256xf32>
    %c0_45 = arith.constant 0 : index
    %c0_46 = arith.constant 0 : index
    %130 = vector.load %arg10[%c0_45, %c0_46] : memref<256x128xbf16, #tpu.memory_space<vmem>>, vector<256x128xbf16>
    %131 = vector.extract_strided_slice %0 {offsets = [6, 0], sizes = [1, 128], strides = [1, 1]} : vector<9x128xf32> to vector<1x128xf32>
    %132 = vector.extract_strided_slice %0 {offsets = [7, 0], sizes = [1, 128], strides = [1, 1]} : vector<9x128xf32> to vector<1x128xf32>
    %133 = vector.extract_strided_slice %0 {offsets = [8, 0], sizes = [1, 128], strides = [1, 1]} : vector<9x128xf32> to vector<1x128xf32>
    %cst_47 = arith.constant dense<0.000000e+00> : vector<2xf32>
    %134 = vector.multi_reduction <add>, %125, %cst_47 [1] : vector<2x128xf32> to vector<2xf32>
    %135 = vector.shape_cast %134 : vector<2xf32> to vector<2x1xf32>
    %cst_48 = arith.constant 1.280000e+02 : f32
    %136 = vector.broadcast %cst_48 : f32 to vector<2x1xf32>
    %137 = arith.divf %135, %136 : vector<2x1xf32>
    %138 = vector.broadcast %137 : vector<2x1xf32> to vector<2x128xf32>
    %139 = arith.subf %125, %138 : vector<2x128xf32>
    %140 = arith.mulf %139, %139 : vector<2x128xf32>
    %cst_49 = arith.constant dense<0.000000e+00> : vector<2xf32>
    %141 = vector.multi_reduction <add>, %140, %cst_49 [1] : vector<2x128xf32> to vector<2xf32>
    %142 = vector.shape_cast %141 : vector<2xf32> to vector<2x1xf32>
    %cst_50 = arith.constant 1.280000e+02 : f32
    %143 = vector.broadcast %cst_50 : f32 to vector<2x1xf32>
    %144 = arith.divf %142, %143 : vector<2x1xf32>
    %145 = vector.broadcast %137 : vector<2x1xf32> to vector<2x128xf32>
    %146 = arith.subf %125, %145 : vector<2x128xf32>
    %cst_51 = arith.constant 9.99999974E-6 : f32
    %147 = vector.broadcast %cst_51 : f32 to vector<2x1xf32>
    %148 = arith.addf %144, %147 : vector<2x1xf32>
    %149 = math.rsqrt %148 : vector<2x1xf32>
    %150 = vector.broadcast %149 : vector<2x1xf32> to vector<2x128xf32>
    %151 = arith.mulf %146, %150 : vector<2x128xf32>
    %152 = vector.broadcast %126 : vector<1x128xf32> to vector<2x128xf32>
    %153 = arith.mulf %151, %152 : vector<2x128xf32>
    %154 = vector.broadcast %127 : vector<1x128xf32> to vector<2x128xf32>
    %155 = arith.addf %153, %154 : vector<2x128xf32>
    %156 = arith.extf %128 : vector<128x256xbf16> to vector<128x256xf32>
    %cst_52 = arith.constant dense<0.000000e+00> : vector<2x256xf32>
    %157 = tpu.matmul %155, %156, %cst_52 {dimension_numbers = #tpu.dot_dimension_numbers<[1], [0], [0], [1], [0, 0, 1, 1], [], []>} : vector<2x128xf32>, vector<128x256xf32>, vector<2x256xf32> -> vector<2x256xf32>
    %158 = vector.broadcast %129 : vector<1x256xf32> to vector<2x256xf32>
    %159 = arith.addf %157, %158 : vector<2x256xf32>
    %cst_53 = arith.constant 0.000000e+00 : f32
    %160 = vector.broadcast %cst_53 : f32 to vector<2x256xf32>
    %161 = arith.maximumf %159, %160 : vector<2x256xf32>
    %162 = arith.extf %130 : vector<256x128xbf16> to vector<256x128xf32>
    %cst_54 = arith.constant dense<0.000000e+00> : vector<2x128xf32>
    %163 = tpu.matmul %161, %162, %cst_54 {dimension_numbers = #tpu.dot_dimension_numbers<[1], [0], [0], [1], [0, 0, 1, 1], [], []>} : vector<2x256xf32>, vector<256x128xf32>, vector<2x128xf32> -> vector<2x128xf32>
    %164 = vector.broadcast %131 : vector<1x128xf32> to vector<2x128xf32>
    %165 = arith.addf %163, %164 : vector<2x128xf32>
    %166 = arith.addf %125, %165 : vector<2x128xf32>
    %cst_55 = arith.constant dense<0.000000e+00> : vector<2xf32>
    %167 = vector.multi_reduction <add>, %166, %cst_55 [1] : vector<2x128xf32> to vector<2xf32>
    %168 = vector.shape_cast %167 : vector<2xf32> to vector<2x1xf32>
    %cst_56 = arith.constant 1.280000e+02 : f32
    %169 = vector.broadcast %cst_56 : f32 to vector<2x1xf32>
    %170 = arith.divf %168, %169 : vector<2x1xf32>
    %171 = vector.broadcast %170 : vector<2x1xf32> to vector<2x128xf32>
    %172 = arith.subf %166, %171 : vector<2x128xf32>
    %173 = arith.mulf %172, %172 : vector<2x128xf32>
    %cst_57 = arith.constant dense<0.000000e+00> : vector<2xf32>
    %174 = vector.multi_reduction <add>, %173, %cst_57 [1] : vector<2x128xf32> to vector<2xf32>
    %175 = vector.shape_cast %174 : vector<2xf32> to vector<2x1xf32>
    %cst_58 = arith.constant 1.280000e+02 : f32
    %176 = vector.broadcast %cst_58 : f32 to vector<2x1xf32>
    %177 = arith.divf %175, %176 : vector<2x1xf32>
    %178 = vector.broadcast %170 : vector<2x1xf32> to vector<2x128xf32>
    %179 = arith.subf %166, %178 : vector<2x128xf32>
    %cst_59 = arith.constant 9.99999974E-6 : f32
    %180 = vector.broadcast %cst_59 : f32 to vector<2x1xf32>
    %181 = arith.addf %177, %180 : vector<2x1xf32>
    %182 = math.rsqrt %181 : vector<2x1xf32>
    %183 = vector.broadcast %182 : vector<2x1xf32> to vector<2x128xf32>
    %184 = arith.mulf %179, %183 : vector<2x128xf32>
    %185 = vector.broadcast %132 : vector<1x128xf32> to vector<2x128xf32>
    %186 = arith.mulf %184, %185 : vector<2x128xf32>
    %187 = vector.broadcast %133 : vector<1x128xf32> to vector<2x128xf32>
    %188 = arith.addf %186, %187 : vector<2x128xf32>
    %c0_60 = arith.constant 0 : index
    %c0_61 = arith.constant 0 : index
    %189 = vector.load %arg11[%c0_60, %c0_61] : memref<2x128xf32, #tpu.memory_space<vmem>>, vector<2x128xf32>
    tpu.vector_store %arg11[%c0_60, %c0_61], %188 {strides = array<i32>} : memref<2x128xf32, #tpu.memory_space<vmem>>, vector<2x128xf32>,
    return
  }
  func.func @transform_0(%arg0: i32) -> (i32, i32) {
    %c0_i32 = arith.constant 0 : i32
    %c0_i32_0 = arith.constant 0 : i32
    %c0_i32_1 = arith.constant 0 : i32
    return %c0_i32, %c0_i32_0 : i32, i32
  }
  func.func @transform_1(%arg0: i32) -> (i32, i32) {
    %c0_i32 = arith.constant 0 : i32
    %c0_i32_0 = arith.constant 0 : i32
    %c0_i32_1 = arith.constant 0 : i32
    return %c0_i32, %c0_i32_0 : i32, i32
  }
  func.func @transform_2(%arg0: i32) -> (i32, i32) {
    %c0_i32 = arith.constant 0 : i32
    %c0_i32_0 = arith.constant 0 : i32
    %c0_i32_1 = arith.constant 0 : i32
    return %c0_i32, %c0_i32_0 : i32, i32
  }
  func.func @transform_3(%arg0: i32) -> (i32, i32) {
    %c0_i32 = arith.constant 0 : i32
    %c0_i32_0 = arith.constant 0 : i32
    %c0_i32_1 = arith.constant 0 : i32
    return %c0_i32, %c0_i32_0 : i32, i32
  }
  func.func @transform_4(%arg0: i32) -> (i32, i32) {
    %c0_i32 = arith.constant 0 : i32
    %c0_i32_0 = arith.constant 0 : i32
    %c0_i32_1 = arith.constant 0 : i32
    return %c0_i32, %c0_i32_0 : i32, i32
  }
  func.func @transform_5(%arg0: i32) -> (i32, i32) {
    %c0_i32 = arith.constant 0 : i32
    %c0_i32_0 = arith.constant 0 : i32
    %c0_i32_1 = arith.constant 0 : i32
    return %c0_i32, %c0_i32_0 : i32, i32
  }
  func.func @transform_6(%arg0: i32) -> (i32, i32) {
    %c0_i32 = arith.constant 0 : i32
    %c0_i32_0 = arith.constant 0 : i32
    %c0_i32_1 = arith.constant 0 : i32
    return %c0_i32, %c0_i32_0 : i32, i32
  }
  func.func @transform_7(%arg0: i32) -> (i32, i32) {
    %c0_i32 = arith.constant 0 : i32
    %c0_i32_0 = arith.constant 0 : i32
    %c0_i32_1 = arith.constant 0 : i32
    return %c0_i32, %c0_i32_0 : i32, i32
  }
  func.func @transform_8(%arg0: i32) -> (i32, i32) {
    %c0_i32 = arith.constant 0 : i32
    %c0_i32_0 = arith.constant 0 : i32
    %c0_i32_1 = arith.constant 0 : i32
    return %c0_i32, %c0_i32_0 : i32, i32
  }
  func.func @transform_9(%arg0: i32) -> (i32, i32) {
    %c0_i32 = arith.constant 0 : i32
    %c0_i32_0 = arith.constant 0 : i32
    %c0_i32_1 = arith.constant 0 : i32
    return %c0_i32, %c0_i32_0 : i32, i32
  }
  func.func @transform_10(%arg0: i32) -> (i32, i32) {
    %c0_i32 = arith.constant 0 : i32
    %c0_i32_0 = arith.constant 0 : i32
    %c0_i32_1 = arith.constant 0 : i32
    return %c0_i32, %c0_i32_0 : i32, i32
  }
}

module attributes {stable_mosaic.version = 11 : i64} {
  func.func @kernel(%arg0: i32, %arg1: memref<2x32xf32, #tpu.memory_space<vmem>>, %arg2: memref<32x256xbf16, #tpu.memory_space<vmem>>, %arg3: memref<3x256xf32, #tpu.memory_space<vmem>>, %arg4: memref<256x128xbf16, #tpu.memory_space<vmem>>, %arg5: memref<1x128xf32, #tpu.memory_space<vmem>>, %arg6: memref<2x128xf32, #tpu.memory_space<vmem>>) attributes {dimension_semantics = [#tpu.dimension_semantics<parallel>], iteration_bounds = array<i64: 1>, scalar_prefetch = 0 : i64, scratch_operands = 0 : i64, tpu.core_type = #tpu.core_type<tc>, window_params = [{pipeline_mode = #tpu.pipeline_mode<synchronous>, transform_indices = @transform_0, window_bounds = array<i64: 2, 32>}, {pipeline_mode = #tpu.pipeline_mode<synchronous>, transform_indices = @transform_1, window_bounds = array<i64: 32, 256>}, {pipeline_mode = #tpu.pipeline_mode<synchronous>, transform_indices = @transform_2, window_bounds = array<i64: 3, 256>}, {transform_indices = @transform_3, window_bounds = array<i64: 256, 128>}, {transform_indices = @transform_4, window_bounds = array<i64: 1, 128>}, {transform_indices = @transform_5, window_bounds = array<i64: 2, 128>}]} {
    %c0 = arith.constant 0 : index
    %c0_0 = arith.constant 0 : index
    %0 = vector.load %arg3[%c0, %c0_0] : memref<3x256xf32, #tpu.memory_space<vmem>>, vector<3x256xf32>
    %c0_1 = arith.constant 0 : index
    %c0_2 = arith.constant 0 : index
    %1 = vector.load %arg1[%c0_1, %c0_2] : memref<2x32xf32, #tpu.memory_space<vmem>>, vector<2x32xf32>
    %c0_3 = arith.constant 0 : index
    %c0_4 = arith.constant 0 : index
    %2 = vector.load %arg2[%c0_3, %c0_4] : memref<32x256xbf16, #tpu.memory_space<vmem>>, vector<32x256xbf16>
    %3 = arith.extf %2 : vector<32x256xbf16> to vector<32x256xf32>
    %cst = arith.constant dense<0.000000e+00> : vector<2x256xf32>
    %4 = tpu.matmul %1, %3, %cst {dimension_numbers = #tpu.dot_dimension_numbers<[1], [0], [0], [1], [0, 0, 1, 1], [], []>} : vector<2x32xf32>, vector<32x256xf32>, vector<2x256xf32> -> vector<2x256xf32>
    %5 = vector.extract_strided_slice %0 {offsets = [0, 0], sizes = [1, 256], strides = [1, 1]} : vector<3x256xf32> to vector<1x256xf32>
    %6 = vector.broadcast %5 : vector<1x256xf32> to vector<2x256xf32>
    %7 = arith.addf %4, %6 : vector<2x256xf32>
    %8 = vector.extract_strided_slice %0 {offsets = [1, 0], sizes = [1, 256], strides = [1, 1]} : vector<3x256xf32> to vector<1x256xf32>
    %9 = vector.extract_strided_slice %0 {offsets = [2, 0], sizes = [1, 256], strides = [1, 1]} : vector<3x256xf32> to vector<1x256xf32>
    %cst_5 = arith.constant dense<0.000000e+00> : vector<2xf32>
    %10 = vector.multi_reduction <add>, %7, %cst_5 [1] : vector<2x256xf32> to vector<2xf32>
    %11 = vector.shape_cast %10 : vector<2xf32> to vector<2x1xf32>
    %cst_6 = arith.constant 2.560000e+02 : f32
    %12 = vector.broadcast %cst_6 : f32 to vector<2x1xf32>
    %13 = arith.divf %11, %12 : vector<2x1xf32>
    %14 = vector.broadcast %13 : vector<2x1xf32> to vector<2x256xf32>
    %15 = arith.subf %7, %14 : vector<2x256xf32>
    %16 = arith.mulf %15, %15 : vector<2x256xf32>
    %cst_7 = arith.constant dense<0.000000e+00> : vector<2xf32>
    %17 = vector.multi_reduction <add>, %16, %cst_7 [1] : vector<2x256xf32> to vector<2xf32>
    %18 = vector.shape_cast %17 : vector<2xf32> to vector<2x1xf32>
    %cst_8 = arith.constant 2.560000e+02 : f32
    %19 = vector.broadcast %cst_8 : f32 to vector<2x1xf32>
    %20 = arith.divf %18, %19 : vector<2x1xf32>
    %21 = vector.broadcast %13 : vector<2x1xf32> to vector<2x256xf32>
    %22 = arith.subf %7, %21 : vector<2x256xf32>
    %cst_9 = arith.constant 9.99999974E-6 : f32
    %23 = vector.broadcast %cst_9 : f32 to vector<2x1xf32>
    %24 = arith.addf %20, %23 : vector<2x1xf32>
    %25 = math.rsqrt %24 : vector<2x1xf32>
    %26 = vector.broadcast %25 : vector<2x1xf32> to vector<2x256xf32>
    %27 = arith.mulf %22, %26 : vector<2x256xf32>
    %28 = vector.broadcast %8 : vector<1x256xf32> to vector<2x256xf32>
    %29 = arith.mulf %27, %28 : vector<2x256xf32>
    %30 = vector.broadcast %9 : vector<1x256xf32> to vector<2x256xf32>
    %31 = arith.addf %29, %30 : vector<2x256xf32>
    %cst_10 = arith.constant 0.000000e+00 : f32
    %32 = vector.broadcast %cst_10 : f32 to vector<2x256xf32>
    %33 = arith.maximumf %31, %32 : vector<2x256xf32>
    %c0_11 = arith.constant 0 : index
    %c0_12 = arith.constant 0 : index
    %34 = vector.load %arg4[%c0_11, %c0_12] : memref<256x128xbf16, #tpu.memory_space<vmem>>, vector<256x128xbf16>
    %35 = arith.extf %34 : vector<256x128xbf16> to vector<256x128xf32>
    %cst_13 = arith.constant dense<0.000000e+00> : vector<2x128xf32>
    %36 = tpu.matmul %33, %35, %cst_13 {dimension_numbers = #tpu.dot_dimension_numbers<[1], [0], [0], [1], [0, 0, 1, 1], [], []>} : vector<2x256xf32>, vector<256x128xf32>, vector<2x128xf32> -> vector<2x128xf32>
    %c0_14 = arith.constant 0 : index
    %c0_15 = arith.constant 0 : index
    %37 = vector.load %arg5[%c0_14, %c0_15] : memref<1x128xf32, #tpu.memory_space<vmem>>, vector<1x128xf32>
    %38 = vector.broadcast %37 : vector<1x128xf32> to vector<2x128xf32>
    %39 = arith.addf %36, %38 : vector<2x128xf32>
    %c0_16 = arith.constant 0 : index
    %c0_17 = arith.constant 0 : index
    %40 = vector.load %arg6[%c0_16, %c0_17] : memref<2x128xf32, #tpu.memory_space<vmem>>, vector<2x128xf32>
    tpu.vector_store %arg6[%c0_16, %c0_17], %39 {strides = array<i32>} : memref<2x128xf32, #tpu.memory_space<vmem>>, vector<2x128xf32>,
    return
  }
  func.func @transform_0(%arg0: i32) -> (i32, i32) {
    %c0_i32 = arith.constant 0 : i32
    %c0_i32_0 = arith.constant 0 : i32
    %c0_i32_1 = arith.constant 0 : i32
    return %c0_i32, %c0_i32_0 : i32, i32
  }
  func.func @transform_1(%arg0: i32) -> (i32, i32) {
    %c0_i32 = arith.constant 0 : i32
    %c0_i32_0 = arith.constant 0 : i32
    %c0_i32_1 = arith.constant 0 : i32
    return %c0_i32, %c0_i32_0 : i32, i32
  }
  func.func @transform_2(%arg0: i32) -> (i32, i32) {
    %c0_i32 = arith.constant 0 : i32
    %c0_i32_0 = arith.constant 0 : i32
    %c0_i32_1 = arith.constant 0 : i32
    return %c0_i32, %c0_i32_0 : i32, i32
  }
  func.func @transform_3(%arg0: i32) -> (i32, i32) {
    %c0_i32 = arith.constant 0 : i32
    %c0_i32_0 = arith.constant 0 : i32
    return %c0_i32, %arg0 : i32, i32
  }
  func.func @transform_4(%arg0: i32) -> (i32, i32) {
    %c0_i32 = arith.constant 0 : i32
    %c0_i32_0 = arith.constant 0 : i32
    return %c0_i32, %arg0 : i32, i32
  }
  func.func @transform_5(%arg0: i32) -> (i32, i32) {
    %c0_i32 = arith.constant 0 : i32
    %c0_i32_0 = arith.constant 0 : i32
    return %c0_i32, %arg0 : i32, i32
  }
}

module attributes {stable_mosaic.version = 11 : i64} {
  func.func @kernel(%arg0: i32, %arg1: memref<2x32xf32, #tpu.memory_space<vmem>>, %arg2: memref<32x256xbf16, #tpu.memory_space<vmem>>, %arg3: memref<3x256xf32, #tpu.memory_space<vmem>>, %arg4: memref<256x128xbf16, #tpu.memory_space<vmem>>, %arg5: memref<1x128xf32, #tpu.memory_space<vmem>>, %arg6: memref<2x128xf32, #tpu.memory_space<vmem>>) attributes {dimension_semantics = [#tpu.dimension_semantics<parallel>], iteration_bounds = array<i64: 1>, scalar_prefetch = 0 : i64, scratch_operands = 0 : i64, tpu.core_type = #tpu.core_type<tc>, window_params = [{pipeline_mode = #tpu.pipeline_mode<synchronous>, transform_indices = @transform_0, window_bounds = array<i64: 2, 32>}, {pipeline_mode = #tpu.pipeline_mode<synchronous>, transform_indices = @transform_1, window_bounds = array<i64: 32, 256>}, {pipeline_mode = #tpu.pipeline_mode<synchronous>, transform_indices = @transform_2, window_bounds = array<i64: 3, 256>}, {transform_indices = @transform_3, window_bounds = array<i64: 256, 128>}, {transform_indices = @transform_4, window_bounds = array<i64: 1, 128>}, {transform_indices = @transform_5, window_bounds = array<i64: 2, 128>}]} {
    %c0 = arith.constant 0 : index
    %c0_0 = arith.constant 0 : index
    %0 = vector.load %arg3[%c0, %c0_0] : memref<3x256xf32, #tpu.memory_space<vmem>>, vector<3x256xf32>
    %c0_1 = arith.constant 0 : index
    %c0_2 = arith.constant 0 : index
    %1 = vector.load %arg1[%c0_1, %c0_2] : memref<2x32xf32, #tpu.memory_space<vmem>>, vector<2x32xf32>
    %c0_3 = arith.constant 0 : index
    %c0_4 = arith.constant 0 : index
    %2 = vector.load %arg2[%c0_3, %c0_4] : memref<32x256xbf16, #tpu.memory_space<vmem>>, vector<32x256xbf16>
    %3 = arith.extf %2 : vector<32x256xbf16> to vector<32x256xf32>
    %cst = arith.constant dense<0.000000e+00> : vector<2x256xf32>
    %4 = tpu.matmul %1, %3, %cst {dimension_numbers = #tpu.dot_dimension_numbers<[1], [0], [0], [1], [0, 0, 1, 1], [], []>} : vector<2x32xf32>, vector<32x256xf32>, vector<2x256xf32> -> vector<2x256xf32>
    %5 = vector.extract_strided_slice %0 {offsets = [0, 0], sizes = [1, 256], strides = [1, 1]} : vector<3x256xf32> to vector<1x256xf32>
    %6 = vector.broadcast %5 : vector<1x256xf32> to vector<2x256xf32>
    %7 = arith.addf %4, %6 : vector<2x256xf32>
    %8 = vector.extract_strided_slice %0 {offsets = [1, 0], sizes = [1, 256], strides = [1, 1]} : vector<3x256xf32> to vector<1x256xf32>
    %9 = vector.extract_strided_slice %0 {offsets = [2, 0], sizes = [1, 256], strides = [1, 1]} : vector<3x256xf32> to vector<1x256xf32>
    %cst_5 = arith.constant dense<0.000000e+00> : vector<2xf32>
    %10 = vector.multi_reduction <add>, %7, %cst_5 [1] : vector<2x256xf32> to vector<2xf32>
    %11 = vector.shape_cast %10 : vector<2xf32> to vector<2x1xf32>
    %cst_6 = arith.constant 2.560000e+02 : f32
    %12 = vector.broadcast %cst_6 : f32 to vector<2x1xf32>
    %13 = arith.divf %11, %12 : vector<2x1xf32>
    %14 = vector.broadcast %13 : vector<2x1xf32> to vector<2x256xf32>
    %15 = arith.subf %7, %14 : vector<2x256xf32>
    %16 = arith.mulf %15, %15 : vector<2x256xf32>
    %cst_7 = arith.constant dense<0.000000e+00> : vector<2xf32>
    %17 = vector.multi_reduction <add>, %16, %cst_7 [1] : vector<2x256xf32> to vector<2xf32>
    %18 = vector.shape_cast %17 : vector<2xf32> to vector<2x1xf32>
    %cst_8 = arith.constant 2.560000e+02 : f32
    %19 = vector.broadcast %cst_8 : f32 to vector<2x1xf32>
    %20 = arith.divf %18, %19 : vector<2x1xf32>
    %21 = vector.broadcast %13 : vector<2x1xf32> to vector<2x256xf32>
    %22 = arith.subf %7, %21 : vector<2x256xf32>
    %cst_9 = arith.constant 9.99999974E-6 : f32
    %23 = vector.broadcast %cst_9 : f32 to vector<2x1xf32>
    %24 = arith.addf %20, %23 : vector<2x1xf32>
    %25 = math.rsqrt %24 : vector<2x1xf32>
    %26 = vector.broadcast %25 : vector<2x1xf32> to vector<2x256xf32>
    %27 = arith.mulf %22, %26 : vector<2x256xf32>
    %28 = vector.broadcast %8 : vector<1x256xf32> to vector<2x256xf32>
    %29 = arith.mulf %27, %28 : vector<2x256xf32>
    %30 = vector.broadcast %9 : vector<1x256xf32> to vector<2x256xf32>
    %31 = arith.addf %29, %30 : vector<2x256xf32>
    %cst_10 = arith.constant 0.000000e+00 : f32
    %32 = vector.broadcast %cst_10 : f32 to vector<2x256xf32>
    %33 = arith.maximumf %31, %32 : vector<2x256xf32>
    %c0_11 = arith.constant 0 : index
    %c0_12 = arith.constant 0 : index
    %34 = vector.load %arg4[%c0_11, %c0_12] : memref<256x128xbf16, #tpu.memory_space<vmem>>, vector<256x128xbf16>
    %35 = arith.extf %34 : vector<256x128xbf16> to vector<256x128xf32>
    %cst_13 = arith.constant dense<0.000000e+00> : vector<2x128xf32>
    %36 = tpu.matmul %33, %35, %cst_13 {dimension_numbers = #tpu.dot_dimension_numbers<[1], [0], [0], [1], [0, 0, 1, 1], [], []>} : vector<2x256xf32>, vector<256x128xf32>, vector<2x128xf32> -> vector<2x128xf32>
    %c0_14 = arith.constant 0 : index
    %c0_15 = arith.constant 0 : index
    %37 = vector.load %arg5[%c0_14, %c0_15] : memref<1x128xf32, #tpu.memory_space<vmem>>, vector<1x128xf32>
    %38 = vector.broadcast %37 : vector<1x128xf32> to vector<2x128xf32>
    %39 = arith.addf %36, %38 : vector<2x128xf32>
    %c0_16 = arith.constant 0 : index
    %c0_17 = arith.constant 0 : index
    %40 = vector.load %arg6[%c0_16, %c0_17] : memref<2x128xf32, #tpu.memory_space<vmem>>, vector<2x128xf32>
    tpu.vector_store %arg6[%c0_16, %c0_17], %39 {strides = array<i32>} : memref<2x128xf32, #tpu.memory_space<vmem>>, vector<2x128xf32>,
    return
  }
  func.func @transform_0(%arg0: i32) -> (i32, i32) {
    %c0_i32 = arith.constant 0 : i32
    %c0_i32_0 = arith.constant 0 : i32
    %c0_i32_1 = arith.constant 0 : i32
    return %c0_i32, %c0_i32_0 : i32, i32
  }
  func.func @transform_1(%arg0: i32) -> (i32, i32) {
    %c0_i32 = arith.constant 0 : i32
    %c0_i32_0 = arith.constant 0 : i32
    %c0_i32_1 = arith.constant 0 : i32
    return %c0_i32, %c0_i32_0 : i32, i32
  }
  func.func @transform_2(%arg0: i32) -> (i32, i32) {
    %c0_i32 = arith.constant 0 : i32
    %c0_i32_0 = arith.constant 0 : i32
    %c0_i32_1 = arith.constant 0 : i32
    return %c0_i32, %c0_i32_0 : i32, i32
  }
  func.func @transform_3(%arg0: i32) -> (i32, i32) {
    %c0_i32 = arith.constant 0 : i32
    %c0_i32_0 = arith.constant 0 : i32
    return %c0_i32, %arg0 : i32, i32
  }
  func.func @transform_4(%arg0: i32) -> (i32, i32) {
    %c0_i32 = arith.constant 0 : i32
    %c0_i32_0 = arith.constant 0 : i32
    return %c0_i32, %arg0 : i32, i32
  }
  func.func @transform_5(%arg0: i32) -> (i32, i32) {
    %c0_i32 = arith.constant 0 : i32
    %c0_i32_0 = arith.constant 0 : i32
    return %c0_i32, %arg0 : i32, i32
  }
}

module attributes {stable_mosaic.version = 11 : i64} {
  func.func @kernel(%arg0: i32, %arg1: memref<2x128xf32, #tpu.memory_space<vmem>>, %arg2: memref<128x2xf32, #tpu.memory_space<vmem>>, %arg3: memref<2x128xf32, #tpu.memory_space<vmem>>, %arg4: memref<128x2xf32, #tpu.memory_space<vmem>>, %arg5: memref<13x128xf32, #tpu.memory_space<vmem>>, %arg6: memref<128x4xf32, #tpu.memory_space<vmem>>, %arg7: memref<128x128xbf16, #tpu.memory_space<vmem>>, %arg8: memref<128x128xbf16, #tpu.memory_space<vmem>>, %arg9: memref<128x128xbf16, #tpu.memory_space<vmem>>, %arg10: memref<128x128xbf16, #tpu.memory_space<vmem>>, %arg11: memref<128x128xbf16, #tpu.memory_space<vmem>>, %arg12: memref<128x128xbf16, #tpu.memory_space<vmem>>, %arg13: memref<128x256xbf16, #tpu.memory_space<vmem>>, %arg14: memref<1x256xf32, #tpu.memory_space<vmem>>, %arg15: memref<256x128xbf16, #tpu.memory_space<vmem>>, %arg16: memref<2x128xf32, #tpu.memory_space<vmem>>, %arg17: memref<2x128xf32, #tpu.memory_space<vmem>>) attributes {dimension_semantics = [#tpu.dimension_semantics<arbitrary>], iteration_bounds = array<i64: 1>, scalar_prefetch = 0 : i64, scratch_operands = 1 : i64, tpu.core_type = #tpu.core_type<tc>, window_params = [{pipeline_mode = #tpu.pipeline_mode<synchronous>, transform_indices = @transform_0, window_bounds = array<i64: 2, 128>}, {pipeline_mode = #tpu.pipeline_mode<synchronous>, transform_indices = @transform_1, window_bounds = array<i64: 128, 2>}, {pipeline_mode = #tpu.pipeline_mode<synchronous>, transform_indices = @transform_2, window_bounds = array<i64: 2, 128>}, {pipeline_mode = #tpu.pipeline_mode<synchronous>, transform_indices = @transform_3, window_bounds = array<i64: 128, 2>}, {pipeline_mode = #tpu.pipeline_mode<synchronous>, transform_indices = @transform_4, window_bounds = array<i64: 13, 128>}, {pipeline_mode = #tpu.pipeline_mode<synchronous>, transform_indices = @transform_5, window_bounds = array<i64: 128, 4>}, {pipeline_mode = #tpu.pipeline_mode<synchronous>, transform_indices = @transform_6, window_bounds = array<i64: 128, 128>}, {pipeline_mode = #tpu.pipeline_mode<synchronous>, transform_indices = @transform_7, window_bounds = array<i64: 128, 128>}, {pipeline_mode = #tpu.pipeline_mode<synchronous>, transform_indices = @transform_8, window_bounds = array<i64: 128, 128>}, {pipeline_mode = #tpu.pipeline_mode<synchronous>, transform_indices = @transform_9, window_bounds = array<i64: 128, 128>}, {pipeline_mode = #tpu.pipeline_mode<synchronous>, transform_indices = @transform_10, window_bounds = array<i64: 128, 128>}, {pipeline_mode = #tpu.pipeline_mode<synchronous>, transform_indices = @transform_11, window_bounds = array<i64: 128, 128>}, {pipeline_mode = #tpu.pipeline_mode<synchronous>, transform_indices = @transform_12, window_bounds = array<i64: 128, 256>}, {pipeline_mode = #tpu.pipeline_mode<synchronous>, transform_indices = @transform_13, window_bounds = array<i64: 1, 256>}, {pipeline_mode = #tpu.pipeline_mode<synchronous>, transform_indices = @transform_14, window_bounds = array<i64: 256, 128>}, {pipeline_mode = #tpu.pipeline_mode<synchronous>, transform_indices = @transform_15, window_bounds = array<i64: 2, 128>}]} {
    %c0 = arith.constant 0 : index
    %c0_0 = arith.constant 0 : index
    %0 = vector.load %arg5[%c0, %c0_0] : memref<13x128xf32, #tpu.memory_space<vmem>>, vector<13x128xf32>
    %c0_1 = arith.constant 0 : index
    %c0_2 = arith.constant 0 : index
    %1 = vector.load %arg6[%c0_1, %c0_2] : memref<128x4xf32, #tpu.memory_space<vmem>>, vector<128x4xf32>
    %c0_3 = arith.constant 0 : index
    %c0_4 = arith.constant 0 : index
    %2 = vector.load %arg1[%c0_3, %c0_4] : memref<2x128xf32, #tpu.memory_space<vmem>>, vector<2x128xf32>
    %c0_5 = arith.constant 0 : index
    %c0_6 = arith.constant 0 : index
    %3 = vector.load %arg2[%c0_5, %c0_6] : memref<128x2xf32, #tpu.memory_space<vmem>>, vector<128x2xf32>
    %4 = vector.extract_strided_slice %0 {offsets = [0, 0], sizes = [1, 128], strides = [1, 1]} : vector<13x128xf32> to vector<1x128xf32>
    %5 = vector.extract_strided_slice %0 {offsets = [1, 0], sizes = [1, 128], strides = [1, 1]} : vector<13x128xf32> to vector<1x128xf32>
    %6 = vector.extract_strided_slice %1 {offsets = [0, 0], sizes = [128, 1], strides = [1, 1]} : vector<128x4xf32> to vector<128x1xf32>
    %7 = vector.extract_strided_slice %1 {offsets = [0, 1], sizes = [128, 1], strides = [1, 1]} : vector<128x4xf32> to vector<128x1xf32>
    %c0_7 = arith.constant 0 : index
    %c0_8 = arith.constant 0 : index
    %8 = vector.load %arg7[%c0_7, %c0_8] : memref<128x128xbf16, #tpu.memory_space<vmem>>, vector<128x128xbf16>
    %9 = vector.extract_strided_slice %0 {offsets = [2, 0], sizes = [1, 128], strides = [1, 1]} : vector<13x128xf32> to vector<1x128xf32>
    %c0_9 = arith.constant 0 : index
    %c0_10 = arith.constant 0 : index
    %10 = vector.load %arg8[%c0_9, %c0_10] : memref<128x128xbf16, #tpu.memory_space<vmem>>, vector<128x128xbf16>
    %11 = vector.extract_strided_slice %1 {offsets = [0, 2], sizes = [128, 1], strides = [1, 1]} : vector<128x4xf32> to vector<128x1xf32>
    %c0_11 = arith.constant 0 : index
    %c0_12 = arith.constant 0 : index
    %12 = vector.load %arg9[%c0_11, %c0_12] : memref<128x128xbf16, #tpu.memory_space<vmem>>, vector<128x128xbf16>
    %13 = vector.extract_strided_slice %0 {offsets = [3, 0], sizes = [1, 128], strides = [1, 1]} : vector<13x128xf32> to vector<1x128xf32>
    %cst = arith.constant dense<0.000000e+00> : vector<2xf32>
    %14 = vector.multi_reduction <add>, %2, %cst [1] : vector<2x128xf32> to vector<2xf32>
    %15 = vector.shape_cast %14 : vector<2xf32> to vector<2x1xf32>
    %cst_13 = arith.constant 1.280000e+02 : f32
    %16 = vector.broadcast %cst_13 : f32 to vector<2x1xf32>
    %17 = arith.divf %15, %16 : vector<2x1xf32>
    %18 = vector.broadcast %17 : vector<2x1xf32> to vector<2x128xf32>
    %19 = arith.subf %2, %18 : vector<2x128xf32>
    %20 = arith.mulf %19, %19 : vector<2x128xf32>
    %cst_14 = arith.constant dense<0.000000e+00> : vector<2xf32>
    %21 = vector.multi_reduction <add>, %20, %cst_14 [1] : vector<2x128xf32> to vector<2xf32>
    %22 = vector.shape_cast %21 : vector<2xf32> to vector<2x1xf32>
    %cst_15 = arith.constant 1.280000e+02 : f32
    %23 = vector.broadcast %cst_15 : f32 to vector<2x1xf32>
    %24 = arith.divf %22, %23 : vector<2x1xf32>
    %25 = vector.broadcast %17 : vector<2x1xf32> to vector<2x128xf32>
    %26 = arith.subf %2, %25 : vector<2x128xf32>
    %cst_16 = arith.constant 9.99999974E-6 : f32
    %27 = vector.broadcast %cst_16 : f32 to vector<2x1xf32>
    %28 = arith.addf %24, %27 : vector<2x1xf32>
    %29 = math.rsqrt %28 : vector<2x1xf32>
    %30 = vector.broadcast %29 : vector<2x1xf32> to vector<2x128xf32>
    %31 = arith.mulf %26, %30 : vector<2x128xf32>
    %32 = vector.broadcast %4 : vector<1x128xf32> to vector<2x128xf32>
    %33 = arith.mulf %31, %32 : vector<2x128xf32>
    %34 = vector.broadcast %5 : vector<1x128xf32> to vector<2x128xf32>
    %35 = arith.addf %33, %34 : vector<2x128xf32>
    %cst_17 = arith.constant dense<0.000000e+00> : vector<2xf32>
    %36 = vector.multi_reduction <add>, %3, %cst_17 [0] : vector<128x2xf32> to vector<2xf32>
    %37 = vector.shape_cast %36 : vector<2xf32> to vector<1x2xf32>
    %cst_18 = arith.constant 1.280000e+02 : f32
    %38 = vector.broadcast %cst_18 : f32 to vector<1x2xf32>
    %39 = arith.divf %37, %38 : vector<1x2xf32>
    %40 = vector.broadcast %39 : vector<1x2xf32> to vector<128x2xf32>
    %41 = arith.subf %3, %40 : vector<128x2xf32>
    %42 = arith.mulf %41, %41 : vector<128x2xf32>
    %cst_19 = arith.constant dense<0.000000e+00> : vector<2xf32>
    %43 = vector.multi_reduction <add>, %42, %cst_19 [0] : vector<128x2xf32> to vector<2xf32>
    %44 = vector.shape_cast %43 : vector<2xf32> to vector<1x2xf32>
    %cst_20 = arith.constant 1.280000e+02 : f32
    %45 = vector.broadcast %cst_20 : f32 to vector<1x2xf32>
    %46 = arith.divf %44, %45 : vector<1x2xf32>
    %47 = vector.broadcast %39 : vector<1x2xf32> to vector<128x2xf32>
    %48 = arith.subf %3, %47 : vector<128x2xf32>
    %cst_21 = arith.constant 9.99999974E-6 : f32
    %49 = vector.broadcast %cst_21 : f32 to vector<1x2xf32>
    %50 = arith.addf %46, %49 : vector<1x2xf32>
    %51 = math.rsqrt %50 : vector<1x2xf32>
    %52 = vector.broadcast %51 : vector<1x2xf32> to vector<128x2xf32>
    %53 = arith.mulf %48, %52 : vector<128x2xf32>
    %54 = vector.broadcast %6 : vector<128x1xf32> to vector<128x2xf32>
    %55 = arith.mulf %53, %54 : vector<128x2xf32>
    %56 = vector.broadcast %7 : vector<128x1xf32> to vector<128x2xf32>
    %57 = arith.addf %55, %56 : vector<128x2xf32>
    %58 = arith.extf %8 : vector<128x128xbf16> to vector<128x128xf32>
    %cst_22 = arith.constant dense<0.000000e+00> : vector<2x128xf32>
    %59 = tpu.matmul %35, %58, %cst_22 {dimension_numbers = #tpu.dot_dimension_numbers<[1], [0], [0], [1], [0, 0, 1, 1], [], []>} : vector<2x128xf32>, vector<128x128xf32>, vector<2x128xf32> -> vector<2x128xf32>
    %60 = vector.broadcast %9 : vector<1x128xf32> to vector<2x128xf32>
    %61 = arith.addf %59, %60 : vector<2x128xf32>
    %cst_23 = arith.constant 0.0883883461 : f32
    %62 = vector.broadcast %cst_23 : f32 to vector<2x128xf32>
    %63 = arith.mulf %61, %62 : vector<2x128xf32>
    %64 = arith.extf %12 : vector<128x128xbf16> to vector<128x128xf32>
    %cst_24 = arith.constant dense<0.000000e+00> : vector<2x128xf32>
    %65 = tpu.matmul %35, %64, %cst_24 {dimension_numbers = #tpu.dot_dimension_numbers<[1], [0], [0], [1], [0, 0, 1, 1], [], []>} : vector<2x128xf32>, vector<128x128xf32>, vector<2x128xf32> -> vector<2x128xf32>
    %66 = vector.broadcast %13 : vector<1x128xf32> to vector<2x128xf32>
    %67 = arith.addf %65, %66 : vector<2x128xf32>
    %68 = arith.extf %10 : vector<128x128xbf16> to vector<128x128xf32>
    %cst_25 = arith.constant dense<0.000000e+00> : vector<128x2xf32>
    %69 = tpu.matmul %68, %57, %cst_25 {dimension_numbers = #tpu.dot_dimension_numbers<[1], [0], [0], [1], [0, 0, 1, 1], [], []>} : vector<128x128xf32>, vector<128x2xf32>, vector<128x2xf32> -> vector<128x2xf32>
    %70 = vector.broadcast %11 : vector<128x1xf32> to vector<128x2xf32>
    %71 = arith.addf %69, %70 : vector<128x2xf32>
    %72 = vector.extract_strided_slice %63 {offsets = [0, 0], sizes = [1, 128], strides = [1, 1]} : vector<2x128xf32> to vector<1x128xf32>
    %73 = vector.extract_strided_slice %71 {offsets = [0, 0], sizes = [128, 1], strides = [1, 1]} : vector<128x2xf32> to vector<128x1xf32>
    %74 = vector.extract_strided_slice %67 {offsets = [0, 0], sizes = [1, 128], strides = [1, 1]} : vector<2x128xf32> to vector<1x128xf32>
    %cst_26 = arith.constant dense<0xFF800000> : vector<1xf32>
    %75 = vector.multi_reduction <maximumf>, %73, %cst_26 [0] : vector<128x1xf32> to vector<1xf32>
    %76 = vector.shape_cast %75 : vector<1xf32> to vector<1x1xf32>
    %cst_27 = arith.constant dense<0x7F800000> : vector<1xf32>
    %77 = vector.multi_reduction <minimumf>, %73, %cst_27 [0] : vector<128x1xf32> to vector<1xf32>
    %78 = vector.shape_cast %77 : vector<1xf32> to vector<1x1xf32>
    %cst_28 = arith.constant 0.000000e+00 : f32
    %79 = vector.broadcast %cst_28 : f32 to vector<1x128xf32>
    %80 = arith.cmpf oge, %72, %79 : vector<1x128xf32>
    %81 = vector.broadcast %76 : vector<1x1xf32> to vector<1x128xf32>
    %82 = arith.mulf %72, %81 : vector<1x128xf32>
    %83 = vector.broadcast %78 : vector<1x1xf32> to vector<1x128xf32>
    %84 = arith.mulf %72, %83 : vector<1x128xf32>
    %85 = arith.select %80, %82, %84 : vector<1x128xi1>, vector<1x128xf32>
    %86 = vector.broadcast %73 : vector<128x1xf32> to vector<128x128xf32>
    %87 = vector.broadcast %72 : vector<1x128xf32> to vector<128x128xf32>
    %88 = arith.mulf %86, %87 : vector<128x128xf32>
    %89 = vector.broadcast %85 : vector<1x128xf32> to vector<128x128xf32>
    %90 = arith.subf %88, %89 : vector<128x128xf32>
    %91 = math.exp %90 : vector<128x128xf32>
    %cst_29 = arith.constant dense<0.000000e+00> : vector<128xf32>
    %92 = vector.multi_reduction <add>, %91, %cst_29 [0] : vector<128x128xf32> to vector<128xf32>
    %93 = vector.shape_cast %92 : vector<128xf32> to vector<1x128xf32>
    %cst_30 = arith.constant dense<0.000000e+00> : vector<1x128xf32>
    %94 = tpu.matmul %74, %91, %cst_30 {dimension_numbers = #tpu.dot_dimension_numbers<[1], [0], [0], [1], [0, 0, 1, 1], [], []>} : vector<1x128xf32>, vector<128x128xf32>, vector<1x128xf32> -> vector<1x128xf32>
    %95 = tpu.reciprocal %93 {approx = true} : vector<1x128xf32> -> vector<1x128xf32>
    %96 = arith.mulf %94, %95 : vector<1x128xf32>
    %c0_31 = arith.constant 0 : index
    %c0_32 = arith.constant 0 : index
    %97 = vector.load %arg17[%c0_31, %c0_32] : memref<2x128xf32, #tpu.memory_space<vmem>>, vector<1x128xf32>
    tpu.vector_store %arg17[%c0_31, %c0_32], %96 {strides = array<i32>} : memref<2x128xf32, #tpu.memory_space<vmem>>, vector<1x128xf32>,
    %98 = vector.extract_strided_slice %63 {offsets = [1, 0], sizes = [1, 128], strides = [1, 1]} : vector<2x128xf32> to vector<1x128xf32>
    %99 = vector.extract_strided_slice %71 {offsets = [0, 1], sizes = [128, 1], strides = [1, 1]} : vector<128x2xf32> to vector<128x1xf32>
    %100 = vector.extract_strided_slice %67 {offsets = [1, 0], sizes = [1, 128], strides = [1, 1]} : vector<2x128xf32> to vector<1x128xf32>
    %cst_33 = arith.constant dense<0xFF800000> : vector<1xf32>
    %101 = vector.multi_reduction <maximumf>, %99, %cst_33 [0] : vector<128x1xf32> to vector<1xf32>
    %102 = vector.shape_cast %101 : vector<1xf32> to vector<1x1xf32>
    %cst_34 = arith.constant dense<0x7F800000> : vector<1xf32>
    %103 = vector.multi_reduction <minimumf>, %99, %cst_34 [0] : vector<128x1xf32> to vector<1xf32>
    %104 = vector.shape_cast %103 : vector<1xf32> to vector<1x1xf32>
    %cst_35 = arith.constant 0.000000e+00 : f32
    %105 = vector.broadcast %cst_35 : f32 to vector<1x128xf32>
    %106 = arith.cmpf oge, %98, %105 : vector<1x128xf32>
    %107 = vector.broadcast %102 : vector<1x1xf32> to vector<1x128xf32>
    %108 = arith.mulf %98, %107 : vector<1x128xf32>
    %109 = vector.broadcast %104 : vector<1x1xf32> to vector<1x128xf32>
    %110 = arith.mulf %98, %109 : vector<1x128xf32>
    %111 = arith.select %106, %108, %110 : vector<1x128xi1>, vector<1x128xf32>
    %112 = vector.broadcast %99 : vector<128x1xf32> to vector<128x128xf32>
    %113 = vector.broadcast %98 : vector<1x128xf32> to vector<128x128xf32>
    %114 = arith.mulf %112, %113 : vector<128x128xf32>
    %115 = vector.broadcast %111 : vector<1x128xf32> to vector<128x128xf32>
    %116 = arith.subf %114, %115 : vector<128x128xf32>
    %117 = math.exp %116 : vector<128x128xf32>
    %cst_36 = arith.constant dense<0.000000e+00> : vector<128xf32>
    %118 = vector.multi_reduction <add>, %117, %cst_36 [0] : vector<128x128xf32> to vector<128xf32>
    %119 = vector.shape_cast %118 : vector<128xf32> to vector<1x128xf32>
    %cst_37 = arith.constant dense<0.000000e+00> : vector<1x128xf32>
    %120 = tpu.matmul %100, %117, %cst_37 {dimension_numbers = #tpu.dot_dimension_numbers<[1], [0], [0], [1], [0, 0, 1, 1], [], []>} : vector<1x128xf32>, vector<128x128xf32>, vector<1x128xf32> -> vector<1x128xf32>
    %121 = tpu.reciprocal %119 {approx = true} : vector<1x128xf32> -> vector<1x128xf32>
    %122 = arith.mulf %120, %121 : vector<1x128xf32>
    %c1 = arith.constant 1 : index
    %c0_38 = arith.constant 0 : index
    %123 = vector.load %arg17[%c1, %c0_38] : memref<2x128xf32, #tpu.memory_space<vmem>>, vector<1x128xf32>
    tpu.vector_store %arg17[%c1, %c0_38], %122 {strides = array<i32>} : memref<2x128xf32, #tpu.memory_space<vmem>>, vector<1x128xf32>,
    %c0_39 = arith.constant 0 : index
    %c0_40 = arith.constant 0 : index
    %124 = vector.load %arg17[%c0_39, %c0_40] : memref<2x128xf32, #tpu.memory_space<vmem>>, vector<2x128xf32>
    %125 = arith.addf %2, %124 : vector<2x128xf32>
    %c0_41 = arith.constant 0 : index
    %c0_42 = arith.constant 0 : index
    %126 = vector.load %arg3[%c0_41, %c0_42] : memref<2x128xf32, #tpu.memory_space<vmem>>, vector<2x128xf32>
    %c0_43 = arith.constant 0 : index
    %c0_44 = arith.constant 0 : index
    %127 = vector.load %arg4[%c0_43, %c0_44] : memref<128x2xf32, #tpu.memory_space<vmem>>, vector<128x2xf32>
    %128 = vector.extract_strided_slice %0 {offsets = [4, 0], sizes = [1, 128], strides = [1, 1]} : vector<13x128xf32> to vector<1x128xf32>
    %129 = vector.extract_strided_slice %0 {offsets = [5, 0], sizes = [1, 128], strides = [1, 1]} : vector<13x128xf32> to vector<1x128xf32>
    %c0_45 = arith.constant 0 : index
    %c0_46 = arith.constant 0 : index
    %130 = vector.load %arg10[%c0_45, %c0_46] : memref<128x128xbf16, #tpu.memory_space<vmem>>, vector<128x128xbf16>
    %131 = vector.extract_strided_slice %0 {offsets = [6, 0], sizes = [1, 128], strides = [1, 1]} : vector<13x128xf32> to vector<1x128xf32>
    %c0_47 = arith.constant 0 : index
    %c0_48 = arith.constant 0 : index
    %132 = vector.load %arg11[%c0_47, %c0_48] : memref<128x128xbf16, #tpu.memory_space<vmem>>, vector<128x128xbf16>
    %133 = vector.extract_strided_slice %1 {offsets = [0, 3], sizes = [128, 1], strides = [1, 1]} : vector<128x4xf32> to vector<128x1xf32>
    %c0_49 = arith.constant 0 : index
    %c0_50 = arith.constant 0 : index
    %134 = vector.load %arg12[%c0_49, %c0_50] : memref<128x128xbf16, #tpu.memory_space<vmem>>, vector<128x128xbf16>
    %135 = vector.extract_strided_slice %0 {offsets = [7, 0], sizes = [1, 128], strides = [1, 1]} : vector<13x128xf32> to vector<1x128xf32>
    %cst_51 = arith.constant dense<0.000000e+00> : vector<2xf32>
    %136 = vector.multi_reduction <add>, %125, %cst_51 [1] : vector<2x128xf32> to vector<2xf32>
    %137 = vector.shape_cast %136 : vector<2xf32> to vector<2x1xf32>
    %cst_52 = arith.constant 1.280000e+02 : f32
    %138 = vector.broadcast %cst_52 : f32 to vector<2x1xf32>
    %139 = arith.divf %137, %138 : vector<2x1xf32>
    %140 = vector.broadcast %139 : vector<2x1xf32> to vector<2x128xf32>
    %141 = arith.subf %125, %140 : vector<2x128xf32>
    %142 = arith.mulf %141, %141 : vector<2x128xf32>
    %cst_53 = arith.constant dense<0.000000e+00> : vector<2xf32>
    %143 = vector.multi_reduction <add>, %142, %cst_53 [1] : vector<2x128xf32> to vector<2xf32>
    %144 = vector.shape_cast %143 : vector<2xf32> to vector<2x1xf32>
    %cst_54 = arith.constant 1.280000e+02 : f32
    %145 = vector.broadcast %cst_54 : f32 to vector<2x1xf32>
    %146 = arith.divf %144, %145 : vector<2x1xf32>
    %147 = vector.broadcast %139 : vector<2x1xf32> to vector<2x128xf32>
    %148 = arith.subf %125, %147 : vector<2x128xf32>
    %cst_55 = arith.constant 9.99999974E-6 : f32
    %149 = vector.broadcast %cst_55 : f32 to vector<2x1xf32>
    %150 = arith.addf %146, %149 : vector<2x1xf32>
    %151 = math.rsqrt %150 : vector<2x1xf32>
    %152 = vector.broadcast %151 : vector<2x1xf32> to vector<2x128xf32>
    %153 = arith.mulf %148, %152 : vector<2x128xf32>
    %154 = vector.broadcast %128 : vector<1x128xf32> to vector<2x128xf32>
    %155 = arith.mulf %153, %154 : vector<2x128xf32>
    %156 = vector.broadcast %129 : vector<1x128xf32> to vector<2x128xf32>
    %157 = arith.addf %155, %156 : vector<2x128xf32>
    %158 = arith.extf %130 : vector<128x128xbf16> to vector<128x128xf32>
    %cst_56 = arith.constant dense<0.000000e+00> : vector<2x128xf32>
    %159 = tpu.matmul %157, %158, %cst_56 {dimension_numbers = #tpu.dot_dimension_numbers<[1], [0], [0], [1], [0, 0, 1, 1], [], []>} : vector<2x128xf32>, vector<128x128xf32>, vector<2x128xf32> -> vector<2x128xf32>
    %160 = vector.broadcast %131 : vector<1x128xf32> to vector<2x128xf32>
    %161 = arith.addf %159, %160 : vector<2x128xf32>
    %cst_57 = arith.constant 0.0883883461 : f32
    %162 = vector.broadcast %cst_57 : f32 to vector<2x128xf32>
    %163 = arith.mulf %161, %162 : vector<2x128xf32>
    %164 = arith.extf %134 : vector<128x128xbf16> to vector<128x128xf32>
    %cst_58 = arith.constant dense<0.000000e+00> : vector<2x128xf32>
    %165 = tpu.matmul %126, %164, %cst_58 {dimension_numbers = #tpu.dot_dimension_numbers<[1], [0], [0], [1], [0, 0, 1, 1], [], []>} : vector<2x128xf32>, vector<128x128xf32>, vector<2x128xf32> -> vector<2x128xf32>
    %166 = vector.broadcast %135 : vector<1x128xf32> to vector<2x128xf32>
    %167 = arith.addf %165, %166 : vector<2x128xf32>
    %168 = arith.extf %132 : vector<128x128xbf16> to vector<128x128xf32>
    %cst_59 = arith.constant dense<0.000000e+00> : vector<128x2xf32>
    %169 = tpu.matmul %168, %127, %cst_59 {dimension_numbers = #tpu.dot_dimension_numbers<[1], [0], [0], [1], [0, 0, 1, 1], [], []>} : vector<128x128xf32>, vector<128x2xf32>, vector<128x2xf32> -> vector<128x2xf32>
    %170 = vector.broadcast %133 : vector<128x1xf32> to vector<128x2xf32>
    %171 = arith.addf %169, %170 : vector<128x2xf32>
    %172 = vector.extract_strided_slice %163 {offsets = [0, 0], sizes = [1, 128], strides = [1, 1]} : vector<2x128xf32> to vector<1x128xf32>
    %173 = vector.extract_strided_slice %171 {offsets = [0, 0], sizes = [128, 1], strides = [1, 1]} : vector<128x2xf32> to vector<128x1xf32>
    %174 = vector.extract_strided_slice %167 {offsets = [0, 0], sizes = [1, 128], strides = [1, 1]} : vector<2x128xf32> to vector<1x128xf32>
    %cst_60 = arith.constant dense<0xFF800000> : vector<1xf32>
    %175 = vector.multi_reduction <maximumf>, %173, %cst_60 [0] : vector<128x1xf32> to vector<1xf32>
    %176 = vector.shape_cast %175 : vector<1xf32> to vector<1x1xf32>
    %cst_61 = arith.constant dense<0x7F800000> : vector<1xf32>
    %177 = vector.multi_reduction <minimumf>, %173, %cst_61 [0] : vector<128x1xf32> to vector<1xf32>
    %178 = vector.shape_cast %177 : vector<1xf32> to vector<1x1xf32>
    %cst_62 = arith.constant 0.000000e+00 : f32
    %179 = vector.broadcast %cst_62 : f32 to vector<1x128xf32>
    %180 = arith.cmpf oge, %172, %179 : vector<1x128xf32>
    %181 = vector.broadcast %176 : vector<1x1xf32> to vector<1x128xf32>
    %182 = arith.mulf %172, %181 : vector<1x128xf32>
    %183 = vector.broadcast %178 : vector<1x1xf32> to vector<1x128xf32>
    %184 = arith.mulf %172, %183 : vector<1x128xf32>
    %185 = arith.select %180, %182, %184 : vector<1x128xi1>, vector<1x128xf32>
    %186 = vector.broadcast %173 : vector<128x1xf32> to vector<128x128xf32>
    %187 = vector.broadcast %172 : vector<1x128xf32> to vector<128x128xf32>
    %188 = arith.mulf %186, %187 : vector<128x128xf32>
    %189 = vector.broadcast %185 : vector<1x128xf32> to vector<128x128xf32>
    %190 = arith.subf %188, %189 : vector<128x128xf32>
    %191 = math.exp %190 : vector<128x128xf32>
    %cst_63 = arith.constant dense<0.000000e+00> : vector<128xf32>
    %192 = vector.multi_reduction <add>, %191, %cst_63 [0] : vector<128x128xf32> to vector<128xf32>
    %193 = vector.shape_cast %192 : vector<128xf32> to vector<1x128xf32>
    %cst_64 = arith.constant dense<0.000000e+00> : vector<1x128xf32>
    %194 = tpu.matmul %174, %191, %cst_64 {dimension_numbers = #tpu.dot_dimension_numbers<[1], [0], [0], [1], [0, 0, 1, 1], [], []>} : vector<1x128xf32>, vector<128x128xf32>, vector<1x128xf32> -> vector<1x128xf32>
    %195 = tpu.reciprocal %193 {approx = true} : vector<1x128xf32> -> vector<1x128xf32>
    %196 = arith.mulf %194, %195 : vector<1x128xf32>
    %c0_65 = arith.constant 0 : index
    %c0_66 = arith.constant 0 : index
    %197 = vector.load %arg17[%c0_65, %c0_66] : memref<2x128xf32, #tpu.memory_space<vmem>>, vector<1x128xf32>
    tpu.vector_store %arg17[%c0_65, %c0_66], %196 {strides = array<i32>} : memref<2x128xf32, #tpu.memory_space<vmem>>, vector<1x128xf32>,
    %198 = vector.extract_strided_slice %163 {offsets = [1, 0], sizes = [1, 128], strides = [1, 1]} : vector<2x128xf32> to vector<1x128xf32>
    %199 = vector.extract_strided_slice %171 {offsets = [0, 1], sizes = [128, 1], strides = [1, 1]} : vector<128x2xf32> to vector<128x1xf32>
    %200 = vector.extract_strided_slice %167 {offsets = [1, 0], sizes = [1, 128], strides = [1, 1]} : vector<2x128xf32> to vector<1x128xf32>
    %cst_67 = arith.constant dense<0xFF800000> : vector<1xf32>
    %201 = vector.multi_reduction <maximumf>, %199, %cst_67 [0] : vector<128x1xf32> to vector<1xf32>
    %202 = vector.shape_cast %201 : vector<1xf32> to vector<1x1xf32>
    %cst_68 = arith.constant dense<0x7F800000> : vector<1xf32>
    %203 = vector.multi_reduction <minimumf>, %199, %cst_68 [0] : vector<128x1xf32> to vector<1xf32>
    %204 = vector.shape_cast %203 : vector<1xf32> to vector<1x1xf32>
    %cst_69 = arith.constant 0.000000e+00 : f32
    %205 = vector.broadcast %cst_69 : f32 to vector<1x128xf32>
    %206 = arith.cmpf oge, %198, %205 : vector<1x128xf32>
    %207 = vector.broadcast %202 : vector<1x1xf32> to vector<1x128xf32>
    %208 = arith.mulf %198, %207 : vector<1x128xf32>
    %209 = vector.broadcast %204 : vector<1x1xf32> to vector<1x128xf32>
    %210 = arith.mulf %198, %209 : vector<1x128xf32>
    %211 = arith.select %206, %208, %210 : vector<1x128xi1>, vector<1x128xf32>
    %212 = vector.broadcast %199 : vector<128x1xf32> to vector<128x128xf32>
    %213 = vector.broadcast %198 : vector<1x128xf32> to vector<128x128xf32>
    %214 = arith.mulf %212, %213 : vector<128x128xf32>
    %215 = vector.broadcast %211 : vector<1x128xf32> to vector<128x128xf32>
    %216 = arith.subf %214, %215 : vector<128x128xf32>
    %217 = math.exp %216 : vector<128x128xf32>
    %cst_70 = arith.constant dense<0.000000e+00> : vector<128xf32>
    %218 = vector.multi_reduction <add>, %217, %cst_70 [0] : vector<128x128xf32> to vector<128xf32>
    %219 = vector.shape_cast %218 : vector<128xf32> to vector<1x128xf32>
    %cst_71 = arith.constant dense<0.000000e+00> : vector<1x128xf32>
    %220 = tpu.matmul %200, %217, %cst_71 {dimension_numbers = #tpu.dot_dimension_numbers<[1], [0], [0], [1], [0, 0, 1, 1], [], []>} : vector<1x128xf32>, vector<128x128xf32>, vector<1x128xf32> -> vector<1x128xf32>
    %221 = tpu.reciprocal %219 {approx = true} : vector<1x128xf32> -> vector<1x128xf32>
    %222 = arith.mulf %220, %221 : vector<1x128xf32>
    %c1_72 = arith.constant 1 : index
    %c0_73 = arith.constant 0 : index
    %223 = vector.load %arg17[%c1_72, %c0_73] : memref<2x128xf32, #tpu.memory_space<vmem>>, vector<1x128xf32>
    tpu.vector_store %arg17[%c1_72, %c0_73], %222 {strides = array<i32>} : memref<2x128xf32, #tpu.memory_space<vmem>>, vector<1x128xf32>,
    %c0_74 = arith.constant 0 : index
    %c0_75 = arith.constant 0 : index
    %224 = vector.load %arg17[%c0_74, %c0_75] : memref<2x128xf32, #tpu.memory_space<vmem>>, vector<2x128xf32>
    %225 = arith.addf %125, %224 : vector<2x128xf32>
    %226 = vector.extract_strided_slice %0 {offsets = [8, 0], sizes = [1, 128], strides = [1, 1]} : vector<13x128xf32> to vector<1x128xf32>
    %227 = vector.extract_strided_slice %0 {offsets = [9, 0], sizes = [1, 128], strides = [1, 1]} : vector<13x128xf32> to vector<1x128xf32>
    %c0_76 = arith.constant 0 : index
    %c0_77 = arith.constant 0 : index
    %228 = vector.load %arg13[%c0_76, %c0_77] : memref<128x256xbf16, #tpu.memory_space<vmem>>, vector<128x256xbf16>
    %c0_78 = arith.constant 0 : index
    %c0_79 = arith.constant 0 : index
    %229 = vector.load %arg14[%c0_78, %c0_79] : memref<1x256xf32, #tpu.memory_space<vmem>>, vector<1x256xf32>
    %c0_80 = arith.constant 0 : index
    %c0_81 = arith.constant 0 : index
    %230 = vector.load %arg15[%c0_80, %c0_81] : memref<256x128xbf16, #tpu.memory_space<vmem>>, vector<256x128xbf16>
    %231 = vector.extract_strided_slice %0 {offsets = [10, 0], sizes = [1, 128], strides = [1, 1]} : vector<13x128xf32> to vector<1x128xf32>
    %232 = vector.extract_strided_slice %0 {offsets = [11, 0], sizes = [1, 128], strides = [1, 1]} : vector<13x128xf32> to vector<1x128xf32>
    %233 = vector.extract_strided_slice %0 {offsets = [12, 0], sizes = [1, 128], strides = [1, 1]} : vector<13x128xf32> to vector<1x128xf32>
    %cst_82 = arith.constant dense<0.000000e+00> : vector<2xf32>
    %234 = vector.multi_reduction <add>, %225, %cst_82 [1] : vector<2x128xf32> to vector<2xf32>
    %235 = vector.shape_cast %234 : vector<2xf32> to vector<2x1xf32>
    %cst_83 = arith.constant 1.280000e+02 : f32
    %236 = vector.broadcast %cst_83 : f32 to vector<2x1xf32>
    %237 = arith.divf %235, %236 : vector<2x1xf32>
    %238 = vector.broadcast %237 : vector<2x1xf32> to vector<2x128xf32>
    %239 = arith.subf %225, %238 : vector<2x128xf32>
    %240 = arith.mulf %239, %239 : vector<2x128xf32>
    %cst_84 = arith.constant dense<0.000000e+00> : vector<2xf32>
    %241 = vector.multi_reduction <add>, %240, %cst_84 [1] : vector<2x128xf32> to vector<2xf32>
    %242 = vector.shape_cast %241 : vector<2xf32> to vector<2x1xf32>
    %cst_85 = arith.constant 1.280000e+02 : f32
    %243 = vector.broadcast %cst_85 : f32 to vector<2x1xf32>
    %244 = arith.divf %242, %243 : vector<2x1xf32>
    %245 = vector.broadcast %237 : vector<2x1xf32> to vector<2x128xf32>
    %246 = arith.subf %225, %245 : vector<2x128xf32>
    %cst_86 = arith.constant 9.99999974E-6 : f32
    %247 = vector.broadcast %cst_86 : f32 to vector<2x1xf32>
    %248 = arith.addf %244, %247 : vector<2x1xf32>
    %249 = math.rsqrt %248 : vector<2x1xf32>
    %250 = vector.broadcast %249 : vector<2x1xf32> to vector<2x128xf32>
    %251 = arith.mulf %246, %250 : vector<2x128xf32>
    %252 = vector.broadcast %226 : vector<1x128xf32> to vector<2x128xf32>
    %253 = arith.mulf %251, %252 : vector<2x128xf32>
    %254 = vector.broadcast %227 : vector<1x128xf32> to vector<2x128xf32>
    %255 = arith.addf %253, %254 : vector<2x128xf32>
    %256 = arith.extf %228 : vector<128x256xbf16> to vector<128x256xf32>
    %cst_87 = arith.constant dense<0.000000e+00> : vector<2x256xf32>
    %257 = tpu.matmul %255, %256, %cst_87 {dimension_numbers = #tpu.dot_dimension_numbers<[1], [0], [0], [1], [0, 0, 1, 1], [], []>} : vector<2x128xf32>, vector<128x256xf32>, vector<2x256xf32> -> vector<2x256xf32>
    %258 = vector.broadcast %229 : vector<1x256xf32> to vector<2x256xf32>
    %259 = arith.addf %257, %258 : vector<2x256xf32>
    %cst_88 = arith.constant 0.000000e+00 : f32
    %260 = vector.broadcast %cst_88 : f32 to vector<2x256xf32>
    %261 = arith.maximumf %259, %260 : vector<2x256xf32>
    %262 = arith.extf %230 : vector<256x128xbf16> to vector<256x128xf32>
    %cst_89 = arith.constant dense<0.000000e+00> : vector<2x128xf32>
    %263 = tpu.matmul %261, %262, %cst_89 {dimension_numbers = #tpu.dot_dimension_numbers<[1], [0], [0], [1], [0, 0, 1, 1], [], []>} : vector<2x256xf32>, vector<256x128xf32>, vector<2x128xf32> -> vector<2x128xf32>
    %264 = vector.broadcast %231 : vector<1x128xf32> to vector<2x128xf32>
    %265 = arith.addf %263, %264 : vector<2x128xf32>
    %266 = arith.addf %225, %265 : vector<2x128xf32>
    %cst_90 = arith.constant dense<0.000000e+00> : vector<2xf32>
    %267 = vector.multi_reduction <add>, %266, %cst_90 [1] : vector<2x128xf32> to vector<2xf32>
    %268 = vector.shape_cast %267 : vector<2xf32> to vector<2x1xf32>
    %cst_91 = arith.constant 1.280000e+02 : f32
    %269 = vector.broadcast %cst_91 : f32 to vector<2x1xf32>
    %270 = arith.divf %268, %269 : vector<2x1xf32>
    %271 = vector.broadcast %270 : vector<2x1xf32> to vector<2x128xf32>
    %272 = arith.subf %266, %271 : vector<2x128xf32>
    %273 = arith.mulf %272, %272 : vector<2x128xf32>
    %cst_92 = arith.constant dense<0.000000e+00> : vector<2xf32>
    %274 = vector.multi_reduction <add>, %273, %cst_92 [1] : vector<2x128xf32> to vector<2xf32>
    %275 = vector.shape_cast %274 : vector<2xf32> to vector<2x1xf32>
    %cst_93 = arith.constant 1.280000e+02 : f32
    %276 = vector.broadcast %cst_93 : f32 to vector<2x1xf32>
    %277 = arith.divf %275, %276 : vector<2x1xf32>
    %278 = vector.broadcast %270 : vector<2x1xf32> to vector<2x128xf32>
    %279 = arith.subf %266, %278 : vector<2x128xf32>
    %cst_94 = arith.constant 9.99999974E-6 : f32
    %280 = vector.broadcast %cst_94 : f32 to vector<2x1xf32>
    %281 = arith.addf %277, %280 : vector<2x1xf32>
    %282 = math.rsqrt %281 : vector<2x1xf32>
    %283 = vector.broadcast %282 : vector<2x1xf32> to vector<2x128xf32>
    %284 = arith.mulf %279, %283 : vector<2x128xf32>
    %285 = vector.broadcast %232 : vector<1x128xf32> to vector<2x128xf32>
    %286 = arith.mulf %284, %285 : vector<2x128xf32>
    %287 = vector.broadcast %233 : vector<1x128xf32> to vector<2x128xf32>
    %288 = arith.addf %286, %287 : vector<2x128xf32>
    %c0_95 = arith.constant 0 : index
    %c0_96 = arith.constant 0 : index
    %289 = vector.load %arg16[%c0_95, %c0_96] : memref<2x128xf32, #tpu.memory_space<vmem>>, vector<2x128xf32>
    tpu.vector_store %arg16[%c0_95, %c0_96], %288 {strides = array<i32>} : memref<2x128xf32, #tpu.memory_space<vmem>>, vector<2x128xf32>,
    return
  }
  func.func @transform_0(%arg0: i32) -> (i32, i32) {
    %c0_i32 = arith.constant 0 : i32
    %c0_i32_0 = arith.constant 0 : i32
    %c0_i32_1 = arith.constant 0 : i32
    return %c0_i32, %c0_i32_0 : i32, i32
  }
  func.func @transform_1(%arg0: i32) -> (i32, i32) {
    %c0_i32 = arith.constant 0 : i32
    %c0_i32_0 = arith.constant 0 : i32
    %c0_i32_1 = arith.constant 0 : i32
    return %c0_i32, %c0_i32_0 : i32, i32
  }
  func.func @transform_2(%arg0: i32) -> (i32, i32) {
    %c0_i32 = arith.constant 0 : i32
    %c0_i32_0 = arith.constant 0 : i32
    %c0_i32_1 = arith.constant 0 : i32
    return %c0_i32, %c0_i32_0 : i32, i32
  }
  func.func @transform_3(%arg0: i32) -> (i32, i32) {
    %c0_i32 = arith.constant 0 : i32
    %c0_i32_0 = arith.constant 0 : i32
    %c0_i32_1 = arith.constant 0 : i32
    return %c0_i32, %c0_i32_0 : i32, i32
  }
  func.func @transform_4(%arg0: i32) -> (i32, i32) {
    %c0_i32 = arith.constant 0 : i32
    %c0_i32_0 = arith.constant 0 : i32
    %c0_i32_1 = arith.constant 0 : i32
    return %c0_i32, %c0_i32_0 : i32, i32
  }
  func.func @transform_5(%arg0: i32) -> (i32, i32) {
    %c0_i32 = arith.constant 0 : i32
    %c0_i32_0 = arith.constant 0 : i32
    %c0_i32_1 = arith.constant 0 : i32
    return %c0_i32, %c0_i32_0 : i32, i32
  }
  func.func @transform_6(%arg0: i32) -> (i32, i32) {
    %c0_i32 = arith.constant 0 : i32
    %c0_i32_0 = arith.constant 0 : i32
    %c0_i32_1 = arith.constant 0 : i32
    return %c0_i32, %c0_i32_0 : i32, i32
  }
  func.func @transform_7(%arg0: i32) -> (i32, i32) {
    %c0_i32 = arith.constant 0 : i32
    %c0_i32_0 = arith.constant 0 : i32
    %c0_i32_1 = arith.constant 0 : i32
    return %c0_i32, %c0_i32_0 : i32, i32
  }
  func.func @transform_8(%arg0: i32) -> (i32, i32) {
    %c0_i32 = arith.constant 0 : i32
    %c0_i32_0 = arith.constant 0 : i32
    %c0_i32_1 = arith.constant 0 : i32
    return %c0_i32, %c0_i32_0 : i32, i32
  }
  func.func @transform_9(%arg0: i32) -> (i32, i32) {
    %c0_i32 = arith.constant 0 : i32
    %c0_i32_0 = arith.constant 0 : i32
    %c0_i32_1 = arith.constant 0 : i32
    return %c0_i32, %c0_i32_0 : i32, i32
  }
  func.func @transform_10(%arg0: i32) -> (i32, i32) {
    %c0_i32 = arith.constant 0 : i32
    %c0_i32_0 = arith.constant 0 : i32
    %c0_i32_1 = arith.constant 0 : i32
    return %c0_i32, %c0_i32_0 : i32, i32
  }
  func.func @transform_11(%arg0: i32) -> (i32, i32) {
    %c0_i32 = arith.constant 0 : i32
    %c0_i32_0 = arith.constant 0 : i32
    %c0_i32_1 = arith.constant 0 : i32
    return %c0_i32, %c0_i32_0 : i32, i32
  }
  func.func @transform_12(%arg0: i32) -> (i32, i32) {
    %c0_i32 = arith.constant 0 : i32
    %c0_i32_0 = arith.constant 0 : i32
    %c0_i32_1 = arith.constant 0 : i32
    return %c0_i32, %c0_i32_0 : i32, i32
  }
  func.func @transform_13(%arg0: i32) -> (i32, i32) {
    %c0_i32 = arith.constant 0 : i32
    %c0_i32_0 = arith.constant 0 : i32
    %c0_i32_1 = arith.constant 0 : i32
    return %c0_i32, %c0_i32_0 : i32, i32
  }
  func.func @transform_14(%arg0: i32) -> (i32, i32) {
    %c0_i32 = arith.constant 0 : i32
    %c0_i32_0 = arith.constant 0 : i32
    %c0_i32_1 = arith.constant 0 : i32
    return %c0_i32, %c0_i32_0 : i32, i32
  }
  func.func @transform_15(%arg0: i32) -> (i32, i32) {
    %c0_i32 = arith.constant 0 : i32
    %c0_i32_0 = arith.constant 0 : i32
    %c0_i32_1 = arith.constant 0 : i32
    return %c0_i32, %c0_i32_0 : i32, i32
  }
}

module attributes {stable_mosaic.version = 11 : i64} {
  func.func @kernel(%arg0: i32, %arg1: memref<2x128xf32, #tpu.memory_space<vmem>>, %arg2: memref<128x256xbf16, #tpu.memory_space<vmem>>, %arg3: memref<3x256xf32, #tpu.memory_space<vmem>>, %arg4: memref<256x32xbf16, #tpu.memory_space<vmem>>, %arg5: memref<1x32xf32, #tpu.memory_space<vmem>>, %arg6: memref<2x32xf32, #tpu.memory_space<vmem>>) attributes {dimension_semantics = [#tpu.dimension_semantics<parallel>], iteration_bounds = array<i64: 1>, scalar_prefetch = 0 : i64, scratch_operands = 0 : i64, tpu.core_type = #tpu.core_type<tc>, window_params = [{pipeline_mode = #tpu.pipeline_mode<synchronous>, transform_indices = @transform_0, window_bounds = array<i64: 2, 128>}, {pipeline_mode = #tpu.pipeline_mode<synchronous>, transform_indices = @transform_1, window_bounds = array<i64: 128, 256>}, {pipeline_mode = #tpu.pipeline_mode<synchronous>, transform_indices = @transform_2, window_bounds = array<i64: 3, 256>}, {transform_indices = @transform_3, window_bounds = array<i64: 256, 32>}, {transform_indices = @transform_4, window_bounds = array<i64: 1, 32>}, {transform_indices = @transform_5, window_bounds = array<i64: 2, 32>}]} {
    %c0 = arith.constant 0 : index
    %c0_0 = arith.constant 0 : index
    %0 = vector.load %arg3[%c0, %c0_0] : memref<3x256xf32, #tpu.memory_space<vmem>>, vector<3x256xf32>
    %c0_1 = arith.constant 0 : index
    %c0_2 = arith.constant 0 : index
    %1 = vector.load %arg1[%c0_1, %c0_2] : memref<2x128xf32, #tpu.memory_space<vmem>>, vector<2x128xf32>
    %c0_3 = arith.constant 0 : index
    %c0_4 = arith.constant 0 : index
    %2 = vector.load %arg2[%c0_3, %c0_4] : memref<128x256xbf16, #tpu.memory_space<vmem>>, vector<128x256xbf16>
    %3 = arith.extf %2 : vector<128x256xbf16> to vector<128x256xf32>
    %cst = arith.constant dense<0.000000e+00> : vector<2x256xf32>
    %4 = tpu.matmul %1, %3, %cst {dimension_numbers = #tpu.dot_dimension_numbers<[1], [0], [0], [1], [0, 0, 1, 1], [], []>} : vector<2x128xf32>, vector<128x256xf32>, vector<2x256xf32> -> vector<2x256xf32>
    %5 = vector.extract_strided_slice %0 {offsets = [0, 0], sizes = [1, 256], strides = [1, 1]} : vector<3x256xf32> to vector<1x256xf32>
    %6 = vector.broadcast %5 : vector<1x256xf32> to vector<2x256xf32>
    %7 = arith.addf %4, %6 : vector<2x256xf32>
    %8 = vector.extract_strided_slice %0 {offsets = [1, 0], sizes = [1, 256], strides = [1, 1]} : vector<3x256xf32> to vector<1x256xf32>
    %9 = vector.extract_strided_slice %0 {offsets = [2, 0], sizes = [1, 256], strides = [1, 1]} : vector<3x256xf32> to vector<1x256xf32>
    %cst_5 = arith.constant dense<0.000000e+00> : vector<2xf32>
    %10 = vector.multi_reduction <add>, %7, %cst_5 [1] : vector<2x256xf32> to vector<2xf32>
    %11 = vector.shape_cast %10 : vector<2xf32> to vector<2x1xf32>
    %cst_6 = arith.constant 2.560000e+02 : f32
    %12 = vector.broadcast %cst_6 : f32 to vector<2x1xf32>
    %13 = arith.divf %11, %12 : vector<2x1xf32>
    %14 = vector.broadcast %13 : vector<2x1xf32> to vector<2x256xf32>
    %15 = arith.subf %7, %14 : vector<2x256xf32>
    %16 = arith.mulf %15, %15 : vector<2x256xf32>
    %cst_7 = arith.constant dense<0.000000e+00> : vector<2xf32>
    %17 = vector.multi_reduction <add>, %16, %cst_7 [1] : vector<2x256xf32> to vector<2xf32>
    %18 = vector.shape_cast %17 : vector<2xf32> to vector<2x1xf32>
    %cst_8 = arith.constant 2.560000e+02 : f32
    %19 = vector.broadcast %cst_8 : f32 to vector<2x1xf32>
    %20 = arith.divf %18, %19 : vector<2x1xf32>
    %21 = vector.broadcast %13 : vector<2x1xf32> to vector<2x256xf32>
    %22 = arith.subf %7, %21 : vector<2x256xf32>
    %cst_9 = arith.constant 9.99999974E-6 : f32
    %23 = vector.broadcast %cst_9 : f32 to vector<2x1xf32>
    %24 = arith.addf %20, %23 : vector<2x1xf32>
    %25 = math.rsqrt %24 : vector<2x1xf32>
    %26 = vector.broadcast %25 : vector<2x1xf32> to vector<2x256xf32>
    %27 = arith.mulf %22, %26 : vector<2x256xf32>
    %28 = vector.broadcast %8 : vector<1x256xf32> to vector<2x256xf32>
    %29 = arith.mulf %27, %28 : vector<2x256xf32>
    %30 = vector.broadcast %9 : vector<1x256xf32> to vector<2x256xf32>
    %31 = arith.addf %29, %30 : vector<2x256xf32>
    %cst_10 = arith.constant 0.000000e+00 : f32
    %32 = vector.broadcast %cst_10 : f32 to vector<2x256xf32>
    %33 = arith.maximumf %31, %32 : vector<2x256xf32>
    %c0_11 = arith.constant 0 : index
    %c0_12 = arith.constant 0 : index
    %34 = vector.load %arg4[%c0_11, %c0_12] : memref<256x32xbf16, #tpu.memory_space<vmem>>, vector<256x32xbf16>
    %35 = arith.extf %34 : vector<256x32xbf16> to vector<256x32xf32>
    %cst_13 = arith.constant dense<0.000000e+00> : vector<2x32xf32>
    %36 = tpu.matmul %33, %35, %cst_13 {dimension_numbers = #tpu.dot_dimension_numbers<[1], [0], [0], [1], [0, 0, 1, 1], [], []>} : vector<2x256xf32>, vector<256x32xf32>, vector<2x32xf32> -> vector<2x32xf32>
    %c0_14 = arith.constant 0 : index
    %c0_15 = arith.constant 0 : index
    %37 = vector.load %arg5[%c0_14, %c0_15] : memref<1x32xf32, #tpu.memory_space<vmem>>, vector<1x32xf32>
    %38 = vector.broadcast %37 : vector<1x32xf32> to vector<2x32xf32>
    %39 = arith.addf %36, %38 : vector<2x32xf32>
    %cst_16 = arith.constant 0.000000e+00 : f32
    %40 = vector.broadcast %cst_16 : f32 to vector<2x32xf32>
    %41 = arith.maximumf %39, %40 : vector<2x32xf32>
    %42 = vector.broadcast %cst_16 : f32 to vector<2x32xf32>
    %43 = arith.subf %39, %42 : vector<2x32xf32>
    %44 = arith.cmpf one, %43, %43 : vector<2x32xf32>
    %45 = vector.broadcast %cst_16 : f32 to vector<2x32xf32>
    %46 = arith.addf %39, %45 : vector<2x32xf32>
    %47 = math.absf %43 : vector<2x32xf32>
    %cst_17 = arith.constant 0.000000e+00 : f32
    %48 = vector.broadcast %cst_17 : f32 to vector<2x32xf32>
    %49 = arith.subf %48, %47 : vector<2x32xf32>
    %50 = math.exp %49 : vector<2x32xf32>
    %51 = math.log1p %50 : vector<2x32xf32>
    %52 = arith.addf %41, %51 : vector<2x32xf32>
    %53 = arith.select %44, %46, %52 : vector<2x32xi1>, vector<2x32xf32>
    %c0_18 = arith.constant 0 : index
    %c0_19 = arith.constant 0 : index
    %54 = vector.load %arg6[%c0_18, %c0_19] : memref<2x32xf32, #tpu.memory_space<vmem>>, vector<2x32xf32>
    tpu.vector_store %arg6[%c0_18, %c0_19], %53 {strides = array<i32>} : memref<2x32xf32, #tpu.memory_space<vmem>>, vector<2x32xf32>,
    return
  }
  func.func @transform_0(%arg0: i32) -> (i32, i32) {
    %c0_i32 = arith.constant 0 : i32
    %c0_i32_0 = arith.constant 0 : i32
    %c0_i32_1 = arith.constant 0 : i32
    return %c0_i32, %c0_i32_0 : i32, i32
  }
  func.func @transform_1(%arg0: i32) -> (i32, i32) {
    %c0_i32 = arith.constant 0 : i32
    %c0_i32_0 = arith.constant 0 : i32
    %c0_i32_1 = arith.constant 0 : i32
    return %c0_i32, %c0_i32_0 : i32, i32
  }
  func.func @transform_2(%arg0: i32) -> (i32, i32) {
    %c0_i32 = arith.constant 0 : i32
    %c0_i32_0 = arith.constant 0 : i32
    %c0_i32_1 = arith.constant 0 : i32
    return %c0_i32, %c0_i32_0 : i32, i32
  }
  func.func @transform_3(%arg0: i32) -> (i32, i32) {
    %c0_i32 = arith.constant 0 : i32
    %c0_i32_0 = arith.constant 0 : i32
    return %c0_i32, %arg0 : i32, i32
  }
  func.func @transform_4(%arg0: i32) -> (i32, i32) {
    %c0_i32 = arith.constant 0 : i32
    %c0_i32_0 = arith.constant 0 : i32
    return %c0_i32, %arg0 : i32, i32
  }
  func.func @transform_5(%arg0: i32) -> (i32, i32) {
    %c0_i32 = arith.constant 0 : i32
    %c0_i32_0 = arith.constant 0 : i32
    return %c0_i32, %arg0 : i32, i32
  }
}

</mosaic_0001>

<bundles_post_ra>
// kernel: transformer_forward.5
= control target key start
LH: loop header
LB: loop body
LE: loop exit
PB: predicated region body
PF: predicated region fallthrough
CT: control target
= control target key end

     0   :  { %10 = vsyncpa [#allocation3], 0  ;;  %s549_s18 = smov [#allocation2]   ;;  %s639_s0 = inlined_call_operand.vmem [shape: f32[2,32], index: 0, kind: input, shape index: {}]   ;;  %s640_s1 = inlined_call_operand.vmem [shape: bf16[32,256], index: 1, kind: input, shape index: {}]   ;;  %s641_s2 = inlined_call_operand.vmem [shape: f32[3,256], index: 2, kind: input, shape index: {}]   ;;  %s642_s3 = inlined_call_operand.hbm [shape: bf16[256,128], index: 3, kind: input, shape index: {}]   ;;  %s643_s4 = inlined_call_operand.vmem [shape: f32[1,128], index: 4, kind: input, shape index: {}]   ;;  %s644_s5 = inlined_call_operand.vmem [shape: f32[2,128], index: 5, kind: output, shape index: {}]  }
   0x1   :  { %s22_s19 = sshll.u32 %s549_s18, 4  ;;  %s525_s22 = scalar_lea.hbm %s642_s3, 2048  ;;  %s23_s19 = int_to_ptr.vmem [resolvable:$true] %s22_s19 }
   0x2   :  { %p526_p0 = scmp.ne.s32.totalorder %s642_s3, %s525_s22  ;;  %p529_p1 = scmp.lt.u32.totalorder %s525_s22, %s642_s3 }
   0x4   :  { %p531_p2 = pnand %p529_p1, %p526_p0 }
   0x6   :  { %534 = shalt.err (!%p531_p2)
}
   0x7   :  { %s535_s27 = scalar_lea.vmem %s23_s19, 2048  ;;  %p540_p4 = scmp.lt.s32.totalorder %s23_s19, %s23_s19 }
   0x8   :  { %p536_p3 = scmp.ne.s32.totalorder %s23_s19, %s535_s27  ;;  %p541_p5 = scmp.lt.s32.totalorder %s535_s27, %s535_s27 }
   0xa   :  { %p542_p6 = por %p541_p5, %p540_p4 }
   0xc   :  { %p543_p7 = pnand %p542_p6, %p536_p3 }
   0xe   :  { %546 = shalt.err (!%p543_p7)
}
   0xf   :  { %s550_s28 = smov 64   ;;  %s551_s29 = smov 4  }
  0x10   :  { %28 = dma.hbm_to_vmem [thread:$0]  %s642_s3, 2048, %s23_s19, [#allocation3], %s550_s28, %s550_s28, %s551_s29  }
  0x11   :  { %547 = dma.done.wait [#allocation3], 2048  }
  0x12   :  { %548 = vsyncadd [#allocation3], 4294965248  ;;  %v552_v0 = vmov 0.0   ;;  %v517_v1 = vld [vmem:[%s640_s1 + $0x4] ss:$8 sps:$4 sm:$0xff]   ;;  %vm67_vm0 = vcmask 261120   ;;  %v49_v6 = vlaneseq }
  0x13   :  { %135 = vmatprep.mubr.f32.mxu0 %v552_v0  ;;  %v519_v2 = vld [vmem:[%s640_s1] ss:$8 sps:$4 sm:$0xff]   ;;  %470 = vmatprep.subr.bf16.mxu0 %v517_v1  ;;  %v520_v3 = vld [vmem:[%s640_s1 + $0x14] ss:$8 sps:$4 sm:$0xff]   ;;  %v522_v4 = vld [vmem:[%s640_s1 + $0x10] ss:$8 sps:$4 sm:$0xff]  }
  0x14   :  { %472 = vmatpush1.bf16.msra.mxu0 %v519_v2  ;;  %v35_v5 = vld [vmem:[%s639_s0] sm:$0x3]  ;;  %v610_v7 = vshrl.u32 %v49_v6, 7  ;;  %vm142_vm1 = vcmask 1041408   ;;  %v427_v24 = vld [vmem:[#allocation2 + $0x48] sm:$0xff]   ;;  %v428_v35 = vld [vmem:[#allocation2 + $0x50] sm:$0xff]  }
  0x15   :  { %474 = vmatprep.subr.bf16.mxu0 %v520_v3  ;;  %v616_v9 = vld [vmem:[%s641_s2] sm:$0x77]  ;;  %v419_v25 = vld [vmem:[#allocation2 + $0x8] sm:$0xff]   ;;  %v420_v36 = vld [vmem:[#allocation2 + $0x10] sm:$0xff]  }
  0x16   :  { %v51_v8 = vsub.s32 0, %v610_v7  ;;  %v55_v10 = vsub.s32 4, %v610_v7  ;;  %v426_v22 = vld [vmem:[#allocation2 + $0x40] sm:$0xff]   ;;  %v429_v37 = vld [vmem:[#allocation2 + $0x58] sm:$0xff]   ;;  %v431_v41 = vld [vmem:[#allocation2 + $0x68] sm:$0xff]   ;;  %v166_v50 = vsub.s32 1, %v610_v7 }
  0x17   :  { %v356_v23 = vld [vmem:[#allocation2] sm:$0xff]   ;;  %478 = vmatprep.subr.bf16.mxu1 %v426_v22  ;;  %v421_v38 = vld [vmem:[#allocation2 + $0x18] sm:$0xff]   ;;  %v423_v42 = vld [vmem:[#allocation2 + $0x28] sm:$0xff]   ;;  %v170_v51 = vsub.s32 5, %v610_v7  ;;  %v186_v52 = vsub.s32 2, %v610_v7  ;;  %v190_v53 = vsub.s32 6, %v610_v7 }
  0x18   :  { %476 = vmatpush1.bf16.msra.mxu0 %v522_v4  ;;  %v52_v11 = vrot.slane %v616_v9, %v51_v8  ;;  %v56_v12 = vrot.slane %v616_v9, %v55_v10  ;;  %480 = vmatpush3.bf16.msra.mxu1 %v356_v23  ;;  %v430_v39 = vld [vmem:[#allocation2 + $0x60] sm:$0xff]   ;;  %v432_v43 = vld [vmem:[#allocation2 + $0x70] sm:$0xff]   ;;  %v433_v45 = vld [vmem:[#allocation2 + $0x78] sm:$0xff]   ;;  %v167_v55 = vrot.slane %v616_v9, %v166_v50 }
  0x19   :  { %482 = vmatprep.subr.bf16.mxu1 %v427_v24  ;;  %v422_v40 = vld [vmem:[#allocation2 + $0x20] sm:$0xff]   ;;  %v424_v44 = vld [vmem:[#allocation2 + $0x30] sm:$0xff]   ;;  %v425_v46 = vld [vmem:[#allocation2 + $0x38] sm:$0xff]   ;;  %v171_v54 = vrot.slane %v616_v9, %v170_v51  ;;  %v191_v56 = vrot.slane %v616_v9, %v190_v53  ;;  %v187_v57 = vrot.slane %v616_v9, %v186_v52 }
  0x1a   :  { %v62_v13 = vrot.slane %v52_v11, %v51_v8  ;;  %v66_v14 = vrot.slane %v56_v12, %v51_v8  ;;  %v177_v59 = vrot.slane %v167_v55, %v166_v50  ;;  %v354_v8 = vld [vmem:[%s643_s4] ss:$0 sm:$0xff] }
  0x1b   :  { %353 = vmatmul.mubr.msk.f32.vlgmr.msra.gmra.mrb[0].mxu0 %vm67_vm0, %v35_v5  ;;  %v181_v58 = vrot.slane %v171_v54, %v166_v50  ;;  %v201_v62 = vrot.slane %v191_v56, %v186_v52  ;;  %v197_v0 = vrot.slane %v187_v57, %v186_v52 }
  0x1c   :  { %484 = vmatpush3.bf16.msra.mxu1 %v419_v25 }
  0x1d   :  { %486 = vmatprep.subr.bf16.mxu1 %v428_v35 }
  0x20   :  { %488 = vmatpush3.bf16.msra.mxu1 %v420_v36 }
  0x21   :  { %490 = vmatprep.subr.bf16.mxu1 %v429_v37 }
  0x24   :  { %492 = vmatpush3.bf16.msra.mxu1 %v421_v38 }
  0x25   :  { %494 = vmatprep.subr.bf16.mxu1 %v430_v39 }
  0x28   :  { %496 = vmatpush3.bf16.msra.mxu1 %v422_v40 }
  0x29   :  { %498 = vmatprep.subr.bf16.mxu1 %v431_v41 }
  0x2c   :  { %500 = vmatpush3.bf16.msra.mxu1 %v423_v42 }
  0x2d   :  { %502 = vmatprep.subr.bf16.mxu1 %v432_v43 }
  0x30   :  { %504 = vmatpush3.bf16.msra.mxu1 %v424_v44 }
  0x31   :  { %506 = vmatprep.subr.bf16.mxu1 %v433_v45 }
  0x34   :  { %508 = vmatpush3.bf16.msra.mxu1 %v425_v46 }
  0xee   :  { %v137_v15 = vpop.f32.mrb[0].mxu0 }
  0xef   :  { %v138_v16 = vadd.f32 %v137_v15, %v62_v13  ;;  %v139_v17 = vpop.f32.mrb[1].mxu0 }
  0xf0   :  { %v140_v18 = vadd.f32 %v139_v17, %v66_v14 }
  0xf1   :  { %v143_v19 = vsel %vm142_vm1, %v138_v16, 0.0 }
  0xf2   :  { %v144_v20 = vsel %vm142_vm1, %v140_v18, 0.0 }
  0xf3   :  { %v145_v21 = vadd.f32 %v144_v20, %v143_v19 }
  0xf5   :  { %146 = vadd.xlane.f32.xlu0 %v145_v21 }
 0x182   :  { %v147_v26 = vpop.xlane.xlu0 %146 }
 0x183   :  { %v149_v27 = vmul.f32 0.00390625, %v147_v26 }
 0x185   :  { %v150_v28 = vsub.f32 %v138_v16, %v149_v27  ;;  %v151_v29 = vsub.f32 %v140_v18, %v149_v27 }
 0x187   :  { %v152_v30 = vmul.f32 %v150_v28, %v150_v28  ;;  %v153_v31 = vmul.f32 %v151_v29, %v151_v29 }
 0x189   :  { %v154_v32 = vsel %vm142_vm1, %v152_v30, 0.0  ;;  %v155_v33 = vsel %vm142_vm1, %v153_v31, 0.0 }
 0x18a   :  { %v156_v34 = vadd.f32 %v155_v33, %v154_v32 }
 0x18c   :  { %157 = vadd.xlane.f32.xlu0 %v156_v34 }
 0x219   :  { %v158_v47 = vpop.xlane.xlu0 %157 }
 0x21a   :  { %v159_v48 = vmul.f32 0.00390625, %v158_v47 }
 0x21c   :  { %v160_v49 = vadd.f32 1e-05, %v159_v48 }
 0x21e   :  { %523 = vrsqrt.f32 %v160_v49 }
 0x228   :  { %v524_v60 = vpop.eup %523 }
 0x229   :  { %v163_v61 = vmul.f32 %v524_v60, %v151_v29  ;;  %v162_v63 = vmul.f32 %v524_v60, %v150_v28 }
 0x22b   :  { %v183_v1 = vmul.f32 %v181_v58, %v163_v61  ;;  %v182_v2 = vmul.f32 %v177_v59, %v162_v63 }
 0x22d   :  { %v203_v3 = vadd.f32 %v201_v62, %v183_v1  ;;  %v202_v4 = vadd.f32 %v197_v0, %v182_v2 }
 0x22f   :  { %v205_v5 = vmax.f32 %v203_v3, 0.0  ;;  %v204_v6 = vmax.f32 %v202_v4, 0.0 }
 0x231   :  { %341 = vmatprep.mubr.f32.mxu1 %v205_v5 }
 0x232   :  { %342 = vmatmul.mubr.f32.vlgmr.msra.gmra.mrb[0].mxu1 %v204_v6 }
 0x305   :  { %v466_v7 = vpop.f32.mrb[0].mxu1 }
 0x306   :  { %v467_v9 = vpop.f32.mrb[1].mxu1 }
 0x307   :  { %v468_v10 = vadd.f32 %v467_v9, %v466_v7 }
 0x309   :  { %v344_v11 = vadd.f32 %v468_v10, %v354_v8 }
 0x30b   :  { %347 = vst [vmem:[%s644_s5] sm:$0x3] %v344_v11 }
 0x30c   :  { %352 = vsyncpa [#allocation3], 1 }

// kernel: transformer_forward.6
= control target key start
LH: loop header
LB: loop body
LE: loop exit
PB: predicated region body
PF: predicated region fallthrough
CT: control target
= control target key end

     0   :  { %v507_v1 = vmov 0.0   ;;  %vm53_vm0 = vcmask 261120   ;;  %v35_v6 = vlaneseq  ;;  %vm128_vm1 = vcmask 1041408   ;;  %s630_s1 = inlined_call_operand.vmem [shape: bf16[32,256], index: 1, kind: input, shape index: {}]   ;;  %s631_s0 = inlined_call_operand.vmem [shape: f32[2,32], index: 0, kind: input, shape index: {}]   ;;  %s632_s2 = inlined_call_operand.vmem [shape: f32[3,256], index: 2, kind: input, shape index: {}]   ;;  %s633_s3 = inlined_call_operand.vmem [shape: bf16[256,128], index: 3, kind: input, shape index: {}]   ;;  %s634_s4 = inlined_call_operand.vmem [shape: f32[1,128], index: 4, kind: input, shape index: {}]   ;;  %s635_s5 = inlined_call_operand.vmem [shape: f32[2,128], index: 5, kind: output, shape index: {}]  }
   0x1   :  { %v499_v0 = vld [vmem:[%s630_s1 + $0x4] ss:$8 sps:$4 sm:$0xff]   ;;  %121 = vmatprep.mubr.f32.mxu0 %v507_v1  ;;  %v501_v2 = vld [vmem:[%s630_s1] ss:$8 sps:$4 sm:$0xff]   ;;  %v502_v3 = vld [vmem:[%s630_s1 + $0x14] ss:$8 sps:$4 sm:$0xff]  }
   0x2   :  { %455 = vmatprep.subr.bf16.mxu0 %v499_v0  ;;  %v504_v4 = vld [vmem:[%s630_s1 + $0x10] ss:$8 sps:$4 sm:$0xff]   ;;  %v21_v5 = vld [vmem:[%s631_s0] sm:$0x3]  ;;  %v553_v7 = vshrl.u32 %v35_v6, 7  ;;  %v412_v24 = vld [vmem:[%s633_s3 + $0x48] sm:$0xff]  }
   0x3   :  { %457 = vmatpush1.bf16.msra.mxu0 %v501_v2  ;;  %v559_v9 = vld [vmem:[%s632_s2] sm:$0x77]  ;;  %v404_v25 = vld [vmem:[%s633_s3 + $0x8] sm:$0xff]   ;;  %v413_v35 = vld [vmem:[%s633_s3 + $0x50] sm:$0xff]  }
   0x4   :  { %459 = vmatprep.subr.bf16.mxu0 %v502_v3  ;;  %v37_v8 = vsub.s32 0, %v553_v7  ;;  %v41_v10 = vsub.s32 4, %v553_v7  ;;  %v411_v22 = vld [vmem:[%s633_s3 + $0x40] sm:$0xff]   ;;  %v405_v36 = vld [vmem:[%s633_s3 + $0x10] sm:$0xff]   ;;  %v414_v37 = vld [vmem:[%s633_s3 + $0x58] sm:$0xff]   ;;  %v152_v50 = vsub.s32 1, %v553_v7 }
   0x5   :  { %v341_v23 = vld [vmem:[%s633_s3] sm:$0xff]   ;;  %463 = vmatprep.subr.bf16.mxu1 %v411_v22  ;;  %v406_v38 = vld [vmem:[%s633_s3 + $0x18] sm:$0xff]   ;;  %v416_v41 = vld [vmem:[%s633_s3 + $0x68] sm:$0xff]   ;;  %v156_v51 = vsub.s32 5, %v553_v7  ;;  %v172_v52 = vsub.s32 2, %v553_v7  ;;  %v176_v53 = vsub.s32 6, %v553_v7 }
   0x6   :  { %v38_v11 = vrot.slane %v559_v9, %v37_v8  ;;  %v42_v12 = vrot.slane %v559_v9, %v41_v10  ;;  %465 = vmatpush3.bf16.msra.mxu1 %v341_v23  ;;  %v415_v39 = vld [vmem:[%s633_s3 + $0x60] sm:$0xff]   ;;  %v408_v42 = vld [vmem:[%s633_s3 + $0x28] sm:$0xff]   ;;  %v417_v43 = vld [vmem:[%s633_s3 + $0x70] sm:$0xff]   ;;  %v153_v55 = vrot.slane %v559_v9, %v152_v50 }
   0x7   :  { %461 = vmatpush1.bf16.msra.mxu0 %v504_v4  ;;  %467 = vmatprep.subr.bf16.mxu1 %v412_v24  ;;  %v407_v40 = vld [vmem:[%s633_s3 + $0x20] sm:$0xff]   ;;  %v409_v44 = vld [vmem:[%s633_s3 + $0x30] sm:$0xff]   ;;  %v418_v45 = vld [vmem:[%s633_s3 + $0x78] sm:$0xff]   ;;  %v157_v54 = vrot.slane %v559_v9, %v156_v51  ;;  %v177_v56 = vrot.slane %v559_v9, %v176_v53  ;;  %v173_v57 = vrot.slane %v559_v9, %v172_v52 }
   0x8   :  { %v48_v13 = vrot.slane %v38_v11, %v37_v8  ;;  %v52_v14 = vrot.slane %v42_v12, %v37_v8  ;;  %v410_v46 = vld [vmem:[%s633_s3 + $0x38] sm:$0xff]   ;;  %v163_v59 = vrot.slane %v153_v55, %v152_v50  ;;  %v339_v8 = vld [vmem:[%s634_s4] ss:$0 sm:$0xff] }
   0x9   :  { %v167_v58 = vrot.slane %v157_v54, %v152_v50  ;;  %v187_v62 = vrot.slane %v177_v56, %v172_v52  ;;  %v183_v0 = vrot.slane %v173_v57, %v172_v52 }
   0xa   :  { %338 = vmatmul.mubr.msk.f32.vlgmr.msra.gmra.mrb[0].mxu0 %vm53_vm0, %v21_v5  ;;  %469 = vmatpush3.bf16.msra.mxu1 %v404_v25 }
   0xb   :  { %471 = vmatprep.subr.bf16.mxu1 %v413_v35 }
   0xe   :  { %473 = vmatpush3.bf16.msra.mxu1 %v405_v36 }
   0xf   :  { %475 = vmatprep.subr.bf16.mxu1 %v414_v37 }
  0x12   :  { %477 = vmatpush3.bf16.msra.mxu1 %v406_v38 }
  0x13   :  { %479 = vmatprep.subr.bf16.mxu1 %v415_v39 }
  0x16   :  { %481 = vmatpush3.bf16.msra.mxu1 %v407_v40 }
  0x17   :  { %483 = vmatprep.subr.bf16.mxu1 %v416_v41 }
  0x1a   :  { %485 = vmatpush3.bf16.msra.mxu1 %v408_v42 }
  0x1b   :  { %487 = vmatprep.subr.bf16.mxu1 %v417_v43 }
  0x1e   :  { %489 = vmatpush3.bf16.msra.mxu1 %v409_v44 }
  0x1f   :  { %491 = vmatprep.subr.bf16.mxu1 %v418_v45 }
  0x22   :  { %493 = vmatpush3.bf16.msra.mxu1 %v410_v46 }
  0xdd   :  { %v123_v15 = vpop.f32.mrb[0].mxu0 }
  0xde   :  { %v124_v16 = vadd.f32 %v123_v15, %v48_v13  ;;  %v125_v17 = vpop.f32.mrb[1].mxu0 }
  0xdf   :  { %v126_v18 = vadd.f32 %v125_v17, %v52_v14 }
  0xe0   :  { %v129_v19 = vsel %vm128_vm1, %v124_v16, 0.0 }
  0xe1   :  { %v130_v20 = vsel %vm128_vm1, %v126_v18, 0.0 }
  0xe2   :  { %v131_v21 = vadd.f32 %v130_v20, %v129_v19 }
  0xe4   :  { %132 = vadd.xlane.f32.xlu0 %v131_v21 }
 0x171   :  { %v133_v26 = vpop.xlane.xlu0 %132 }
 0x172   :  { %v135_v27 = vmul.f32 0.00390625, %v133_v26 }
 0x174   :  { %v136_v28 = vsub.f32 %v124_v16, %v135_v27  ;;  %v137_v29 = vsub.f32 %v126_v18, %v135_v27 }
 0x176   :  { %v138_v30 = vmul.f32 %v136_v28, %v136_v28  ;;  %v139_v31 = vmul.f32 %v137_v29, %v137_v29 }
 0x178   :  { %v140_v32 = vsel %vm128_vm1, %v138_v30, 0.0  ;;  %v141_v33 = vsel %vm128_vm1, %v139_v31, 0.0 }
 0x179   :  { %v142_v34 = vadd.f32 %v141_v33, %v140_v32 }
 0x17b   :  { %143 = vadd.xlane.f32.xlu0 %v142_v34 }
 0x208   :  { %v144_v47 = vpop.xlane.xlu0 %143 }
 0x209   :  { %v145_v48 = vmul.f32 0.00390625, %v144_v47 }
 0x20b   :  { %v146_v49 = vadd.f32 1e-05, %v145_v48 }
 0x20d   :  { %505 = vrsqrt.f32 %v146_v49 }
 0x217   :  { %v506_v60 = vpop.eup %505 }
 0x218   :  { %v149_v61 = vmul.f32 %v506_v60, %v137_v29  ;;  %v148_v63 = vmul.f32 %v506_v60, %v136_v28 }
 0x21a   :  { %v169_v1 = vmul.f32 %v167_v58, %v149_v61  ;;  %v168_v2 = vmul.f32 %v163_v59, %v148_v63 }
 0x21c   :  { %v189_v3 = vadd.f32 %v187_v62, %v169_v1  ;;  %v188_v4 = vadd.f32 %v183_v0, %v168_v2 }
 0x21e   :  { %v191_v5 = vmax.f32 %v189_v3, 0.0  ;;  %v190_v6 = vmax.f32 %v188_v4, 0.0 }
 0x220   :  { %327 = vmatprep.mubr.f32.mxu1 %v191_v5 }
 0x221   :  { %328 = vmatmul.mubr.f32.vlgmr.msra.gmra.mrb[0].mxu1 %v190_v6 }
 0x2f4   :  { %v451_v7 = vpop.f32.mrb[0].mxu1 }
 0x2f5   :  { %v452_v9 = vpop.f32.mrb[1].mxu1 }
 0x2f6   :  { %v453_v10 = vadd.f32 %v452_v9, %v451_v7 }
 0x2f8   :  { %v330_v11 = vadd.f32 %v453_v10, %v339_v8 }
 0x2fa   :  { %333 = vst [vmem:[%s635_s5] sm:$0x3] %v330_v11 }

// kernel: transformer_forward.7
= control target key start
LH: loop header
LB: loop body
LE: loop exit
PB: predicated region body
PF: predicated region fallthrough
CT: control target
= control target key end

     0   :  { %vm118_vm0 = vcmask 1041408   ;;  %v2719_v1 = vmov 0   ;;  %v2720_v3 = vmov 1   ;;  %vm143_vm1 = vcmask 15360   ;;  %s3877_s0 = inlined_call_operand.vmem [shape: f32[2,128], index: 0, kind: input, shape index: {}]   ;;  %s3878_s3 = inlined_call_operand.vmem [shape: f32[128,3], index: 3, kind: input, shape index: {}]   ;;  %s3879_s1 = inlined_call_operand.vmem [shape: f32[128,2], index: 1, kind: input, shape index: {}]   ;;  %s3880_s4 = inlined_call_operand.vmem [shape: bf16[128,128], index: 4, kind: input, shape index: {}]   ;;  %s3881_s6 = inlined_call_operand.vmem [shape: bf16[128,128], index: 6, kind: input, shape index: {}]   ;;  %s3882_s2 = inlined_call_operand.vmem [shape: f32[9,128], index: 2, kind: input, shape index: {}]   ;;  %s3883_s5 = inlined_call_operand.vmem [shape: bf16[128,128], index: 5, kind: input, shape index: {}]   ;;  %s3884_s7 = inlined_call_operand.vmem [shape: bf16[128,256], index: 7, kind: input, shape index: {}]   ;;  %s3885_s9 = inlined_call_operand.vmem [shape: bf16[256,128], index: 9, kind: input, shape index: {}]   ;;  %s3886_s8 = inlined_call_operand.vmem [shape: f32[1,256], index: 8, kind: input, shape index: {}]   ;;  %s3887_s10 = inlined_call_operand.vmem [shape: f32[2,128], index: 10, kind: output, shape index: {}]  }
   0x1   :  { %v2783_v0 = vld [vmem:[%s3877_s0] sm:$0x3]  ;;  %2575 = vset.pattern.permute.xlu1 %v2719_v1  ;;  %2576 = vset.pattern.permute.xlu0 %v2720_v3  ;;  %v2798_v5 = vld [vmem:[%s3878_s3 + $0x8] sm:$0xff]  ;;  %v2813_v8 = vld [vmem:[%s3879_s1 + $0x10] sm:$0xff]  ;;  %vm2722_vm2 = vmmov 0   ;;  %vm852_vm3 = vcmask 7168  }
   0x2   :  { %v2789_v2 = vld [vmem:[%s3878_s3] sm:$0xff]  ;;  %v119_v4 = vsel %vm118_vm0, %v2783_v0, 0.0  ;;  %v2808_v7 = vld [vmem:[%s3879_s1 + $0x8] sm:$0xff]  ;;  %v2818_v9 = vld [vmem:[%s3879_s1 + $0x18] sm:$0xff]  ;;  %v147_v12 = vsel %vm143_vm1, %v2813_v8, 0.0  ;;  %vm1187_vm4 = vcmask 15368  }
   0x3   :  { %272 = vperm.xlu1 %2575, %v2789_v2   ;;  %120 = vadd.xlane.f32.xlu0 %v119_v4  ;;  %v2803_v6 = vld [vmem:[%s3879_s1] sm:$0xff]  ;;  %v145_v11 = vsel %vm143_vm1, %v2808_v7, 0.0  ;;  %v149_v15 = vsel %vm143_vm1, %v2818_v9, 0.0  ;;  %v2837_v16 = vld [vmem:[%s3879_s1 + $0x28] sm:$0xff]  ;;  %v2846_v19 = vld [vmem:[%s3879_s1 + $0x30] sm:$0xff] }
   0x4   :  { %v144_v10 = vsel %vm143_vm1, %v2803_v6, 0.0  ;;  %v2830_v13 = vld [vmem:[%s3879_s1 + $0x20] sm:$0xff]  ;;  %v153_v21 = vsel %vm143_vm1, %v2837_v16, 0.0  ;;  %v2853_v22 = vld [vmem:[%s3878_s3 + $0x10] sm:$0xff]  ;;  %v2858_v23 = vld [vmem:[%s3879_s1 + $0x38] sm:$0xff]  ;;  %v155_v25 = vsel %vm143_vm1, %v2846_v19, 0.0 }
   0x5   :  { %v146_v14 = vadd.f32 %v145_v11, %v144_v10  ;;  %v151_v18 = vsel %vm143_vm1, %v2830_v13, 0.0  ;;  %v2866_v26 = vld [vmem:[%s3879_s1 + $0x40] sm:$0xff]  ;;  %v157_v28 = vsel %vm143_vm1, %v2858_v23, 0.0  ;;  %v2874_v29 = vld [vmem:[%s3878_s3 + $0x18] sm:$0xff]  ;;  %v2879_v30 = vld [vmem:[%s3879_s1 + $0x48] sm:$0xff] }
   0x6   :  { %v159_v32 = vsel %vm143_vm1, %v2866_v26, 0.0  ;;  %v2886_v33 = vld [vmem:[%s3879_s1 + $0x50] sm:$0xff]  ;;  %v161_v35 = vsel %vm143_vm1, %v2879_v30, 0.0  ;;  %v2894_v36 = vld [vmem:[%s3879_s1 + $0x58] sm:$0xff]  ;;  %v2901_v39 = vld [vmem:[%s3879_s1 + $0x60] sm:$0xff] }
   0x7   :  { %277 = vperm.xlu1 %2575, %v2798_v5   ;;  %v148_v17 = vadd.f32 %v147_v12, %v146_v14  ;;  %v163_v38 = vsel %vm143_vm1, %v2886_v33, 0.0  ;;  %v165_v41 = vsel %vm143_vm1, %v2894_v36, 0.0  ;;  %v2911_v42 = vld [vmem:[%s3879_s1 + $0x68] sm:$0xff]  ;;  %v167_v44 = vsel %vm143_vm1, %v2901_v39, 0.0  ;;  %v2918_v45 = vld [vmem:[%s3878_s3 + $0x40] sm:$0xff]  ;;  %v2923_v46 = vld [vmem:[%s3879_s1 + $0x70] sm:$0xff] }
   0x8   :  { %v169_v48 = vsel %vm143_vm1, %v2911_v42, 0.0  ;;  %v2932_v49 = vld [vmem:[%s3879_s1 + $0x78] sm:$0xff]  ;;  %v171_v51 = vsel %vm143_vm1, %v2923_v46, 0.0  ;;  %v2940_v52 = vld [vmem:[%s3878_s3 + $0x20] sm:$0xff]  ;;  %v2949_v56 = vld [vmem:[%s3878_s3 + $0x28] sm:$0xff] }
   0x9   :  { %v150_v20 = vadd.f32 %v149_v15, %v148_v17  ;;  %v173_v54 = vsel %vm143_vm1, %v2932_v49, 0.0  ;;  %v2958_v4 = vld [vmem:[%s3878_s3 + $0x30] sm:$0xff]  ;;  %v2983_v17 = vld [vmem:[%s3878_s3 + $0x38] sm:$0xff] }
   0xb   :  { %2577 = vset.pattern.permute.xlu1 %v2720_v3  ;;  %v152_v24 = vadd.f32 %v151_v18, %v150_v20 }
   0xc   :  { %371 = vperm.xlu1 %2577, %v2798_v5  }
   0xd   :  { %v154_v27 = vadd.f32 %v153_v21, %v152_v24 }
   0xf   :  { %v156_v31 = vadd.f32 %v155_v25, %v154_v27 }
  0x10   :  { %2578 = vset.pattern.permute.xlu1 %v2719_v1 }
  0x11   :  { %282 = vperm.xlu1 %2578, %v2853_v22   ;;  %v158_v34 = vadd.f32 %v157_v28, %v156_v31 }
  0x13   :  { %v160_v37 = vadd.f32 %v159_v32, %v158_v34 }
  0x15   :  { %287 = vperm.xlu1 %2578, %v2874_v29   ;;  %v162_v40 = vadd.f32 %v161_v35, %v160_v37 }
  0x17   :  { %v164_v43 = vadd.f32 %v163_v38, %v162_v40  ;;  %v3030_v38 = vld [vmem:[%s3878_s3 + $0x48] sm:$0xff] }
  0x19   :  { %2579 = vset.pattern.permute.xlu1 %v2720_v3  ;;  %367 = vperm.xlu0 %2576, %v2789_v2   ;;  %v166_v47 = vadd.f32 %v165_v41, %v164_v43 }
  0x1a   :  { %375 = vperm.xlu1 %2579, %v2853_v22  }
  0x1b   :  { %v168_v50 = vadd.f32 %v167_v44, %v166_v47 }
  0x1d   :  { %2584 = vset.pattern.permute.xlu0 %v2719_v1  ;;  %v170_v53 = vadd.f32 %v169_v48, %v168_v50 }
  0x1e   :  { %379 = vperm.xlu1 %2579, %v2874_v29   ;;  %312 = vperm.xlu0 %2584, %v2918_v45  }
  0x1f   :  { %v172_v55 = vadd.f32 %v171_v51, %v170_v53 }
  0x21   :  { %v174_v57 = vadd.f32 %v173_v54, %v172_v55  ;;  %v1835_v55 = vld [vmem:[%s3880_s4] sm:$0xff]  }
  0x22   :  { %2580 = vset.pattern.permute.xlu1 %v2719_v1 }
  0x23   :  { %292 = vperm.xlu1 %2580, %v2940_v52   ;;  %v175_v58 = vrot.slane %v174_v57, 4 }
  0x25   :  { %v176_v59 = vadd.f32 %v175_v58, %v174_v57 }
  0x27   :  { %297 = vperm.xlu1 %2580, %v2949_v56   ;;  %v177_v60 = vrot.slane %v176_v59, 2 }
  0x29   :  { %v178_v61 = vadd.f32 %v177_v60, %v176_v59  ;;  %v1994_v59 = vld [vmem:[%s3880_s4 + $0x8] sm:$0xff]  }
  0x2b   :  { %2581 = vset.pattern.permute.xlu1 %v2720_v3  ;;  %v179_v62 = vrot.slane %v178_v61, 1 }
  0x2c   :  { %383 = vperm.xlu1 %2581, %v2940_v52  }
  0x2d   :  { %v180_v63 = vadd.f32 %v179_v62, %v178_v61 }
  0x2f   :  { %v2960_v10 = vmul.f32 0.0078125, %v180_v63 }
  0x30   :  { %387 = vperm.xlu1 %2581, %v2949_v56  }
  0x31   :  { %v2965_v11 = vsub.f32 %v2803_v6, %v2960_v10  ;;  %v2969_v12 = vsub.f32 %v2808_v7, %v2960_v10  ;;  %v2973_v14 = vsub.f32 %v2813_v8, %v2960_v10  ;;  %v2977_v15 = vsub.f32 %v2818_v9, %v2960_v10 }
  0x32   :  { %v2987_v6 = vsub.f32 %v2830_v13, %v2960_v10  ;;  %v2997_v18 = vsub.f32 %v2837_v16, %v2960_v10  ;;  %v3006_v24 = vsub.f32 %v2846_v19, %v2960_v10  ;;  %v3013_v28 = vsub.f32 %v2858_v23, %v2960_v10 }
  0x33   :  { %v198_v7 = vmul.f32 %v2965_v11, %v2965_v11  ;;  %v199_v8 = vmul.f32 %v2969_v12, %v2969_v12  ;;  %v200_v9 = vmul.f32 %v2973_v14, %v2973_v14  ;;  %v201_v20 = vmul.f32 %v2977_v15, %v2977_v15 }
  0x34   :  { %2582 = vset.pattern.permute.xlu1 %v2719_v1  ;;  %v202_v25 = vmul.f32 %v2987_v6, %v2987_v6  ;;  %v203_v31 = vmul.f32 %v2997_v18, %v2997_v18  ;;  %v3022_v19 = vsub.f32 %v2866_v26, %v2960_v10  ;;  %v204_v35 = vmul.f32 %v3006_v24, %v3006_v24 }
  0x35   :  { %302 = vperm.xlu1 %2582, %v2958_v4   ;;  %v214_v21 = vsel %vm143_vm1, %v198_v7, 0.0  ;;  %v215_v13 = vsel %vm143_vm1, %v199_v8, 0.0  ;;  %v217_v16 = vsel %vm143_vm1, %v200_v9, 0.0  ;;  %v219_v32 = vsel %vm143_vm1, %v201_v20, 0.0  ;;  %v1899_v7 = vld [vmem:[%s3881_s6] sm:$0xff]   ;;  %v3082_v8 = vld [vmem:[%s3878_s3 + $0x50] sm:$0xff] }
  0x36   :  { %v216_v27 = vadd.f32 %v215_v13, %v214_v21  ;;  %v221_v23 = vsel %vm143_vm1, %v202_v25, 0.0  ;;  %v3034_v40 = vsub.f32 %v2879_v30, %v2960_v10  ;;  %v205_v41 = vmul.f32 %v3013_v28, %v3013_v28  ;;  %v1995_v20 = vld [vmem:[%s3880_s4 + $0x10] sm:$0xff]  }
  0x37   :  { %v223_v26 = vsel %vm143_vm1, %v203_v31, 0.0  ;;  %v3042_v44 = vsub.f32 %v2886_v33, %v2960_v10  ;;  %v206_v47 = vmul.f32 %v3022_v19, %v3022_v19  ;;  %v225_v48 = vsel %vm143_vm1, %v204_v35, 0.0  ;;  %v3105_v31 = vld [vmem:[%s3878_s3 + $0x58] sm:$0xff] }
  0x38   :  { %v218_v34 = vadd.f32 %v217_v16, %v216_v27  ;;  %v3050_v50 = vsub.f32 %v2894_v36, %v2960_v10  ;;  %v207_v51 = vmul.f32 %v3034_v40, %v3034_v40  ;;  %v227_v53 = vsel %vm143_vm1, %v205_v41, 0.0  ;;  %v2008_v16 = vld [vmem:[%s3881_s6 + $0x8] sm:$0xff]  }
  0x39   :  { %307 = vperm.xlu1 %2582, %v2983_v17   ;;  %v2721_v33 = vmov 0.0|0.0   ;;  %v208_v57 = vmul.f32 %v3042_v44, %v3042_v44  ;;  %v229_v36 = vsel %vm143_vm1, %v206_v47, 0.0  ;;  %v3071_v60 = vsub.f32 %v2901_v39, %v2960_v10 }
  0x3a   :  { %v220_v37 = vadd.f32 %v219_v32, %v218_v34  ;;  %2361 = vmatprep.subr.bf16.mxu0 %v2721_v33  ;;  %2385 = vmatprep.subr.bf16.mxu1 %v2721_v33  ;;  %v209_v61 = vmul.f32 %v3050_v50, %v3050_v50  ;;  %v231_v62 = vsel %vm143_vm1, %v207_v51, 0.0  ;;  %v3093_v21 = vsub.f32 %v2911_v42, %v2960_v10  ;;  %v1996_v32 = vld [vmem:[%s3880_s4 + $0x18] sm:$0xff]  }
  0x3b   :  { %2363 = vmatpush3.bf16.msra.mxu0 %v1835_v55  ;;  %v233_v9 = vsel %vm143_vm1, %v208_v57, 0.0  ;;  %2387 = vmatpush3.bf16.msra.mxu1 %v1899_v7  ;;  %v210_v13 = vmul.f32 %v3071_v60, %v3071_v60  ;;  %v3114_v34 = vsub.f32 %v2923_v46, %v2960_v10  ;;  %v1997_v46 = vld [vmem:[%s3880_s4 + $0x20] sm:$0xff]  }
  0x3c   :  { %v222_v43 = vadd.f32 %v221_v23, %v220_v37  ;;  %2364 = vmatprep.subr.bf16.mxu0 %v2721_v33  ;;  %2388 = vmatprep.subr.bf16.mxu1 %v2721_v33  ;;  %v235_v25 = vsel %vm143_vm1, %v209_v61, 0.0  ;;  %v211_v35 = vmul.f32 %v3093_v21, %v3093_v21  ;;  %v2009_v37 = vld [vmem:[%s3881_s6 + $0x10] sm:$0xff]   ;;  %v3159_v57 = vld [vmem:[%s3878_s3 + $0x60] sm:$0xff] }
  0x3d   :  { %2583 = vset.pattern.permute.xlu1 %v2720_v3  ;;  %v237_v23 = vsel %vm143_vm1, %v210_v13, 0.0 }
  0x3e   :  { %395 = vperm.xlu1 %2583, %v2983_v17   ;;  %v224_v30 = vadd.f32 %v223_v26, %v222_v43  ;;  %v3130_v26 = vsub.f32 %v2932_v49, %v2960_v10  ;;  %v212_v43 = vmul.f32 %v3114_v34, %v3114_v34  ;;  %v239_v47 = vsel %vm143_vm1, %v211_v35, 0.0  ;;  %v3144_v49 = vld [vmem:[%s3878_s3 + $0x68] sm:$0xff] }
  0x3f   :  { %2366 = vmatpush3.bf16.msra.mxu0 %v1994_v59  ;;  %2390 = vmatpush3.bf16.msra.mxu1 %v2008_v16  ;;  %v3170_v59 = vld [vmem:[%s3878_s3 + $0x70] sm:$0xff] }
  0x40   :  { %v226_v54 = vadd.f32 %v225_v48, %v224_v30  ;;  %2367 = vmatprep.subr.bf16.mxu0 %v2721_v33  ;;  %2391 = vmatprep.subr.bf16.mxu1 %v2721_v33  ;;  %v1998_v30 = vld [vmem:[%s3880_s4 + $0x28] sm:$0xff]   ;;  %v213_v10 = vmul.f32 %v3130_v26, %v3130_v26  ;;  %v241_v51 = vsel %vm143_vm1, %v212_v43, 0.0 }
  0x42   :  { %2585 = vset.pattern.permute.xlu1 %v2719_v1  ;;  %v228_v58 = vadd.f32 %v227_v53, %v226_v54  ;;  %v1999_v54 = vld [vmem:[%s3880_s4 + $0x30] sm:$0xff]   ;;  %v243_v55 = vsel %vm143_vm1, %v213_v10, 0.0 }
  0x43   :  { %317 = vperm.xlu1 %2585, %v3030_v38   ;;  %2369 = vmatpush3.bf16.msra.mxu0 %v1995_v20 }
  0x44   :  { %v230_v63 = vadd.f32 %v229_v36, %v228_v58  ;;  %2370 = vmatprep.subr.bf16.mxu0 %v2721_v33  ;;  %2393 = vmatpush3.bf16.msra.mxu1 %v2009_v37  ;;  %v2000_v58 = vld [vmem:[%s3880_s4 + $0x38] sm:$0xff]  }
  0x45   :  { %2394 = vmatprep.subr.bf16.mxu1 %v2721_v33 }
  0x46   :  { %v232_v39 = vadd.f32 %v231_v62, %v230_v63  ;;  %v3177_v62 = vld [vmem:[%s3878_s3 + $0x78] sm:$0xff] }
  0x47   :  { %2586 = vset.pattern.permute.xlu1 %v2720_v3  ;;  %2372 = vmatpush3.bf16.msra.mxu0 %v1996_v32 }
  0x48   :  { %399 = vperm.xlu1 %2586, %v2918_v45   ;;  %v234_v27 = vadd.f32 %v233_v9, %v232_v39  ;;  %2373 = vmatprep.subr.bf16.mxu0 %v2721_v33 }
  0x4a   :  { %v236_v42 = vadd.f32 %v235_v25, %v234_v27 }
  0x4b   :  { %2375 = vmatpush3.bf16.msra.mxu0 %v1997_v46 }
  0x4c   :  { %2587 = vset.pattern.permute.xlu1 %v2719_v1  ;;  %v238_v41 = vadd.f32 %v237_v23, %v236_v42  ;;  %2376 = vmatprep.subr.bf16.mxu0 %v2721_v33 }
  0x4d   :  { %322 = vperm.xlu1 %2587, %v3082_v8  }
  0x4e   :  { %v240_v48 = vadd.f32 %v239_v47, %v238_v41 }
  0x4f   :  { %2378 = vmatpush3.bf16.msra.mxu0 %v1998_v30 }
  0x50   :  { %v242_v53 = vadd.f32 %v241_v51, %v240_v48  ;;  %2379 = vmatprep.subr.bf16.mxu0 %v2721_v33 }
  0x51   :  { %327 = vperm.xlu1 %2587, %v3105_v31  }
  0x52   :  { %v244_v36 = vadd.f32 %v243_v55, %v242_v53 }
  0x53   :  { %2381 = vmatpush3.bf16.msra.mxu0 %v1999_v54 }
  0x54   :  { %2382 = vmatprep.subr.bf16.mxu0 %v2721_v33  ;;  %v245_v61 = vrot.slane %v244_v36, 4 }
  0x55   :  { %2588 = vset.pattern.permute.xlu1 %v2720_v3 }
  0x56   :  { %411 = vperm.xlu1 %2588, %v3105_v31   ;;  %v246_v63 = vadd.f32 %v245_v61, %v244_v36 }
  0x57   :  { %2384 = vmatpush3.bf16.msra.mxu0 %v2000_v58 }
  0x58   :  { %v247_v7 = vrot.slane %v246_v63, 2 }
  0x5a   :  { %2590 = vset.pattern.permute.xlu1 %v2719_v1  ;;  %v248_v9 = vadd.f32 %v247_v7, %v246_v63 }
  0x5b   :  { %337 = vperm.xlu1 %2590, %v3144_v49  }
  0x5c   :  { %v249_v39 = vrot.slane %v248_v9, 1 }
  0x5e   :  { %v250_v20 = vadd.f32 %v249_v39, %v248_v9 }
  0x5f   :  { %2591 = vset.pattern.permute.xlu1 %v2720_v3 }
  0x60   :  { %415 = vperm.xlu1 %2591, %v3159_v57   ;;  %v251_v13 = vmul.f32 0.0078125, %v250_v20 }
  0x62   :  { %v252_v25 = vadd.f32 1e-05, %v251_v13 }
  0x64   :  { %2592 = vset.pattern.permute.xlu1 %v2719_v1  ;;  %2641 = vrsqrt.f32 %v252_v25  ;;  %v2010_v25 = vld [vmem:[%s3881_s6 + $0x18] sm:$0xff]  }
  0x65   :  { %342 = vperm.xlu1 %2592, %v3170_v59   ;;  %2396 = vmatpush3.bf16.msra.mxu1 %v2010_v25 }
  0x66   :  { %2397 = vmatprep.subr.bf16.mxu1 %v2721_v33 }
  0x69   :  { %347 = vperm.xlu1 %2592, %v3177_v62  }
  0x6d   :  { %2593 = vset.pattern.permute.xlu1 %v2720_v3 }
  0x6e   :  { %427 = vperm.xlu1 %2593, %v3177_v62   ;;  %v3182_v32 = vpop.eup %2641 }
  0x6f   :  { %v255_v35 = vmul.f32 %v3182_v32, %v2969_v12  ;;  %v254_v46 = vmul.f32 %v3182_v32, %v2965_v11  ;;  %v256_v48 = vmul.f32 %v3182_v32, %v2973_v14  ;;  %v257_v12 = vmul.f32 %v3182_v32, %v2977_v15 }
  0x70   :  { %v258_v15 = vmul.f32 %v3182_v32, %v2987_v6  ;;  %v259_v13 = vmul.f32 %v3182_v32, %v2997_v18 }
  0x82   :  { %v273_v27 = vpop.permute.xlu1 %272 }
  0x83   :  { %v350_v51 = vmul.f32 %v273_v27, %v254_v46  ;;  %v2013_v46 = vld [vmem:[%s3881_s6 + $0x30] sm:$0xff]  }
  0x86   :  { %v278_v16 = vpop.permute.xlu1 %277 }
  0x87   :  { %v351_v47 = vmul.f32 %v278_v16, %v255_v35 }
  0x8b   :  { %v372_v42 = vpop.permute.xlu1 %371 }
  0x8c   :  { %v431_v54 = vadd.f32 %v372_v42, %v351_v47  ;;  %v2011_v42 = vld [vmem:[%s3881_s6 + $0x20] sm:$0xff]   ;;  %v2014_v47 = vld [vmem:[%s3881_s6 + $0x38] sm:$0xff]  }
  0x8d   :  { %2399 = vmatpush3.bf16.msra.mxu1 %v2011_v42 }
  0x8e   :  { %2400 = vmatprep.subr.bf16.mxu1 %v2721_v33 }
  0x90   :  { %v283_v23 = vpop.permute.xlu1 %282  ;;  %v121_v37 = vpop.xlane.xlu0 %120 }
  0x91   :  { %v123_v41 = vmul.f32 0.0078125, %v121_v37  ;;  %v352_v55 = vmul.f32 %v283_v23, %v256_v48  ;;  %v2012_v37 = vld [vmem:[%s3881_s6 + $0x28] sm:$0xff]   ;;  %v2723_v48 = vmov 0.0  }
  0x92   :  { %2402 = vmatpush3.bf16.msra.mxu1 %v2012_v37  ;;  %2197 = vmatprep.mubr.msk.f32.mxu0 %vm2722_vm2, %v2723_v48 }
  0x93   :  { %v3189_v43 = vsub.f32 %v2783_v0, %v123_v41  ;;  %2403 = vmatprep.subr.bf16.mxu1 %v2721_v33  ;;  %2232 = vmatprep.mubr.msk.f32.mxu1 %vm2722_vm2, %v2723_v48 }
  0x94   :  { %v288_v30 = vpop.permute.xlu1 %287 }
  0x95   :  { %v125_v10 = vmul.f32 %v3189_v43, %v3189_v43  ;;  %v353_v36 = vmul.f32 %v288_v30, %v257_v12  ;;  %v2724_v30 = vmov 2  }
  0x96   :  { %2405 = vmatpush3.bf16.msra.mxu1 %v2013_v46  ;;  %2595 = vset.pattern.permute.xlu1 %v2724_v30 }
  0x97   :  { %v126_v53 = vsel %vm118_vm0, %v125_v10, 0.0  ;;  %2406 = vmatprep.subr.bf16.mxu1 %v2721_v33  ;;  %648 = vperm.xlu1 %2595, %v2798_v5  }
  0x98   :  { %127 = vadd.xlane.f32.xlu0 %v126_v53  ;;  %v368_v0 = vpop.permute.xlu0 %367 }
  0x99   :  { %v376_v11 = vpop.permute.xlu1 %375  ;;  %v430_v58 = vadd.f32 %v368_v0, %v350_v51  ;;  %v262_v51 = vmul.f32 %v3182_v32, %v3022_v19 }
  0x9a   :  { %v432_v61 = vadd.f32 %v376_v11, %v352_v55  ;;  %2408 = vmatpush3.bf16.msra.mxu1 %v2014_v47  ;;  %v263_v55 = vmul.f32 %v3182_v32, %v3034_v40  ;;  %v265_v11 = vmul.f32 %v3182_v32, %v3050_v50  ;;  %v1867_v50 = vld [vmem:[%s3883_s5] sm:$0xff]  }
  0x9b   :  { %v3198_v63 = vpack.c.bf16 %v431_v54, %v430_v58  ;;  %2441 = vmatprep.subr.bf16.mxu1 %v2721_v33  ;;  %652 = vperm.xlu1 %2595, %v2853_v22   ;;  %v3272_v54 = vld [vmem:[%s3882_s2] sm:$0xff] }
  0x9d   :  { %v380_v14 = vpop.permute.xlu1 %379  ;;  %2410 = vmatprep.subr.bf16.mxu0 %v3198_v63 }
  0x9e   :  { %v433_v7 = vadd.f32 %v380_v14, %v353_v36 }
  0x9f   :  { %660 = vperm.xlu1 %2595, %v2940_v52  }
  0xa0   :  { %v3201_v9 = vpack.c.bf16 %v433_v7, %v432_v61  ;;  %v264_v7 = vmul.f32 %v3182_v32, %v3042_v44 }
  0xa2   :  { %v293_v39 = vpop.permute.xlu1 %292 }
  0xa3   :  { %v354_v27 = vmul.f32 %v293_v39, %v258_v15  ;;  %668 = vperm.xlu1 %2595, %v2958_v4  }
  0xa6   :  { %v298_v20 = vpop.permute.xlu1 %297 }
  0xa7   :  { %v355_v35 = vmul.f32 %v298_v20, %v259_v13  ;;  %676 = vperm.xlu1 %2595, %v2918_v45   ;;  %v313_v45 = vpop.permute.xlu0 %312 }
  0xa8   :  { %v358_v36 = vmul.f32 %v313_v45, %v262_v51  ;;  %v268_v45 = vmul.f32 %v3182_v32, %v3114_v34 }
  0xab   :  { %v384_v16 = vpop.permute.xlu1 %383  ;;  %684 = vperm.xlu1 %2595, %v3082_v8  }
  0xac   :  { %v434_v6 = vadd.f32 %v384_v16, %v354_v27 }
  0xae   :  { %332 = vperm.xlu0 %2584, %v3159_v57  }
  0xaf   :  { %v388_v18 = vpop.permute.xlu1 %387  ;;  %692 = vperm.xlu1 %2595, %v3159_v57   ;;  %v260_v57 = vmul.f32 %v3182_v32, %v3006_v24 }
  0xb0   :  { %v435_v23 = vadd.f32 %v388_v18, %v355_v35 }
  0xb2   :  { %v3219_v41 = vpack.c.bf16 %v435_v23, %v434_v6  ;;  %2589 = vset.pattern.permute.xlu0 %v2720_v3  ;;  %v1868_v6 = vunpack.c.l.bf16 %v1867_v50 }
  0xb3   :  { %391 = vperm.xlu0 %2589, %v2958_v4   ;;  %700 = vperm.xlu1 %2595, %v3170_v59  }
  0xb4   :  { %v303_v10 = vpop.permute.xlu1 %302 }
  0xb7   :  { %403 = vperm.xlu0 %2589, %v3030_v38   ;;  %2596 = vset.pattern.permute.xlu1 %v2719_v1 }
  0xbb   :  { %407 = vperm.xlu0 %2589, %v3082_v8  }
  0xbf   :  { %419 = vperm.xlu0 %2589, %v3144_v49  }
  0xc3   :  { %423 = vperm.xlu0 %2589, %v3170_v59  }
  0xc7   :  { %2594 = vset.pattern.permute.xlu0 %v2724_v30 }
  0xc8   :  { %644 = vperm.xlu0 %2594, %v2789_v2   ;;  %v308_v2 = vpop.permute.xlu1 %307 }
  0xcc   :  { %656 = vperm.xlu0 %2594, %v2874_v29   ;;  %v396_v5 = vpop.permute.xlu1 %395 }
  0xd0   :  { %664 = vperm.xlu0 %2594, %v2949_v56   ;;  %v318_v22 = vpop.permute.xlu1 %317 }
  0xd1   :  { %v359_v39 = vmul.f32 %v318_v22, %v263_v55 }
  0xd4   :  { %672 = vperm.xlu0 %2594, %v2983_v17   ;;  %v400_v29 = vpop.permute.xlu1 %399  ;;  %v133_v17 = vlaneseq }
  0xd5   :  { %v438_v27 = vadd.f32 %v400_v29, %v358_v36  ;;  %v2005_v36 = vld [vmem:[%s3883_s5 + $0x28] sm:$0xff]  }
  0xd8   :  { %680 = vperm.xlu0 %2594, %v3030_v38   ;;  %v323_v52 = vpop.permute.xlu1 %322 }
  0xd9   :  { %v360_v18 = vmul.f32 %v323_v52, %v264_v7  ;;  %v1889_v7 = vunpack.c.h.bf16 %v2005_v36 }
  0xdc   :  { %688 = vperm.xlu0 %2594, %v3105_v31   ;;  %v328_v8 = vpop.permute.xlu1 %327  ;;  %v261_v31 = vmul.f32 %v3182_v32, %v3013_v28  ;;  %v356_v28 = vmul.f32 %v303_v10, %v260_v57 }
  0xdd   :  { %v361_v16 = vmul.f32 %v328_v8, %v265_v11  ;;  %v2004_v11 = vld [vmem:[%s3883_s5 + $0x20] sm:$0xff]  }
  0xe0   :  { %696 = vperm.xlu0 %2594, %v3144_v49   ;;  %v3260_v49 = vshrl.u32 %v133_v17, 7  ;;  %v412_v53 = vpop.permute.xlu1 %411 }
  0xe1   :  { %v441_v46 = vadd.f32 %v412_v53, %v361_v16  ;;  %v2003_v53 = vld [vmem:[%s3883_s5 + $0x18] sm:$0xff]  }
  0xe2   :  { %v3267_v12 = vsub.s32 0, %v3260_v49  ;;  %v3277_v24 = vsub.s32 1, %v3260_v49  ;;  %v1880_v55 = vunpack.c.l.bf16 %v2003_v53 }
  0xe4   :  { %704 = vperm.xlu0 %2594, %v3177_v62   ;;  %v357_v62 = vmul.f32 %v308_v2, %v261_v31  ;;  %v136_v61 = vrot.slane %v3272_v54, %v3267_v12  ;;  %v141_v20 = vrot.slane %v3272_v54, %v3277_v24  ;;  %v338_v13 = vpop.permute.xlu1 %337  ;;  %v267_v2 = vmul.f32 %v3182_v32, %v3093_v21 }
  0xe6   :  { %v437_v0 = vadd.f32 %v396_v5, %v357_v62  ;;  %v363_v29 = vmul.f32 %v338_v13, %v267_v2 }
  0xe8   :  { %2598 = vset.pattern.permute.xlu0 %v2720_v3  ;;  %v416_v47 = vpop.permute.xlu1 %415 }
  0xec   :  { %v343_v10 = vpop.permute.xlu1 %342 }
  0xf0   :  { %v348_v5 = vpop.permute.xlu1 %347 }
 0x125   :  { %v128_v56 = vpop.xlane.xlu0 %127 }
 0x126   :  { %v129_v4 = vmul.f32 0.0078125, %v128_v56  ;;  %v364_v56 = vmul.f32 %v343_v10, %v268_v45 }
 0x128   :  { %v130_v38 = vadd.f32 1e-05, %v129_v4 }
 0x12a   :  { %2643 = vrsqrt.f32 %v130_v38 }
 0x12d   :  { %v333_v59 = vpop.permute.xlu0 %332 }
 0x132   :  { %v392_v19 = vpop.permute.xlu0 %391 }
 0x133   :  { %v436_v58 = vadd.f32 %v392_v19, %v356_v28  ;;  %v1881_v19 = vunpack.c.h.bf16 %v2003_v53 }
 0x134   :  { %v2644_v14 = vpop.eup %2643 }
 0x135   :  { %v2421_v15 = vpack.c.bf16 %v437_v0, %v436_v58  ;;  %v132_v40 = vmul.f32 %v2644_v14, %v3189_v43  ;;  %v1884_v0 = vunpack.c.l.bf16 %v2004_v11  ;;  %v1885_v58 = vunpack.c.h.bf16 %v2004_v11  ;;  %v2006_v14 = vld [vmem:[%s3883_s5 + $0x30] sm:$0xff]  }
 0x136   :  { %v404_v25 = vpop.permute.xlu0 %403 }
 0x137   :  { %v439_v42 = vadd.f32 %v404_v25, %v359_v39  ;;  %v137_v35 = vmul.f32 %v136_v61, %v132_v40  ;;  %v1888_v61 = vunpack.c.l.bf16 %v2005_v36  ;;  %v1892_v39 = vunpack.c.l.bf16 %v2006_v14 }
 0x138   :  { %v1893_v40 = vunpack.c.h.bf16 %v2006_v14 }
 0x139   :  { %v2425_v44 = vpack.c.bf16 %v439_v42, %v438_v27  ;;  %v142_v23 = vadd.f32 %v141_v20, %v137_v35 }
 0x13a   :  { %v408_v37 = vpop.permute.xlu0 %407 }
 0x13b   :  { %v440_v43 = vadd.f32 %v408_v37, %v360_v18  ;;  %2198 = vmatmul.mubr.f32.vlgmr.msra.gmra.mrb[0].mxu0 %v142_v23  ;;  %2233 = vmatmul.mubr.f32.vlgmr.msra.gmra.mrb[0].mxu1 %v142_v23 }
 0x13c   :  { %2412 = vmatpush3.bf16.msra.mxu0 %v3198_v63  ;;  %2267 = vmatprep.mubr.f32.mxu0 %v1868_v6  ;;  %v266_v63 = vmul.f32 %v3182_v32, %v3071_v60 }
 0x13d   :  { %v2429_v30 = vpack.c.bf16 %v441_v46, %v440_v43  ;;  %2414 = vmatprep.subr.bf16.mxu0 %v3201_v9  ;;  %2323 = vmatprep.mubr.msk.f32.mxu1 %vm2722_vm2, %v2723_v48 }
 0x13e   :  { %v420_v22 = vpop.permute.xlu0 %419  ;;  %v362_v52 = vmul.f32 %v333_v59, %v266_v63  ;;  %v2002_v59 = vld [vmem:[%s3883_s5 + $0x10] sm:$0xff]  }
 0x13f   :  { %v443_v4 = vadd.f32 %v420_v22, %v363_v29  ;;  %v1876_v51 = vunpack.c.l.bf16 %v2002_v59  ;;  %v1877_v28 = vunpack.c.h.bf16 %v2002_v59 }
 0x140   :  { %2416 = vmatpush3.bf16.msra.mxu0 %v3201_v9  ;;  %v269_v9 = vmul.f32 %v3182_v32, %v3130_v26  ;;  %v442_v60 = vadd.f32 %v416_v47, %v362_v52  ;;  %v2001_v26 = vld [vmem:[%s3883_s5 + $0x8] sm:$0xff]   ;;  %v1869_v32 = vunpack.c.h.bf16 %v1867_v50 }
 0x141   :  { %2418 = vmatprep.subr.bf16.mxu0 %v3219_v41  ;;  %v1872_v57 = vunpack.c.l.bf16 %v2001_v26  ;;  %v1873_v62 = vunpack.c.h.bf16 %v2001_v26 }
 0x142   :  { %v365_v21 = vmul.f32 %v348_v5, %v269_v9  ;;  %v424_v17 = vpop.permute.xlu0 %423  ;;  %v2433_v38 = vpack.c.bf16 %v443_v4, %v442_v60 }
 0x143   :  { %v444_v31 = vadd.f32 %v424_v17, %v364_v56 }
 0x144   :  { %2420 = vmatpush3.bf16.msra.mxu0 %v3219_v41  ;;  %v428_v41 = vpop.permute.xlu1 %427 }
 0x145   :  { %2422 = vmatprep.subr.bf16.mxu0 %v2421_v15  ;;  %v445_v8 = vadd.f32 %v428_v41, %v365_v21 }
 0x147   :  { %v2437_v34 = vpack.c.bf16 %v445_v8, %v444_v31  ;;  %v645_v42 = vpop.permute.xlu0 %644 }
 0x148   :  { %2424 = vmatpush3.bf16.msra.mxu0 %v2421_v15  ;;  %v2007_v15 = vld [vmem:[%s3883_s5 + $0x38] sm:$0xff]   ;;  %v649_v35 = vpop.permute.xlu1 %648 }
 0x149   :  { %2426 = vmatprep.subr.bf16.mxu0 %v2425_v44  ;;  %v1896_v20 = vunpack.c.l.bf16 %v2007_v15  ;;  %v1897_v50 = vunpack.c.h.bf16 %v2007_v15 }
 0x14b   :  { %v657_v6 = vpop.permute.xlu0 %656 }
 0x14c   :  { %2428 = vmatpush3.bf16.msra.mxu0 %v2425_v44  ;;  %v653_v18 = vpop.permute.xlu1 %652 }
 0x14d   :  { %2430 = vmatprep.subr.bf16.mxu0 %v2429_v30 }
 0x14f   :  { %v665_v44 = vpop.permute.xlu0 %664 }
 0x150   :  { %2432 = vmatpush3.bf16.msra.mxu0 %v2429_v30  ;;  %v661_v23 = vpop.permute.xlu1 %660 }
 0x151   :  { %2434 = vmatprep.subr.bf16.mxu0 %v2433_v38 }
 0x153   :  { %v673_v30 = vpop.permute.xlu0 %672 }
 0x154   :  { %2436 = vmatpush3.bf16.msra.mxu0 %v2433_v38  ;;  %v669_v2 = vpop.permute.xlu1 %668 }
 0x155   :  { %2438 = vmatprep.subr.bf16.mxu0 %v2437_v34 }
 0x158   :  { %2440 = vmatpush3.bf16.msra.mxu0 %v2437_v34 }
 0x159   :  { %2465 = vmatprep.subr.bf16.mxu0 %v2721_v33 }
 0x15b   :  { %2268 = vmatmul.mubr.f32.vlgmr.msra.gmra.mrb[2].mxu0 %v1869_v32 }
 0x15c   :  { %2270 = vmatprep.mubr.f32.mxu0 %v1872_v57  ;;  %v681_v57 = vpop.permute.xlu0 %680 }
 0x15f   :  { %2271 = vmatmul.mubr.f32.gmra.mrb[4].mxu0 %v1873_v62 }
 0x160   :  { %2273 = vmatprep.mubr.f32.mxu0 %v1876_v51 }
 0x163   :  { %2274 = vmatmul.mubr.f32.gmra.mrb[6].mxu0 %v1877_v28  ;;  %v677_v28 = vpop.permute.xlu1 %676 }
 0x164   :  { %2276 = vmatprep.mubr.f32.mxu0 %v1880_v55 }
 0x167   :  { %2277 = vmatmul.mubr.f32.gmra.mrb[8].mxu0 %v1881_v19 }
 0x168   :  { %2279 = vmatprep.mubr.f32.mxu0 %v1884_v0 }
 0x16b   :  { %2280 = vmatmul.mubr.f32.gmra.mrb[10].mxu0 %v1885_v58 }
 0x16c   :  { %2282 = vmatprep.mubr.f32.mxu0 %v1888_v61 }
 0x16f   :  { %2283 = vmatmul.mubr.f32.gmra.mrb[12].mxu0 %v1889_v7 }
 0x170   :  { %2285 = vmatprep.mubr.f32.mxu0 %v1892_v39 }
 0x173   :  { %2286 = vmatmul.mubr.f32.gmra.mrb[14].mxu0 %v1893_v40 }
 0x174   :  { %2288 = vmatprep.mubr.f32.mxu0 %v1896_v20 }
 0x177   :  { %2289 = vmatmul.mubr.f32.gmra.mrb[16].mxu0 %v1897_v50 }
 0x178   :  { %2358 = vmatprep.mubr.msk.f32.mxu0 %vm2722_vm2, %v2723_v48 }
 0x20e   :  { %v3330_v13 = vpop.f32.mrb[0].mxu0  ;;  %v3332_v25 = vpop.f32.mrb[0].mxu1 }
 0x20f   :  { %v2199_v27 = vpop.f32.mrb[1].mxu0  ;;  %v2234_v16 = vpop.f32.mrb[1].mxu1 }
 0x22e   :  { %v2269_v37 = vpop.f32.mrb[2].mxu0 }
 0x22f   :  { %v779_v46 = vadd.f32 %v2269_v37, %v649_v35  ;;  %v773_v43 = vpop.f32.mrb[3].mxu0  ;;  %v689_v37 = vpop.permute.xlu0 %688 }
 0x230   :  { %v3334_v47 = vadd.f32 %v773_v43, %v645_v42 }
 0x231   :  { %948 = vperm.xlu1 %2596, %v779_v46   ;;  %v3340_v22 = vsel %vm852_vm3, %v779_v46, -inf  ;;  %v3343_v29 = vsel %vm852_vm3, %v779_v46, inf  ;;  %v3348_v9 = vsel %vm1187_vm4, %v779_v46, -inf  ;;  %v3351_v52 = vsel %vm1187_vm4, %v779_v46, inf }
 0x232   :  { %v2272_v10 = vpop.f32.mrb[4].mxu0  ;;  %1276 = vperm.xlu0 %2598, %v3334_v47   ;;  %v3355_v56 = vsel %vm852_vm3, %v3334_v47, -inf  ;;  %v3359_v21 = vsel %vm852_vm3, %v3334_v47, inf  ;;  %v3364_v4 = vsel %vm1187_vm4, %v3334_v47, -inf  ;;  %v3368_v41 = vsel %vm1187_vm4, %v3334_v47, inf }
 0x233   :  { %v3337_v63 = vadd.f32 %v2272_v10, %v657_v6  ;;  %v783_v5 = vpop.f32.mrb[5].mxu0 }
 0x234   :  { %v3345_v45 = vadd.f32 %v783_v5, %v653_v18  ;;  %v685_v5 = vpop.permute.xlu1 %684 }
 0x235   :  { %2597 = vset.pattern.permute.xlu1 %v2720_v3  ;;  %v3372_v17 = vsel %vm852_vm3, %v3337_v63, -inf  ;;  %v3376_v60 = vsel %vm852_vm3, %v3337_v63, inf  ;;  %v3380_v8 = vsel %vm1187_vm4, %v3337_v63, -inf  ;;  %v3384_v31 = vsel %vm1187_vm4, %v3337_v63, inf }
 0x236   :  { %1280 = vperm.xlu1 %2597, %v779_v46   ;;  %v2275_v38 = vpop.f32.mrb[6].mxu0  ;;  %v3388_v34 = vsel %vm852_vm3, %v3345_v45, -inf  ;;  %v3394_v59 = vsel %vm852_vm3, %v3345_v45, inf  ;;  %v3398_v62 = vsel %vm1187_vm4, %v3345_v45, -inf  ;;  %v3402_v51 = vsel %vm1187_vm4, %v3345_v45, inf }
 0x237   :  { %v3390_v26 = vadd.f32 %v2275_v38, %v665_v44  ;;  %v793_v32 = vpop.f32.mrb[7].mxu0 }
 0x238   :  { %v3404_v53 = vadd.f32 %v793_v32, %v661_v23 }
 0x239   :  { %v859_v55 = vsel %vm852_vm3, %v3390_v26, -inf  ;;  %v896_v11 = vsel %vm852_vm3, %v3390_v26, inf  ;;  %v1194_v19 = vsel %vm1187_vm4, %v3390_v26, -inf  ;;  %v3414_v0 = vsel %vm1187_vm4, %v3390_v26, inf }
 0x23a   :  { %v857_v36 = vsel %vm852_vm3, %v3404_v53, -inf  ;;  %v894_v58 = vsel %vm852_vm3, %v3404_v53, inf  ;;  %v1192_v61 = vsel %vm1187_vm4, %v3404_v53, -inf  ;;  %v3424_v14 = vsel %vm1187_vm4, %v3404_v53, inf  ;;  %v2278_v7 = vpop.f32.mrb[8].mxu0  ;;  %1292 = vperm.xlu0 %2598, %v3404_v53   ;;  %1288 = vperm.xlu1 %2597, %v3337_v63  }
 0x23b   :  { %v3428_v39 = vadd.f32 %v2278_v7, %v673_v30  ;;  %v803_v15 = vpop.f32.mrb[9].mxu0  ;;  %v895_v40 = vmin.f32 %v3359_v21, %v894_v58  ;;  %v897_v20 = vmin.f32 %v3343_v29, %v896_v11  ;;  %v858_v50 = vmax.f32 %v3355_v56, %v857_v36 }
 0x23c   :  { %v3433_v27 = vadd.f32 %v803_v15, %v669_v2  ;;  %v860_v16 = vmax.f32 %v3340_v22, %v859_v55  ;;  %v1193_v42 = vmax.f32 %v3364_v4, %v1192_v61  ;;  %v1195_v35 = vmax.f32 %v3348_v9, %v1194_v19 }
 0x23d   :  { %v863_v6 = vsel %vm852_vm3, %v3428_v39, -inf  ;;  %v900_v18 = vsel %vm852_vm3, %v3428_v39, inf  ;;  %v1198_v44 = vsel %vm1187_vm4, %v3428_v39, -inf  ;;  %v3446_v23 = vsel %vm1187_vm4, %v3428_v39, inf }
 0x23e   :  { %v861_v46 = vsel %vm852_vm3, %v3433_v27, -inf  ;;  %v898_v43 = vsel %vm852_vm3, %v3433_v27, inf  ;;  %v1196_v30 = vsel %vm1187_vm4, %v3433_v27, -inf  ;;  %v3456_v10 = vsel %vm1187_vm4, %v3433_v27, inf  ;;  %v2281_v2 = vpop.f32.mrb[10].mxu0  ;;  %2599 = vset.pattern.permute.xlu1 %v2719_v1 }
 0x23f   :  { %v3459_v22 = vadd.f32 %v2281_v2, %v681_v57  ;;  %v813_v29 = vpop.f32.mrb[11].mxu0  ;;  %953 = vperm.xlu1 %2599, %v3345_v45   ;;  %v899_v9 = vmin.f32 %v3394_v59, %v898_v43  ;;  %v901_v56 = vmin.f32 %v3376_v60, %v900_v18  ;;  %v862_v21 = vmax.f32 %v3388_v34, %v861_v46 }
 0x240   :  { %v3465_v4 = vadd.f32 %v813_v29, %v677_v28  ;;  %v864_v38 = vmax.f32 %v3372_v17, %v863_v6  ;;  %v1197_v32 = vmax.f32 %v3398_v62, %v1196_v30  ;;  %v1199_v55 = vmax.f32 %v3380_v8, %v1198_v44  ;;  %v693_v6 = vpop.permute.xlu1 %692 }
 0x241   :  { %v904_v57 = vsel %vm852_vm3, %v3459_v22, inf  ;;  %v867_v11 = vsel %vm852_vm3, %v3459_v22, -inf  ;;  %v1202_v59 = vsel %vm1187_vm4, %v3459_v22, -inf  ;;  %v1230_v60 = vmin.f32 %v3368_v41, %v3424_v14  ;;  %v697_v14 = vpop.permute.xlu0 %696 }
 0x242   :  { %v2284_v34 = vpop.f32.mrb[12].mxu0  ;;  %1308 = vperm.xlu0 %2598, %v3465_v4   ;;  %v902_v17 = vsel %vm852_vm3, %v3465_v4, inf  ;;  %v905_v62 = vmin.f32 %v897_v20, %v904_v57  ;;  %v865_v8 = vsel %vm852_vm3, %v3465_v4, -inf  ;;  %v868_v28 = vmax.f32 %v860_v16, %v867_v11 }
 0x243   :  { %v3483_v19 = vadd.f32 %v2284_v34, %v689_v37  ;;  %v823_v36 = vpop.f32.mrb[13].mxu0  ;;  %2600 = vset.pattern.permute.xlu1 %v2720_v3  ;;  %v903_v58 = vmin.f32 %v895_v40, %v902_v17  ;;  %v866_v61 = vmax.f32 %v858_v50, %v865_v8  ;;  %v1200_v41 = vsel %vm1187_vm4, %v3465_v4, -inf }
 0x244   :  { %v3488_v7 = vadd.f32 %v823_v36, %v685_v5  ;;  %1284 = vperm.xlu1 %2600, %v3345_v45   ;;  %v3491_v15 = vmax.f32 %v1193_v42, %v1200_v41  ;;  %v1203_v20 = vmax.f32 %v1195_v35, %v1202_v59  ;;  %v1232_v16 = vmin.f32 %v3351_v52, %v3414_v0  ;;  %v701_v36 = vpop.permute.xlu1 %700 }
 0x245   :  { %v908_v18 = vsel %vm852_vm3, %v3483_v19, inf  ;;  %v871_v40 = vsel %vm852_vm3, %v3483_v19, -inf  ;;  %v1206_v50 = vsel %vm1187_vm4, %v3483_v19, -inf  ;;  %v1234_v44 = vmin.f32 %v3402_v51, %v3456_v10  ;;  %v705_v17 = vpop.permute.xlu0 %704 }
 0x246   :  { %v2287_v45 = vpop.f32.mrb[14].mxu0  ;;  %v906_v42 = vsel %vm852_vm3, %v3488_v7, inf  ;;  %v909_v35 = vmin.f32 %v901_v56, %v908_v18  ;;  %v869_v37 = vsel %vm852_vm3, %v3488_v7, -inf  ;;  %v872_v46 = vmax.f32 %v864_v38, %v871_v40 }
 0x247   :  { %v3507_v43 = vadd.f32 %v2287_v45, %v697_v14  ;;  %v833_v30 = vpop.f32.mrb[15].mxu0  ;;  %v907_v2 = vmin.f32 %v899_v9, %v906_v42  ;;  %v870_v5 = vmax.f32 %v862_v21, %v869_v37  ;;  %v1204_v29 = vsel %vm1187_vm4, %v3488_v7, -inf }
 0x248   :  { %v3511_v57 = vadd.f32 %v833_v30, %v693_v6  ;;  %2601 = vset.pattern.permute.xlu1 %v2719_v1  ;;  %v1205_v11 = vmax.f32 %v1197_v32, %v1204_v29  ;;  %v1207_v59 = vmax.f32 %v1199_v55, %v1206_v50  ;;  %v1236_v56 = vmin.f32 %v3384_v31, %v3446_v23 }
 0x249   :  { %968 = vperm.xlu1 %2601, %v3390_v26   ;;  %v912_v38 = vsel %vm852_vm3, %v3507_v43, inf  ;;  %v875_v9 = vsel %vm852_vm3, %v3507_v43, -inf  ;;  %v1210_v21 = vsel %vm1187_vm4, %v3507_v43, -inf  ;;  %v1237_v34 = vsel %vm1187_vm4, %v3465_v4, inf }
 0x24a   :  { %v2290_v32 = vpop.f32.mrb[16].mxu0  ;;  %1324 = vperm.xlu0 %2598, %v3511_v57   ;;  %v910_v31 = vsel %vm852_vm3, %v3511_v57, inf  ;;  %v913_v23 = vmin.f32 %v905_v62, %v912_v38  ;;  %v873_v55 = vsel %vm852_vm3, %v3511_v57, -inf  ;;  %v876_v8 = vmax.f32 %v868_v28, %v875_v9 }
 0x24b   :  { %v3530_v41 = vadd.f32 %v2290_v32, %v705_v17  ;;  %v843_v14 = vpop.f32.mrb[17].mxu0  ;;  %v911_v6 = vmin.f32 %v903_v58, %v910_v31  ;;  %v874_v18 = vmax.f32 %v866_v61, %v873_v55  ;;  %v1208_v40 = vsel %vm1187_vm4, %v3511_v57, -inf }
 0x24c   :  { %v3534_v50 = vadd.f32 %v843_v14, %v701_v36  ;;  %v1209_v45 = vmax.f32 %v3491_v15, %v1208_v40  ;;  %v1211_v42 = vmax.f32 %v1203_v20, %v1210_v21  ;;  %v1238_v37 = vmin.f32 %v1230_v60, %v1237_v34 }
 0x24d   :  { %2602 = vset.pattern.permute.xlu1 %v2720_v3  ;;  %v916_v62 = vsel %vm852_vm3, %v3530_v41, inf  ;;  %v918_v28 = vmin.f32 %v911_v6, %v913_v23  ;;  %v879_v30 = vsel %vm852_vm3, %v3530_v41, -inf  ;;  %v881_v58 = vmax.f32 %v874_v18, %v876_v8 }
 0x24e   :  { %1296 = vperm.xlu1 %2602, %v3390_v26   ;;  %2612 = vset.pattern.permute.xlu0 %v2719_v1  ;;  %v914_v61 = vsel %vm852_vm3, %v3534_v50, inf  ;;  %v917_v15 = vmin.f32 %v909_v35, %v916_v62  ;;  %v877_v60 = vsel %vm852_vm3, %v3534_v50, -inf  ;;  %v880_v20 = vmax.f32 %v872_v46, %v879_v30 }
 0x24f   :  { %v915_v29 = vmin.f32 %v907_v2, %v914_v61  ;;  %v878_v38 = vmax.f32 %v870_v5, %v877_v60  ;;  %v1212_v9 = vsel %vm1187_vm4, %v3534_v50, -inf  ;;  %v1214_v21 = vsel %vm1187_vm4, %v3530_v41, -inf }
 0x250   :  { %v1213_v34 = vmax.f32 %v1205_v11, %v1212_v9  ;;  %v1215_v26 = vmax.f32 %v1207_v59, %v1214_v21  ;;  %v1216_v17 = vmax.f32 %v1209_v45, %v1211_v42  ;;  %v1239_v32 = vsel %vm1187_vm4, %v3459_v22, inf }
 0x251   :  { %v919_v31 = vmin.f32 %v915_v29, %v917_v15  ;;  %v882_v35 = vmax.f32 %v878_v38, %v880_v20  ;;  %v1240_v46 = vmin.f32 %v1232_v16, %v1239_v32  ;;  %v1241_v2 = vsel %vm1187_vm4, %v3488_v7, inf }
 0x252   :  { %1304 = vperm.xlu1 %2602, %v3428_v39   ;;  %v1217_v5 = vmax.f32 %v1213_v34, %v1215_v26  ;;  %v1242_v11 = vmin.f32 %v1234_v44, %v1241_v2  ;;  %v1243_v59 = vsel %vm1187_vm4, %v3483_v19, inf  ;;  %v1245_v23 = vsel %vm1187_vm4, %v3511_v57, inf }
 0x253   :  { %v920_v55 = vmin.f32 %v918_v28, %v919_v31  ;;  %v883_v8 = vmax.f32 %v881_v58, %v882_v35  ;;  %v1244_v52 = vmin.f32 %v1236_v56, %v1243_v59  ;;  %v1246_v0 = vmin.f32 %v1238_v37, %v1245_v23 }
 0x254   :  { %v1218_v16 = vmax.f32 %v1216_v17, %v1217_v5  ;;  %v1247_v36 = vsel %vm1187_vm4, %v3507_v43, inf  ;;  %v1249_v14 = vsel %vm1187_vm4, %v3534_v50, inf  ;;  %v1251_v51 = vsel %vm1187_vm4, %v3530_v41, inf }
 0x255   :  { %v921_v10 = vrot.slane %v920_v55, 4  ;;  %v884_v44 = vrot.slane %v883_v8, 4  ;;  %v1248_v6 = vmin.f32 %v1240_v46, %v1247_v36  ;;  %v1250_v18 = vmin.f32 %v1242_v11, %v1249_v14 }
 0x256   :  { %2603 = vset.pattern.permute.xlu1 %v2719_v1  ;;  %v1252_v40 = vmin.f32 %v1244_v52, %v1251_v51  ;;  %v1219_v28 = vrot.slane %v1218_v16, 4  ;;  %v464_v2 = vsub.s32 2, %v3260_v49 }
 0x257   :  { %973 = vperm.xlu1 %2603, %v3433_v27   ;;  %v922_v56 = vmin.f32 %v920_v55, %v921_v10  ;;  %v1253_v45 = vmin.f32 %v1246_v0, %v1248_v6  ;;  %v885_v62 = vmax.f32 %v883_v8, %v884_v44 }
 0x258   :  { %v1254_v42 = vmin.f32 %v1250_v18, %v1252_v40  ;;  %v1220_v60 = vmax.f32 %v1218_v16, %v1219_v28  ;;  %v465_v11 = vrot.slane %v3272_v54, %v464_v2 }
 0x259   :  { %v923_v37 = vrot.slane %v922_v56, 2  ;;  %v886_v15 = vrot.slane %v885_v62, 2 }
 0x25a   :  { %v1255_v30 = vmin.f32 %v1253_v45, %v1254_v42  ;;  %v1221_v9 = vrot.slane %v1220_v60, 2  ;;  %v533_v55 = vadd.f32 %v3330_v13, %v465_v11 }
 0x25b   :  { %2604 = vset.pattern.permute.xlu1 %v2720_v3  ;;  %v924_v58 = vmin.f32 %v922_v56, %v923_v37  ;;  %v887_v38 = vmax.f32 %v885_v62, %v886_v15 }
 0x25c   :  { %1300 = vperm.xlu1 %2604, %v3433_v27   ;;  %v1256_v20 = vrot.slane %v1255_v30, 4  ;;  %v1222_v27 = vmax.f32 %v1220_v60, %v1221_v9  ;;  %v536_v0 = vmul.f32 0.088388346, %v533_v55 }
 0x25d   :  { %v925_v61 = vrot.slane %v924_v58, 1  ;;  %v888_v34 = vrot.slane %v887_v38, 1 }
 0x25e   :  { %v1257_v21 = vmin.f32 %v1255_v30, %v1256_v20  ;;  %v1223_v32 = vrot.slane %v1222_v27, 1  ;;  %v3632_v10 = vrot.slane %v536_v0, %v3267_v12  ;;  %vm927_vm5 = vcmp.ge.f32.partialorder %v536_v0, 0.0 }
 0x25f   :  { %v926_v29 = vmin.f32 %v924_v58, %v925_v61  ;;  %v889_v17 = vmax.f32 %v887_v38, %v888_v34  ;;  %v3658_v11 = vrot.slane %v536_v0, %v3277_v24 }
 0x260   :  { %2605 = vset.pattern.permute.xlu1 %v2719_v1  ;;  %v1258_v26 = vrot.slane %v1257_v21, 2  ;;  %v1224_v35 = vmax.f32 %v1222_v27, %v1223_v32 }
 0x261   :  { %988 = vperm.xlu1 %2605, %v3459_v22   ;;  %936 = vperm.xlu0 %2612, %v926_v29  }
 0x262   :  { %v1259_v31 = vmin.f32 %v1257_v21, %v1258_v26 }
 0x264   :  { %v1260_v46 = vrot.slane %v1259_v31, 1 }
 0x265   :  { %2606 = vset.pattern.permute.xlu1 %v2720_v3  ;;  %943 = vperm.xlu0 %2612, %v3334_v47  }
 0x266   :  { %1312 = vperm.xlu1 %2606, %v3459_v22   ;;  %v1261_v47 = vmin.f32 %v1259_v31, %v1260_v46 }
 0x269   :  { %958 = vperm.xlu0 %2612, %v3337_v63  }
 0x26a   :  { %2607 = vset.pattern.permute.xlu1 %v2719_v1 }
 0x26b   :  { %930 = vperm.xlu1 %2607, %v889_v17  }
 0x26d   :  { %963 = vperm.xlu0 %2612, %v3404_v53  }
 0x26f   :  { %2608 = vset.pattern.permute.xlu1 %v2720_v3 }
 0x270   :  { %1264 = vperm.xlu1 %2608, %v1224_v35  }
 0x271   :  { %978 = vperm.xlu0 %2612, %v3428_v39  }
 0x274   :  { %1270 = vperm.xlu1 %2608, %v1261_v47  }
 0x275   :  { %983 = vperm.xlu0 %2612, %v3465_v4  }
 0x278   :  { %2609 = vset.pattern.permute.xlu1 %v2719_v1 }
 0x279   :  { %998 = vperm.xlu0 %2612, %v3483_v19   ;;  %993 = vperm.xlu1 %2609, %v3488_v7  }
 0x27d   :  { %1003 = vperm.xlu0 %2612, %v3511_v57   ;;  %2610 = vset.pattern.permute.xlu1 %v2720_v3 }
 0x27e   :  { %1316 = vperm.xlu1 %2610, %v3488_v7  }
 0x281   :  { %1018 = vperm.xlu0 %2612, %v3530_v41  }
 0x282   :  { %1320 = vperm.xlu1 %2610, %v3483_v19  }
 0x285   :  { %2616 = vset.pattern.permute.xlu0 %v2720_v3 }
 0x286   :  { %2611 = vset.pattern.permute.xlu1 %v2719_v1 }
 0x287   :  { %1008 = vperm.xlu1 %2611, %v3507_v43  }
 0x28b   :  { %2613 = vset.pattern.permute.xlu1 %v2720_v3 }
 0x28c   :  { %1328 = vperm.xlu1 %2613, %v3507_v43  }
 0x290   :  { %2614 = vset.pattern.permute.xlu1 %v2719_v1 }
 0x291   :  { %1013 = vperm.xlu1 %2614, %v3534_v50  }
 0x295   :  { %2615 = vset.pattern.permute.xlu1 %v2720_v3 }
 0x296   :  { %1332 = vperm.xlu1 %2615, %v3534_v50  }
 0x29a   :  { %1336 = vperm.xlu1 %2615, %v3530_v41  }
 0x2b0   :  { %v949_v63 = vpop.permute.xlu1 %948 }
 0x2b1   :  { %v3614_v1 = vpop.permute.xlu0 %1276  ;;  %v1026_v54 = vmul.f32 %v3632_v10, %v949_v63 }
 0x2b5   :  { %v3606_v53 = vpop.permute.xlu1 %1280 }
 0x2b9   :  { %v3608_v39 = vpop.permute.xlu1 %1288  ;;  %v3618_v3 = vpop.permute.xlu0 %1292 }
 0x2be   :  { %v954_v22 = vpop.permute.xlu1 %953 }
 0x2bf   :  { %v1027_v18 = vmul.f32 %v3632_v10, %v954_v22 }
 0x2c1   :  { %v3620_v50 = vpop.permute.xlu0 %1308 }
 0x2c3   :  { %v3610_v4 = vpop.permute.xlu1 %1284 }
 0x2c8   :  { %v969_v19 = vpop.permute.xlu1 %968 }
 0x2c9   :  { %v3625_v5 = vpop.permute.xlu0 %1324  ;;  %v1030_v60 = vmul.f32 %v3632_v10, %v969_v19 }
 0x2cd   :  { %v3612_v7 = vpop.permute.xlu1 %1296 }
 0x2d1   :  { %v3616_v43 = vpop.permute.xlu1 %1304 }
 0x2d6   :  { %v974_v57 = vpop.permute.xlu1 %973 }
 0x2d7   :  { %v1031_v9 = vmul.f32 %v3632_v10, %v974_v57 }
 0x2db   :  { %v3622_v41 = vpop.permute.xlu1 %1300 }
 0x2e0   :  { %v989_v59 = vpop.permute.xlu1 %988  ;;  %v937_v23 = vpop.permute.xlu0 %936 }
 0x2e1   :  { %v939_v14 = vmul.f32 %v937_v23, %v536_v0  ;;  %v1034_v23 = vmul.f32 %v3632_v10, %v989_v59 }
 0x2e4   :  { %v944_v8 = vpop.permute.xlu0 %943 }
 0x2e5   :  { %v3629_v52 = vpop.permute.xlu1 %1312  ;;  %v1025_v13 = vmul.f32 %v3632_v10, %v944_v8 }
 0x2e8   :  { %v959_v16 = vpop.permute.xlu0 %958 }
 0x2e9   :  { %v1028_v56 = vmul.f32 %v3632_v10, %v959_v16 }
 0x2ea   :  { %v931_v36 = vpop.permute.xlu1 %930 }
 0x2eb   :  { %v933_v51 = vmul.f32 %v931_v36, %v536_v0 }
 0x2ec   :  { %v964_v44 = vpop.permute.xlu0 %963 }
 0x2ed   :  { %v940_v6 = vsel %vm927_vm5, %v933_v51, %v939_v14  ;;  %v1029_v45 = vmul.f32 %v3632_v10, %v964_v44  ;;  %v1344_v44 = vmul.f32 %v3658_v11, %v3606_v53 }
 0x2ee   :  { %v3639_v40 = vrot.slane %v940_v6, %v3267_v12 }
 0x2ef   :  { %v1265_v42 = vpop.permute.xlu1 %1264 }
 0x2f0   :  { %v1045_v37 = vsub.f32 %v1025_v13, %v3639_v40  ;;  %v1046_v62 = vsub.f32 %v1026_v54, %v3639_v40  ;;  %v1047_v28 = vsub.f32 %v1027_v18, %v3639_v40  ;;  %v979_v30 = vpop.permute.xlu0 %978  ;;  %v1048_v58 = vsub.f32 %v1028_v56, %v3639_v40 }
 0x2f1   :  { %v1049_v29 = vsub.f32 %v1029_v45, %v3639_v40  ;;  %v1050_v27 = vsub.f32 %v1030_v60, %v3639_v40  ;;  %v1032_v17 = vmul.f32 %v3632_v10, %v979_v30  ;;  %v1267_v32 = vmul.f32 %v1265_v42, %v536_v0 }
 0x2f2   :  { %v1061_v61 = vmul.f32 1.442695, %v1045_v37  ;;  %v1063_v15 = vmul.f32 1.442695, %v1046_v62  ;;  %v1065_v20 = vmul.f32 1.442695, %v1047_v28  ;;  %v1051_v35 = vsub.f32 %v1031_v9, %v3639_v40 }
 0x2f3   :  { %v1271_v38 = vpop.permute.xlu1 %1270  ;;  %v1067_v26 = vmul.f32 1.442695, %v1048_v58  ;;  %v1069_v31 = vmul.f32 1.442695, %v1049_v29  ;;  %v1071_v19 = vmul.f32 1.442695, %v1050_v27  ;;  %v1052_v57 = vsub.f32 %v1032_v17, %v3639_v40 }
 0x2f4   :  { %2645 = vpow2.f32 %v1061_v61  ;;  %v1273_v21 = vmul.f32 %v1271_v38, %v536_v0  ;;  %v984_v34 = vpop.permute.xlu0 %983  ;;  %v1073_v8 = vmul.f32 1.442695, %v1051_v35  ;;  %v1054_v14 = vsub.f32 %v1034_v23, %v3639_v40 }
 0x2f5   :  { %2647 = vpow2.f32 %v1063_v15  ;;  %v1033_v46 = vmul.f32 %v3632_v10, %v984_v34  ;;  %v1075_v0 = vmul.f32 1.442695, %v1052_v57  ;;  %v1345_v18 = vmul.f32 %v3658_v11, %v3610_v4 }
 0x2f6   :  { %2649 = vpow2.f32 %v1065_v20  ;;  %v1274_v47 = vsel %vm927_vm5, %v1267_v32, %v1273_v21  ;;  %v1343_v42 = vmul.f32 %v3658_v11, %v3614_v1  ;;  %v1346_v62 = vmul.f32 %v3658_v11, %v3608_v39 }
 0x2f7   :  { %2651 = vpow2.f32 %v1067_v26  ;;  %v3663_v16 = vrot.slane %v1274_v47, %v3277_v24  ;;  %v1053_v36 = vsub.f32 %v1033_v46, %v3639_v40  ;;  %v1079_v30 = vmul.f32 1.442695, %v1054_v14 }
 0x2f8   :  { %v994_v63 = vpop.permute.xlu1 %993  ;;  %v999_v22 = vpop.permute.xlu0 %998  ;;  %2653 = vpow2.f32 %v1069_v31  ;;  %v1347_v61 = vmul.f32 %v3658_v11, %v3618_v3  ;;  %v1348_v20 = vmul.f32 %v3658_v11, %v3612_v7  ;;  %v1350_v21 = vmul.f32 %v3658_v11, %v3616_v43 }
 0x2f9   :  { %v1035_v2 = vmul.f32 %v3632_v10, %v994_v63  ;;  %v1036_v55 = vmul.f32 %v3632_v10, %v999_v22  ;;  %2655 = vpow2.f32 %v1071_v19  ;;  %v1077_v37 = vmul.f32 1.442695, %v1053_v36 }
 0x2fa   :  { %2657 = vpow2.f32 %v1073_v8  ;;  %v1364_v53 = vsub.f32 %v1344_v44, %v3663_v16  ;;  %v1365_v58 = vsub.f32 %v1345_v18, %v3663_v16  ;;  %v1363_v60 = vsub.f32 %v1343_v42, %v3663_v16 }
 0x2fb   :  { %v1055_v6 = vsub.f32 %v1035_v2, %v3639_v40  ;;  %v1056_v13 = vsub.f32 %v1036_v55, %v3639_v40  ;;  %2659 = vpow2.f32 %v1075_v0  ;;  %v1366_v3 = vsub.f32 %v1346_v62, %v3663_v16 }
 0x2fc   :  { %v1004_v51 = vpop.permute.xlu0 %1003  ;;  %2661 = vpow2.f32 %v1077_v37  ;;  %v1381_v34 = vmul.f32 1.442695, %v1364_v53  ;;  %v1349_v27 = vmul.f32 %v3658_v11, %v3622_v41  ;;  %v1383_v17 = vmul.f32 1.442695, %v1365_v58 }
 0x2fd   :  { %v1317_v59 = vpop.permute.xlu1 %1316  ;;  %v1037_v56 = vmul.f32 %v3632_v10, %v1004_v51  ;;  %v1081_v15 = vmul.f32 1.442695, %v1055_v6  ;;  %v1083_v38 = vmul.f32 1.442695, %v1056_v13  ;;  %2663 = vpow2.f32 %v1079_v30 }
 0x2fe   :  { %v2646_v54 = vpop.eup %2645  ;;  %v1368_v7 = vsub.f32 %v1348_v20, %v3663_v16  ;;  %v1379_v31 = vmul.f32 1.442695, %v1363_v60  ;;  %v1367_v43 = vsub.f32 %v1347_v61, %v3663_v16  ;;  %v1352_v19 = vmul.f32 %v3658_v11, %v3629_v52 }
 0x2ff   :  { %v2648_v45 = vpop.eup %2647  ;;  %v1057_v39 = vsub.f32 %v1037_v56, %v3639_v40  ;;  %2665 = vpow2.f32 %v1081_v15  ;;  %v1385_v41 = vmul.f32 1.442695, %v1366_v3  ;;  %v1369_v55 = vsub.f32 %v1349_v27, %v3663_v16 }
 0x300   :  { %v1093_v28 = vadd.f32 %v2648_v45, %v2646_v54  ;;  %v2650_v4 = vpop.eup %2649  ;;  %v2442_v35 = vpack.c.bf16 %v2648_v45, %v2646_v54  ;;  %2667 = vpow2.f32 %v1083_v38  ;;  %v1019_v57 = vpop.permute.xlu0 %1018  ;;  %v1353_v8 = vmul.f32 %v3658_v11, %v1317_v59 }
 0x301   :  { %v3683_v1 = vpop.permute.xlu1 %1320  ;;  %v2652_v9 = vpop.eup %2651  ;;  %v1085_v47 = vmul.f32 1.442695, %v1057_v39  ;;  %2669 = vpow2.f32 %v1381_v34  ;;  %v1389_v14 = vmul.f32 1.442695, %v1368_v7  ;;  %v1387_v0 = vmul.f32 1.442695, %v1367_v43 }
 0x302   :  { %v1094_v29 = vadd.f32 %v2650_v4, %v1093_v28  ;;  %v2654_v32 = vpop.eup %2653  ;;  %2443 = vmatpush3.bf16.msra.mxu1 %v2442_v35  ;;  %2671 = vpow2.f32 %v1383_v17  ;;  %v2445_v51 = vpack.c.bf16 %v2652_v9, %v2650_v4  ;;  %v1040_v6 = vmul.f32 %v3632_v10, %v1019_v57 }
 0x303   :  { %v2656_v22 = vpop.eup %2655  ;;  %2444 = vmatprep.subr.bf16.mxu1 %v2721_v33  ;;  %2673 = vpow2.f32 %v1379_v31  ;;  %v1351_v18 = vmul.f32 %v3658_v11, %v3620_v50  ;;  %v1370_v13 = vsub.f32 %v1350_v21, %v3663_v16  ;;  %v1372_v42 = vsub.f32 %v1352_v19, %v3663_v16 }
 0x304   :  { %v1095_v26 = vadd.f32 %v2652_v9, %v1094_v29  ;;  %v2658_v36 = vpop.eup %2657  ;;  %2675 = vpow2.f32 %v1085_v47  ;;  %v1391_v53 = vmul.f32 1.442695, %v1369_v55  ;;  %v2448_v28 = vpack.c.bf16 %v2656_v22, %v2654_v32 }
 0x305   :  { %v2660_v54 = vpop.eup %2659  ;;  %2677 = vpow2.f32 %v1385_v41  ;;  %v1371_v62 = vsub.f32 %v1351_v18, %v3663_v16  ;;  %v1373_v50 = vsub.f32 %v1353_v8, %v3663_v16  ;;  %v1060_v4 = vsub.f32 %v1040_v6, %v3639_v40 }
 0x306   :  { %v1096_v46 = vadd.f32 %v2654_v32, %v1095_v26  ;;  %v1009_v63 = vpop.permute.xlu1 %1008  ;;  %2446 = vmatpush3.bf16.msra.mxu1 %v2445_v51  ;;  %v2662_v37 = vpop.eup %2661  ;;  %2679 = vpow2.f32 %v1389_v14  ;;  %v1393_v15 = vmul.f32 1.442695, %v1370_v13  ;;  %v1354_v60 = vmul.f32 %v3658_v11, %v3683_v1 }
 0x307   :  { %v1038_v2 = vmul.f32 %v3632_v10, %v1009_v63  ;;  %2447 = vmatprep.subr.bf16.mxu1 %v2721_v33  ;;  %v2664_v30 = vpop.eup %2663  ;;  %2681 = vpow2.f32 %v1387_v0  ;;  %v1397_v38 = vmul.f32 1.442695, %v1372_v42  ;;  %v1355_v21 = vmul.f32 %v3658_v11, %v3625_v5 }
 0x308   :  { %v1097_v23 = vadd.f32 %v2656_v22, %v1096_v46  ;;  %v1395_v3 = vmul.f32 1.442695, %v1371_v62  ;;  %v2451_v34 = vpack.c.bf16 %v2660_v54, %v2658_v36  ;;  %v1399_v1 = vmul.f32 1.442695, %v1373_v50 }
 0x309   :  { %v1058_v52 = vsub.f32 %v1038_v2, %v3639_v40  ;;  %v3711_v61 = vpop.eup %2665  ;;  %v1091_v32 = vmul.f32 1.442695, %v1060_v4  ;;  %v1374_v31 = vsub.f32 %v1354_v60, %v3663_v16  ;;  %v1375_v22 = vsub.f32 %v1355_v21, %v3663_v16 }
 0x30a   :  { %v1098_v44 = vadd.f32 %v2658_v36, %v1097_v23  ;;  %2449 = vmatpush3.bf16.msra.mxu1 %v2448_v28  ;;  %v2668_v20 = vpop.eup %2667  ;;  %v2454_v41 = vpack.c.bf16 %v2664_v30, %v2662_v37  ;;  %v555_v50 = vsub.s32 3, %v3260_v49 }
 0x30b   :  { %v1087_v59 = vmul.f32 1.442695, %v1058_v52  ;;  %v1329_v56 = vpop.permute.xlu1 %1328  ;;  %2450 = vmatprep.subr.bf16.mxu1 %v2721_v33  ;;  %v2670_v9 = vpop.eup %2669  ;;  %v1401_v8 = vmul.f32 1.442695, %v1374_v31  ;;  %v1403_v6 = vmul.f32 1.442695, %v1375_v22 }
 0x30c   :  { %v1099_v45 = vadd.f32 %v2660_v54, %v1098_v44  ;;  %v2672_v26 = vpop.eup %2671  ;;  %v1356_v35 = vmul.f32 %v3658_v11, %v1329_v56  ;;  %v2457_v54 = vpack.c.bf16 %v2668_v20, %v3711_v61 }
 0x30d   :  { %2683 = vpow2.f32 %v1087_v59  ;;  %v2674_v7 = vpop.eup %2673 }
 0x30e   :  { %v1100_v58 = vadd.f32 %v2662_v37, %v1099_v45  ;;  %2685 = vpow2.f32 %v1391_v53  ;;  %2452 = vmatpush3.bf16.msra.mxu1 %v2451_v34  ;;  %v2676_v5 = vpop.eup %2675  ;;  %v1411_v43 = vadd.f32 %v2674_v7, %v2670_v9  ;;  %v1376_v36 = vsub.f32 %v1356_v35, %v3663_v16 }
 0x30f   :  { %2687 = vpow2.f32 %v1393_v15  ;;  %2453 = vmatprep.subr.bf16.mxu1 %v2721_v33  ;;  %v2678_v63 = vpop.eup %2677 }
 0x310   :  { %v1101_v29 = vadd.f32 %v2664_v30, %v1100_v58  ;;  %v1014_v39 = vpop.permute.xlu1 %1013  ;;  %2689 = vpow2.f32 %v1397_v38  ;;  %v1412_v23 = vadd.f32 %v2672_v26, %v1411_v43  ;;  %v2680_v55 = vpop.eup %2679  ;;  %v2469_v52 = vpack.c.bf16 %v2678_v63, %v2672_v26  ;;  %v3741_v38 = vld [vmem:[%s3882_s2] sm:$0xff] }
 0x311   :  { %v1039_v27 = vmul.f32 %v3632_v10, %v1014_v39  ;;  %v2466_v10 = vpack.c.bf16 %v2670_v9, %v2674_v7  ;;  %2691 = vpow2.f32 %v1395_v3  ;;  %v2682_v14 = vpop.eup %2681  ;;  %v1405_v45 = vmul.f32 1.442695, %v1376_v36 }
 0x312   :  { %v1102_v17 = vadd.f32 %v3711_v61, %v1101_v29  ;;  %2693 = vpow2.f32 %v1091_v32  ;;  %2455 = vmatpush3.bf16.msra.mxu1 %v2454_v41  ;;  %v1413_v51 = vadd.f32 %v2678_v63, %v1412_v23  ;;  %v2472_v62 = vpack.c.bf16 %v2680_v55, %v2682_v14 }
 0x313   :  { %v1059_v46 = vsub.f32 %v1039_v27, %v3639_v40  ;;  %2467 = vmatpush3.bf16.msra.mxu0 %v2466_v10  ;;  %2456 = vmatprep.subr.bf16.mxu1 %v2721_v33  ;;  %v556_v39 = vrot.slane %v3741_v38, %v555_v50  ;;  %v2622_v50 = vld [vmem:[%s3884_s7 + $0x10] ss:$8 sps:$4 sm:$0xff]  }
 0x314   :  { %v1103_v47 = vadd.f32 %v2668_v20, %v1102_v17  ;;  %2468 = vmatprep.subr.bf16.mxu0 %v2721_v33  ;;  %v1414_v13 = vadd.f32 %v2682_v14, %v1413_v51 }
 0x315   :  { %v1089_v19 = vmul.f32 1.442695, %v1059_v46  ;;  %v1333_v57 = vpop.permute.xlu1 %1332  ;;  %v624_v32 = vadd.f32 %v3332_v25, %v556_v39  ;;  %v2628_v39 = vld [vmem:[%s3884_s7 + $0x30] ss:$8 sps:$4 sm:$0xff]  }
 0x316   :  { %v1104_v2 = vadd.f32 %v2676_v5, %v1103_v47  ;;  %v1357_v40 = vmul.f32 %v3658_v11, %v1333_v57  ;;  %2458 = vmatpush3.bf16.msra.mxu1 %v2457_v54  ;;  %v1415_v53 = vadd.f32 %v2680_v55, %v1414_v13 }
 0x317   :  { %2695 = vpow2.f32 %v1089_v19  ;;  %v2684_v0 = vpop.eup %2683  ;;  %2470 = vmatpush3.bf16.msra.mxu0 %v2469_v52  ;;  %2459 = vmatprep.subr.bf16.mxu1 %v2721_v33  ;;  %v1433_v57 = vrot.slane %v624_v32, 1 }
 0x318   :  { %v1377_v44 = vsub.f32 %v1357_v40, %v3663_v16  ;;  %2697 = vpow2.f32 %v1399_v1  ;;  %v1105_v59 = vadd.f32 %v2684_v0, %v1104_v2  ;;  %2471 = vmatprep.subr.bf16.mxu0 %v2721_v33  ;;  %v2460_v42 = vpack.c.bf16 %v2684_v0, %v2676_v5  ;;  %v2686_v37 = vpop.eup %2685 }
 0x319   :  { %v1337_v18 = vpop.permute.xlu1 %1336  ;;  %2699 = vpow2.f32 %v1401_v8  ;;  %v2688_v58 = vpop.eup %2687  ;;  %v1416_v61 = vadd.f32 %v2686_v37, %v1415_v53 }
 0x31a   :  { %v1358_v56 = vmul.f32 %v3658_v11, %v1337_v18  ;;  %v1407_v28 = vmul.f32 1.442695, %v1377_v44  ;;  %v2690_v4 = vpop.eup %2689  ;;  %2701 = vpow2.f32 %v1403_v6  ;;  %2461 = vmatpush3.bf16.msra.mxu1 %v2460_v42  ;;  %v2475_v29 = vpack.c.bf16 %v2688_v58, %v2686_v37  ;;  %v2718_v37 = vld [vmem:[%s3877_s0] sm:$0x3] }
 0x31b   :  { %2473 = vmatpush3.bf16.msra.mxu0 %v2472_v62  ;;  %v2692_v15 = vpop.eup %2691  ;;  %2703 = vpow2.f32 %v1405_v45  ;;  %v1417_v20 = vadd.f32 %v2688_v58, %v1416_v61  ;;  %2462 = vmatprep.subr.bf16.mxu1 %v2721_v33  ;;  %v2620_v58 = vld [vmem:[%s3884_s7 + $0x14] ss:$8 sps:$4 sm:$0xff]   ;;  %v2625_v61 = vld [vmem:[%s3884_s7 + $0x20] ss:$8 sps:$4 sm:$0xff]  }
 0x31c   :  { %v1378_v30 = vsub.f32 %v1358_v56, %v3663_v16  ;;  %2474 = vmatprep.subr.bf16.mxu0 %v2721_v33  ;;  %v2694_v60 = vpop.eup %2693  ;;  %2705 = vpow2.f32 %v1407_v28  ;;  %v2478_v17 = vpack.c.bf16 %v2690_v4, %v2692_v15  ;;  %v2617_v28 = vld [vmem:[%s3884_s7 + $0x4] ss:$8 sps:$4 sm:$0xff]  }
 0x31d   :  { %v1418_v9 = vadd.f32 %v2692_v15, %v1417_v20 }
 0x31e   :  { %v1409_v11 = vmul.f32 1.442695, %v1378_v30  ;;  %v2619_v30 = vld [vmem:[%s3884_s7] ss:$8 sps:$4 sm:$0xff]  }
 0x31f   :  { %2476 = vmatpush3.bf16.msra.mxu0 %v2475_v29  ;;  %v1419_v27 = vadd.f32 %v2690_v4, %v1418_v9  ;;  %v2623_v4 = vld [vmem:[%s3884_s7 + $0x24] ss:$8 sps:$4 sm:$0xff]  }
 0x320   :  { %2707 = vpow2.f32 %v1409_v11  ;;  %2477 = vmatprep.subr.bf16.mxu0 %v2721_v33  ;;  %v2629_v9 = vld [vmem:[%s3884_s7 + $0x44] ss:$8 sps:$4 sm:$0xff]  }
 0x321   :  { %v2696_v16 = vpop.eup %2695 }
 0x322   :  { %v1106_v21 = vadd.f32 %v2696_v16, %v1105_v59  ;;  %v2463_v3 = vpack.c.bf16 %v2694_v60, %v2696_v16  ;;  %v2698_v34 = vpop.eup %2697  ;;  %v2626_v16 = vld [vmem:[%s3884_s7 + $0x34] ss:$8 sps:$4 sm:$0xff]  }
 0x323   :  { %v2700_v1 = vpop.eup %2699  ;;  %v1420_v7 = vadd.f32 %v2698_v34, %v1419_v27  ;;  %2479 = vmatpush3.bf16.msra.mxu0 %v2478_v17  ;;  %v2635_v27 = vld [vmem:[%s3884_s7 + $0x64] ss:$8 sps:$4 sm:$0xff]   ;;  %v2638_v17 = vld [vmem:[%s3884_s7 + $0x74] ss:$8 sps:$4 sm:$0xff]  }
 0x324   :  { %v1107_v26 = vadd.f32 %v2694_v60, %v1106_v21  ;;  %2464 = vmatpush3.bf16.msra.mxu1 %v2463_v3  ;;  %2480 = vmatprep.subr.bf16.mxu0 %v2721_v33  ;;  %v2702_v31 = vpop.eup %2701  ;;  %v2481_v46 = vpack.c.bf16 %v2700_v1, %v2698_v34  ;;  %v2631_v21 = vld [vmem:[%s3884_s7 + $0x40] ss:$8 sps:$4 sm:$0xff]   ;;  %v2632_v3 = vld [vmem:[%s3884_s7 + $0x54] ss:$8 sps:$4 sm:$0xff]   ;;  %v2634_v34 = vld [vmem:[%s3884_s7 + $0x50] ss:$8 sps:$4 sm:$0xff]  }
 0x325   :  { %v1421_v35 = vadd.f32 %v2700_v1, %v1420_v7  ;;  %v2704_v5 = vpop.eup %2703  ;;  %2490 = vmatprep.subr.bf16.mxu1 %v2617_v28  ;;  %v2640_v1 = vld [vmem:[%s3884_s7 + $0x70] ss:$8 sps:$4 sm:$0xff]   ;;  %v1931_v7 = vld [vmem:[%s3885_s9] sm:$0xff]  }
 0x326   :  { %v2706_v47 = vpop.eup %2705  ;;  %v2484_v22 = vpack.c.bf16 %v2704_v5, %v2702_v31  ;;  %v1108_v2 = vrot.slane %v1107_v26, 4 }
 0x327   :  { %2324 = vmatmul.mubr.f32.vlgmr.msra.gmra.mrb[2].mxu1 %v624_v32  ;;  %v1422_v43 = vadd.f32 %v2702_v31, %v1421_v35  ;;  %2482 = vmatpush3.bf16.msra.mxu0 %v2481_v46  ;;  %v2022_v32 = vld [vmem:[%s3885_s9 + $0x40] sm:$0xff]   ;;  %v2023_v31 = vld [vmem:[%s3885_s9 + $0x48] sm:$0xff]   ;;  %v2024_v46 = vld [vmem:[%s3885_s9 + $0x50] sm:$0xff]  }
 0x328   :  { %1689 = vmatprep.mubr.f32.mxu1 %v2723_v48  ;;  %2483 = vmatprep.subr.bf16.mxu0 %v2721_v33  ;;  %v1109_v48 = vadd.f32 %v1108_v2, %v1107_v26  ;;  %v2637_v26 = vld [vmem:[%s3884_s7 + $0x60] ss:$8 sps:$4 sm:$0xff]  }
 0x329   :  { %v1423_v63 = vadd.f32 %v2704_v5, %v1422_v43  ;;  %2492 = vmatpush1.bf16.msra.mxu1 %v2619_v30  ;;  %v2015_v35 = vld [vmem:[%s3885_s9 + $0x8] sm:$0xff]   ;;  %v2016_v5 = vld [vmem:[%s3885_s9 + $0x10] sm:$0xff]   ;;  %v2017_v43 = vld [vmem:[%s3885_s9 + $0x18] sm:$0xff]  }
 0x32a   :  { %v2708_v10 = vpop.eup %2707  ;;  %v1110_v23 = vrot.slane %v1109_v48, 2  ;;  %2494 = vmatprep.subr.bf16.mxu1 %v2620_v58 }
 0x32b   :  { %v1424_v25 = vadd.f32 %v2706_v47, %v1423_v63  ;;  %2485 = vmatpush3.bf16.msra.mxu0 %v2484_v22  ;;  %v2487_v19 = vpack.c.bf16 %v2708_v10, %v2706_v47  ;;  %v2025_v47 = vld [vmem:[%s3885_s9 + $0x58] sm:$0xff]   ;;  %v2018_v63 = vld [vmem:[%s3885_s9 + $0x20] sm:$0xff]   ;;  %v2027_v22 = vld [vmem:[%s3885_s9 + $0x68] sm:$0xff]  }
 0x32c   :  { %2486 = vmatprep.subr.bf16.mxu0 %v2721_v33  ;;  %v1111_v40 = vadd.f32 %v1110_v23, %v1109_v48  ;;  %v1574_v48 = vsub.s32 4, %v3260_v49  ;;  %v1579_v23 = vsub.s32 5, %v3260_v49 }
 0x32d   :  { %v1425_v41 = vadd.f32 %v2708_v10, %v1424_v25  ;;  %2496 = vmatpush1.bf16.msra.mxu1 %v2622_v50  ;;  %v2026_v10 = vld [vmem:[%s3885_s9 + $0x60] sm:$0xff]   ;;  %v2019_v25 = vld [vmem:[%s3885_s9 + $0x28] sm:$0xff]  }
 0x32e   :  { %v1112_v8 = vrot.slane %v1111_v40, 1  ;;  %2498 = vmatprep.subr.bf16.mxu1 %v2623_v4 }
 0x32f   :  { %2488 = vmatpush3.bf16.msra.mxu0 %v2487_v19  ;;  %v1426_v55 = vrot.slane %v1425_v41, 4  ;;  %v2028_v19 = vld [vmem:[%s3885_s9 + $0x70] sm:$0xff]  }
 0x330   :  { %v1113_v14 = vadd.f32 %v1112_v8, %v1111_v40  ;;  %2522 = vmatprep.subr.bf16.mxu0 %v2022_v32  ;;  %v1575_v40 = vrot.slane %v3741_v38, %v1574_v48 }
 0x331   :  { %v1427_v36 = vadd.f32 %v1426_v55, %v1425_v41  ;;  %2500 = vmatpush1.bf16.msra.mxu1 %v2625_v61 }
 0x332   :  { %2359 = vmatmul.mubr.f32.vlgmr.msra.gmra.mrb[18].mxu0 %v1433_v57  ;;  %2709 = vrcp.f32 %v1113_v14  ;;  %2502 = vmatprep.subr.bf16.mxu1 %v2626_v16 }
 0x333   :  { %v1428_v51 = vrot.slane %v1427_v36, 2  ;;  %2524 = vmatpush3.bf16.msra.mxu0 %v1931_v7 }
 0x334   :  { %2526 = vmatprep.subr.bf16.mxu0 %v2023_v31 }
 0x335   :  { %v1429_v52 = vadd.f32 %v1428_v51, %v1427_v36  ;;  %2504 = vmatpush1.bf16.msra.mxu1 %v2628_v39  ;;  %v1580_v36 = vrot.slane %v3741_v38, %v1579_v23  ;;  %v1820_v39 = vsub.s32 7, %v3260_v49 }
 0x336   :  { %2506 = vmatprep.subr.bf16.mxu1 %v2629_v9 }
 0x337   :  { %v1430_v44 = vrot.slane %v1429_v52, 1  ;;  %2528 = vmatpush3.bf16.msra.mxu0 %v2015_v35  ;;  %v1821_v9 = vrot.slane %v3741_v38, %v1820_v39 }
 0x338   :  { %2530 = vmatprep.subr.bf16.mxu0 %v2024_v46 }
 0x339   :  { %v1431_v54 = vadd.f32 %v1430_v44, %v1429_v52  ;;  %2508 = vmatpush1.bf16.msra.mxu1 %v2631_v21  ;;  %v2020_v52 = vld [vmem:[%s3885_s9 + $0x30] sm:$0xff]   ;;  %v2029_v44 = vld [vmem:[%s3885_s9 + $0x78] sm:$0xff]  }
 0x33a   :  { %2510 = vmatprep.subr.bf16.mxu1 %v2632_v3  ;;  %v1833_v3 = vld [vmem:[%s3882_s2 + $0x8] ss:$0 sm:$0xff] }
 0x33b   :  { %2711 = vrcp.f32 %v1431_v54  ;;  %2532 = vmatpush3.bf16.msra.mxu0 %v2016_v5 }
 0x33c   :  { %v2710_v0 = vpop.eup %2709  ;;  %2534 = vmatprep.subr.bf16.mxu0 %v2025_v47 }
 0x33d   :  { %2512 = vmatpush1.bf16.msra.mxu1 %v2634_v34 }
 0x33e   :  { %2514 = vmatprep.subr.bf16.mxu1 %v2635_v27 }
 0x33f   :  { %2536 = vmatpush3.bf16.msra.mxu0 %v2017_v43 }
 0x340   :  { %2538 = vmatprep.subr.bf16.mxu0 %v2026_v10 }
 0x341   :  { %2516 = vmatpush1.bf16.msra.mxu1 %v2637_v26 }
 0x342   :  { %2518 = vmatprep.subr.bf16.mxu1 %v2638_v17 }
 0x343   :  { %2540 = vmatpush3.bf16.msra.mxu0 %v2018_v63 }
 0x344   :  { %2542 = vmatprep.subr.bf16.mxu0 %v2027_v22 }
 0x345   :  { %v2712_v13 = vpop.eup %2711  ;;  %2520 = vmatpush1.bf16.msra.mxu1 %v2640_v1 }
 0x347   :  { %2544 = vmatpush3.bf16.msra.mxu0 %v2019_v25 }
 0x348   :  { %2546 = vmatprep.subr.bf16.mxu0 %v2028_v19 }
 0x34b   :  { %2548 = vmatpush3.bf16.msra.mxu0 %v2020_v52 }
 0x34c   :  { %2550 = vmatprep.subr.bf16.mxu0 %v2029_v44 }
 0x3fa   :  { %v1180_v6 = vpop.f32.mrb[2].mxu1 }
 0x3fb   :  { %v1185_v33 = vmul.f32 %v2710_v0, %v1180_v6  ;;  %v2325_v18 = vpop.f32.mrb[3].mxu1  ;;  %v2021_v0 = vld [vmem:[%s3885_s9 + $0x38] sm:$0xff]   ;;  %v1526_v6 = vld [vmem:[%s3886_s8] sm:$0x3] }
 0x3fc   :  { %2552 = vmatpush3.bf16.msra.mxu0 %v2021_v0  ;;  %v1618_v54 = vrot.slane %v1526_v6, %v3267_v12 }
 0x3fd   :  { %1186 = vst [vmem:[#allocation2] sm:$0x1] %v1185_v33  ;;  %v1622_v33 = vrot.slane %v1526_v6, %v3277_v24 }
 0x405   :  { %v1501_v59 = vpop.f32.mrb[18].mxu0 }
 0x406   :  { %v1506_v56 = vmul.f32 %v2712_v13, %v1501_v59  ;;  %v2360_v45 = vpop.f32.mrb[19].mxu0 }
 0x408   :  { %1507 = vst [vmem:[#allocation2 + $0x1] sm:$0x1] %v1506_v56 }
 0x40f   :  { %v1508_v42 = vld [vmem:[#allocation2] sm:$0x3] }
 0x410   :  { %v3753_v53 = vadd.f32 %v2718_v37, %v1508_v42  ;;  %v1732_v37 = vsub.s32 6, %v3260_v49 }
 0x412   :  { %v1559_v62 = vsel %vm118_vm0, %v3753_v53, 0.0  ;;  %v1733_v28 = vrot.slane %v3741_v38, %v1732_v37 }
 0x413   :  { %1560 = vadd.xlane.f32.xlu0 %v1559_v62 }
 0x4a0   :  { %v1561_v11 = vpop.xlane.xlu0 %1560 }
 0x4a1   :  { %v1562_v15 = vmul.f32 0.0078125, %v1561_v11 }
 0x4a3   :  { %v1563_v60 = vsub.f32 %v3753_v53, %v1562_v15 }
 0x4a5   :  { %v1564_v20 = vmul.f32 %v1563_v60, %v1563_v60 }
 0x4a7   :  { %v1565_v29 = vsel %vm118_vm0, %v1564_v20, 0.0 }
 0x4a8   :  { %1566 = vadd.xlane.f32.xlu1 %v1565_v29 }
 0x535   :  { %v1567_v41 = vpop.xlane.xlu1 %1566 }
 0x536   :  { %v1568_v57 = vmul.f32 0.0078125, %v1567_v41 }
 0x538   :  { %v1569_v2 = vadd.f32 1e-05, %v1568_v57 }
 0x53a   :  { %2713 = vrsqrt.f32 %v1569_v2 }
 0x544   :  { %v2714_v55 = vpop.eup %2713 }
 0x545   :  { %v1571_v8 = vmul.f32 %v2714_v55, %v1563_v60 }
 0x547   :  { %v1576_v14 = vmul.f32 %v1575_v40, %v1571_v8 }
 0x549   :  { %v1581_v51 = vadd.f32 %v1580_v36, %v1576_v14 }
 0x54b   :  { %1690 = vmatmul.mubr.f32.vlgmr.msra.gmra.mrb[4].mxu1 %v1581_v51 }
 0x61e   :  { %v1691_v18 = vpop.f32.mrb[4].mxu1 }
 0x61f   :  { %v1692_v13 = vadd.f32 %v1691_v18, %v1618_v54  ;;  %v1693_v59 = vpop.f32.mrb[5].mxu1 }
 0x620   :  { %v1694_v56 = vadd.f32 %v1693_v59, %v1622_v33 }
 0x621   :  { %v1696_v42 = vmax.f32 %v1692_v13, 0.0 }
 0x622   :  { %v1697_v45 = vmax.f32 %v1694_v56, 0.0 }
 0x624   :  { %1798 = vmatprep.mubr.f32.mxu0 %v1697_v45 }
 0x625   :  { %1799 = vmatmul.mubr.f32.vlgmr.msra.gmra.mrb[20].mxu0 %v1696_v42 }
 0x6f8   :  { %v2162_v62 = vpop.f32.mrb[20].mxu0 }
 0x6f9   :  { %v2163_v30 = vpop.f32.mrb[21].mxu0 }
 0x6fa   :  { %v2164_v58 = vadd.f32 %v2163_v30, %v2162_v62 }
 0x6fc   :  { %v1801_v50 = vadd.f32 %v2164_v58, %v1733_v28 }
 0x6fe   :  { %v1804_v12 = vadd.f32 %v1801_v50, %v3753_v53 }
 0x700   :  { %v1805_v24 = vsel %vm118_vm0, %v1804_v12, 0.0 }
 0x701   :  { %1806 = vadd.xlane.f32.xlu0 %v1805_v24 }
 0x78e   :  { %v1807_v4 = vpop.xlane.xlu0 %1806 }
 0x78f   :  { %v1808_v61 = vmul.f32 0.0078125, %v1807_v4 }
 0x791   :  { %v1809_v11 = vsub.f32 %v1804_v12, %v1808_v61 }
 0x793   :  { %v1810_v15 = vmul.f32 %v1809_v11, %v1809_v11 }
 0x795   :  { %v1811_v60 = vsel %vm118_vm0, %v1810_v15, 0.0 }
 0x796   :  { %1812 = vadd.xlane.f32.xlu0 %v1811_v60 }
 0x823   :  { %v1813_v20 = vpop.xlane.xlu0 %1812 }
 0x824   :  { %v1814_v29 = vmul.f32 0.0078125, %v1813_v20 }
 0x826   :  { %v1815_v16 = vadd.f32 1e-05, %v1814_v29 }
 0x828   :  { %2715 = vrsqrt.f32 %v1815_v16 }
 0x832   :  { %v2716_v21 = vpop.eup %2715 }
 0x833   :  { %v1817_v53 = vmul.f32 %v2716_v21, %v1809_v11 }
 0x835   :  { %v1822_v34 = vmul.f32 %v1821_v9, %v1817_v53 }
 0x837   :  { %v1827_v27 = vadd.f32 %v1833_v3, %v1822_v34 }
 0x839   :  { %1828 = vst [vmem:[%s3887_s10] sm:$0x3] %v1827_v27 }

// kernel: transformer_forward.9
= control target key start
LH: loop header
LB: loop body
LE: loop exit
PB: predicated region body
PF: predicated region fallthrough
CT: control target
= control target key end

     0   :  { %v651_v2 = vmov 0.0   ;;  %s820_s0 = inlined_call_operand.vmem [shape: f32[2,128], index: 0, kind: input, shape index: {}]   ;;  %s821_s1 = inlined_call_operand.vmem [shape: bf16[128,256], index: 1, kind: input, shape index: {}]   ;;  %s822_s2 = inlined_call_operand.vmem [shape: f32[3,256], index: 2, kind: input, shape index: {}]   ;;  %s823_s3 = inlined_call_operand.vmem [shape: bf16[256,32], index: 3, kind: input, shape index: {}]   ;;  %s824_s4 = inlined_call_operand.vmem [shape: f32[1,32], index: 4, kind: input, shape index: {}]   ;;  %s825_s5 = inlined_call_operand.hbm [shape: f32[2,32], index: 5, kind: output, shape index: {}]  }
   0x1   :  { %v597_v0 = vld [vmem:[%s821_s1 + $0x4] ss:$8 sps:$4 sm:$0xff]   ;;  %v599_v1 = vld [vmem:[%s821_s1] ss:$8 sps:$4 sm:$0xff]   ;;  %154 = vmatprep.mubr.f32.mxu0 %v651_v2  ;;  %v600_v3 = vld [vmem:[%s821_s1 + $0x14] ss:$8 sps:$4 sm:$0xff]  }
   0x2   :  { %516 = vmatprep.subr.bf16.mxu0 %v597_v0  ;;  %v602_v4 = vld [vmem:[%s821_s1 + $0x10] ss:$8 sps:$4 sm:$0xff]   ;;  %v603_v5 = vld [vmem:[%s821_s1 + $0x24] ss:$8 sps:$4 sm:$0xff]   ;;  %v605_v6 = vld [vmem:[%s821_s1 + $0x20] ss:$8 sps:$4 sm:$0xff]  }
   0x3   :  { %518 = vmatpush1.bf16.msra.mxu0 %v599_v1  ;;  %v606_v7 = vld [vmem:[%s821_s1 + $0x34] ss:$8 sps:$4 sm:$0xff]   ;;  %v608_v8 = vld [vmem:[%s821_s1 + $0x30] ss:$8 sps:$4 sm:$0xff]  }
   0x4   :  { %520 = vmatprep.subr.bf16.mxu0 %v600_v3 }
   0x7   :  { %522 = vmatpush1.bf16.msra.mxu0 %v602_v4 }
   0x8   :  { %524 = vmatprep.subr.bf16.mxu0 %v603_v5 }
   0xb   :  { %526 = vmatpush1.bf16.msra.mxu0 %v605_v6 }
   0xc   :  { %10 = vsyncpa [#allocation3], 0  ;;  %528 = vmatprep.subr.bf16.mxu0 %v606_v7  ;;  %v609_v9 = vld [vmem:[%s821_s1 + $0x44] ss:$8 sps:$4 sm:$0xff]   ;;  %v611_v10 = vld [vmem:[%s821_s1 + $0x40] ss:$8 sps:$4 sm:$0xff]   ;;  %v72_v18 = vlaneseq }
   0xd   :  { %v612_v11 = vld [vmem:[%s821_s1 + $0x54] ss:$8 sps:$4 sm:$0xff]   ;;  %v614_v12 = vld [vmem:[%s821_s1 + $0x50] ss:$8 sps:$4 sm:$0xff]   ;;  %v615_v13 = vld [vmem:[%s821_s1 + $0x64] ss:$8 sps:$4 sm:$0xff]  }
   0xe   :  { %v617_v14 = vld [vmem:[%s821_s1 + $0x60] ss:$8 sps:$4 sm:$0xff]   ;;  %v618_v15 = vld [vmem:[%s821_s1 + $0x74] ss:$8 sps:$4 sm:$0xff]   ;;  %v620_v16 = vld [vmem:[%s821_s1 + $0x70] ss:$8 sps:$4 sm:$0xff]  }
   0xf   :  { %530 = vmatpush1.bf16.msra.mxu0 %v608_v8  ;;  %v22_v17 = vld [vmem:[%s820_s0] sm:$0x3]  ;;  %v734_v19 = vshrl.u32 %v72_v18, 7  ;;  %vm161_vm0 = vcmask 1041408   ;;  %v473_v36 = vld [vmem:[%s823_s3 + $0x48] sm:$0xff]   ;;  %v474_v47 = vld [vmem:[%s823_s3 + $0x50] sm:$0xff]  }
  0x10   :  { %532 = vmatprep.subr.bf16.mxu0 %v609_v9  ;;  %v740_v21 = vld [vmem:[%s822_s2] sm:$0x77]  ;;  %v465_v37 = vld [vmem:[%s823_s3 + $0x8] sm:$0xff]   ;;  %v466_v48 = vld [vmem:[%s823_s3 + $0x10] sm:$0xff]   ;;  %s652_s6 = smov [#allocation2]   ;;  %vm384_vm2 = vcmask 254976  }
  0x11   :  { %v74_v20 = vsub.s32 0, %v734_v19  ;;  %v78_v22 = vsub.s32 4, %v734_v19  ;;  %v472_v34 = vld [vmem:[%s823_s3 + $0x40] sm:$0xff]   ;;  %v475_v49 = vld [vmem:[%s823_s3 + $0x58] sm:$0xff]   ;;  %v477_v53 = vld [vmem:[%s823_s3 + $0x68] sm:$0xff]   ;;  %v185_v62 = vsub.s32 1, %v734_v19 }
  0x12   :  { %v402_v35 = vld [vmem:[%s823_s3] sm:$0xff]   ;;  %548 = vmatprep.subr.bf16.mxu1 %v472_v34  ;;  %v467_v50 = vld [vmem:[%s823_s3 + $0x18] sm:$0xff]   ;;  %v469_v54 = vld [vmem:[%s823_s3 + $0x28] sm:$0xff]   ;;  %v189_v63 = vsub.s32 5, %v734_v19  ;;  %v205_v0 = vsub.s32 2, %v734_v19  ;;  %v209_v1 = vsub.s32 6, %v734_v19 }
  0x13   :  { %534 = vmatpush1.bf16.msra.mxu0 %v611_v10  ;;  %v75_v23 = vrot.slane %v740_v21, %v74_v20  ;;  %v79_v24 = vrot.slane %v740_v21, %v78_v22  ;;  %550 = vmatpush3.bf16.msra.mxu1 %v402_v35  ;;  %v476_v51 = vld [vmem:[%s823_s3 + $0x60] sm:$0xff]   ;;  %v478_v55 = vld [vmem:[%s823_s3 + $0x70] sm:$0xff]   ;;  %v479_v57 = vld [vmem:[%s823_s3 + $0x78] sm:$0xff]   ;;  %v186_v3 = vrot.slane %v740_v21, %v185_v62 }
  0x14   :  { %536 = vmatprep.subr.bf16.mxu0 %v612_v11  ;;  %552 = vmatprep.subr.bf16.mxu1 %v473_v36  ;;  %v468_v52 = vld [vmem:[%s823_s3 + $0x20] sm:$0xff]   ;;  %v470_v56 = vld [vmem:[%s823_s3 + $0x30] sm:$0xff]   ;;  %v471_v58 = vld [vmem:[%s823_s3 + $0x38] sm:$0xff]   ;;  %v190_v2 = vrot.slane %v740_v21, %v189_v63  ;;  %v210_v4 = vrot.slane %v740_v21, %v209_v1  ;;  %v206_v5 = vrot.slane %v740_v21, %v205_v0 }
  0x15   :  { %v85_v25 = vrot.slane %v75_v23, %v74_v20  ;;  %v89_v26 = vrot.slane %v79_v24, %v74_v20  ;;  %v196_v7 = vrot.slane %v186_v3, %v185_v62  ;;  %v400_v20 = vld [vmem:[%s824_s4] ss:$0 sm:$0xff]  ;;  %s392_s4 = sshll.u32 %s652_s6, 4  ;;  %s393_s4 = int_to_ptr.vmem [resolvable:$true] %s392_s4 }
  0x16   :  { %v200_v6 = vrot.slane %v190_v2, %v185_v62  ;;  %v220_v10 = vrot.slane %v210_v4, %v205_v0  ;;  %s627_s7 = scalar_lea.vmem %s393_s4, 32  ;;  %p632_p1 = scmp.lt.s32.totalorder %s393_s4, %s393_s4 }
  0x17   :  { %538 = vmatpush1.bf16.msra.mxu0 %v614_v12  ;;  %554 = vmatpush3.bf16.msra.mxu1 %v465_v37  ;;  %v216_v12 = vrot.slane %v206_v5, %v205_v0  ;;  %p628_p0 = scmp.ne.s32.totalorder %s393_s4, %s627_s7  ;;  %p633_p2 = scmp.lt.s32.totalorder %s627_s7, %s627_s7 }
  0x18   :  { %540 = vmatprep.subr.bf16.mxu0 %v615_v13  ;;  %556 = vmatprep.subr.bf16.mxu1 %v474_v47 }
  0x19   :  { %p634_p3 = por %p633_p2, %p632_p1 }
  0x1b   :  { %542 = vmatpush1.bf16.msra.mxu0 %v617_v14  ;;  %558 = vmatpush3.bf16.msra.mxu1 %v466_v48  ;;  %p635_p4 = pnand %p634_p3, %p628_p0 }
  0x1c   :  { %544 = vmatprep.subr.bf16.mxu0 %v618_v15  ;;  %560 = vmatprep.subr.bf16.mxu1 %v475_v49 }
  0x1f   :  { %546 = vmatpush1.bf16.msra.mxu0 %v620_v16  ;;  %562 = vmatpush3.bf16.msra.mxu1 %v467_v50 }
  0x20   :  { %564 = vmatprep.subr.bf16.mxu1 %v476_v51 }
  0x22   :  { %155 = vmatmul.mubr.f32.vlgmr.msra.gmra.mrb[0].mxu0 %v22_v17 }
  0x23   :  { %566 = vmatpush3.bf16.msra.mxu1 %v468_v52 }
  0x24   :  { %568 = vmatprep.subr.bf16.mxu1 %v477_v53 }
  0x27   :  { %570 = vmatpush3.bf16.msra.mxu1 %v469_v54 }
  0x28   :  { %572 = vmatprep.subr.bf16.mxu1 %v478_v55 }
  0x2b   :  { %574 = vmatpush3.bf16.msra.mxu1 %v470_v56 }
  0x2c   :  { %576 = vmatprep.subr.bf16.mxu1 %v479_v57 }
  0x2f   :  { %578 = vmatpush3.bf16.msra.mxu1 %v471_v58 }
  0xf5   :  { %v156_v27 = vpop.f32.mrb[0].mxu0 }
  0xf6   :  { %v157_v28 = vadd.f32 %v156_v27, %v85_v25  ;;  %v158_v29 = vpop.f32.mrb[1].mxu0 }
  0xf7   :  { %v159_v30 = vadd.f32 %v158_v29, %v89_v26 }
  0xf8   :  { %v162_v31 = vsel %vm161_vm0, %v157_v28, 0.0 }
  0xf9   :  { %v163_v32 = vsel %vm161_vm0, %v159_v30, 0.0 }
  0xfa   :  { %v164_v33 = vadd.f32 %v163_v32, %v162_v31 }
  0xfc   :  { %165 = vadd.xlane.f32.xlu0 %v164_v33 }
 0x189   :  { %v166_v38 = vpop.xlane.xlu0 %165 }
 0x18a   :  { %v168_v39 = vmul.f32 0.00390625, %v166_v38 }
 0x18c   :  { %v169_v40 = vsub.f32 %v157_v28, %v168_v39  ;;  %v170_v41 = vsub.f32 %v159_v30, %v168_v39 }
 0x18e   :  { %v171_v42 = vmul.f32 %v169_v40, %v169_v40  ;;  %v172_v43 = vmul.f32 %v170_v41, %v170_v41 }
 0x190   :  { %v173_v44 = vsel %vm161_vm0, %v171_v42, 0.0  ;;  %v174_v45 = vsel %vm161_vm0, %v172_v43, 0.0 }
 0x191   :  { %v175_v46 = vadd.f32 %v174_v45, %v173_v44 }
 0x193   :  { %176 = vadd.xlane.f32.xlu0 %v175_v46 }
 0x220   :  { %v177_v59 = vpop.xlane.xlu0 %176 }
 0x221   :  { %v178_v60 = vmul.f32 0.00390625, %v177_v59 }
 0x223   :  { %v179_v61 = vadd.f32 1e-05, %v178_v60 }
 0x225   :  { %621 = vrsqrt.f32 %v179_v61 }
 0x22f   :  { %v622_v8 = vpop.eup %621 }
 0x230   :  { %v182_v9 = vmul.f32 %v622_v8, %v170_v41  ;;  %v181_v11 = vmul.f32 %v622_v8, %v169_v40 }
 0x232   :  { %v202_v13 = vmul.f32 %v200_v6, %v182_v9  ;;  %v201_v14 = vmul.f32 %v196_v7, %v181_v11 }
 0x234   :  { %v222_v15 = vadd.f32 %v220_v10, %v202_v13  ;;  %v221_v16 = vadd.f32 %v216_v12, %v201_v14 }
 0x236   :  { %v224_v17 = vmax.f32 %v222_v15, 0.0  ;;  %v223_v18 = vmax.f32 %v221_v16, 0.0 }
 0x238   :  { %360 = vmatprep.mubr.f32.mxu1 %v224_v17 }
 0x239   :  { %361 = vmatmul.mubr.f32.vlgmr.msra.gmra.mrb[0].mxu1 %v223_v18 }
 0x30c   :  { %v512_v19 = vpop.f32.mrb[0].mxu1 }
 0x30d   :  { %v513_v21 = vpop.f32.mrb[1].mxu1 }
 0x30e   :  { %v514_v22 = vadd.f32 %v513_v21, %v512_v19 }
 0x310   :  { %v363_v23 = vadd.f32 %v514_v22, %v400_v20 }
 0x312   :  { %v369_v24 = vand.u32 2147483647, %v363_v23  ;;  %v366_v35 = vmax.f32 %v363_v23, 0.0  ;;  %vm367_vm3 = vcmp.ne.f32.partialorder %v363_v23, %v363_v23 }
 0x314   :  { %v370_v25 = vsub.f32 0.0, %v369_v24 }
 0x316   :  { %v371_v26 = vmul.f32 1.442695, %v370_v25 }
 0x318   :  { %623 = vpow2.f32 %v371_v26 }
 0x322   :  { %v624_v27 = vpop.eup %623 }
 0x323   :  { %v373_v28 = vadd.f32 1.0, %v624_v27  ;;  %v376_v29 = vmul.f32 -0.5, %v624_v27  ;;  %v379_v31 = vand.u32 2147483647, %v624_v27 }
 0x325   :  { %625 = vlog2.f32 %v373_v28  ;;  %v377_v30 = vadd.f32 1.0, %v376_v29  ;;  %vm380_vm1 = vcmp.lt.f32.partialorder %v379_v31, 0.0004427343 }
 0x327   :  { %v378_v34 = vmul.f32 %v624_v27, %v377_v30 }
 0x32f   :  { %v626_v32 = vpop.eup %625 }
 0x330   :  { %v375_v33 = vmul.f32 0.6931472, %v626_v32 }
 0x332   :  { %v381_v36 = vsel %vm380_vm1, %v378_v34, %v375_v33 }
 0x333   :  { %v382_v37 = vadd.f32 %v381_v36, %v366_v35 }
 0x335   :  { %v383_v38 = vsel %vm367_vm3, %v363_v23, %v382_v37 }
 0x336   :  { %385 = vst.msk [vmem:[#allocation2] sm:$0x3] %vm384_vm2, %v383_v38 }
 0x337   :  { %638 = shalt.err (!%p635_p4)
}
 0x338   :  { %s639_s10 = scalar_lea.hbm %s825_s5, 32 }
 0x339   :  { %p640_p5 = scmp.ne.s32.totalorder %s825_s5, %s639_s10  ;;  %p643_p6 = scmp.lt.u32.totalorder %s639_s10, %s825_s5 }
 0x33b   :  { %p645_p7 = pnand %p643_p6, %p640_p5 }
 0x33d   :  { %648 = shalt.err (!%p645_p7)
}
 0x33e   :  { %395 = dma.vmem_to_hbm [thread:$0]  %s393_s4, 32, %s825_s5, [#allocation3]  }
 0x33f   :  { %649 = dma.done.wait [#allocation3], 32  }
 0x340   :  { %650 = vsyncadd [#allocation3], 4294967264 }
 0x341   :  { %399 = vsyncpa [#allocation3], 1 }

// kernel: transformer_forward.8
= control target key start
LH: loop header
LB: loop body
LE: loop exit
PB: predicated region body
PF: predicated region fallthrough
CT: control target
= control target key end

     0   :  { %vm133_vm0 = vcmask 1041408   ;;  %v4531_v1 = vmov 0   ;;  %v4532_v3 = vmov 1   ;;  %vm158_vm1 = vcmask 15360   ;;  %s6315_s0 = inlined_call_operand.vmem [shape: f32[2,128], index: 0, kind: input, shape index: {}]   ;;  %s6316_s5 = inlined_call_operand.vmem [shape: f32[128,4], index: 5, kind: input, shape index: {}]   ;;  %s6317_s1 = inlined_call_operand.vmem [shape: f32[128,2], index: 1, kind: input, shape index: {}]   ;;  %s6318_s6 = inlined_call_operand.vmem [shape: bf16[128,128], index: 6, kind: input, shape index: {}]   ;;  %s6319_s8 = inlined_call_operand.vmem [shape: bf16[128,128], index: 8, kind: input, shape index: {}]   ;;  %s6320_s4 = inlined_call_operand.vmem [shape: f32[13,128], index: 4, kind: input, shape index: {}]   ;;  %s6321_s7 = inlined_call_operand.vmem [shape: bf16[128,128], index: 7, kind: input, shape index: {}]   ;;  %s6322_s9 = inlined_call_operand.vmem [shape: bf16[128,128], index: 9, kind: input, shape index: {}]   ;;  %s6323_s3 = inlined_call_operand.vmem [shape: f32[128,2], index: 3, kind: input, shape index: {}]   ;;  %s6324_s10 = inlined_call_operand.vmem [shape: bf16[128,128], index: 10, kind: input, shape index: {}]   ;;  %s6325_s11 = inlined_call_operand.vmem [shape: bf16[128,128], index: 11, kind: input, shape index: {}]   ;;  %s6326_s2 = inlined_call_operand.vmem [shape: f32[2,128], index: 2, kind: input, shape index: {}]   ;;  %s6327_s12 = inlined_call_operand.vmem [shape: bf16[128,256], index: 12, kind: input, shape index: {}]   ;;  %s6328_s14 = inlined_call_operand.vmem [shape: bf16[256,128], index: 14, kind: input, shape index: {}]   ;;  %s6329_s13 = inlined_call_operand.vmem [shape: f32[1,256], index: 13, kind: input, shape index: {}]   ;;  %s6330_s15 = inlined_call_operand.vmem [shape: f32[2,128], index: 15, kind: output, shape index: {}]  }
   0x1   :  { %v4621_v0 = vld [vmem:[%s6315_s0] sm:$0x3]  ;;  %4281 = vset.pattern.permute.xlu1 %v4531_v1  ;;  %4282 = vset.pattern.permute.xlu0 %v4532_v3  ;;  %v4636_v5 = vld [vmem:[%s6316_s5 + $0x8] sm:$0xff]  ;;  %v4651_v8 = vld [vmem:[%s6317_s1 + $0x10] sm:$0xff]  ;;  %vm4534_vm2 = vmmov 0   ;;  %vm867_vm3 = vcmask 7168  }
   0x2   :  { %v4627_v2 = vld [vmem:[%s6316_s5] sm:$0xff]  ;;  %v134_v4 = vsel %vm133_vm0, %v4621_v0, 0.0  ;;  %v4646_v7 = vld [vmem:[%s6317_s1 + $0x8] sm:$0xff]  ;;  %v4656_v9 = vld [vmem:[%s6317_s1 + $0x18] sm:$0xff]  ;;  %v162_v12 = vsel %vm158_vm1, %v4651_v8, 0.0  ;;  %vm1202_vm4 = vcmask 15368  }
   0x3   :  { %287 = vperm.xlu1 %4281, %v4627_v2   ;;  %135 = vadd.xlane.f32.xlu0 %v134_v4  ;;  %v4641_v6 = vld [vmem:[%s6317_s1] sm:$0xff]  ;;  %v160_v11 = vsel %vm158_vm1, %v4646_v7, 0.0  ;;  %v164_v15 = vsel %vm158_vm1, %v4656_v9, 0.0  ;;  %v4675_v16 = vld [vmem:[%s6317_s1 + $0x28] sm:$0xff]  ;;  %v4684_v19 = vld [vmem:[%s6317_s1 + $0x30] sm:$0xff] }
   0x4   :  { %v159_v10 = vsel %vm158_vm1, %v4641_v6, 0.0  ;;  %v4668_v13 = vld [vmem:[%s6317_s1 + $0x20] sm:$0xff]  ;;  %v168_v21 = vsel %vm158_vm1, %v4675_v16, 0.0  ;;  %v4691_v22 = vld [vmem:[%s6316_s5 + $0x10] sm:$0xff]  ;;  %v4696_v23 = vld [vmem:[%s6317_s1 + $0x38] sm:$0xff]  ;;  %v170_v25 = vsel %vm158_vm1, %v4684_v19, 0.0 }
   0x5   :  { %v161_v14 = vadd.f32 %v160_v11, %v159_v10  ;;  %v166_v18 = vsel %vm158_vm1, %v4668_v13, 0.0  ;;  %v4704_v26 = vld [vmem:[%s6317_s1 + $0x40] sm:$0xff]  ;;  %v172_v28 = vsel %vm158_vm1, %v4696_v23, 0.0  ;;  %v4712_v29 = vld [vmem:[%s6316_s5 + $0x18] sm:$0xff]  ;;  %v4717_v30 = vld [vmem:[%s6317_s1 + $0x48] sm:$0xff] }
   0x6   :  { %v174_v32 = vsel %vm158_vm1, %v4704_v26, 0.0  ;;  %v4724_v33 = vld [vmem:[%s6317_s1 + $0x50] sm:$0xff]  ;;  %v176_v35 = vsel %vm158_vm1, %v4717_v30, 0.0  ;;  %v4732_v36 = vld [vmem:[%s6317_s1 + $0x58] sm:$0xff]  ;;  %v4739_v39 = vld [vmem:[%s6317_s1 + $0x60] sm:$0xff] }
   0x7   :  { %292 = vperm.xlu1 %4281, %v4636_v5   ;;  %v163_v17 = vadd.f32 %v162_v12, %v161_v14  ;;  %v178_v38 = vsel %vm158_vm1, %v4724_v33, 0.0  ;;  %v180_v41 = vsel %vm158_vm1, %v4732_v36, 0.0  ;;  %v4749_v42 = vld [vmem:[%s6317_s1 + $0x68] sm:$0xff]  ;;  %v182_v44 = vsel %vm158_vm1, %v4739_v39, 0.0  ;;  %v4756_v45 = vld [vmem:[%s6316_s5 + $0x40] sm:$0xff]  ;;  %v4761_v46 = vld [vmem:[%s6317_s1 + $0x70] sm:$0xff] }
   0x8   :  { %v184_v48 = vsel %vm158_vm1, %v4749_v42, 0.0  ;;  %v4770_v49 = vld [vmem:[%s6317_s1 + $0x78] sm:$0xff]  ;;  %v186_v51 = vsel %vm158_vm1, %v4761_v46, 0.0  ;;  %v4778_v52 = vld [vmem:[%s6316_s5 + $0x20] sm:$0xff]  ;;  %v4787_v56 = vld [vmem:[%s6316_s5 + $0x28] sm:$0xff] }
   0x9   :  { %v165_v20 = vadd.f32 %v164_v15, %v163_v17  ;;  %v188_v54 = vsel %vm158_vm1, %v4770_v49, 0.0  ;;  %v4796_v4 = vld [vmem:[%s6316_s5 + $0x30] sm:$0xff]  ;;  %v4821_v17 = vld [vmem:[%s6316_s5 + $0x38] sm:$0xff] }
   0xb   :  { %4283 = vset.pattern.permute.xlu1 %v4532_v3  ;;  %v167_v24 = vadd.f32 %v166_v18, %v165_v20 }
   0xc   :  { %386 = vperm.xlu1 %4283, %v4636_v5  }
   0xd   :  { %v169_v27 = vadd.f32 %v168_v21, %v167_v24 }
   0xf   :  { %v171_v31 = vadd.f32 %v170_v25, %v169_v27 }
  0x10   :  { %4284 = vset.pattern.permute.xlu1 %v4531_v1 }
  0x11   :  { %297 = vperm.xlu1 %4284, %v4691_v22   ;;  %v173_v34 = vadd.f32 %v172_v28, %v171_v31 }
  0x13   :  { %v175_v37 = vadd.f32 %v174_v32, %v173_v34 }
  0x15   :  { %302 = vperm.xlu1 %4284, %v4712_v29   ;;  %v177_v40 = vadd.f32 %v176_v35, %v175_v37 }
  0x17   :  { %v179_v43 = vadd.f32 %v178_v38, %v177_v40  ;;  %v4868_v38 = vld [vmem:[%s6316_s5 + $0x48] sm:$0xff] }
  0x19   :  { %4285 = vset.pattern.permute.xlu1 %v4532_v3  ;;  %382 = vperm.xlu0 %4282, %v4627_v2   ;;  %v181_v47 = vadd.f32 %v180_v41, %v179_v43 }
  0x1a   :  { %390 = vperm.xlu1 %4285, %v4691_v22  }
  0x1b   :  { %v183_v50 = vadd.f32 %v182_v44, %v181_v47 }
  0x1d   :  { %4290 = vset.pattern.permute.xlu0 %v4531_v1  ;;  %v185_v53 = vadd.f32 %v184_v48, %v183_v50 }
  0x1e   :  { %394 = vperm.xlu1 %4285, %v4712_v29   ;;  %327 = vperm.xlu0 %4290, %v4756_v45  }
  0x1f   :  { %v187_v55 = vadd.f32 %v186_v51, %v185_v53 }
  0x21   :  { %v189_v57 = vadd.f32 %v188_v54, %v187_v55  ;;  %v2999_v55 = vld [vmem:[%s6318_s6] sm:$0xff]  }
  0x22   :  { %4286 = vset.pattern.permute.xlu1 %v4531_v1 }
  0x23   :  { %307 = vperm.xlu1 %4286, %v4778_v52   ;;  %v190_v58 = vrot.slane %v189_v57, 4 }
  0x25   :  { %v191_v59 = vadd.f32 %v190_v58, %v189_v57 }
  0x27   :  { %312 = vperm.xlu1 %4286, %v4787_v56   ;;  %v192_v60 = vrot.slane %v191_v59, 2 }
  0x29   :  { %v193_v61 = vadd.f32 %v192_v60, %v191_v59  ;;  %v3254_v59 = vld [vmem:[%s6318_s6 + $0x8] sm:$0xff]  }
  0x2b   :  { %4287 = vset.pattern.permute.xlu1 %v4532_v3  ;;  %v194_v62 = vrot.slane %v193_v61, 1 }
  0x2c   :  { %398 = vperm.xlu1 %4287, %v4778_v52  }
  0x2d   :  { %v195_v63 = vadd.f32 %v194_v62, %v193_v61 }
  0x2f   :  { %v4798_v10 = vmul.f32 0.0078125, %v195_v63 }
  0x30   :  { %402 = vperm.xlu1 %4287, %v4787_v56  }
  0x31   :  { %v4803_v11 = vsub.f32 %v4641_v6, %v4798_v10  ;;  %v4807_v12 = vsub.f32 %v4646_v7, %v4798_v10  ;;  %v4811_v14 = vsub.f32 %v4651_v8, %v4798_v10  ;;  %v4815_v15 = vsub.f32 %v4656_v9, %v4798_v10 }
  0x32   :  { %v4825_v6 = vsub.f32 %v4668_v13, %v4798_v10  ;;  %v4835_v18 = vsub.f32 %v4675_v16, %v4798_v10  ;;  %v4844_v24 = vsub.f32 %v4684_v19, %v4798_v10  ;;  %v4851_v28 = vsub.f32 %v4696_v23, %v4798_v10 }
  0x33   :  { %v213_v7 = vmul.f32 %v4803_v11, %v4803_v11  ;;  %v214_v8 = vmul.f32 %v4807_v12, %v4807_v12  ;;  %v215_v9 = vmul.f32 %v4811_v14, %v4811_v14  ;;  %v216_v20 = vmul.f32 %v4815_v15, %v4815_v15 }
  0x34   :  { %4288 = vset.pattern.permute.xlu1 %v4531_v1  ;;  %v217_v25 = vmul.f32 %v4825_v6, %v4825_v6  ;;  %v218_v31 = vmul.f32 %v4835_v18, %v4835_v18  ;;  %v4860_v19 = vsub.f32 %v4704_v26, %v4798_v10  ;;  %v219_v35 = vmul.f32 %v4844_v24, %v4844_v24 }
  0x35   :  { %317 = vperm.xlu1 %4288, %v4796_v4   ;;  %v229_v21 = vsel %vm158_vm1, %v213_v7, 0.0  ;;  %v230_v13 = vsel %vm158_vm1, %v214_v8, 0.0  ;;  %v232_v16 = vsel %vm158_vm1, %v215_v9, 0.0  ;;  %v234_v32 = vsel %vm158_vm1, %v216_v20, 0.0  ;;  %v3063_v7 = vld [vmem:[%s6319_s8] sm:$0xff]   ;;  %v4920_v8 = vld [vmem:[%s6316_s5 + $0x50] sm:$0xff] }
  0x36   :  { %v231_v27 = vadd.f32 %v230_v13, %v229_v21  ;;  %v236_v23 = vsel %vm158_vm1, %v217_v25, 0.0  ;;  %v4872_v40 = vsub.f32 %v4717_v30, %v4798_v10  ;;  %v220_v41 = vmul.f32 %v4851_v28, %v4851_v28  ;;  %v3255_v20 = vld [vmem:[%s6318_s6 + $0x10] sm:$0xff]  }
  0x37   :  { %v238_v26 = vsel %vm158_vm1, %v218_v31, 0.0  ;;  %v4880_v44 = vsub.f32 %v4724_v33, %v4798_v10  ;;  %v221_v47 = vmul.f32 %v4860_v19, %v4860_v19  ;;  %v240_v48 = vsel %vm158_vm1, %v219_v35, 0.0  ;;  %v4943_v31 = vld [vmem:[%s6316_s5 + $0x58] sm:$0xff] }
  0x38   :  { %v233_v34 = vadd.f32 %v232_v16, %v231_v27  ;;  %v4888_v50 = vsub.f32 %v4732_v36, %v4798_v10  ;;  %v222_v51 = vmul.f32 %v4872_v40, %v4872_v40  ;;  %v242_v53 = vsel %vm158_vm1, %v220_v41, 0.0  ;;  %v3268_v16 = vld [vmem:[%s6319_s8 + $0x8] sm:$0xff]  }
  0x39   :  { %322 = vperm.xlu1 %4288, %v4821_v17   ;;  %v4533_v33 = vmov 0.0|0.0   ;;  %v223_v57 = vmul.f32 %v4880_v44, %v4880_v44  ;;  %v244_v36 = vsel %vm158_vm1, %v221_v47, 0.0  ;;  %v4909_v60 = vsub.f32 %v4739_v39, %v4798_v10 }
  0x3a   :  { %v235_v37 = vadd.f32 %v234_v32, %v233_v34  ;;  %3938 = vmatprep.subr.bf16.mxu0 %v4533_v33  ;;  %3962 = vmatprep.subr.bf16.mxu1 %v4533_v33  ;;  %v224_v61 = vmul.f32 %v4888_v50, %v4888_v50  ;;  %v246_v62 = vsel %vm158_vm1, %v222_v51, 0.0  ;;  %v4931_v21 = vsub.f32 %v4749_v42, %v4798_v10  ;;  %v3256_v32 = vld [vmem:[%s6318_s6 + $0x18] sm:$0xff]  }
  0x3b   :  { %3940 = vmatpush3.bf16.msra.mxu0 %v2999_v55  ;;  %v248_v9 = vsel %vm158_vm1, %v223_v57, 0.0  ;;  %3964 = vmatpush3.bf16.msra.mxu1 %v3063_v7  ;;  %v225_v13 = vmul.f32 %v4909_v60, %v4909_v60  ;;  %v4952_v34 = vsub.f32 %v4761_v46, %v4798_v10  ;;  %v3257_v46 = vld [vmem:[%s6318_s6 + $0x20] sm:$0xff]  }
  0x3c   :  { %v237_v43 = vadd.f32 %v236_v23, %v235_v37  ;;  %3941 = vmatprep.subr.bf16.mxu0 %v4533_v33  ;;  %3965 = vmatprep.subr.bf16.mxu1 %v4533_v33  ;;  %v250_v25 = vsel %vm158_vm1, %v224_v61, 0.0  ;;  %v226_v35 = vmul.f32 %v4931_v21, %v4931_v21  ;;  %v3269_v37 = vld [vmem:[%s6319_s8 + $0x10] sm:$0xff]   ;;  %v4997_v57 = vld [vmem:[%s6316_s5 + $0x60] sm:$0xff] }
  0x3d   :  { %4289 = vset.pattern.permute.xlu1 %v4532_v3  ;;  %v252_v23 = vsel %vm158_vm1, %v225_v13, 0.0 }
  0x3e   :  { %410 = vperm.xlu1 %4289, %v4821_v17   ;;  %v239_v30 = vadd.f32 %v238_v26, %v237_v43  ;;  %v4968_v26 = vsub.f32 %v4770_v49, %v4798_v10  ;;  %v227_v43 = vmul.f32 %v4952_v34, %v4952_v34  ;;  %v254_v47 = vsel %vm158_vm1, %v226_v35, 0.0  ;;  %v4982_v49 = vld [vmem:[%s6316_s5 + $0x68] sm:$0xff] }
  0x3f   :  { %3943 = vmatpush3.bf16.msra.mxu0 %v3254_v59  ;;  %3967 = vmatpush3.bf16.msra.mxu1 %v3268_v16  ;;  %v5008_v59 = vld [vmem:[%s6316_s5 + $0x70] sm:$0xff] }
  0x40   :  { %v241_v54 = vadd.f32 %v240_v48, %v239_v30  ;;  %3944 = vmatprep.subr.bf16.mxu0 %v4533_v33  ;;  %3968 = vmatprep.subr.bf16.mxu1 %v4533_v33  ;;  %v3258_v30 = vld [vmem:[%s6318_s6 + $0x28] sm:$0xff]   ;;  %v228_v10 = vmul.f32 %v4968_v26, %v4968_v26  ;;  %v256_v51 = vsel %vm158_vm1, %v227_v43, 0.0 }
  0x42   :  { %4291 = vset.pattern.permute.xlu1 %v4531_v1  ;;  %v243_v58 = vadd.f32 %v242_v53, %v241_v54  ;;  %v3259_v54 = vld [vmem:[%s6318_s6 + $0x30] sm:$0xff]   ;;  %v258_v55 = vsel %vm158_vm1, %v228_v10, 0.0 }
  0x43   :  { %332 = vperm.xlu1 %4291, %v4868_v38   ;;  %3946 = vmatpush3.bf16.msra.mxu0 %v3255_v20 }
  0x44   :  { %v245_v63 = vadd.f32 %v244_v36, %v243_v58  ;;  %3947 = vmatprep.subr.bf16.mxu0 %v4533_v33  ;;  %3970 = vmatpush3.bf16.msra.mxu1 %v3269_v37  ;;  %v3260_v58 = vld [vmem:[%s6318_s6 + $0x38] sm:$0xff]  }
  0x45   :  { %3971 = vmatprep.subr.bf16.mxu1 %v4533_v33 }
  0x46   :  { %v247_v39 = vadd.f32 %v246_v62, %v245_v63  ;;  %v5015_v62 = vld [vmem:[%s6316_s5 + $0x78] sm:$0xff] }
  0x47   :  { %4292 = vset.pattern.permute.xlu1 %v4532_v3  ;;  %3949 = vmatpush3.bf16.msra.mxu0 %v3256_v32 }
  0x48   :  { %414 = vperm.xlu1 %4292, %v4756_v45   ;;  %v249_v27 = vadd.f32 %v248_v9, %v247_v39  ;;  %3950 = vmatprep.subr.bf16.mxu0 %v4533_v33 }
  0x4a   :  { %v251_v42 = vadd.f32 %v250_v25, %v249_v27 }
  0x4b   :  { %3952 = vmatpush3.bf16.msra.mxu0 %v3257_v46 }
  0x4c   :  { %4293 = vset.pattern.permute.xlu1 %v4531_v1  ;;  %v253_v41 = vadd.f32 %v252_v23, %v251_v42  ;;  %3953 = vmatprep.subr.bf16.mxu0 %v4533_v33 }
  0x4d   :  { %337 = vperm.xlu1 %4293, %v4920_v8  }
  0x4e   :  { %v255_v48 = vadd.f32 %v254_v47, %v253_v41 }
  0x4f   :  { %3955 = vmatpush3.bf16.msra.mxu0 %v3258_v30 }
  0x50   :  { %v257_v53 = vadd.f32 %v256_v51, %v255_v48  ;;  %3956 = vmatprep.subr.bf16.mxu0 %v4533_v33 }
  0x51   :  { %342 = vperm.xlu1 %4293, %v4943_v31  }
  0x52   :  { %v259_v36 = vadd.f32 %v258_v55, %v257_v53 }
  0x53   :  { %3958 = vmatpush3.bf16.msra.mxu0 %v3259_v54 }
  0x54   :  { %3959 = vmatprep.subr.bf16.mxu0 %v4533_v33  ;;  %v260_v61 = vrot.slane %v259_v36, 4 }
  0x55   :  { %4294 = vset.pattern.permute.xlu1 %v4532_v3 }
  0x56   :  { %426 = vperm.xlu1 %4294, %v4943_v31   ;;  %v261_v63 = vadd.f32 %v260_v61, %v259_v36 }
  0x57   :  { %3961 = vmatpush3.bf16.msra.mxu0 %v3260_v58 }
  0x58   :  { %v262_v7 = vrot.slane %v261_v63, 2 }
  0x5a   :  { %4296 = vset.pattern.permute.xlu1 %v4531_v1  ;;  %v263_v9 = vadd.f32 %v262_v7, %v261_v63 }
  0x5b   :  { %352 = vperm.xlu1 %4296, %v4982_v49  }
  0x5c   :  { %v264_v39 = vrot.slane %v263_v9, 1 }
  0x5e   :  { %v265_v20 = vadd.f32 %v264_v39, %v263_v9 }
  0x5f   :  { %4297 = vset.pattern.permute.xlu1 %v4532_v3 }
  0x60   :  { %430 = vperm.xlu1 %4297, %v4997_v57   ;;  %v266_v13 = vmul.f32 0.0078125, %v265_v20 }
  0x62   :  { %v267_v25 = vadd.f32 1e-05, %v266_v13 }
  0x64   :  { %4298 = vset.pattern.permute.xlu1 %v4531_v1  ;;  %4366 = vrsqrt.f32 %v267_v25  ;;  %v3270_v25 = vld [vmem:[%s6319_s8 + $0x18] sm:$0xff]  }
  0x65   :  { %357 = vperm.xlu1 %4298, %v5008_v59   ;;  %3973 = vmatpush3.bf16.msra.mxu1 %v3270_v25 }
  0x66   :  { %3974 = vmatprep.subr.bf16.mxu1 %v4533_v33 }
  0x69   :  { %362 = vperm.xlu1 %4298, %v5015_v62  }
  0x6d   :  { %4299 = vset.pattern.permute.xlu1 %v4532_v3 }
  0x6e   :  { %442 = vperm.xlu1 %4299, %v5015_v62   ;;  %v5020_v32 = vpop.eup %4366 }
  0x6f   :  { %v270_v35 = vmul.f32 %v5020_v32, %v4807_v12  ;;  %v269_v46 = vmul.f32 %v5020_v32, %v4803_v11  ;;  %v271_v48 = vmul.f32 %v5020_v32, %v4811_v14  ;;  %v272_v12 = vmul.f32 %v5020_v32, %v4815_v15 }
  0x70   :  { %v273_v15 = vmul.f32 %v5020_v32, %v4825_v6  ;;  %v274_v13 = vmul.f32 %v5020_v32, %v4835_v18 }
  0x82   :  { %v288_v27 = vpop.permute.xlu1 %287 }
  0x83   :  { %v365_v51 = vmul.f32 %v288_v27, %v269_v46  ;;  %v3273_v46 = vld [vmem:[%s6319_s8 + $0x30] sm:$0xff]  }
  0x86   :  { %v293_v16 = vpop.permute.xlu1 %292 }
  0x87   :  { %v366_v47 = vmul.f32 %v293_v16, %v270_v35 }
  0x8b   :  { %v387_v42 = vpop.permute.xlu1 %386 }
  0x8c   :  { %v446_v54 = vadd.f32 %v387_v42, %v366_v47  ;;  %v3271_v42 = vld [vmem:[%s6319_s8 + $0x20] sm:$0xff]   ;;  %v3274_v47 = vld [vmem:[%s6319_s8 + $0x38] sm:$0xff]  }
  0x8d   :  { %3976 = vmatpush3.bf16.msra.mxu1 %v3271_v42 }
  0x8e   :  { %3977 = vmatprep.subr.bf16.mxu1 %v4533_v33 }
  0x90   :  { %v298_v23 = vpop.permute.xlu1 %297  ;;  %v136_v37 = vpop.xlane.xlu0 %135 }
  0x91   :  { %v138_v41 = vmul.f32 0.0078125, %v136_v37  ;;  %v367_v55 = vmul.f32 %v298_v23, %v271_v48  ;;  %v3272_v37 = vld [vmem:[%s6319_s8 + $0x28] sm:$0xff]   ;;  %v4535_v48 = vmov 0.0  }
  0x92   :  { %3979 = vmatpush3.bf16.msra.mxu1 %v3272_v37  ;;  %3578 = vmatprep.mubr.msk.f32.mxu0 %vm4534_vm2, %v4535_v48 }
  0x93   :  { %v5027_v43 = vsub.f32 %v4621_v0, %v138_v41  ;;  %3980 = vmatprep.subr.bf16.mxu1 %v4533_v33  ;;  %3613 = vmatprep.mubr.msk.f32.mxu1 %vm4534_vm2, %v4535_v48 }
  0x94   :  { %v303_v30 = vpop.permute.xlu1 %302 }
  0x95   :  { %v140_v10 = vmul.f32 %v5027_v43, %v5027_v43  ;;  %v368_v36 = vmul.f32 %v303_v30, %v272_v12  ;;  %v4536_v30 = vmov 2  }
  0x96   :  { %3982 = vmatpush3.bf16.msra.mxu1 %v3273_v46  ;;  %4301 = vset.pattern.permute.xlu1 %v4536_v30 }
  0x97   :  { %v141_v53 = vsel %vm133_vm0, %v140_v10, 0.0  ;;  %3983 = vmatprep.subr.bf16.mxu1 %v4533_v33  ;;  %663 = vperm.xlu1 %4301, %v4636_v5  }
  0x98   :  { %142 = vadd.xlane.f32.xlu0 %v141_v53  ;;  %v383_v0 = vpop.permute.xlu0 %382 }
  0x99   :  { %v391_v11 = vpop.permute.xlu1 %390  ;;  %v445_v58 = vadd.f32 %v383_v0, %v365_v51  ;;  %v277_v51 = vmul.f32 %v5020_v32, %v4860_v19 }
  0x9a   :  { %v447_v61 = vadd.f32 %v391_v11, %v367_v55  ;;  %3985 = vmatpush3.bf16.msra.mxu1 %v3274_v47  ;;  %v278_v55 = vmul.f32 %v5020_v32, %v4872_v40  ;;  %v280_v11 = vmul.f32 %v5020_v32, %v4888_v50  ;;  %v3031_v50 = vld [vmem:[%s6321_s7] sm:$0xff]  }
  0x9b   :  { %v5036_v63 = vpack.c.bf16 %v446_v54, %v445_v58  ;;  %4018 = vmatprep.subr.bf16.mxu1 %v4533_v33  ;;  %667 = vperm.xlu1 %4301, %v4691_v22   ;;  %v5110_v54 = vld [vmem:[%s6320_s4] sm:$0xff] }
  0x9d   :  { %v395_v14 = vpop.permute.xlu1 %394  ;;  %3987 = vmatprep.subr.bf16.mxu0 %v5036_v63 }
  0x9e   :  { %v448_v7 = vadd.f32 %v395_v14, %v368_v36 }
  0x9f   :  { %675 = vperm.xlu1 %4301, %v4778_v52  }
  0xa0   :  { %v5039_v9 = vpack.c.bf16 %v448_v7, %v447_v61  ;;  %v279_v7 = vmul.f32 %v5020_v32, %v4880_v44 }
  0xa2   :  { %v308_v39 = vpop.permute.xlu1 %307 }
  0xa3   :  { %v369_v27 = vmul.f32 %v308_v39, %v273_v15  ;;  %683 = vperm.xlu1 %4301, %v4796_v4  }
  0xa6   :  { %v313_v20 = vpop.permute.xlu1 %312 }
  0xa7   :  { %v370_v35 = vmul.f32 %v313_v20, %v274_v13  ;;  %691 = vperm.xlu1 %4301, %v4756_v45   ;;  %v328_v45 = vpop.permute.xlu0 %327 }
  0xa8   :  { %v373_v36 = vmul.f32 %v328_v45, %v277_v51  ;;  %v283_v45 = vmul.f32 %v5020_v32, %v4952_v34 }
  0xab   :  { %v399_v16 = vpop.permute.xlu1 %398  ;;  %699 = vperm.xlu1 %4301, %v4920_v8  }
  0xac   :  { %v449_v6 = vadd.f32 %v399_v16, %v369_v27 }
  0xae   :  { %347 = vperm.xlu0 %4290, %v4997_v57  }
  0xaf   :  { %v403_v18 = vpop.permute.xlu1 %402  ;;  %707 = vperm.xlu1 %4301, %v4997_v57   ;;  %v275_v57 = vmul.f32 %v5020_v32, %v4844_v24 }
  0xb0   :  { %v450_v23 = vadd.f32 %v403_v18, %v370_v35 }
  0xb2   :  { %v5057_v41 = vpack.c.bf16 %v450_v23, %v449_v6  ;;  %4295 = vset.pattern.permute.xlu0 %v4532_v3  ;;  %v3032_v6 = vunpack.c.l.bf16 %v3031_v50 }
  0xb3   :  { %406 = vperm.xlu0 %4295, %v4796_v4   ;;  %715 = vperm.xlu1 %4301, %v5008_v59  }
  0xb4   :  { %v318_v10 = vpop.permute.xlu1 %317 }
  0xb7   :  { %418 = vperm.xlu0 %4295, %v4868_v38   ;;  %4302 = vset.pattern.permute.xlu1 %v4531_v1 }
  0xbb   :  { %422 = vperm.xlu0 %4295, %v4920_v8  }
  0xbf   :  { %434 = vperm.xlu0 %4295, %v4982_v49  }
  0xc3   :  { %438 = vperm.xlu0 %4295, %v5008_v59  }
  0xc7   :  { %4300 = vset.pattern.permute.xlu0 %v4536_v30 }
  0xc8   :  { %659 = vperm.xlu0 %4300, %v4627_v2   ;;  %v323_v2 = vpop.permute.xlu1 %322 }
  0xcc   :  { %671 = vperm.xlu0 %4300, %v4712_v29   ;;  %v411_v5 = vpop.permute.xlu1 %410 }
  0xd0   :  { %679 = vperm.xlu0 %4300, %v4787_v56   ;;  %v333_v22 = vpop.permute.xlu1 %332 }
  0xd1   :  { %v374_v39 = vmul.f32 %v333_v22, %v278_v55 }
  0xd4   :  { %687 = vperm.xlu0 %4300, %v4821_v17   ;;  %v415_v29 = vpop.permute.xlu1 %414  ;;  %v148_v17 = vlaneseq }
  0xd5   :  { %v453_v27 = vadd.f32 %v415_v29, %v373_v36  ;;  %v3265_v36 = vld [vmem:[%s6321_s7 + $0x28] sm:$0xff]  }
  0xd8   :  { %695 = vperm.xlu0 %4300, %v4868_v38   ;;  %v338_v52 = vpop.permute.xlu1 %337 }
  0xd9   :  { %v375_v18 = vmul.f32 %v338_v52, %v279_v7  ;;  %v3053_v7 = vunpack.c.h.bf16 %v3265_v36 }
  0xdc   :  { %703 = vperm.xlu0 %4300, %v4943_v31   ;;  %v343_v8 = vpop.permute.xlu1 %342  ;;  %v276_v31 = vmul.f32 %v5020_v32, %v4851_v28  ;;  %v371_v28 = vmul.f32 %v318_v10, %v275_v57 }
  0xdd   :  { %v376_v16 = vmul.f32 %v343_v8, %v280_v11  ;;  %v3264_v11 = vld [vmem:[%s6321_s7 + $0x20] sm:$0xff]  }
  0xe0   :  { %711 = vperm.xlu0 %4300, %v4982_v49   ;;  %v5098_v49 = vshrl.u32 %v148_v17, 7  ;;  %v427_v53 = vpop.permute.xlu1 %426 }
  0xe1   :  { %v456_v46 = vadd.f32 %v427_v53, %v376_v16  ;;  %v3263_v53 = vld [vmem:[%s6321_s7 + $0x18] sm:$0xff]  }
  0xe2   :  { %v5105_v12 = vsub.s32 0, %v5098_v49  ;;  %v5115_v24 = vsub.s32 1, %v5098_v49  ;;  %v3044_v55 = vunpack.c.l.bf16 %v3263_v53 }
  0xe4   :  { %719 = vperm.xlu0 %4300, %v5015_v62   ;;  %v372_v62 = vmul.f32 %v323_v2, %v276_v31  ;;  %v151_v61 = vrot.slane %v5110_v54, %v5105_v12  ;;  %v156_v20 = vrot.slane %v5110_v54, %v5115_v24  ;;  %v353_v13 = vpop.permute.xlu1 %352  ;;  %v282_v2 = vmul.f32 %v5020_v32, %v4931_v21 }
  0xe6   :  { %v452_v0 = vadd.f32 %v411_v5, %v372_v62  ;;  %v378_v29 = vmul.f32 %v353_v13, %v282_v2 }
  0xe8   :  { %4304 = vset.pattern.permute.xlu0 %v4532_v3  ;;  %v431_v47 = vpop.permute.xlu1 %430 }
  0xec   :  { %v358_v10 = vpop.permute.xlu1 %357 }
  0xf0   :  { %v363_v5 = vpop.permute.xlu1 %362 }
 0x125   :  { %v143_v56 = vpop.xlane.xlu0 %142 }
 0x126   :  { %v144_v4 = vmul.f32 0.0078125, %v143_v56  ;;  %v379_v56 = vmul.f32 %v358_v10, %v283_v45 }
 0x128   :  { %v145_v38 = vadd.f32 1e-05, %v144_v4 }
 0x12a   :  { %4368 = vrsqrt.f32 %v145_v38 }
 0x12d   :  { %v348_v59 = vpop.permute.xlu0 %347 }
 0x132   :  { %v407_v19 = vpop.permute.xlu0 %406 }
 0x133   :  { %v451_v58 = vadd.f32 %v407_v19, %v371_v28  ;;  %v3045_v19 = vunpack.c.h.bf16 %v3263_v53 }
 0x134   :  { %v4369_v14 = vpop.eup %4368 }
 0x135   :  { %v3998_v15 = vpack.c.bf16 %v452_v0, %v451_v58  ;;  %v147_v40 = vmul.f32 %v4369_v14, %v5027_v43  ;;  %v3048_v0 = vunpack.c.l.bf16 %v3264_v11  ;;  %v3049_v58 = vunpack.c.h.bf16 %v3264_v11  ;;  %v3266_v14 = vld [vmem:[%s6321_s7 + $0x30] sm:$0xff]  }
 0x136   :  { %v419_v25 = vpop.permute.xlu0 %418 }
 0x137   :  { %v454_v42 = vadd.f32 %v419_v25, %v374_v39  ;;  %v152_v35 = vmul.f32 %v151_v61, %v147_v40  ;;  %v3052_v61 = vunpack.c.l.bf16 %v3265_v36  ;;  %v3056_v39 = vunpack.c.l.bf16 %v3266_v14 }
 0x138   :  { %v3057_v40 = vunpack.c.h.bf16 %v3266_v14 }
 0x139   :  { %v4002_v44 = vpack.c.bf16 %v454_v42, %v453_v27  ;;  %v157_v23 = vadd.f32 %v156_v20, %v152_v35 }
 0x13a   :  { %v423_v37 = vpop.permute.xlu0 %422 }
 0x13b   :  { %v455_v43 = vadd.f32 %v423_v37, %v375_v18  ;;  %3579 = vmatmul.mubr.f32.vlgmr.msra.gmra.mrb[0].mxu0 %v157_v23  ;;  %3614 = vmatmul.mubr.f32.vlgmr.msra.gmra.mrb[0].mxu1 %v157_v23 }
 0x13c   :  { %3989 = vmatpush3.bf16.msra.mxu0 %v5036_v63  ;;  %3648 = vmatprep.mubr.f32.mxu0 %v3032_v6  ;;  %v281_v63 = vmul.f32 %v5020_v32, %v4909_v60 }
 0x13d   :  { %v4006_v30 = vpack.c.bf16 %v456_v46, %v455_v43  ;;  %3991 = vmatprep.subr.bf16.mxu0 %v5039_v9  ;;  %3704 = vmatprep.mubr.msk.f32.mxu1 %vm4534_vm2, %v4535_v48 }
 0x13e   :  { %v435_v22 = vpop.permute.xlu0 %434  ;;  %v377_v52 = vmul.f32 %v348_v59, %v281_v63  ;;  %v3262_v59 = vld [vmem:[%s6321_s7 + $0x10] sm:$0xff]  }
 0x13f   :  { %v458_v4 = vadd.f32 %v435_v22, %v378_v29  ;;  %v3040_v51 = vunpack.c.l.bf16 %v3262_v59  ;;  %v3041_v28 = vunpack.c.h.bf16 %v3262_v59 }
 0x140   :  { %3993 = vmatpush3.bf16.msra.mxu0 %v5039_v9  ;;  %v284_v9 = vmul.f32 %v5020_v32, %v4968_v26  ;;  %v457_v60 = vadd.f32 %v431_v47, %v377_v52  ;;  %v3261_v26 = vld [vmem:[%s6321_s7 + $0x8] sm:$0xff]   ;;  %v3033_v32 = vunpack.c.h.bf16 %v3031_v50 }
 0x141   :  { %3995 = vmatprep.subr.bf16.mxu0 %v5057_v41  ;;  %v3036_v57 = vunpack.c.l.bf16 %v3261_v26  ;;  %v3037_v62 = vunpack.c.h.bf16 %v3261_v26 }
 0x142   :  { %v380_v21 = vmul.f32 %v363_v5, %v284_v9  ;;  %v439_v17 = vpop.permute.xlu0 %438  ;;  %v4010_v38 = vpack.c.bf16 %v458_v4, %v457_v60 }
 0x143   :  { %v459_v31 = vadd.f32 %v439_v17, %v379_v56 }
 0x144   :  { %3997 = vmatpush3.bf16.msra.mxu0 %v5057_v41  ;;  %v443_v41 = vpop.permute.xlu1 %442 }
 0x145   :  { %3999 = vmatprep.subr.bf16.mxu0 %v3998_v15  ;;  %v460_v8 = vadd.f32 %v443_v41, %v380_v21 }
 0x147   :  { %v4014_v34 = vpack.c.bf16 %v460_v8, %v459_v31  ;;  %v660_v42 = vpop.permute.xlu0 %659 }
 0x148   :  { %4001 = vmatpush3.bf16.msra.mxu0 %v3998_v15  ;;  %v3267_v15 = vld [vmem:[%s6321_s7 + $0x38] sm:$0xff]   ;;  %v664_v35 = vpop.permute.xlu1 %663 }
 0x149   :  { %4003 = vmatprep.subr.bf16.mxu0 %v4002_v44  ;;  %v3060_v20 = vunpack.c.l.bf16 %v3267_v15  ;;  %v3061_v50 = vunpack.c.h.bf16 %v3267_v15 }
 0x14b   :  { %v672_v6 = vpop.permute.xlu0 %671 }
 0x14c   :  { %4005 = vmatpush3.bf16.msra.mxu0 %v4002_v44  ;;  %v668_v18 = vpop.permute.xlu1 %667 }
 0x14d   :  { %4007 = vmatprep.subr.bf16.mxu0 %v4006_v30 }
 0x14f   :  { %v680_v44 = vpop.permute.xlu0 %679 }
 0x150   :  { %4009 = vmatpush3.bf16.msra.mxu0 %v4006_v30  ;;  %v676_v23 = vpop.permute.xlu1 %675 }
 0x151   :  { %4011 = vmatprep.subr.bf16.mxu0 %v4010_v38 }
 0x153   :  { %v688_v30 = vpop.permute.xlu0 %687 }
 0x154   :  { %4013 = vmatpush3.bf16.msra.mxu0 %v4010_v38  ;;  %v684_v2 = vpop.permute.xlu1 %683 }
 0x155   :  { %4015 = vmatprep.subr.bf16.mxu0 %v4014_v34 }
 0x158   :  { %4017 = vmatpush3.bf16.msra.mxu0 %v4014_v34 }
 0x159   :  { %4042 = vmatprep.subr.bf16.mxu0 %v4533_v33 }
 0x15b   :  { %3649 = vmatmul.mubr.f32.vlgmr.msra.gmra.mrb[2].mxu0 %v3033_v32 }
 0x15c   :  { %3651 = vmatprep.mubr.f32.mxu0 %v3036_v57  ;;  %v696_v57 = vpop.permute.xlu0 %695 }
 0x15f   :  { %3652 = vmatmul.mubr.f32.gmra.mrb[4].mxu0 %v3037_v62 }
 0x160   :  { %3654 = vmatprep.mubr.f32.mxu0 %v3040_v51 }
 0x163   :  { %3655 = vmatmul.mubr.f32.gmra.mrb[6].mxu0 %v3041_v28  ;;  %v692_v28 = vpop.permute.xlu1 %691 }
 0x164   :  { %3657 = vmatprep.mubr.f32.mxu0 %v3044_v55 }
 0x167   :  { %3658 = vmatmul.mubr.f32.gmra.mrb[8].mxu0 %v3045_v19 }
 0x168   :  { %3660 = vmatprep.mubr.f32.mxu0 %v3048_v0 }
 0x16b   :  { %3661 = vmatmul.mubr.f32.gmra.mrb[10].mxu0 %v3049_v58 }
 0x16c   :  { %3663 = vmatprep.mubr.f32.mxu0 %v3052_v61 }
 0x16f   :  { %3664 = vmatmul.mubr.f32.gmra.mrb[12].mxu0 %v3053_v7 }
 0x170   :  { %3666 = vmatprep.mubr.f32.mxu0 %v3056_v39 }
 0x173   :  { %3667 = vmatmul.mubr.f32.gmra.mrb[14].mxu0 %v3057_v40 }
 0x174   :  { %3669 = vmatprep.mubr.f32.mxu0 %v3060_v20 }
 0x177   :  { %3670 = vmatmul.mubr.f32.gmra.mrb[16].mxu0 %v3061_v50 }
 0x178   :  { %3739 = vmatprep.mubr.msk.f32.mxu0 %vm4534_vm2, %v4535_v48 }
 0x20e   :  { %v5168_v13 = vpop.f32.mrb[0].mxu0  ;;  %v5170_v25 = vpop.f32.mrb[0].mxu1 }
 0x20f   :  { %v3580_v27 = vpop.f32.mrb[1].mxu0  ;;  %v3615_v16 = vpop.f32.mrb[1].mxu1 }
 0x22e   :  { %v3650_v37 = vpop.f32.mrb[2].mxu0 }
 0x22f   :  { %v794_v46 = vadd.f32 %v3650_v37, %v664_v35  ;;  %v788_v43 = vpop.f32.mrb[3].mxu0  ;;  %v704_v37 = vpop.permute.xlu0 %703 }
 0x230   :  { %v5172_v47 = vadd.f32 %v788_v43, %v660_v42 }
 0x231   :  { %963 = vperm.xlu1 %4302, %v794_v46   ;;  %v5178_v22 = vsel %vm867_vm3, %v794_v46, -inf  ;;  %v5181_v29 = vsel %vm867_vm3, %v794_v46, inf  ;;  %v5186_v9 = vsel %vm1202_vm4, %v794_v46, -inf  ;;  %v5189_v52 = vsel %vm1202_vm4, %v794_v46, inf }
 0x232   :  { %v3653_v10 = vpop.f32.mrb[4].mxu0  ;;  %1291 = vperm.xlu0 %4304, %v5172_v47   ;;  %v5193_v56 = vsel %vm867_vm3, %v5172_v47, -inf  ;;  %v5197_v21 = vsel %vm867_vm3, %v5172_v47, inf  ;;  %v5202_v4 = vsel %vm1202_vm4, %v5172_v47, -inf  ;;  %v5206_v41 = vsel %vm1202_vm4, %v5172_v47, inf }
 0x233   :  { %v5175_v63 = vadd.f32 %v3653_v10, %v672_v6  ;;  %v798_v5 = vpop.f32.mrb[5].mxu0 }
 0x234   :  { %v5183_v45 = vadd.f32 %v798_v5, %v668_v18  ;;  %v700_v5 = vpop.permute.xlu1 %699 }
 0x235   :  { %4303 = vset.pattern.permute.xlu1 %v4532_v3  ;;  %v5210_v17 = vsel %vm867_vm3, %v5175_v63, -inf  ;;  %v5214_v60 = vsel %vm867_vm3, %v5175_v63, inf  ;;  %v5218_v8 = vsel %vm1202_vm4, %v5175_v63, -inf  ;;  %v5222_v31 = vsel %vm1202_vm4, %v5175_v63, inf }
 0x236   :  { %1295 = vperm.xlu1 %4303, %v794_v46   ;;  %v3656_v38 = vpop.f32.mrb[6].mxu0  ;;  %v5226_v34 = vsel %vm867_vm3, %v5183_v45, -inf  ;;  %v5232_v59 = vsel %vm867_vm3, %v5183_v45, inf  ;;  %v5236_v62 = vsel %vm1202_vm4, %v5183_v45, -inf  ;;  %v5240_v51 = vsel %vm1202_vm4, %v5183_v45, inf }
 0x237   :  { %v5228_v26 = vadd.f32 %v3656_v38, %v680_v44  ;;  %v808_v32 = vpop.f32.mrb[7].mxu0 }
 0x238   :  { %v5242_v53 = vadd.f32 %v808_v32, %v676_v23 }
 0x239   :  { %v874_v55 = vsel %vm867_vm3, %v5228_v26, -inf  ;;  %v911_v11 = vsel %vm867_vm3, %v5228_v26, inf  ;;  %v1209_v19 = vsel %vm1202_vm4, %v5228_v26, -inf  ;;  %v5252_v0 = vsel %vm1202_vm4, %v5228_v26, inf }
 0x23a   :  { %v872_v36 = vsel %vm867_vm3, %v5242_v53, -inf  ;;  %v909_v58 = vsel %vm867_vm3, %v5242_v53, inf  ;;  %v1207_v61 = vsel %vm1202_vm4, %v5242_v53, -inf  ;;  %v5262_v14 = vsel %vm1202_vm4, %v5242_v53, inf  ;;  %v3659_v7 = vpop.f32.mrb[8].mxu0  ;;  %1307 = vperm.xlu0 %4304, %v5242_v53   ;;  %1303 = vperm.xlu1 %4303, %v5175_v63  }
 0x23b   :  { %v5266_v39 = vadd.f32 %v3659_v7, %v688_v30  ;;  %v818_v15 = vpop.f32.mrb[9].mxu0  ;;  %v910_v40 = vmin.f32 %v5197_v21, %v909_v58  ;;  %v912_v20 = vmin.f32 %v5181_v29, %v911_v11  ;;  %v873_v50 = vmax.f32 %v5193_v56, %v872_v36 }
 0x23c   :  { %v5271_v27 = vadd.f32 %v818_v15, %v684_v2  ;;  %v875_v16 = vmax.f32 %v5178_v22, %v874_v55  ;;  %v1208_v42 = vmax.f32 %v5202_v4, %v1207_v61  ;;  %v1210_v35 = vmax.f32 %v5186_v9, %v1209_v19 }
 0x23d   :  { %v878_v6 = vsel %vm867_vm3, %v5266_v39, -inf  ;;  %v915_v18 = vsel %vm867_vm3, %v5266_v39, inf  ;;  %v1213_v44 = vsel %vm1202_vm4, %v5266_v39, -inf  ;;  %v5284_v23 = vsel %vm1202_vm4, %v5266_v39, inf }
 0x23e   :  { %v876_v46 = vsel %vm867_vm3, %v5271_v27, -inf  ;;  %v913_v43 = vsel %vm867_vm3, %v5271_v27, inf  ;;  %v1211_v30 = vsel %vm1202_vm4, %v5271_v27, -inf  ;;  %v5294_v10 = vsel %vm1202_vm4, %v5271_v27, inf  ;;  %v3662_v2 = vpop.f32.mrb[10].mxu0  ;;  %4305 = vset.pattern.permute.xlu1 %v4531_v1 }
 0x23f   :  { %v5297_v22 = vadd.f32 %v3662_v2, %v696_v57  ;;  %v828_v29 = vpop.f32.mrb[11].mxu0  ;;  %968 = vperm.xlu1 %4305, %v5183_v45   ;;  %v914_v9 = vmin.f32 %v5232_v59, %v913_v43  ;;  %v916_v56 = vmin.f32 %v5214_v60, %v915_v18  ;;  %v877_v21 = vmax.f32 %v5226_v34, %v876_v46 }
 0x240   :  { %v5303_v4 = vadd.f32 %v828_v29, %v692_v28  ;;  %v879_v38 = vmax.f32 %v5210_v17, %v878_v6  ;;  %v1212_v32 = vmax.f32 %v5236_v62, %v1211_v30  ;;  %v1214_v55 = vmax.f32 %v5218_v8, %v1213_v44  ;;  %v708_v6 = vpop.permute.xlu1 %707 }
 0x241   :  { %v919_v57 = vsel %vm867_vm3, %v5297_v22, inf  ;;  %v882_v11 = vsel %vm867_vm3, %v5297_v22, -inf  ;;  %v1217_v59 = vsel %vm1202_vm4, %v5297_v22, -inf  ;;  %v1245_v60 = vmin.f32 %v5206_v41, %v5262_v14  ;;  %v712_v14 = vpop.permute.xlu0 %711 }
 0x242   :  { %v3665_v34 = vpop.f32.mrb[12].mxu0  ;;  %1323 = vperm.xlu0 %4304, %v5303_v4   ;;  %v917_v17 = vsel %vm867_vm3, %v5303_v4, inf  ;;  %v920_v62 = vmin.f32 %v912_v20, %v919_v57  ;;  %v880_v8 = vsel %vm867_vm3, %v5303_v4, -inf  ;;  %v883_v28 = vmax.f32 %v875_v16, %v882_v11 }
 0x243   :  { %v5321_v19 = vadd.f32 %v3665_v34, %v704_v37  ;;  %v838_v36 = vpop.f32.mrb[13].mxu0  ;;  %4306 = vset.pattern.permute.xlu1 %v4532_v3  ;;  %v918_v58 = vmin.f32 %v910_v40, %v917_v17  ;;  %v881_v61 = vmax.f32 %v873_v50, %v880_v8  ;;  %v1215_v41 = vsel %vm1202_vm4, %v5303_v4, -inf }
 0x244   :  { %v5326_v7 = vadd.f32 %v838_v36, %v700_v5  ;;  %1299 = vperm.xlu1 %4306, %v5183_v45   ;;  %v5329_v15 = vmax.f32 %v1208_v42, %v1215_v41  ;;  %v1218_v20 = vmax.f32 %v1210_v35, %v1217_v59  ;;  %v1247_v16 = vmin.f32 %v5189_v52, %v5252_v0  ;;  %v716_v36 = vpop.permute.xlu1 %715 }
 0x245   :  { %v923_v18 = vsel %vm867_vm3, %v5321_v19, inf  ;;  %v886_v40 = vsel %vm867_vm3, %v5321_v19, -inf  ;;  %v1221_v50 = vsel %vm1202_vm4, %v5321_v19, -inf  ;;  %v1249_v44 = vmin.f32 %v5240_v51, %v5294_v10  ;;  %v720_v17 = vpop.permute.xlu0 %719 }
 0x246   :  { %v3668_v45 = vpop.f32.mrb[14].mxu0  ;;  %v921_v42 = vsel %vm867_vm3, %v5326_v7, inf  ;;  %v924_v35 = vmin.f32 %v916_v56, %v923_v18  ;;  %v884_v37 = vsel %vm867_vm3, %v5326_v7, -inf  ;;  %v887_v46 = vmax.f32 %v879_v38, %v886_v40 }
 0x247   :  { %v5345_v43 = vadd.f32 %v3668_v45, %v712_v14  ;;  %v848_v30 = vpop.f32.mrb[15].mxu0  ;;  %v922_v2 = vmin.f32 %v914_v9, %v921_v42  ;;  %v885_v5 = vmax.f32 %v877_v21, %v884_v37  ;;  %v1219_v29 = vsel %vm1202_vm4, %v5326_v7, -inf }
 0x248   :  { %v5349_v57 = vadd.f32 %v848_v30, %v708_v6  ;;  %4307 = vset.pattern.permute.xlu1 %v4531_v1  ;;  %v1220_v11 = vmax.f32 %v1212_v32, %v1219_v29  ;;  %v1222_v59 = vmax.f32 %v1214_v55, %v1221_v50  ;;  %v1251_v56 = vmin.f32 %v5222_v31, %v5284_v23 }
 0x249   :  { %983 = vperm.xlu1 %4307, %v5228_v26   ;;  %v927_v38 = vsel %vm867_vm3, %v5345_v43, inf  ;;  %v890_v9 = vsel %vm867_vm3, %v5345_v43, -inf  ;;  %v1225_v21 = vsel %vm1202_vm4, %v5345_v43, -inf  ;;  %v1252_v34 = vsel %vm1202_vm4, %v5303_v4, inf }
 0x24a   :  { %v3671_v32 = vpop.f32.mrb[16].mxu0  ;;  %1339 = vperm.xlu0 %4304, %v5349_v57   ;;  %v925_v31 = vsel %vm867_vm3, %v5349_v57, inf  ;;  %v928_v23 = vmin.f32 %v920_v62, %v927_v38  ;;  %v888_v55 = vsel %vm867_vm3, %v5349_v57, -inf  ;;  %v891_v8 = vmax.f32 %v883_v28, %v890_v9 }
 0x24b   :  { %v5368_v41 = vadd.f32 %v3671_v32, %v720_v17  ;;  %v858_v14 = vpop.f32.mrb[17].mxu0  ;;  %v926_v6 = vmin.f32 %v918_v58, %v925_v31  ;;  %v889_v18 = vmax.f32 %v881_v61, %v888_v55  ;;  %v1223_v40 = vsel %vm1202_vm4, %v5349_v57, -inf }
 0x24c   :  { %v5372_v50 = vadd.f32 %v858_v14, %v716_v36  ;;  %v1224_v45 = vmax.f32 %v5329_v15, %v1223_v40  ;;  %v1226_v42 = vmax.f32 %v1218_v20, %v1225_v21  ;;  %v1253_v37 = vmin.f32 %v1245_v60, %v1252_v34 }
 0x24d   :  { %4308 = vset.pattern.permute.xlu1 %v4532_v3  ;;  %v931_v62 = vsel %vm867_vm3, %v5368_v41, inf  ;;  %v933_v28 = vmin.f32 %v926_v6, %v928_v23  ;;  %v894_v30 = vsel %vm867_vm3, %v5368_v41, -inf  ;;  %v896_v58 = vmax.f32 %v889_v18, %v891_v8 }
 0x24e   :  { %1311 = vperm.xlu1 %4308, %v5228_v26   ;;  %4318 = vset.pattern.permute.xlu0 %v4531_v1  ;;  %v929_v61 = vsel %vm867_vm3, %v5372_v50, inf  ;;  %v932_v15 = vmin.f32 %v924_v35, %v931_v62  ;;  %v892_v60 = vsel %vm867_vm3, %v5372_v50, -inf  ;;  %v895_v20 = vmax.f32 %v887_v46, %v894_v30 }
 0x24f   :  { %v930_v29 = vmin.f32 %v922_v2, %v929_v61  ;;  %v893_v38 = vmax.f32 %v885_v5, %v892_v60  ;;  %v1227_v9 = vsel %vm1202_vm4, %v5372_v50, -inf  ;;  %v1229_v21 = vsel %vm1202_vm4, %v5368_v41, -inf }
 0x250   :  { %v1228_v34 = vmax.f32 %v1220_v11, %v1227_v9  ;;  %v1230_v26 = vmax.f32 %v1222_v59, %v1229_v21  ;;  %v1231_v17 = vmax.f32 %v1224_v45, %v1226_v42  ;;  %v1254_v32 = vsel %vm1202_vm4, %v5297_v22, inf }
 0x251   :  { %v934_v31 = vmin.f32 %v930_v29, %v932_v15  ;;  %v897_v35 = vmax.f32 %v893_v38, %v895_v20  ;;  %v1255_v46 = vmin.f32 %v1247_v16, %v1254_v32  ;;  %v1256_v2 = vsel %vm1202_vm4, %v5326_v7, inf }
 0x252   :  { %1319 = vperm.xlu1 %4308, %v5266_v39   ;;  %v1232_v5 = vmax.f32 %v1228_v34, %v1230_v26  ;;  %v1257_v11 = vmin.f32 %v1249_v44, %v1256_v2  ;;  %v1258_v59 = vsel %vm1202_vm4, %v5321_v19, inf  ;;  %v1260_v23 = vsel %vm1202_vm4, %v5349_v57, inf }
 0x253   :  { %v935_v55 = vmin.f32 %v933_v28, %v934_v31  ;;  %v898_v8 = vmax.f32 %v896_v58, %v897_v35  ;;  %v1259_v52 = vmin.f32 %v1251_v56, %v1258_v59  ;;  %v1261_v0 = vmin.f32 %v1253_v37, %v1260_v23 }
 0x254   :  { %v1233_v16 = vmax.f32 %v1231_v17, %v1232_v5  ;;  %v1262_v36 = vsel %vm1202_vm4, %v5345_v43, inf  ;;  %v1264_v14 = vsel %vm1202_vm4, %v5372_v50, inf  ;;  %v1266_v51 = vsel %vm1202_vm4, %v5368_v41, inf }
 0x255   :  { %v936_v10 = vrot.slane %v935_v55, 4  ;;  %v899_v44 = vrot.slane %v898_v8, 4  ;;  %v1263_v6 = vmin.f32 %v1255_v46, %v1262_v36  ;;  %v1265_v18 = vmin.f32 %v1257_v11, %v1264_v14 }
 0x256   :  { %4309 = vset.pattern.permute.xlu1 %v4531_v1  ;;  %v1267_v40 = vmin.f32 %v1259_v52, %v1266_v51  ;;  %v1234_v28 = vrot.slane %v1233_v16, 4  ;;  %v479_v11 = vsub.s32 2, %v5098_v49 }
 0x257   :  { %988 = vperm.xlu1 %4309, %v5271_v27   ;;  %v937_v56 = vmin.f32 %v935_v55, %v936_v10  ;;  %v1268_v45 = vmin.f32 %v1261_v0, %v1263_v6  ;;  %v900_v62 = vmax.f32 %v898_v8, %v899_v44 }
 0x258   :  { %v1269_v42 = vmin.f32 %v1265_v18, %v1267_v40  ;;  %v1235_v60 = vmax.f32 %v1233_v16, %v1234_v28  ;;  %v480_v23 = vrot.slane %v5110_v54, %v479_v11 }
 0x259   :  { %v938_v37 = vrot.slane %v937_v56, 2  ;;  %v901_v15 = vrot.slane %v900_v62, 2 }
 0x25a   :  { %v1270_v30 = vmin.f32 %v1268_v45, %v1269_v42  ;;  %v1236_v9 = vrot.slane %v1235_v60, 2  ;;  %v548_v52 = vadd.f32 %v5168_v13, %v480_v23 }
 0x25b   :  { %4310 = vset.pattern.permute.xlu1 %v4532_v3  ;;  %v939_v58 = vmin.f32 %v937_v56, %v938_v37  ;;  %v902_v38 = vmax.f32 %v900_v62, %v901_v15 }
 0x25c   :  { %1315 = vperm.xlu1 %4310, %v5271_v27   ;;  %v1271_v20 = vrot.slane %v1270_v30, 4  ;;  %v1237_v27 = vmax.f32 %v1235_v60, %v1236_v9  ;;  %v551_v36 = vmul.f32 0.088388346, %v548_v52 }
 0x25d   :  { %v940_v61 = vrot.slane %v939_v58, 1  ;;  %v903_v34 = vrot.slane %v902_v38, 1 }
 0x25e   :  { %v1272_v21 = vmin.f32 %v1270_v30, %v1271_v20  ;;  %v1238_v32 = vrot.slane %v1237_v27, 1  ;;  %v5471_v6 = vrot.slane %v551_v36, %v5105_v12  ;;  %vm942_vm5 = vcmp.ge.f32.partialorder %v551_v36, 0.0 }
 0x25f   :  { %v941_v29 = vmin.f32 %v939_v58, %v940_v61  ;;  %v904_v17 = vmax.f32 %v902_v38, %v903_v34 }
 0x260   :  { %4311 = vset.pattern.permute.xlu1 %v4531_v1  ;;  %v1273_v26 = vrot.slane %v1272_v21, 2  ;;  %v1239_v35 = vmax.f32 %v1237_v27, %v1238_v32 }
 0x261   :  { %1003 = vperm.xlu1 %4311, %v5297_v22   ;;  %951 = vperm.xlu0 %4318, %v941_v29  }
 0x262   :  { %v1274_v31 = vmin.f32 %v1272_v21, %v1273_v26 }
 0x264   :  { %v1275_v46 = vrot.slane %v1274_v31, 1 }
 0x265   :  { %4312 = vset.pattern.permute.xlu1 %v4532_v3  ;;  %958 = vperm.xlu0 %4318, %v5172_v47  }
 0x266   :  { %1327 = vperm.xlu1 %4312, %v5297_v22   ;;  %v1276_v47 = vmin.f32 %v1274_v31, %v1275_v46 }
 0x269   :  { %973 = vperm.xlu0 %4318, %v5175_v63  }
 0x26a   :  { %4313 = vset.pattern.permute.xlu1 %v4531_v1 }
 0x26b   :  { %945 = vperm.xlu1 %4313, %v904_v17  }
 0x26d   :  { %978 = vperm.xlu0 %4318, %v5242_v53  }
 0x26f   :  { %4314 = vset.pattern.permute.xlu1 %v4532_v3 }
 0x270   :  { %1279 = vperm.xlu1 %4314, %v1239_v35  }
 0x271   :  { %993 = vperm.xlu0 %4318, %v5266_v39  }
 0x274   :  { %1285 = vperm.xlu1 %4314, %v1276_v47  }
 0x275   :  { %998 = vperm.xlu0 %4318, %v5303_v4  }
 0x278   :  { %4315 = vset.pattern.permute.xlu1 %v4531_v1 }
 0x279   :  { %1013 = vperm.xlu0 %4318, %v5321_v19   ;;  %1008 = vperm.xlu1 %4315, %v5326_v7  }
 0x27d   :  { %1018 = vperm.xlu0 %4318, %v5349_v57   ;;  %4316 = vset.pattern.permute.xlu1 %v4532_v3 }
 0x27e   :  { %1331 = vperm.xlu1 %4316, %v5326_v7  }
 0x281   :  { %1033 = vperm.xlu0 %4318, %v5368_v41  }
 0x282   :  { %1335 = vperm.xlu1 %4316, %v5321_v19  }
 0x286   :  { %4317 = vset.pattern.permute.xlu1 %v4531_v1 }
 0x287   :  { %1023 = vperm.xlu1 %4317, %v5345_v43  }
 0x28b   :  { %4319 = vset.pattern.permute.xlu1 %v4532_v3 }
 0x28c   :  { %1343 = vperm.xlu1 %4319, %v5345_v43  }
 0x290   :  { %4320 = vset.pattern.permute.xlu1 %v4531_v1 }
 0x291   :  { %1028 = vperm.xlu1 %4320, %v5372_v50  }
 0x295   :  { %4321 = vset.pattern.permute.xlu1 %v4532_v3 }
 0x296   :  { %1347 = vperm.xlu1 %4321, %v5372_v50  }
 0x29a   :  { %1351 = vperm.xlu1 %4321, %v5368_v41  }
 0x2b0   :  { %v964_v63 = vpop.permute.xlu1 %963 }
 0x2b1   :  { %v5451_v43 = vpop.permute.xlu0 %1291  ;;  %v1041_v54 = vmul.f32 %v5471_v6, %v964_v63 }
 0x2b5   :  { %v5443_v53 = vpop.permute.xlu1 %1295 }
 0x2b9   :  { %v5445_v39 = vpop.permute.xlu1 %1303  ;;  %v5455_v2 = vpop.permute.xlu0 %1307 }
 0x2be   :  { %v969_v22 = vpop.permute.xlu1 %968 }
 0x2bf   :  { %v1042_v56 = vmul.f32 %v5471_v6, %v969_v22 }
 0x2c1   :  { %v5457_v5 = vpop.permute.xlu0 %1323 }
 0x2c3   :  { %v5447_v4 = vpop.permute.xlu1 %1299 }
 0x2c8   :  { %v984_v19 = vpop.permute.xlu1 %983 }
 0x2c9   :  { %v5462_v59 = vpop.permute.xlu0 %1339  ;;  %v1045_v29 = vmul.f32 %v5471_v6, %v984_v19 }
 0x2cd   :  { %v5449_v7 = vpop.permute.xlu1 %1311 }
 0x2d1   :  { %v5453_v57 = vpop.permute.xlu1 %1319 }
 0x2d6   :  { %v989_v50 = vpop.permute.xlu1 %988 }
 0x2d7   :  { %v1046_v34 = vmul.f32 %v5471_v6, %v989_v50 }
 0x2db   :  { %v5459_v41 = vpop.permute.xlu1 %1315 }
 0x2e0   :  { %v1004_v55 = vpop.permute.xlu1 %1003  ;;  %v952_v8 = vpop.permute.xlu0 %951 }
 0x2e1   :  { %v954_v10 = vmul.f32 %v952_v8, %v551_v36 }
 0x2e4   :  { %v959_v0 = vpop.permute.xlu0 %958 }
 0x2e5   :  { %v5468_v16 = vpop.permute.xlu1 %1327  ;;  %v1040_v13 = vmul.f32 %v5471_v6, %v959_v0  ;;  %v5497_v0 = vrot.slane %v551_v36, %v5115_v24 }
 0x2e8   :  { %v974_v14 = vpop.permute.xlu0 %973 }
 0x2e9   :  { %v1043_v42 = vmul.f32 %v5471_v6, %v974_v14  ;;  %v1049_v14 = vmul.f32 %v5471_v6, %v1004_v55 }
 0x2ea   :  { %v946_v51 = vpop.permute.xlu1 %945 }
 0x2eb   :  { %v948_v44 = vmul.f32 %v946_v51, %v551_v36 }
 0x2ec   :  { %v979_v18 = vpop.permute.xlu0 %978 }
 0x2ed   :  { %v955_v40 = vsel %vm942_vm5, %v948_v44, %v954_v10  ;;  %v1044_v37 = vmul.f32 %v5471_v6, %v979_v18 }
 0x2ee   :  { %v5478_v45 = vrot.slane %v955_v40, %v5105_v12 }
 0x2ef   :  { %v1280_v62 = vpop.permute.xlu1 %1279 }
 0x2f0   :  { %v1060_v28 = vsub.f32 %v1040_v13, %v5478_v45  ;;  %v1061_v30 = vsub.f32 %v1041_v54, %v5478_v45  ;;  %v1062_v58 = vsub.f32 %v1042_v56, %v5478_v45  ;;  %v994_v61 = vpop.permute.xlu0 %993  ;;  %v1063_v15 = vsub.f32 %v1043_v42, %v5478_v45 }
 0x2f1   :  { %v1064_v9 = vsub.f32 %v1044_v37, %v5478_v45  ;;  %v1065_v17 = vsub.f32 %v1045_v29, %v5478_v45  ;;  %v1047_v31 = vmul.f32 %v5471_v6, %v994_v61  ;;  %v1282_v35 = vmul.f32 %v1280_v62, %v551_v36 }
 0x2f2   :  { %v1076_v60 = vmul.f32 1.442695, %v1060_v28  ;;  %v1078_v20 = vmul.f32 1.442695, %v1061_v30  ;;  %v1080_v38 = vmul.f32 1.442695, %v1062_v58  ;;  %v1066_v47 = vsub.f32 %v1046_v34, %v5478_v45 }
 0x2f3   :  { %v1286_v21 = vpop.permute.xlu1 %1285  ;;  %v1082_v32 = vmul.f32 1.442695, %v1063_v15  ;;  %v1084_v46 = vmul.f32 1.442695, %v1064_v9  ;;  %v1086_v23 = vmul.f32 1.442695, %v1065_v17  ;;  %v1067_v8 = vsub.f32 %v1047_v31, %v5478_v45 }
 0x2f4   :  { %4370 = vpow2.f32 %v1076_v60  ;;  %v1288_v27 = vmul.f32 %v1286_v21, %v551_v36  ;;  %v999_v26 = vpop.permute.xlu0 %998  ;;  %v1088_v10 = vmul.f32 1.442695, %v1066_v47  ;;  %v1069_v40 = vsub.f32 %v1049_v14, %v5478_v45 }
 0x2f5   :  { %4372 = vpow2.f32 %v1078_v20  ;;  %v1048_v63 = vmul.f32 %v5471_v6, %v999_v26  ;;  %v1359_v56 = vmul.f32 %v5497_v0, %v5443_v53  ;;  %v1090_v36 = vmul.f32 1.442695, %v1067_v8 }
 0x2f6   :  { %4374 = vpow2.f32 %v1080_v38  ;;  %v1289_v22 = vsel %vm942_vm5, %v1282_v35, %v1288_v27  ;;  %v1360_v37 = vmul.f32 %v5497_v0, %v5447_v4  ;;  %v1358_v58 = vmul.f32 %v5497_v0, %v5451_v43 }
 0x2f7   :  { %4376 = vpow2.f32 %v1082_v32  ;;  %v5502_v44 = vrot.slane %v1289_v22, %v5115_v24  ;;  %v1068_v18 = vsub.f32 %v1048_v63, %v5478_v45  ;;  %v1361_v15 = vmul.f32 %v5497_v0, %v5445_v39 }
 0x2f8   :  { %v1009_v19 = vpop.permute.xlu1 %1008  ;;  %v1014_v50 = vpop.permute.xlu0 %1013  ;;  %4378 = vpow2.f32 %v1084_v46  ;;  %v1094_v20 = vmul.f32 1.442695, %v1069_v40  ;;  %v1362_v38 = vmul.f32 %v5497_v0, %v5455_v2  ;;  %v1363_v34 = vmul.f32 %v5497_v0, %v5449_v7 }
 0x2f9   :  { %v1050_v52 = vmul.f32 %v5471_v6, %v1009_v19  ;;  %v1051_v51 = vmul.f32 %v5471_v6, %v1014_v50  ;;  %4380 = vpow2.f32 %v1086_v23  ;;  %v1092_v61 = vmul.f32 1.442695, %v1068_v18 }
 0x2fa   :  { %4382 = vpow2.f32 %v1088_v10  ;;  %v1379_v53 = vsub.f32 %v1359_v56, %v5502_v44  ;;  %v1380_v29 = vsub.f32 %v1360_v37, %v5502_v44  ;;  %v1378_v21 = vsub.f32 %v1358_v58, %v5502_v44 }
 0x2fb   :  { %v1070_v13 = vsub.f32 %v1050_v52, %v5478_v45  ;;  %v1071_v62 = vsub.f32 %v1051_v51, %v5478_v45  ;;  %4384 = vpow2.f32 %v1090_v36  ;;  %v1365_v32 = vmul.f32 %v5497_v0, %v5453_v57 }
 0x2fc   :  { %v1019_v54 = vpop.permute.xlu0 %1018  ;;  %4386 = vpow2.f32 %v1092_v61  ;;  %v1381_v2 = vsub.f32 %v1361_v15, %v5502_v44  ;;  %v1396_v31 = vmul.f32 1.442695, %v1379_v53  ;;  %v1364_v35 = vmul.f32 %v5497_v0, %v5459_v41 }
 0x2fd   :  { %v1332_v55 = vpop.permute.xlu1 %1331  ;;  %v1052_v28 = vmul.f32 %v5471_v6, %v1019_v54  ;;  %v1096_v9 = vmul.f32 1.442695, %v1070_v13  ;;  %v1098_v26 = vmul.f32 1.442695, %v1071_v62  ;;  %4388 = vpow2.f32 %v1094_v20 }
 0x2fe   :  { %v4371_v42 = vpop.eup %4370  ;;  %v1398_v47 = vmul.f32 1.442695, %v1380_v29  ;;  %v1383_v7 = vsub.f32 %v1363_v34, %v5502_v44  ;;  %v1394_v22 = vmul.f32 1.442695, %v1378_v21  ;;  %v1382_v57 = vsub.f32 %v1362_v38, %v5502_v44 }
 0x2ff   :  { %v4373_v30 = vpop.eup %4372  ;;  %v1072_v39 = vsub.f32 %v1052_v28, %v5478_v45  ;;  %4390 = vpow2.f32 %v1096_v9  ;;  %v1367_v14 = vmul.f32 %v5497_v0, %v5468_v16  ;;  %v1400_v41 = vmul.f32 1.442695, %v1381_v2 }
 0x300   :  { %v1108_v60 = vadd.f32 %v4373_v30, %v4371_v42  ;;  %v4375_v4 = vpop.eup %4374  ;;  %v4019_v19 = vpack.c.bf16 %v4373_v30, %v4371_v42  ;;  %4392 = vpow2.f32 %v1098_v26  ;;  %v1034_v51 = vpop.permute.xlu0 %1033  ;;  %v1384_v40 = vsub.f32 %v1364_v35, %v5502_v44 }
 0x301   :  { %v5522_v43 = vpop.permute.xlu1 %1335  ;;  %v4377_v17 = vpop.eup %4376  ;;  %v1100_v23 = vmul.f32 1.442695, %v1072_v39  ;;  %4394 = vpow2.f32 %v1396_v31  ;;  %v1368_v54 = vmul.f32 %v5497_v0, %v1332_v55  ;;  %v1404_v36 = vmul.f32 1.442695, %v1383_v7 }
 0x302   :  { %v1109_v27 = vadd.f32 %v4375_v4, %v1108_v60  ;;  %v4379_v63 = vpop.eup %4378  ;;  %4020 = vmatpush3.bf16.msra.mxu1 %v4019_v19  ;;  %4396 = vpow2.f32 %v1398_v47  ;;  %v4022_v13 = vpack.c.bf16 %v4377_v17, %v4375_v4  ;;  %v1402_v37 = vmul.f32 1.442695, %v1382_v57 }
 0x303   :  { %v4381_v52 = vpop.eup %4380  ;;  %4021 = vmatprep.subr.bf16.mxu1 %v4533_v33  ;;  %4398 = vpow2.f32 %v1394_v22  ;;  %v1055_v62 = vmul.f32 %v5471_v6, %v1034_v51  ;;  %v1366_v30 = vmul.f32 %v5497_v0, %v5457_v5  ;;  %v1385_v58 = vsub.f32 %v1365_v32, %v5502_v44 }
 0x304   :  { %v1110_v46 = vadd.f32 %v4377_v17, %v1109_v27  ;;  %v4383_v56 = vpop.eup %4382  ;;  %4400 = vpow2.f32 %v1100_v23  ;;  %v1387_v15 = vsub.f32 %v1367_v14, %v5502_v44  ;;  %v1406_v20 = vmul.f32 1.442695, %v1384_v40 }
 0x305   :  { %v4385_v28 = vpop.eup %4384  ;;  %4402 = vpow2.f32 %v1400_v41  ;;  %v1386_v29 = vsub.f32 %v1366_v30, %v5502_v44  ;;  %v4025_v4 = vpack.c.bf16 %v4381_v52, %v4379_v63  ;;  %v1388_v5 = vsub.f32 %v1368_v54, %v5502_v44 }
 0x306   :  { %v1111_v50 = vadd.f32 %v4379_v63, %v1110_v46  ;;  %v1024_v8 = vpop.permute.xlu1 %1023  ;;  %4023 = vmatpush3.bf16.msra.mxu1 %v4022_v13  ;;  %v4387_v60 = vpop.eup %4386  ;;  %4404 = vpow2.f32 %v1404_v36  ;;  %v1075_v21 = vsub.f32 %v1055_v62, %v5478_v45  ;;  %v1408_v27 = vmul.f32 1.442695, %v1385_v58 }
 0x307   :  { %v1053_v10 = vmul.f32 %v5471_v6, %v1024_v8  ;;  %4024 = vmatprep.subr.bf16.mxu1 %v4533_v33  ;;  %v4389_v38 = vpop.eup %4388  ;;  %4406 = vpow2.f32 %v1402_v37  ;;  %v1369_v26 = vmul.f32 %v5497_v0, %v5522_v43  ;;  %v1412_v32 = vmul.f32 1.442695, %v1387_v15 }
 0x308   :  { %v1112_v18 = vadd.f32 %v4381_v52, %v1111_v50  ;;  %v1370_v35 = vmul.f32 %v5497_v0, %v5462_v59  ;;  %v1410_v46 = vmul.f32 1.442695, %v1386_v29  ;;  %v4028_v47 = vpack.c.bf16 %v4385_v28, %v4383_v56 }
 0x309   :  { %v1073_v16 = vsub.f32 %v1053_v10, %v5478_v45  ;;  %v5550_v34 = vpop.eup %4390  ;;  %v1414_v43 = vmul.f32 1.442695, %v1388_v5  ;;  %v1106_v19 = vmul.f32 1.442695, %v1075_v21  ;;  %v1389_v23 = vsub.f32 %v1369_v26, %v5502_v44 }
 0x30a   :  { %v1113_v42 = vadd.f32 %v4383_v56, %v1112_v18  ;;  %4026 = vmatpush3.bf16.msra.mxu1 %v4025_v4  ;;  %v4393_v39 = vpop.eup %4392  ;;  %v1390_v51 = vsub.f32 %v1370_v35, %v5502_v44  ;;  %v4031_v18 = vpack.c.bf16 %v4389_v38, %v4387_v60  ;;  %v5580_v35 = vld [vmem:[%s6320_s4] sm:$0xff] }
 0x30b   :  { %v1102_v55 = vmul.f32 1.442695, %v1073_v16  ;;  %v1344_v61 = vpop.permute.xlu1 %1343  ;;  %4027 = vmatprep.subr.bf16.mxu1 %v4533_v33  ;;  %v4395_v31 = vpop.eup %4394  ;;  %v1416_v13 = vmul.f32 1.442695, %v1389_v23 }
 0x30c   :  { %v1114_v53 = vadd.f32 %v4385_v28, %v1113_v42  ;;  %v4397_v7 = vpop.eup %4396  ;;  %v1371_v57 = vmul.f32 %v5497_v0, %v1344_v61  ;;  %v1418_v58 = vmul.f32 1.442695, %v1390_v51 }
 0x30d   :  { %4408 = vpow2.f32 %v1102_v55  ;;  %v4399_v50 = vpop.eup %4398  ;;  %v4034_v55 = vpack.c.bf16 %v4393_v39, %v5550_v34 }
 0x30e   :  { %v1115_v9 = vadd.f32 %v4387_v60, %v1114_v53  ;;  %4410 = vpow2.f32 %v1406_v20  ;;  %4029 = vmatpush3.bf16.msra.mxu1 %v4028_v47  ;;  %v4401_v59 = vpop.eup %4400  ;;  %v1426_v14 = vadd.f32 %v4399_v50, %v4395_v31  ;;  %v1391_v16 = vsub.f32 %v1371_v57, %v5502_v44 }
 0x30f   :  { %4412 = vpow2.f32 %v1408_v27  ;;  %4030 = vmatprep.subr.bf16.mxu1 %v4533_v33  ;;  %v4403_v41 = vpop.eup %4402  ;;  %v570_v27 = vsub.s32 3, %v5098_v49 }
 0x310   :  { %v1116_v17 = vadd.f32 %v4389_v38, %v1115_v9  ;;  %v1029_v2 = vpop.permute.xlu1 %1028  ;;  %4414 = vpow2.f32 %v1412_v32  ;;  %v1427_v56 = vadd.f32 %v4397_v7, %v1426_v14  ;;  %v4405_v36 = vpop.eup %4404  ;;  %v4046_v62 = vpack.c.bf16 %v4403_v41, %v4397_v7 }
 0x311   :  { %v1054_v63 = vmul.f32 %v5471_v6, %v1029_v2  ;;  %v4043_v6 = vpack.c.bf16 %v4395_v31, %v4399_v50  ;;  %4416 = vpow2.f32 %v1410_v46  ;;  %v4407_v42 = vpop.eup %4406  ;;  %v1420_v20 = vmul.f32 1.442695, %v1391_v16 }
 0x312   :  { %v1117_v22 = vadd.f32 %v5550_v34, %v1116_v17  ;;  %4418 = vpow2.f32 %v1106_v19  ;;  %4032 = vmatpush3.bf16.msra.mxu1 %v4031_v18  ;;  %v1428_v37 = vadd.f32 %v4403_v41, %v1427_v56  ;;  %v4049_v9 = vpack.c.bf16 %v4405_v36, %v4407_v42 }
 0x313   :  { %v1074_v8 = vsub.f32 %v1054_v63, %v5478_v45  ;;  %4044 = vmatpush3.bf16.msra.mxu0 %v4043_v6  ;;  %4033 = vmatprep.subr.bf16.mxu1 %v4533_v33  ;;  %v571_v46 = vrot.slane %v5580_v35, %v570_v27 }
 0x314   :  { %v1118_v52 = vadd.f32 %v4393_v39, %v1117_v22  ;;  %4045 = vmatprep.subr.bf16.mxu0 %v4533_v33  ;;  %v1429_v53 = vadd.f32 %v4407_v42, %v1428_v37 }
 0x315   :  { %v1104_v10 = vmul.f32 1.442695, %v1074_v8  ;;  %v1348_v40 = vpop.permute.xlu1 %1347  ;;  %v639_v57 = vadd.f32 %v5170_v25, %v571_v46 }
 0x316   :  { %v1119_v54 = vadd.f32 %v4401_v59, %v1118_v52  ;;  %v1372_v45 = vmul.f32 %v5497_v0, %v1348_v40  ;;  %4035 = vmatpush3.bf16.msra.mxu1 %v4034_v55  ;;  %v1430_v38 = vadd.f32 %v4405_v36, %v1429_v53 }
 0x317   :  { %4420 = vpow2.f32 %v1104_v10  ;;  %v4409_v30 = vpop.eup %4408  ;;  %4047 = vmatpush3.bf16.msra.mxu0 %v4046_v62  ;;  %4036 = vmatprep.subr.bf16.mxu1 %v4533_v33 }
 0x318   :  { %v1392_v28 = vsub.f32 %v1372_v45, %v5502_v44  ;;  %4422 = vpow2.f32 %v1414_v43  ;;  %v1120_v15 = vadd.f32 %v4409_v30, %v1119_v54  ;;  %4048 = vmatprep.subr.bf16.mxu0 %v4533_v33  ;;  %v4037_v29 = vpack.c.bf16 %v4409_v30, %v4401_v59  ;;  %v4411_v4 = vpop.eup %4410 }
 0x319   :  { %v1352_v61 = vpop.permute.xlu1 %1351  ;;  %4424 = vpow2.f32 %v1416_v13  ;;  %v4413_v34 = vpop.eup %4412  ;;  %v1431_v39 = vadd.f32 %v4411_v4, %v1430_v38  ;;  %v1448_v45 = vrot.slane %v639_v57, 1 }
 0x31a   :  { %v1373_v60 = vmul.f32 %v5497_v0, %v1352_v61  ;;  %v1422_v5 = vmul.f32 1.442695, %v1392_v28  ;;  %v4415_v26 = vpop.eup %4414  ;;  %4426 = vpow2.f32 %v1418_v58  ;;  %4038 = vmatpush3.bf16.msra.mxu1 %v4037_v29  ;;  %v4052_v31 = vpack.c.bf16 %v4413_v34, %v4411_v4 }
 0x31b   :  { %4050 = vmatpush3.bf16.msra.mxu0 %v4049_v9  ;;  %v4417_v17 = vpop.eup %4416  ;;  %4428 = vpow2.f32 %v1420_v20  ;;  %v1432_v2 = vadd.f32 %v4413_v34, %v1431_v39  ;;  %4039 = vmatprep.subr.bf16.mxu1 %v4533_v33  ;;  %v4513_v34 = vld [vmem:[%s6315_s0] sm:$0x3] }
 0x31c   :  { %v1393_v21 = vsub.f32 %v1373_v60, %v5502_v44  ;;  %4051 = vmatprep.subr.bf16.mxu0 %v4533_v33  ;;  %v4419_v32 = vpop.eup %4418  ;;  %4430 = vpow2.f32 %v1422_v5  ;;  %v4055_v50 = vpack.c.bf16 %v4415_v26, %v4417_v17 }
 0x31d   :  { %v1433_v47 = vadd.f32 %v4417_v17, %v1432_v2  ;;  %v3275_v17 = vld [vmem:[%s6322_s9 + $0x8] sm:$0xff]  }
 0x31e   :  { %v1424_v0 = vmul.f32 1.442695, %v1393_v21 }
 0x31f   :  { %4053 = vmatpush3.bf16.msra.mxu0 %v4052_v31  ;;  %v1434_v43 = vadd.f32 %v4415_v26, %v1433_v47 }
 0x320   :  { %4432 = vpow2.f32 %v1424_v0  ;;  %4054 = vmatprep.subr.bf16.mxu0 %v4533_v33  ;;  %v3095_v0 = vld [vmem:[%s6322_s9] sm:$0xff]  }
 0x321   :  { %v4421_v44 = vpop.eup %4420 }
 0x322   :  { %v1121_v63 = vadd.f32 %v4421_v44, %v1120_v15  ;;  %v4040_v7 = vpack.c.bf16 %v4419_v32, %v4421_v44  ;;  %v4423_v22 = vpop.eup %4422 }
 0x323   :  { %v4425_v23 = vpop.eup %4424  ;;  %v1435_v8 = vadd.f32 %v4423_v22, %v1434_v43  ;;  %4056 = vmatpush3.bf16.msra.mxu0 %v4055_v50  ;;  %v3280_v43 = vld [vmem:[%s6322_s9 + $0x30] sm:$0xff]   ;;  %v1527_v50 = vld [vmem:[%s6323_s3 + $0x8] sm:$0xff] }
 0x324   :  { %v1122_v19 = vadd.f32 %v4419_v32, %v1121_v63  ;;  %4041 = vmatpush3.bf16.msra.mxu1 %v4040_v7  ;;  %4057 = vmatprep.subr.bf16.mxu0 %v4533_v33  ;;  %v4427_v59 = vpop.eup %4426  ;;  %v4058_v14 = vpack.c.bf16 %v4425_v23, %v4423_v22  ;;  %v3276_v32 = vld [vmem:[%s6322_s9 + $0x10] sm:$0xff]   ;;  %v3277_v63 = vld [vmem:[%s6322_s9 + $0x18] sm:$0xff]   ;;  %v3278_v7 = vld [vmem:[%s6322_s9 + $0x20] sm:$0xff]  }
 0x325   :  { %4066 = vmatprep.subr.bf16.mxu1 %v4533_v33  ;;  %v1436_v52 = vadd.f32 %v4425_v23, %v1435_v8  ;;  %v4429_v6 = vpop.eup %4428  ;;  %v3279_v22 = vld [vmem:[%s6322_s9 + $0x28] sm:$0xff]   ;;  %v3281_v23 = vld [vmem:[%s6322_s9 + $0x38] sm:$0xff]   ;;  %v4537_v8 = vmov 3  }
 0x326   :  { %v4431_v41 = vpop.eup %4430  ;;  %v4061_v18 = vpack.c.bf16 %v4429_v6, %v4427_v59  ;;  %v1123_v36 = vrot.slane %v1122_v19, 4  ;;  %4323 = vset.pattern.permute.xlu1 %v4537_v8  ;;  %4322 = vset.pattern.permute.xlu0 %v4537_v8 }
 0x327   :  { %3705 = vmatmul.mubr.f32.vlgmr.msra.gmra.mrb[2].mxu1 %v639_v57  ;;  %v1437_v51 = vadd.f32 %v4427_v59, %v1436_v52  ;;  %4059 = vmatpush3.bf16.msra.mxu0 %v4058_v14  ;;  %v4514_v59 = vld [vmem:[%s6316_s5 + $0x8] sm:$0xff]  ;;  %v4515_v52 = vld [vmem:[%s6316_s5] sm:$0xff]  ;;  %v4516_v14 = vld [vmem:[%s6316_s5 + $0x10] sm:$0xff] }
 0x328   :  { %3774 = vmatprep.mubr.msk.f32.mxu1 %vm4534_vm2, %v4535_v48  ;;  %4060 = vmatprep.subr.bf16.mxu0 %v4533_v33  ;;  %v1124_v13 = vadd.f32 %v1123_v36, %v1122_v19  ;;  %v1526_v19 = vld [vmem:[%s6323_s3] sm:$0xff]  ;;  %v4527_v36 = vld [vmem:[%s6316_s5 + $0x58] sm:$0xff] }
 0x329   :  { %v1438_v25 = vadd.f32 %v4429_v6, %v1437_v51  ;;  %4068 = vmatpush3.bf16.msra.mxu1 %v3095_v0  ;;  %v4114_v57 = vpack.c.bf16 %v1527_v50, %v1526_v19  ;;  %v4517_v6 = vld [vmem:[%s6316_s5 + $0x40] sm:$0xff]  ;;  %v4519_v51 = vld [vmem:[%s6316_s5 + $0x50] sm:$0xff]  ;;  %v1533_v0 = vld [vmem:[%s6323_s3 + $0x38] sm:$0xff] }
 0x32a   :  { %v4433_v10 = vpop.eup %4432  ;;  %v1125_v16 = vrot.slane %v1124_v13, 2  ;;  %4069 = vmatprep.subr.bf16.mxu1 %v4533_v33  ;;  %v1541_v19 = vld [vmem:[%s6323_s3 + $0x78] sm:$0xff] }
 0x32b   :  { %v1439_v40 = vadd.f32 %v4431_v41, %v1438_v25  ;;  %4062 = vmatpush3.bf16.msra.mxu0 %v4061_v18  ;;  %v4064_v54 = vpack.c.bf16 %v4433_v10, %v4431_v41  ;;  %v4518_v41 = vld [vmem:[%s6316_s5 + $0x18] sm:$0xff]  ;;  %v4521_v25 = vld [vmem:[%s6316_s5 + $0x60] sm:$0xff]  ;;  %v4522_v18 = vld [vmem:[%s6316_s5 + $0x28] sm:$0xff] }
 0x32c   :  { %4063 = vmatprep.subr.bf16.mxu0 %v4533_v33  ;;  %v1126_v42 = vadd.f32 %v1125_v16, %v1124_v13  ;;  %v4528_v13 = vld [vmem:[%s6316_s5 + $0x68] sm:$0xff]  ;;  %v4529_v16 = vld [vmem:[%s6316_s5 + $0x78] sm:$0xff] }
 0x32d   :  { %v1440_v56 = vadd.f32 %v4433_v10, %v1439_v40  ;;  %4071 = vmatpush3.bf16.msra.mxu1 %v3275_v17  ;;  %v4520_v10 = vld [vmem:[%s6316_s5 + $0x20] sm:$0xff]  ;;  %v4523_v40 = vld [vmem:[%s6316_s5 + $0x70] sm:$0xff] }
 0x32e   :  { %v1127_v62 = vrot.slane %v1126_v42, 1  ;;  %4072 = vmatprep.subr.bf16.mxu1 %v4533_v33 }
 0x32f   :  { %4065 = vmatpush3.bf16.msra.mxu0 %v4064_v54  ;;  %v1441_v37 = vrot.slane %v1440_v56, 4  ;;  %v4524_v54 = vld [vmem:[%s6316_s5 + $0x30] sm:$0xff] }
 0x330   :  { %4090 = vmatprep.subr.bf16.mxu0 %v4533_v33  ;;  %v1128_v30 = vadd.f32 %v1127_v62, %v1126_v42 }
 0x331   :  { %v1442_v28 = vadd.f32 %v1441_v37, %v1440_v56  ;;  %4074 = vmatpush3.bf16.msra.mxu1 %v3276_v32  ;;  %v4525_v56 = vld [vmem:[%s6316_s5 + $0x38] sm:$0xff]  ;;  %v1534_v32 = vld [vmem:[%s6323_s3 + $0x40] sm:$0xff] }
 0x332   :  { %3740 = vmatmul.mubr.f32.vlgmr.msra.gmra.mrb[18].mxu0 %v1448_v45  ;;  %4434 = vrcp.f32 %v1128_v30  ;;  %4075 = vmatprep.subr.bf16.mxu1 %v4533_v33  ;;  %v4526_v45 = vld [vmem:[%s6316_s5 + $0x48] sm:$0xff]  ;;  %v1610_v30 = vsub.s32 5, %v5098_v49 }
 0x333   :  { %3809 = vmatprep.mubr.msk.f32.mxu0 %vm4534_vm2, %v4535_v48  ;;  %v1443_v58 = vrot.slane %v1442_v28, 2 }
 0x335   :  { %v1444_v55 = vadd.f32 %v1443_v58, %v1442_v28  ;;  %4077 = vmatpush3.bf16.msra.mxu1 %v3277_v63  ;;  %v1605_v28 = vsub.s32 4, %v5098_v49  ;;  %v1538_v63 = vld [vmem:[%s6323_s3 + $0x60] sm:$0xff] }
 0x336   :  { %4078 = vmatprep.subr.bf16.mxu1 %v4533_v33 }
 0x337   :  { %v1445_v61 = vrot.slane %v1444_v55, 1  ;;  %v1606_v58 = vrot.slane %v5580_v35, %v1605_v28 }
 0x339   :  { %v1446_v60 = vadd.f32 %v1445_v61, %v1444_v55  ;;  %4080 = vmatpush3.bf16.msra.mxu1 %v3278_v7  ;;  %v1539_v7 = vld [vmem:[%s6323_s3 + $0x68] sm:$0xff] }
 0x33a   :  { %4081 = vmatprep.subr.bf16.mxu1 %v4533_v33 }
 0x33b   :  { %4436 = vrcp.f32 %v1446_v60  ;;  %v1528_v60 = vld [vmem:[%s6323_s3 + $0x10] sm:$0xff] }
 0x33c   :  { %v4435_v53 = vpop.eup %4434 }
 0x33d   :  { %4083 = vmatpush3.bf16.msra.mxu1 %v3279_v22  ;;  %v4138_v22 = vpack.c.bf16 %v1539_v7, %v1538_v63 }
 0x33e   :  { %4084 = vmatprep.subr.bf16.mxu1 %v4533_v33 }
 0x341   :  { %4086 = vmatpush3.bf16.msra.mxu1 %v3280_v43  ;;  %v1540_v43 = vld [vmem:[%s6323_s3 + $0x70] sm:$0xff] }
 0x342   :  { %4087 = vmatprep.subr.bf16.mxu1 %v4533_v33  ;;  %v4142_v50 = vpack.c.bf16 %v1541_v19, %v1540_v43 }
 0x345   :  { %v4437_v4 = vpop.eup %4436  ;;  %4089 = vmatpush3.bf16.msra.mxu1 %v3281_v23  ;;  %v3282_v23 = vld [vmem:[%s6324_s10 + $0x8] sm:$0xff]  }
 0x346   :  { %4115 = vmatprep.subr.bf16.mxu1 %v4114_v57  ;;  %v3132_v8 = vunpack.c.l.bf16 %v3282_v23 }
 0x3fa   :  { %v1195_v15 = vpop.f32.mrb[2].mxu1 }
 0x3fb   :  { %v1200_v20 = vmul.f32 %v4435_v53, %v1195_v15  ;;  %v3706_v29 = vpop.f32.mrb[3].mxu1  ;;  %v1611_v53 = vrot.slane %v5580_v35, %v1610_v30  ;;  %v3127_v15 = vld [vmem:[%s6324_s10] sm:$0xff]  }
 0x3fc   :  { %v3159_v30 = vld [vmem:[%s6325_s11] sm:$0xff]  }
 0x3fd   :  { %1201 = vst [vmem:[#allocation2] sm:$0x1] %v1200_v20  ;;  %v1529_v20 = vld [vmem:[%s6323_s3 + $0x18] sm:$0xff]  ;;  %4092 = vmatpush3.bf16.msra.mxu0 %v3159_v30 }
 0x3fe   :  { %4093 = vmatprep.subr.bf16.mxu0 %v4533_v33 }
 0x405   :  { %v1516_v38 = vpop.f32.mrb[18].mxu0 }
 0x406   :  { %v1521_v9 = vmul.f32 %v4437_v4, %v1516_v38  ;;  %v3741_v5 = vpop.f32.mrb[19].mxu0  ;;  %v3128_v4 = vunpack.c.l.bf16 %v3127_v15 }
 0x407   :  { %v1530_v5 = vld [vmem:[%s6323_s3 + $0x20] sm:$0xff] }
 0x408   :  { %1522 = vst [vmem:[#allocation2 + $0x1] sm:$0x1] %v1521_v9  ;;  %v4118_v9 = vpack.c.bf16 %v1529_v20, %v1528_v60  ;;  %v3294_v60 = vld [vmem:[%s6325_s11 + $0x30] sm:$0xff]   ;;  %v3295_v20 = vld [vmem:[%s6325_s11 + $0x38] sm:$0xff]  }
 0x40f   :  { %v1523_v21 = vld [vmem:[#allocation2] sm:$0x3] }
 0x410   :  { %v5599_v26 = vadd.f32 %v4513_v34, %v1523_v21  ;;  %v1531_v21 = vld [vmem:[%s6323_s3 + $0x28] sm:$0xff] }
 0x411   :  { %v4122_v34 = vpack.c.bf16 %v1531_v21, %v1530_v5 }
 0x412   :  { %v1590_v39 = vsel %vm133_vm0, %v5599_v26, 0.0 }
 0x413   :  { %1591 = vadd.xlane.f32.xlu0 %v1590_v39  ;;  %v1532_v39 = vld [vmem:[%s6323_s3 + $0x30] sm:$0xff] }
 0x414   :  { %v4126_v17 = vpack.c.bf16 %v1533_v0, %v1532_v39 }
 0x429   :  { %1811 = vperm.xlu0 %4322, %v4515_v52   ;;  %v3133_v52 = vunpack.c.h.bf16 %v3282_v23 }
 0x42d   :  { %1843 = vperm.xlu0 %4322, %v4517_v6   ;;  %v3284_v6 = vld [vmem:[%s6324_s10 + $0x18] sm:$0xff]  }
 0x431   :  { %1851 = vperm.xlu0 %4322, %v4519_v51   ;;  %v3140_v51 = vunpack.c.l.bf16 %v3284_v6 }
 0x435   :  { %1859 = vperm.xlu0 %4322, %v4521_v25   ;;  %v3141_v25 = vunpack.c.h.bf16 %v3284_v6 }
 0x439   :  { %1867 = vperm.xlu0 %4322, %v4523_v40   ;;  %v3286_v40 = vld [vmem:[%s6324_s10 + $0x28] sm:$0xff]  }
 0x43d   :  { %4327 = vset.pattern.permute.xlu0 %v4531_v1 }
 0x4a0   :  { %v1592_v2 = vpop.xlane.xlu0 %1591 }
 0x4a1   :  { %v1593_v31 = vmul.f32 0.0078125, %v1592_v2  ;;  %v1535_v2 = vld [vmem:[%s6323_s3 + $0x48] sm:$0xff] }
 0x4a3   :  { %v5616_v44 = vsub.f32 %v5599_v26, %v1593_v31  ;;  %v4130_v31 = vpack.c.bf16 %v1535_v2, %v1534_v32 }
 0x4a5   :  { %v1595_v46 = vmul.f32 %v5616_v44, %v5616_v44 }
 0x4a7   :  { %v1596_v47 = vsel %vm133_vm0, %v1595_v46, 0.0  ;;  %v1537_v46 = vld [vmem:[%s6323_s3 + $0x58] sm:$0xff] }
 0x4a8   :  { %1597 = vadd.xlane.f32.xlu1 %v1596_v47 }
 0x4b9   :  { %1815 = vperm.xlu1 %4323, %v4514_v59   ;;  %v3283_v59 = vld [vmem:[%s6324_s10 + $0x10] sm:$0xff]  }
 0x4bd   :  { %1819 = vperm.xlu1 %4323, %v4516_v14   ;;  %v3136_v14 = vunpack.c.l.bf16 %v3283_v59 }
 0x4c1   :  { %1823 = vperm.xlu1 %4323, %v4518_v41   ;;  %v3137_v41 = vunpack.c.h.bf16 %v3283_v59 }
 0x4c5   :  { %1827 = vperm.xlu1 %4323, %v4520_v10   ;;  %v3285_v10 = vld [vmem:[%s6324_s10 + $0x20] sm:$0xff]  }
 0x4c9   :  { %1831 = vperm.xlu1 %4323, %v4522_v18   ;;  %v3144_v18 = vunpack.c.l.bf16 %v3285_v10 }
 0x4cd   :  { %1835 = vperm.xlu1 %4323, %v4524_v54   ;;  %v3145_v54 = vunpack.c.h.bf16 %v3285_v10 }
 0x4d1   :  { %1839 = vperm.xlu1 %4323, %v4525_v56   ;;  %v3148_v56 = vunpack.c.l.bf16 %v3286_v40 }
 0x4d5   :  { %1847 = vperm.xlu1 %4323, %v4526_v45   ;;  %v3287_v45 = vld [vmem:[%s6324_s10 + $0x30] sm:$0xff]  }
 0x4d9   :  { %1855 = vperm.xlu1 %4323, %v4527_v36   ;;  %v3149_v36 = vunpack.c.h.bf16 %v3286_v40 }
 0x4dd   :  { %1863 = vperm.xlu1 %4323, %v4528_v13   ;;  %v3152_v13 = vunpack.c.l.bf16 %v3287_v45 }
 0x4e1   :  { %1871 = vperm.xlu1 %4323, %v4529_v16   ;;  %v3288_v16 = vld [vmem:[%s6324_s10 + $0x38] sm:$0xff]  }
 0x4e5   :  { %4324 = vset.pattern.permute.xlu1 %v4531_v1 }
 0x535   :  { %v1598_v42 = vpop.xlane.xlu1 %1597 }
 0x536   :  { %v1599_v37 = vmul.f32 0.0078125, %v1598_v42  ;;  %v3153_v42 = vunpack.c.h.bf16 %v3287_v45 }
 0x538   :  { %v1600_v62 = vadd.f32 1e-05, %v1599_v37  ;;  %v3156_v37 = vunpack.c.l.bf16 %v3288_v16 }
 0x53a   :  { %4438 = vrsqrt.f32 %v1600_v62  ;;  %v3157_v62 = vunpack.c.h.bf16 %v3288_v16 }
 0x544   :  { %v4439_v55 = vpop.eup %4438 }
 0x545   :  { %v1602_v61 = vmul.f32 %v4439_v55, %v5616_v44  ;;  %v1536_v44 = vld [vmem:[%s6323_s3 + $0x50] sm:$0xff] }
 0x546   :  { %v4134_v47 = vpack.c.bf16 %v1537_v46, %v1536_v44  ;;  %v3290_v55 = vld [vmem:[%s6325_s11 + $0x10] sm:$0xff]  }
 0x547   :  { %v1607_v29 = vmul.f32 %v1606_v58, %v1602_v61  ;;  %v3289_v58 = vld [vmem:[%s6325_s11 + $0x8] sm:$0xff]   ;;  %v3291_v61 = vld [vmem:[%s6325_s11 + $0x18] sm:$0xff]  }
 0x548   :  { %4095 = vmatpush3.bf16.msra.mxu0 %v3289_v58 }
 0x549   :  { %v1612_v38 = vadd.f32 %v1611_v53, %v1607_v29  ;;  %4096 = vmatprep.subr.bf16.mxu0 %v4533_v33  ;;  %v3292_v53 = vld [vmem:[%s6325_s11 + $0x20] sm:$0xff]  }
 0x54a   :  { %v1525_v29 = vld [vmem:[%s6326_s2] sm:$0x3] }
 0x54b   :  { %3775 = vmatmul.mubr.f32.vlgmr.msra.gmra.mrb[4].mxu1 %v1612_v38 }
 0x54c   :  { %4117 = vmatpush3.bf16.msra.mxu1 %v4114_v57  ;;  %3844 = vmatprep.mubr.f32.mxu1 %v3128_v4  ;;  %v3129_v57 = vunpack.c.h.bf16 %v3127_v15  ;;  %v3293_v15 = vld [vmem:[%s6325_s11 + $0x28] sm:$0xff]   ;;  %v1816_v4 = vpop.permute.xlu1 %1815 }
 0x54d   :  { %4119 = vmatprep.subr.bf16.mxu1 %v4118_v9  ;;  %4098 = vmatpush3.bf16.msra.mxu0 %v3290_v55 }
 0x54e   :  { %4099 = vmatprep.subr.bf16.mxu0 %v4533_v33 }
 0x550   :  { %4121 = vmatpush3.bf16.msra.mxu1 %v4118_v9  ;;  %v1820_v5 = vpop.permute.xlu1 %1819 }
 0x551   :  { %4123 = vmatprep.subr.bf16.mxu1 %v4122_v34  ;;  %4101 = vmatpush3.bf16.msra.mxu0 %v3291_v61 }
 0x552   :  { %4102 = vmatprep.subr.bf16.mxu0 %v4533_v33 }
 0x554   :  { %4125 = vmatpush3.bf16.msra.mxu1 %v4122_v34  ;;  %v1824_v21 = vpop.permute.xlu1 %1823 }
 0x555   :  { %4127 = vmatprep.subr.bf16.mxu1 %v4126_v17  ;;  %4104 = vmatpush3.bf16.msra.mxu0 %v3292_v53 }
 0x556   :  { %4105 = vmatprep.subr.bf16.mxu0 %v4533_v33 }
 0x558   :  { %4129 = vmatpush3.bf16.msra.mxu1 %v4126_v17  ;;  %v1828_v34 = vpop.permute.xlu1 %1827 }
 0x559   :  { %4131 = vmatprep.subr.bf16.mxu1 %v4130_v31  ;;  %4107 = vmatpush3.bf16.msra.mxu0 %v3293_v15 }
 0x55a   :  { %4108 = vmatprep.subr.bf16.mxu0 %v4533_v33 }
 0x55c   :  { %4133 = vmatpush3.bf16.msra.mxu1 %v4130_v31  ;;  %v1832_v39 = vpop.permute.xlu1 %1831  ;;  %v1812_v31 = vpop.permute.xlu0 %1811 }
 0x55d   :  { %4135 = vmatprep.subr.bf16.mxu1 %v4134_v47  ;;  %4110 = vmatpush3.bf16.msra.mxu0 %v3294_v60 }
 0x55e   :  { %4111 = vmatprep.subr.bf16.mxu0 %v4533_v33 }
 0x560   :  { %4137 = vmatpush3.bf16.msra.mxu1 %v4134_v47  ;;  %v1836_v0 = vpop.permute.xlu1 %1835  ;;  %v1844_v16 = vpop.permute.xlu0 %1843 }
 0x561   :  { %4139 = vmatprep.subr.bf16.mxu1 %v4138_v22  ;;  %4113 = vmatpush3.bf16.msra.mxu0 %v3295_v20 }
 0x562   :  { %4146 = vmatprep.subr.bf16.mxu0 %v4533_v33 }
 0x564   :  { %4141 = vmatpush3.bf16.msra.mxu1 %v4138_v22  ;;  %3810 = vmatmul.mubr.f32.vlgmr.msra.gmra.mrb[20].mxu0 %v1525_v29  ;;  %v1840_v46 = vpop.permute.xlu1 %1839 }
 0x565   :  { %4143 = vmatprep.subr.bf16.mxu1 %v4142_v50  ;;  %3900 = vmatprep.mubr.msk.f32.mxu0 %vm4534_vm2, %v4535_v48 }
 0x568   :  { %4145 = vmatpush3.bf16.msra.mxu1 %v4142_v50 }
 0x569   :  { %4170 = vmatprep.subr.bf16.mxu1 %v4533_v33 }
 0x56b   :  { %3845 = vmatmul.mubr.f32.vlgmr.msra.gmra.mrb[6].mxu1 %v3129_v57 }
 0x56c   :  { %3847 = vmatprep.mubr.f32.mxu1 %v3132_v8 }
 0x56f   :  { %3848 = vmatmul.mubr.f32.gmra.mrb[8].mxu1 %v3133_v52 }
 0x570   :  { %3850 = vmatprep.mubr.f32.mxu1 %v3136_v14 }
 0x573   :  { %3851 = vmatmul.mubr.f32.gmra.mrb[10].mxu1 %v3137_v41 }
 0x574   :  { %3853 = vmatprep.mubr.f32.mxu1 %v3140_v51 }
 0x577   :  { %3854 = vmatmul.mubr.f32.gmra.mrb[12].mxu1 %v3141_v25 }
 0x578   :  { %3856 = vmatprep.mubr.f32.mxu1 %v3144_v18 }
 0x57b   :  { %3857 = vmatmul.mubr.f32.gmra.mrb[14].mxu1 %v3145_v54  ;;  %v1848_v54 = vpop.permute.xlu1 %1847 }
 0x57c   :  { %3859 = vmatprep.mubr.f32.mxu1 %v3148_v56 }
 0x57f   :  { %3860 = vmatmul.mubr.f32.gmra.mrb[16].mxu1 %v3149_v36 }
 0x580   :  { %3862 = vmatprep.mubr.f32.mxu1 %v3152_v13 }
 0x583   :  { %3863 = vmatmul.mubr.f32.gmra.mrb[18].mxu1 %v3153_v42 }
 0x584   :  { %3865 = vmatprep.mubr.f32.mxu1 %v3156_v37 }
 0x587   :  { %3866 = vmatmul.mubr.f32.gmra.mrb[20].mxu1 %v3157_v62 }
 0x588   :  { %3935 = vmatprep.mubr.msk.f32.mxu1 %vm4534_vm2, %v4535_v48 }
 0x61e   :  { %v5809_v38 = vpop.f32.mrb[4].mxu1 }
 0x61f   :  { %v3776_v9 = vpop.f32.mrb[5].mxu1 }
 0x63e   :  { %v3846_v17 = vpop.f32.mrb[6].mxu1 }
 0x63f   :  { %v1946_v32 = vadd.f32 %v3846_v17, %v1816_v4  ;;  %v1940_v2 = vpop.f32.mrb[7].mxu1 }
 0x640   :  { %v5811_v44 = vadd.f32 %v1940_v2, %v1812_v31 }
 0x641   :  { %2114 = vperm.xlu1 %4324, %v1946_v32   ;;  %v5816_v22 = vsel %vm867_vm3, %v1946_v32, -inf  ;;  %v5819_v43 = vsel %vm867_vm3, %v1946_v32, inf  ;;  %v5824_v50 = vsel %vm1202_vm4, %v1946_v32, -inf  ;;  %v5827_v23 = vsel %vm1202_vm4, %v1946_v32, inf }
 0x642   :  { %v3849_v47 = vpop.f32.mrb[8].mxu1  ;;  %v5831_v57 = vsel %vm867_vm3, %v5811_v44, -inf  ;;  %v5835_v8 = vsel %vm867_vm3, %v5811_v44, inf  ;;  %v5840_v59 = vsel %vm1202_vm4, %v5811_v44, -inf  ;;  %v5844_v52 = vsel %vm1202_vm4, %v5811_v44, inf }
 0x643   :  { %v5813_v63 = vadd.f32 %v3849_v47, %v1824_v21  ;;  %v1950_v7 = vpop.f32.mrb[9].mxu1 }
 0x644   :  { %v5821_v19 = vadd.f32 %v1950_v7, %v1820_v5 }
 0x645   :  { %4325 = vset.pattern.permute.xlu1 %v4532_v3  ;;  %v5848_v14 = vsel %vm867_vm3, %v5813_v63, -inf  ;;  %v5852_v6 = vsel %vm867_vm3, %v5813_v63, inf  ;;  %v5857_v51 = vsel %vm1202_vm4, %v5813_v63, -inf  ;;  %v5861_v10 = vsel %vm1202_vm4, %v5813_v63, inf }
 0x646   :  { %v3852_v41 = vpop.f32.mrb[10].mxu1  ;;  %2445 = vperm.xlu1 %4325, %v1946_v32   ;;  %2119 = vperm.xlu0 %4327, %v5821_v19   ;;  %v5865_v25 = vsel %vm867_vm3, %v5821_v19, -inf  ;;  %v5871_v56 = vsel %vm867_vm3, %v5821_v19, inf  ;;  %v5875_v45 = vsel %vm1202_vm4, %v5821_v19, -inf  ;;  %v5879_v36 = vsel %vm1202_vm4, %v5821_v19, inf }
 0x647   :  { %v5867_v18 = vadd.f32 %v3852_v41, %v1832_v39  ;;  %v1960_v40 = vpop.f32.mrb[11].mxu1 }
 0x648   :  { %v5881_v13 = vadd.f32 %v1960_v40, %v1828_v34 }
 0x649   :  { %v2025_v42 = vsel %vm867_vm3, %v5867_v18, -inf  ;;  %v2062_v37 = vsel %vm867_vm3, %v5867_v18, inf  ;;  %v2359_v62 = vsel %vm1202_vm4, %v5867_v18, -inf  ;;  %v5891_v30 = vsel %vm1202_vm4, %v5867_v18, inf }
 0x64a   :  { %v2063_v58 = vmin.f32 %v5819_v43, %v2062_v37  ;;  %v2360_v55 = vmax.f32 %v5824_v50, %v2359_v62  ;;  %v2023_v61 = vsel %vm867_vm3, %v5881_v13, -inf  ;;  %v2060_v53 = vsel %vm867_vm3, %v5881_v13, inf  ;;  %v3855_v15 = vpop.f32.mrb[12].mxu1  ;;  %4326 = vset.pattern.permute.xlu1 %v4531_v1  ;;  %v1852_v50 = vpop.permute.xlu0 %1851 }
 0x64b   :  { %v2061_v60 = vmin.f32 %v5835_v8, %v2060_v53  ;;  %v2357_v20 = vsel %vm1202_vm4, %v5881_v13, -inf  ;;  %v5905_v29 = vsel %vm1202_vm4, %v5881_v13, inf  ;;  %v5907_v4 = vadd.f32 %v3855_v15, %v1840_v46  ;;  %v1970_v9 = vpop.f32.mrb[13].mxu1  ;;  %2109 = vperm.xlu1 %4326, %v5811_v44   ;;  %v1856_v46 = vpop.permute.xlu1 %1855 }
 0x64c   :  { %v2358_v5 = vmax.f32 %v5840_v59, %v2357_v20  ;;  %v5911_v21 = vadd.f32 %v1970_v9, %v1836_v0  ;;  %v2024_v34 = vmax.f32 %v5831_v57, %v2023_v61  ;;  %v2026_v39 = vmax.f32 %v5816_v22, %v2025_v42 }
 0x64d   :  { %v2029_v17 = vsel %vm867_vm3, %v5907_v4, -inf  ;;  %v2066_v32 = vsel %vm867_vm3, %v5907_v4, inf  ;;  %v2363_v2 = vsel %vm1202_vm4, %v5907_v4, -inf  ;;  %v5923_v31 = vsel %vm1202_vm4, %v5907_v4, inf }
 0x64e   :  { %v2067_v0 = vmin.f32 %v5852_v6, %v2066_v32  ;;  %v2364_v47 = vmax.f32 %v5857_v51, %v2363_v2  ;;  %v2027_v7 = vsel %vm867_vm3, %v5911_v21, -inf  ;;  %v2064_v22 = vsel %vm867_vm3, %v5911_v21, inf  ;;  %v3858_v43 = vpop.f32.mrb[14].mxu1  ;;  %2139 = vperm.xlu0 %4327, %v5911_v21  }
 0x64f   :  { %v2065_v57 = vmin.f32 %v5871_v56, %v2064_v22  ;;  %v2361_v8 = vsel %vm1202_vm4, %v5911_v21, -inf  ;;  %v5937_v59 = vsel %vm1202_vm4, %v5911_v21, inf  ;;  %v5939_v6 = vadd.f32 %v3858_v43, %v1848_v54  ;;  %v1980_v41 = vpop.f32.mrb[15].mxu1  ;;  %2124 = vperm.xlu1 %4326, %v5813_v63   ;;  %v1860_v43 = vpop.permute.xlu0 %1859 }
 0x650   :  { %v2362_v51 = vmax.f32 %v5875_v45, %v2361_v8  ;;  %v5943_v40 = vadd.f32 %v1980_v41, %v1844_v16  ;;  %v2028_v42 = vmax.f32 %v5865_v25, %v2027_v7  ;;  %v2030_v56 = vmax.f32 %v5848_v14, %v2029_v17 }
 0x651   :  { %v2070_v37 = vsel %vm867_vm3, %v5939_v6, inf  ;;  %v2367_v62 = vsel %vm1202_vm4, %v5939_v6, -inf  ;;  %v2033_v54 = vsel %vm867_vm3, %v5939_v6, -inf  ;;  %v2395_v61 = vmin.f32 %v5844_v52, %v5905_v29  ;;  %v1864_v52 = vpop.permute.xlu1 %1863 }
 0x652   :  { %v2068_v45 = vsel %vm867_vm3, %v5943_v40, inf  ;;  %v2365_v25 = vsel %vm1202_vm4, %v5943_v40, -inf  ;;  %v3861_v16 = vpop.f32.mrb[16].mxu1  ;;  %v2031_v14 = vsel %vm867_vm3, %v5943_v40, -inf  ;;  %v2034_v53 = vmax.f32 %v2026_v39, %v2033_v54 }
 0x653   :  { %v5961_v15 = vadd.f32 %v3861_v16, %v1856_v46  ;;  %v1990_v20 = vpop.f32.mrb[17].mxu1  ;;  %4328 = vset.pattern.permute.xlu1 %v4532_v3  ;;  %v2032_v9 = vmax.f32 %v2024_v34, %v2031_v14  ;;  %v2069_v17 = vmin.f32 %v2061_v60, %v2068_v45  ;;  %v2071_v32 = vmin.f32 %v2063_v58, %v2070_v37  ;;  %v1868_v16 = vpop.permute.xlu0 %1867 }
 0x654   :  { %v5964_v29 = vadd.f32 %v1990_v20, %v1852_v50  ;;  %2449 = vperm.xlu1 %4328, %v5821_v19   ;;  %v2366_v2 = vmax.f32 %v2358_v5, %v2365_v25  ;;  %v2368_v7 = vmax.f32 %v2360_v55, %v2367_v62  ;;  %v2397_v22 = vmin.f32 %v5827_v23, %v5891_v30 }
 0x655   :  { %v2074_v39 = vsel %vm867_vm3, %v5961_v15, inf  ;;  %v2371_v46 = vsel %vm1202_vm4, %v5961_v15, -inf  ;;  %v2037_v58 = vsel %vm867_vm3, %v5961_v15, -inf  ;;  %v2399_v60 = vmin.f32 %v5879_v36, %v5937_v59 }
 0x656   :  { %v2072_v19 = vsel %vm867_vm3, %v5964_v29, inf  ;;  %v2369_v55 = vsel %vm1202_vm4, %v5964_v29, -inf  ;;  %v3864_v23 = vpop.f32.mrb[18].mxu1  ;;  %v2035_v30 = vsel %vm867_vm3, %v5964_v29, -inf  ;;  %v2038_v5 = vmax.f32 %v2030_v56, %v2037_v58 }
 0x657   :  { %v5983_v34 = vadd.f32 %v3864_v23, %v1864_v52  ;;  %v2000_v50 = vpop.f32.mrb[19].mxu1  ;;  %v2036_v8 = vmax.f32 %v2028_v42, %v2035_v30  ;;  %v2073_v41 = vmin.f32 %v2065_v57, %v2072_v19  ;;  %v2075_v37 = vmin.f32 %v2067_v0, %v2074_v39  ;;  %v1872_v42 = vpop.permute.xlu1 %1871 }
 0x658   :  { %v5985_v62 = vadd.f32 %v2000_v50, %v1860_v43  ;;  %4329 = vset.pattern.permute.xlu1 %v4531_v1  ;;  %v2370_v36 = vmax.f32 %v2362_v51, %v2369_v55  ;;  %v2372_v59 = vmax.f32 %v2364_v47, %v2371_v46  ;;  %v2401_v54 = vmin.f32 %v5861_v10, %v5923_v31 }
 0x659   :  { %2134 = vperm.xlu1 %4329, %v5867_v18   ;;  %v2041_v56 = vsel %vm867_vm3, %v5983_v34, -inf  ;;  %v2078_v45 = vsel %vm867_vm3, %v5983_v34, inf  ;;  %v2375_v0 = vsel %vm1202_vm4, %v5983_v34, -inf  ;;  %v2402_v57 = vsel %vm1202_vm4, %v5943_v40, inf }
 0x65a   :  { %v3867_v51 = vpop.f32.mrb[20].mxu1  ;;  %v2039_v47 = vsel %vm867_vm3, %v5985_v62, -inf  ;;  %v2042_v10 = vmax.f32 %v2034_v53, %v2041_v56  ;;  %v2076_v31 = vsel %vm867_vm3, %v5985_v62, inf  ;;  %v2079_v25 = vmin.f32 %v2071_v32, %v2078_v45 }
 0x65b   :  { %v6003_v14 = vadd.f32 %v3867_v51, %v1872_v42  ;;  %v2010_v20 = vpop.f32.mrb[21].mxu1  ;;  %v2040_v52 = vmax.f32 %v2032_v9, %v2039_v47  ;;  %v2077_v43 = vmin.f32 %v2069_v17, %v2076_v31  ;;  %v2373_v39 = vsel %vm1202_vm4, %v5985_v62, -inf }
 0x65c   :  { %v6007_v46 = vadd.f32 %v2010_v20, %v1868_v16  ;;  %v2374_v58 = vmax.f32 %v2366_v2, %v2373_v39  ;;  %v2376_v19 = vmax.f32 %v2368_v7, %v2375_v0  ;;  %v2403_v55 = vmin.f32 %v2395_v61, %v2402_v57 }
 0x65d   :  { %4330 = vset.pattern.permute.xlu1 %v4532_v3  ;;  %v2045_v53 = vsel %vm867_vm3, %v6003_v14, -inf  ;;  %v2047_v32 = vmax.f32 %v2040_v52, %v2042_v10  ;;  %v2082_v23 = vsel %vm867_vm3, %v6003_v14, inf  ;;  %v2084_v30 = vmin.f32 %v2077_v43, %v2079_v25 }
 0x65e   :  { %2461 = vperm.xlu1 %4330, %v5867_v18   ;;  %v2043_v9 = vsel %vm867_vm3, %v6007_v46, -inf  ;;  %v2046_v17 = vmax.f32 %v2038_v5, %v2045_v53  ;;  %v2080_v2 = vsel %vm867_vm3, %v6007_v46, inf  ;;  %v2083_v61 = vmin.f32 %v2075_v37, %v2082_v23 }
 0x65f   :  { %v2044_v7 = vmax.f32 %v2036_v8, %v2043_v9  ;;  %v2081_v50 = vmin.f32 %v2073_v41, %v2080_v2  ;;  %v2377_v56 = vsel %vm1202_vm4, %v6007_v46, -inf  ;;  %v2379_v45 = vsel %vm1202_vm4, %v6003_v14, -inf }
 0x660   :  { %v2378_v0 = vmax.f32 %v2370_v36, %v2377_v56  ;;  %v2380_v57 = vmax.f32 %v2372_v59, %v2379_v45  ;;  %v2381_v42 = vmax.f32 %v2374_v58, %v2376_v19  ;;  %v2404_v18 = vsel %vm1202_vm4, %v5939_v6, inf }
 0x661   :  { %v2048_v51 = vmax.f32 %v2044_v7, %v2046_v17  ;;  %v2085_v5 = vmin.f32 %v2081_v50, %v2083_v61  ;;  %v2405_v47 = vmin.f32 %v2397_v22, %v2404_v18  ;;  %v2406_v37 = vsel %vm1202_vm4, %v5964_v29, inf }
 0x662   :  { %4331 = vset.pattern.permute.xlu1 %v4531_v1  ;;  %v2382_v8 = vmax.f32 %v2378_v0, %v2380_v57  ;;  %v2407_v41 = vmin.f32 %v2399_v60, %v2406_v37  ;;  %v2408_v10 = vsel %vm1202_vm4, %v5961_v15, inf  ;;  %v2410_v36 = vsel %vm1202_vm4, %v5985_v62, inf }
 0x663   :  { %2129 = vperm.xlu1 %4331, %v5881_v13   ;;  %v2049_v59 = vmax.f32 %v2047_v32, %v2048_v51  ;;  %v2086_v31 = vmin.f32 %v2084_v30, %v2085_v5  ;;  %v2409_v25 = vmin.f32 %v2401_v54, %v2408_v10  ;;  %v2411_v16 = vmin.f32 %v2403_v55, %v2410_v36 }
 0x664   :  { %v2383_v22 = vmax.f32 %v2381_v42, %v2382_v8  ;;  %v2412_v20 = vsel %vm1202_vm4, %v5983_v34, inf  ;;  %v2414_v52 = vsel %vm1202_vm4, %v6007_v46, inf  ;;  %v2416_v60 = vsel %vm1202_vm4, %v6003_v14, inf }
 0x665   :  { %v2050_v43 = vrot.slane %v2049_v59, 4  ;;  %v2087_v39 = vrot.slane %v2086_v31, 4  ;;  %v2413_v58 = vmin.f32 %v2405_v47, %v2412_v20  ;;  %v2415_v19 = vmin.f32 %v2407_v41, %v2414_v52 }
 0x666   :  { %v2417_v53 = vmin.f32 %v2409_v25, %v2416_v60  ;;  %v2384_v23 = vrot.slane %v2383_v22, 4 }
 0x667   :  { %2144 = vperm.xlu1 %4331, %v5907_v4   ;;  %v2051_v32 = vmax.f32 %v2049_v59, %v2050_v43  ;;  %v2088_v54 = vmin.f32 %v2086_v31, %v2087_v39  ;;  %v2418_v55 = vmin.f32 %v2411_v16, %v2413_v58 }
 0x668   :  { %v2419_v30 = vmin.f32 %v2415_v19, %v2417_v53  ;;  %v2385_v7 = vmax.f32 %v2383_v22, %v2384_v23 }
 0x669   :  { %v2052_v9 = vrot.slane %v2051_v32, 2  ;;  %v2089_v61 = vrot.slane %v2088_v54, 2 }
 0x66a   :  { %v2420_v17 = vmin.f32 %v2418_v55, %v2419_v30  ;;  %v2386_v42 = vrot.slane %v2385_v7, 2 }
 0x66b   :  { %4332 = vset.pattern.permute.xlu1 %v4532_v3  ;;  %v2053_v2 = vmax.f32 %v2051_v32, %v2052_v9  ;;  %v2090_v57 = vmin.f32 %v2088_v54, %v2089_v61 }
 0x66c   :  { %2465 = vperm.xlu1 %4332, %v5911_v21   ;;  %v2421_v50 = vrot.slane %v2420_v17, 4  ;;  %v2387_v5 = vmax.f32 %v2385_v7, %v2386_v42 }
 0x66d   :  { %v2054_v56 = vrot.slane %v2053_v2, 1  ;;  %v2091_v51 = vrot.slane %v2090_v57, 1 }
 0x66e   :  { %v2422_v45 = vmin.f32 %v2420_v17, %v2421_v50  ;;  %v2388_v37 = vrot.slane %v2387_v5, 1 }
 0x66f   :  { %v2055_v0 = vmax.f32 %v2053_v2, %v2054_v56  ;;  %v2092_v21 = vmin.f32 %v2090_v57, %v2091_v51 }
 0x670   :  { %4333 = vset.pattern.permute.xlu1 %v4531_v1  ;;  %v2423_v18 = vrot.slane %v2422_v45, 2  ;;  %v2389_v41 = vmax.f32 %v2387_v5, %v2388_v37 }
 0x671   :  { %2154 = vperm.xlu1 %4333, %v5939_v6   ;;  %2096 = vperm.xlu0 %4327, %v2055_v0  }
 0x672   :  { %v2424_v47 = vmin.f32 %v2422_v45, %v2423_v18 }
 0x674   :  { %v2425_v8 = vrot.slane %v2424_v47, 1 }
 0x675   :  { %2149 = vperm.xlu1 %4333, %v5943_v40   ;;  %2159 = vperm.xlu0 %4327, %v5964_v29  }
 0x676   :  { %v2426_v10 = vmin.f32 %v2424_v47, %v2425_v8 }
 0x679   :  { %2102 = vperm.xlu1 %4333, %v2092_v21   ;;  %2179 = vperm.xlu0 %4327, %v6007_v46  }
 0x67d   :  { %4334 = vset.pattern.permute.xlu1 %v4532_v3  ;;  %4339 = vset.pattern.permute.xlu0 %v4532_v3 }
 0x67e   :  { %2429 = vperm.xlu1 %4334, %v2389_v41   ;;  %2435 = vperm.xlu0 %4339, %v2426_v10  }
 0x682   :  { %2477 = vperm.xlu1 %4334, %v5939_v6   ;;  %2441 = vperm.xlu0 %4339, %v5811_v44   ;;  %v6071_v44 = vpop.f32.mrb[20].mxu0 }
 0x686   :  { %4335 = vset.pattern.permute.xlu1 %v4531_v1  ;;  %2453 = vperm.xlu0 %4339, %v5813_v63   ;;  %v3811_v63 = vpop.f32.mrb[21].mxu0 }
 0x687   :  { %2164 = vperm.xlu1 %4335, %v5961_v15  }
 0x68a   :  { %2457 = vperm.xlu0 %4339, %v5881_v13  }
 0x68b   :  { %4336 = vset.pattern.permute.xlu1 %v4532_v3 }
 0x68c   :  { %2481 = vperm.xlu1 %4336, %v5964_v29  }
 0x68e   :  { %2469 = vperm.xlu0 %4339, %v5907_v4  }
 0x690   :  { %4337 = vset.pattern.permute.xlu1 %v4531_v1 }
 0x691   :  { %2169 = vperm.xlu1 %4337, %v5985_v62  }
 0x692   :  { %2473 = vperm.xlu0 %4339, %v5943_v40  }
 0x695   :  { %2174 = vperm.xlu1 %4337, %v5983_v34  }
 0x696   :  { %2485 = vperm.xlu0 %4339, %v5961_v15  }
 0x699   :  { %4338 = vset.pattern.permute.xlu1 %v4532_v3 }
 0x69a   :  { %2493 = vperm.xlu1 %4338, %v5983_v34   ;;  %2489 = vperm.xlu0 %4339, %v5985_v62  }
 0x69e   :  { %4340 = vset.pattern.permute.xlu1 %v4531_v1  ;;  %2501 = vperm.xlu0 %4339, %v6003_v14  }
 0x69f   :  { %2184 = vperm.xlu1 %4340, %v6003_v14   ;;  %v1631_v14 = vsub.s32 6, %v5098_v49 }
 0x6a3   :  { %4341 = vset.pattern.permute.xlu1 %v4532_v3 }
 0x6a4   :  { %2497 = vperm.xlu1 %4341, %v6007_v46   ;;  %v1632_v46 = vrot.slane %v5580_v35, %v1631_v14 }
 0x6a6   :  { %v1700_v16 = vadd.f32 %v5809_v38, %v1632_v46 }
 0x6a8   :  { %v1703_v52 = vmul.f32 0.088388346, %v1700_v16 }
 0x6aa   :  { %vm2093_vm6 = vcmp.ge.f32.partialorder %v1703_v52, 0.0  ;;  %v6083_v19 = vrot.slane %v1703_v52, %v5105_v12  ;;  %v6090_v32 = vrot.slane %v1703_v52, %v5115_v24 }
 0x6c0   :  { %v2115_v13 = vpop.permute.xlu1 %2114 }
 0x6c1   :  { %v2192_v38 = vmul.f32 %v6083_v19, %v2115_v13 }
 0x6c5   :  { %v2446_v4 = vpop.permute.xlu1 %2445  ;;  %v2120_v36 = vpop.permute.xlu0 %2119 }
 0x6c6   :  { %v2509_v17 = vmul.f32 %v6090_v32, %v2446_v4  ;;  %v2193_v2 = vmul.f32 %v6083_v19, %v2120_v36 }
 0x6ca   :  { %v2110_v6 = vpop.permute.xlu1 %2109 }
 0x6cb   :  { %v2191_v54 = vmul.f32 %v6083_v19, %v2110_v6 }
 0x6cd   :  { %v2140_v3 = vpop.permute.xlu0 %2139 }
 0x6ce   :  { %v2125_v40 = vpop.permute.xlu1 %2124  ;;  %v2197_v50 = vmul.f32 %v6083_v19, %v2140_v3 }
 0x6cf   :  { %v2194_v56 = vmul.f32 %v6083_v19, %v2125_v40 }
 0x6d3   :  { %v2450_v15 = vpop.permute.xlu1 %2449 }
 0x6d4   :  { %v2510_v45 = vmul.f32 %v6090_v32, %v2450_v15 }
 0x6d8   :  { %v2135_v29 = vpop.permute.xlu1 %2134 }
 0x6d9   :  { %v2196_v57 = vmul.f32 %v6083_v19, %v2135_v29 }
 0x6dd   :  { %v6073_v34 = vpop.permute.xlu1 %2461 }
 0x6e2   :  { %v2130_v1 = vpop.permute.xlu1 %2129 }
 0x6e3   :  { %v2195_v42 = vmul.f32 %v6083_v19, %v2130_v1 }
 0x6e6   :  { %v2145_v62 = vpop.permute.xlu1 %2144 }
 0x6e7   :  { %v2198_v18 = vmul.f32 %v6083_v19, %v2145_v62 }
 0x6eb   :  { %v6076_v59 = vpop.permute.xlu1 %2465 }
 0x6f0   :  { %v2155_v31 = vpop.permute.xlu1 %2154  ;;  %v2097_v25 = vpop.permute.xlu0 %2096 }
 0x6f1   :  { %v2099_v39 = vmul.f32 %v2097_v25, %v1703_v52  ;;  %v2200_v21 = vmul.f32 %v6083_v19, %v2155_v31 }
 0x6f4   :  { %v2150_v22 = vpop.permute.xlu1 %2149  ;;  %v2160_v20 = vpop.permute.xlu0 %2159 }
 0x6f5   :  { %v2199_v6 = vmul.f32 %v6083_v19, %v2150_v22  ;;  %v2201_v16 = vmul.f32 %v6083_v19, %v2160_v20 }
 0x6f8   :  { %v2103_v60 = vpop.permute.xlu1 %2102  ;;  %v6080_v43 = vpop.permute.xlu0 %2179 }
 0x6f9   :  { %v2105_v58 = vmul.f32 %v2103_v60, %v1703_v52 }
 0x6fb   :  { %v2106_v53 = vsel %vm2093_vm6, %v2099_v39, %v2105_v58 }
 0x6fc   :  { %v6087_v35 = vrot.slane %v2106_v53, %v5105_v12 }
 0x6fd   :  { %v2430_v55 = vpop.permute.xlu1 %2429  ;;  %v2436_v23 = vpop.permute.xlu0 %2435 }
 0x6fe   :  { %v2432_v30 = vmul.f32 %v2430_v55, %v1703_v52  ;;  %v2438_v9 = vmul.f32 %v2436_v23, %v1703_v52  ;;  %v2211_v61 = vsub.f32 %v2191_v54, %v6087_v35  ;;  %v2212_v7 = vsub.f32 %v2192_v38, %v6087_v35 }
 0x6ff   :  { %v2213_v41 = vsub.f32 %v2193_v2, %v6087_v35  ;;  %v2214_v29 = vsub.f32 %v2194_v56, %v6087_v35  ;;  %v2215_v14 = vsub.f32 %v2195_v42, %v6087_v35  ;;  %v2216_v22 = vsub.f32 %v2196_v57, %v6087_v35 }
 0x700   :  { %v2439_v0 = vsel %vm2093_vm6, %v2432_v30, %v2438_v9  ;;  %v2227_v13 = vmul.f32 1.442695, %v2211_v61  ;;  %v2229_v4 = vmul.f32 1.442695, %v2212_v7  ;;  %v2217_v58 = vsub.f32 %v2197_v50, %v6087_v35 }
 0x701   :  { %v6106_v51 = vrot.slane %v2439_v0, %v5115_v24  ;;  %v2478_v5 = vpop.permute.xlu1 %2477  ;;  %v2442_v47 = vpop.permute.xlu0 %2441  ;;  %v2231_v52 = vmul.f32 1.442695, %v2213_v41  ;;  %v2218_v53 = vsub.f32 %v2198_v18, %v6087_v35  ;;  %v2219_v38 = vsub.f32 %v2199_v6, %v6087_v35 }
 0x702   :  { %v2517_v37 = vmul.f32 %v6090_v32, %v2478_v5  ;;  %v2508_v8 = vmul.f32 %v6090_v32, %v2442_v47  ;;  %4440 = vpow2.f32 %v2227_v13  ;;  %v2233_v54 = vmul.f32 1.442695, %v2214_v29 }
 0x703   :  { %v2529_v10 = vsub.f32 %v2509_v17, %v6106_v51  ;;  %v2530_v63 = vsub.f32 %v2510_v45, %v6106_v51  ;;  %4442 = vpow2.f32 %v2229_v4  ;;  %v2220_v23 = vsub.f32 %v2200_v21, %v6087_v35 }
 0x704   :  { %v2537_v40 = vsub.f32 %v2517_v37, %v6106_v51  ;;  %v2528_v15 = vsub.f32 %v2508_v8, %v6106_v51  ;;  %v2235_v30 = vmul.f32 1.442695, %v2215_v14  ;;  %v2221_v9 = vsub.f32 %v2201_v16, %v6087_v35 }
 0x705   :  { %v2546_v1 = vmul.f32 1.442695, %v2529_v10  ;;  %v2548_v62 = vmul.f32 1.442695, %v2530_v63  ;;  %v2454_v36 = vpop.permute.xlu0 %2453  ;;  %v2237_v17 = vmul.f32 1.442695, %v2216_v22  ;;  %v2513_v7 = vmul.f32 %v6090_v32, %v6073_v34 }
 0x706   :  { %v2562_v3 = vmul.f32 1.442695, %v2537_v40  ;;  %v2544_v46 = vmul.f32 1.442695, %v2528_v15  ;;  %v2511_v31 = vmul.f32 %v6090_v32, %v2454_v36  ;;  %v2165_v25 = vpop.permute.xlu1 %2164  ;;  %v2239_v56 = vmul.f32 1.442695, %v2217_v58 }
 0x707   :  { %4444 = vpow2.f32 %v2546_v1  ;;  %v2202_v39 = vmul.f32 %v6083_v19, %v2165_v25  ;;  %v2514_v45 = vmul.f32 %v6090_v32, %v6076_v59  ;;  %v6137_v0 = vmul.f32 %v6083_v19, %v6080_v43 }
 0x708   :  { %4446 = vpow2.f32 %v2562_v3  ;;  %v2531_v60 = vsub.f32 %v2511_v31, %v6106_v51  ;;  %v2241_v57 = vmul.f32 1.442695, %v2218_v53  ;;  %v2243_v18 = vmul.f32 1.442695, %v2219_v38 }
 0x709   :  { %4448 = vpow2.f32 %v2544_v46  ;;  %v2458_v55 = vpop.permute.xlu0 %2457  ;;  %v2222_v50 = vsub.f32 %v2202_v39, %v6087_v35  ;;  %v2533_v5 = vsub.f32 %v2513_v7, %v6106_v51  ;;  %v2245_v21 = vmul.f32 1.442695, %v2220_v23 }
 0x70a   :  { %4450 = vpow2.f32 %v2548_v62  ;;  %v2550_v20 = vmul.f32 1.442695, %v2531_v60  ;;  %v2512_v2 = vmul.f32 %v6090_v32, %v2458_v55  ;;  %v2247_v37 = vmul.f32 1.442695, %v2221_v9 }
 0x70b   :  { %4452 = vpow2.f32 %v2231_v52  ;;  %v2482_v61 = vpop.permute.xlu1 %2481  ;;  %v2249_v41 = vmul.f32 1.442695, %v2222_v50  ;;  %v2534_v43 = vsub.f32 %v2514_v45, %v6106_v51  ;;  %v2225_v1 = vsub.f32 %v6137_v0, %v6087_v35 }
 0x70c   :  { %4454 = vpow2.f32 %v2550_v20  ;;  %v4441_v47 = vpop.eup %4440  ;;  %v2532_v8 = vsub.f32 %v2512_v2, %v6106_v51  ;;  %v2554_v62 = vmul.f32 1.442695, %v2533_v5  ;;  %v2518_v46 = vmul.f32 %v6090_v32, %v2482_v61 }
 0x70d   :  { %4456 = vpow2.f32 %v2233_v54  ;;  %v2470_v42 = vpop.permute.xlu0 %2469  ;;  %v4443_v59 = vpop.eup %4442  ;;  %v2556_v58 = vmul.f32 1.442695, %v2534_v43 }
 0x70e   :  { %4458 = vpow2.f32 %v2235_v30  ;;  %v2515_v34 = vmul.f32 %v6090_v32, %v2470_v42  ;;  %v2259_v4 = vadd.f32 %v4443_v59, %v4441_v47  ;;  %v4147_v6 = vpack.c.bf16 %v4443_v59, %v4441_v47 }
 0x70f   :  { %4460 = vpow2.f32 %v2237_v17  ;;  %v2552_v3 = vmul.f32 1.442695, %v2532_v8  ;;  %v2538_v42 = vsub.f32 %v2518_v46, %v6106_v51 }
 0x710   :  { %4462 = vpow2.f32 %v2239_v56  ;;  %v2535_v10 = vsub.f32 %v2515_v34, %v6106_v51  ;;  %v2170_v63 = vpop.permute.xlu1 %2169  ;;  %4148 = vmatpush3.bf16.msra.mxu0 %v4147_v6 }
 0x711   :  { %v4445_v13 = vpop.eup %4444  ;;  %4464 = vpow2.f32 %v2241_v57  ;;  %v2203_v40 = vmul.f32 %v6083_v19, %v2170_v63  ;;  %v2474_v15 = vpop.permute.xlu0 %2473  ;;  %4149 = vmatprep.subr.bf16.mxu0 %v4533_v33 }
 0x712   :  { %v6145_v29 = vpop.eup %4446  ;;  %4466 = vpow2.f32 %v2243_v18  ;;  %v2516_v36 = vmul.f32 %v6090_v32, %v2474_v15  ;;  %v2558_v53 = vmul.f32 1.442695, %v2535_v10  ;;  %v2564_v15 = vmul.f32 1.442695, %v2538_v42 }
 0x713   :  { %v4449_v14 = vpop.eup %4448  ;;  %4468 = vpow2.f32 %v2245_v21  ;;  %v2223_v31 = vsub.f32 %v2203_v40, %v6087_v35 }
 0x714   :  { %v4451_v25 = vpop.eup %4450  ;;  %v2576_v16 = vadd.f32 %v4449_v14, %v4445_v13  ;;  %4470 = vpow2.f32 %v2247_v37  ;;  %v2536_v22 = vsub.f32 %v2516_v36, %v6106_v51  ;;  %v2175_v52 = vpop.permute.xlu1 %2174  ;;  %v4171_v60 = vpack.c.bf16 %v4445_v13, %v4449_v14 }
 0x715   :  { %v4453_v39 = vpop.eup %4452  ;;  %4472 = vpow2.f32 %v2249_v41  ;;  %v2204_v38 = vmul.f32 %v6083_v19, %v2175_v52  ;;  %v2486_v54 = vpop.permute.xlu0 %2485  ;;  %v2251_v30 = vmul.f32 1.442695, %v2223_v31  ;;  %v2255_v41 = vmul.f32 1.442695, %v2225_v1 }
 0x716   :  { %v4455_v55 = vpop.eup %4454  ;;  %v2577_v20 = vadd.f32 %v4451_v25, %v2576_v16  ;;  %v2260_v23 = vadd.f32 %v4453_v39, %v2259_v4  ;;  %4474 = vpow2.f32 %v2554_v62  ;;  %4172 = vmatpush3.bf16.msra.mxu1 %v4171_v60  ;;  %v2519_v2 = vmul.f32 %v6090_v32, %v2486_v54 }
 0x717   :  { %v4457_v9 = vpop.eup %4456  ;;  %4476 = vpow2.f32 %v2552_v3  ;;  %v2224_v17 = vsub.f32 %v2204_v38, %v6087_v35  ;;  %4173 = vmatprep.subr.bf16.mxu1 %v4533_v33  ;;  %v4174_v61 = vpack.c.bf16 %v4455_v55, %v4451_v25  ;;  %v2560_v45 = vmul.f32 1.442695, %v2536_v22 }
 0x718   :  { %v4459_v7 = vpop.eup %4458  ;;  %v2578_v50 = vadd.f32 %v4455_v55, %v2577_v20  ;;  %v2261_v56 = vadd.f32 %v4457_v9, %v2260_v23  ;;  %v4150_v0 = vpack.c.bf16 %v4457_v9, %v4453_v39  ;;  %4478 = vpow2.f32 %v2556_v58 }
 0x719   :  { %v4461_v57 = vpop.eup %4460  ;;  %v2253_v18 = vmul.f32 1.442695, %v2224_v17  ;;  %v2539_v5 = vsub.f32 %v2519_v2, %v6106_v51  ;;  %v2494_v34 = vpop.permute.xlu1 %2493  ;;  %4480 = vpow2.f32 %v2558_v53 }
 0x71a   :  { %v2490_v47 = vpop.permute.xlu0 %2489  ;;  %v4463_v21 = vpop.eup %4462  ;;  %v2262_v37 = vadd.f32 %v4459_v7, %v2261_v56  ;;  %4151 = vmatpush3.bf16.msra.mxu0 %v4150_v0  ;;  %v2521_v8 = vmul.f32 %v6090_v32, %v2494_v34  ;;  %4175 = vmatpush3.bf16.msra.mxu1 %v4174_v61  ;;  %4482 = vpow2.f32 %v2251_v30  ;;  %v4153_v4 = vpack.c.bf16 %v4461_v57, %v4459_v7 }
 0x71b   :  { %v4465_v59 = vpop.eup %4464  ;;  %v2566_v43 = vmul.f32 1.442695, %v2539_v5  ;;  %4152 = vmatprep.subr.bf16.mxu0 %v4533_v33  ;;  %v2520_v10 = vmul.f32 %v6090_v32, %v2490_v47  ;;  %4176 = vmatprep.subr.bf16.mxu1 %v4533_v33  ;;  %4484 = vpow2.f32 %v2560_v45 }
 0x71c   :  { %v4467_v63 = vpop.eup %4466  ;;  %v2263_v13 = vadd.f32 %v4461_v57, %v2262_v37  ;;  %v2541_v6 = vsub.f32 %v2521_v8, %v6106_v51  ;;  %4486 = vpow2.f32 %v2253_v18  ;;  %v4156_v39 = vpack.c.bf16 %v4465_v59, %v4463_v21 }
 0x71d   :  { %v4469_v40 = vpop.eup %4468  ;;  %v2540_v62 = vsub.f32 %v2520_v10, %v6106_v51  ;;  %4488 = vpow2.f32 %v2566_v43  ;;  %v1722_v8 = vsub.s32 7, %v5098_v49 }
 0x71e   :  { %v2502_v1 = vpop.permute.xlu0 %2501  ;;  %v4471_v36 = vpop.eup %4470  ;;  %v2264_v14 = vadd.f32 %v4463_v21, %v2263_v13  ;;  %4154 = vmatpush3.bf16.msra.mxu0 %v4153_v4  ;;  %v2570_v3 = vmul.f32 1.442695, %v2541_v6  ;;  %4490 = vpow2.f32 %v2255_v41  ;;  %v4159_v61 = vpack.c.bf16 %v4469_v40, %v4467_v63 }
 0x71f   :  { %v2523_v46 = vmul.f32 %v6090_v32, %v2502_v1  ;;  %v2185_v31 = vpop.permute.xlu1 %2184  ;;  %v4473_v25 = vpop.eup %4472  ;;  %v2568_v16 = vmul.f32 1.442695, %v2540_v62  ;;  %4155 = vmatprep.subr.bf16.mxu0 %v4533_v33  ;;  %4492 = vpow2.f32 %v2564_v15  ;;  %v4530_v15 = vld [vmem:[%s6320_s4] sm:$0xff] }
 0x720   :  { %v2206_v22 = vmul.f32 %v6083_v19, %v2185_v31  ;;  %v4475_v52 = vpop.eup %4474  ;;  %v2265_v60 = vadd.f32 %v4465_v59, %v2264_v14  ;;  %4494 = vpow2.f32 %v2570_v3  ;;  %v4162_v5 = vpack.c.bf16 %v4473_v25, %v4471_v36 }
 0x721   :  { %v4477_v58 = vpop.eup %4476  ;;  %v2543_v53 = vsub.f32 %v2523_v46, %v6106_v51  ;;  %4496 = vpow2.f32 %v2568_v16  ;;  %v1723_v62 = vrot.slane %v4530_v15, %v1722_v8  ;;  %v4360_v15 = vld [vmem:[%s6327_s12 + $0x64] ss:$8 sps:$4 sm:$0xff]  }
 0x722   :  { %v2226_v38 = vsub.f32 %v2206_v22, %v6087_v35  ;;  %v2266_v54 = vadd.f32 %v4467_v63, %v2265_v60  ;;  %v2579_v55 = vadd.f32 %v4477_v58, %v2578_v50  ;;  %4157 = vmatpush3.bf16.msra.mxu0 %v4156_v39  ;;  %v4177_v20 = vpack.c.bf16 %v4475_v52, %v4477_v58  ;;  %v4479_v23 = vpop.eup %4478 }
 0x723   :  { %4158 = vmatprep.subr.bf16.mxu0 %v4533_v33  ;;  %v2498_v19 = vpop.permute.xlu1 %2497  ;;  %v4481_v9 = vpop.eup %4480  ;;  %v2574_v35 = vmul.f32 1.442695, %v2543_v53 }
 0x724   :  { %v2257_v30 = vmul.f32 1.442695, %v2226_v38  ;;  %v2267_v17 = vadd.f32 %v4469_v40, %v2266_v54  ;;  %v2580_v2 = vadd.f32 %v4475_v52, %v2579_v55  ;;  %4178 = vmatpush3.bf16.msra.mxu1 %v4177_v20  ;;  %v2522_v7 = vmul.f32 %v6090_v32, %v2498_v19  ;;  %v4483_v56 = vpop.eup %4482 }
 0x725   :  { %4179 = vmatprep.subr.bf16.mxu1 %v4533_v33  ;;  %v4180_v50 = vpack.c.bf16 %v4481_v9, %v4479_v23  ;;  %v4485_v45 = vpop.eup %4484 }
 0x726   :  { %4498 = vpow2.f32 %v2257_v30  ;;  %v2268_v0 = vadd.f32 %v4471_v36, %v2267_v17  ;;  %v2581_v57 = vadd.f32 %v4479_v23, %v2580_v2  ;;  %4160 = vmatpush3.bf16.msra.mxu0 %v4159_v61  ;;  %v2542_v42 = vsub.f32 %v2522_v7, %v6106_v51  ;;  %v4487_v18 = vpop.eup %4486 }
 0x727   :  { %4161 = vmatprep.subr.bf16.mxu0 %v4533_v33  ;;  %v4183_v21 = vpack.c.bf16 %v6145_v29, %v4485_v45  ;;  %v4489_v37 = vpop.eup %4488  ;;  %4500 = vpow2.f32 %v2574_v35  ;;  %v4165_v51 = vpack.c.bf16 %v4487_v18, %v4483_v56 }
 0x728   :  { %v2269_v34 = vadd.f32 %v4473_v25, %v2268_v0  ;;  %v2582_v47 = vadd.f32 %v4481_v9, %v2581_v57  ;;  %4181 = vmatpush3.bf16.msra.mxu1 %v4180_v50  ;;  %v2572_v32 = vmul.f32 1.442695, %v2542_v42  ;;  %v4491_v59 = vpop.eup %4490  ;;  %v1791_v25 = vadd.f32 %v6071_v44, %v1723_v62  ;;  %v4362_v62 = vld [vmem:[%s6327_s12 + $0x60] ss:$8 sps:$4 sm:$0xff]  }
 0x729   :  { %4182 = vmatprep.subr.bf16.mxu1 %v4533_v33  ;;  %v4493_v10 = vpop.eup %4492 }
 0x72a   :  { %v2270_v41 = vadd.f32 %v4483_v56, %v2269_v34  ;;  %v2583_v43 = vadd.f32 %v4485_v45, %v2582_v47  ;;  %4502 = vpow2.f32 %v2572_v32  ;;  %4163 = vmatpush3.bf16.msra.mxu0 %v4162_v5  ;;  %v4495_v63 = vpop.eup %4494  ;;  %v4186_v6 = vpack.c.bf16 %v4489_v37, %v4493_v10  ;;  %v4342_v34 = vld [vmem:[%s6327_s12 + $0x4] ss:$8 sps:$4 sm:$0xff]   ;;  %v4344_v47 = vld [vmem:[%s6327_s12] ss:$8 sps:$4 sm:$0xff]   ;;  %v4345_v32 = vld [vmem:[%s6327_s12 + $0x14] ss:$8 sps:$4 sm:$0xff]  }
 0x72b   :  { %4164 = vmatprep.subr.bf16.mxu0 %v4533_v33  ;;  %v4497_v40 = vpop.eup %4496  ;;  %v2598_v53 = vrot.slane %v1791_v25, 1 }
 0x72c   :  { %v2584_v13 = vadd.f32 %v6145_v29, %v2583_v43  ;;  %v2271_v4 = vadd.f32 %v4487_v18, %v2270_v41  ;;  %4184 = vmatpush3.bf16.msra.mxu1 %v4183_v21  ;;  %v4189_v29 = vpack.c.bf16 %v4495_v63, %v4497_v40  ;;  %v4348_v21 = vld [vmem:[%s6327_s12 + $0x24] ss:$8 sps:$4 sm:$0xff]  }
 0x72d   :  { %4185 = vmatprep.subr.bf16.mxu1 %v4533_v33 }
 0x72e   :  { %v2585_v1 = vadd.f32 %v4493_v10, %v2584_v13  ;;  %v2272_v36 = vadd.f32 %v4491_v59, %v2271_v4  ;;  %4166 = vmatpush3.bf16.msra.mxu0 %v4165_v51  ;;  %v4351_v10 = vld [vmem:[%s6327_s12 + $0x34] ss:$8 sps:$4 sm:$0xff]   ;;  %v4354_v13 = vld [vmem:[%s6327_s12 + $0x44] ss:$8 sps:$4 sm:$0xff]   ;;  %v4356_v4 = vld [vmem:[%s6327_s12 + $0x40] ss:$8 sps:$4 sm:$0xff]  }
 0x72f   :  { %4167 = vmatprep.subr.bf16.mxu0 %v4533_v33 }
 0x730   :  { %v4499_v14 = vpop.eup %4498  ;;  %v2586_v3 = vadd.f32 %v4489_v37, %v2585_v1  ;;  %4187 = vmatpush3.bf16.msra.mxu1 %v4186_v6  ;;  %v4350_v37 = vld [vmem:[%s6327_s12 + $0x20] ss:$8 sps:$4 sm:$0xff]   ;;  %v4357_v6 = vld [vmem:[%s6327_s12 + $0x54] ss:$8 sps:$4 sm:$0xff]  }
 0x731   :  { %v2273_v46 = vadd.f32 %v4499_v14, %v2272_v36  ;;  %v4168_v31 = vpack.c.bf16 %v4499_v14, %v4491_v59  ;;  %4188 = vmatprep.subr.bf16.mxu1 %v4533_v33  ;;  %v4501_v22 = vpop.eup %4500  ;;  %v4363_v1 = vld [vmem:[%s6327_s12 + $0x74] ss:$8 sps:$4 sm:$0xff]   ;;  %v4365_v36 = vld [vmem:[%s6327_s12 + $0x70] ss:$8 sps:$4 sm:$0xff]   ;;  %v3303_v14 = vld [vmem:[%s6328_s14 + $0x40] sm:$0xff]  }
 0x732   :  { %v2587_v16 = vadd.f32 %v4497_v40, %v2586_v3  ;;  %v4359_v40 = vld [vmem:[%s6327_s12 + $0x50] ss:$8 sps:$4 sm:$0xff]   ;;  %v3191_v3 = vld [vmem:[%s6328_s14] sm:$0xff]  }
 0x733   :  { %4169 = vmatpush3.bf16.msra.mxu0 %v4168_v31  ;;  %v2274_v54 = vrot.slane %v2273_v46, 4  ;;  %v3305_v31 = vld [vmem:[%s6328_s14 + $0x50] sm:$0xff]  }
 0x734   :  { %v4503_v52 = vpop.eup %4502  ;;  %v2588_v60 = vadd.f32 %v4495_v63, %v2587_v16  ;;  %4190 = vmatpush3.bf16.msra.mxu1 %v4189_v29  ;;  %4195 = vmatprep.subr.bf16.mxu0 %v4342_v34  ;;  %v4353_v63 = vld [vmem:[%s6327_s12 + $0x30] ss:$8 sps:$4 sm:$0xff]   ;;  %v3296_v29 = vld [vmem:[%s6328_s14 + $0x8] sm:$0xff]  }
 0x735   :  { %4191 = vmatprep.subr.bf16.mxu1 %v4533_v33  ;;  %v4192_v39 = vpack.c.bf16 %v4501_v22, %v4503_v52  ;;  %v2275_v55 = vadd.f32 %v2274_v54, %v2273_v46  ;;  %v3304_v46 = vld [vmem:[%s6328_s14 + $0x48] sm:$0xff]   ;;  %v3306_v16 = vld [vmem:[%s6328_s14 + $0x58] sm:$0xff]  }
 0x736   :  { %3901 = vmatmul.mubr.f32.vlgmr.msra.gmra.mrb[22].mxu0 %v1791_v25  ;;  %v2589_v58 = vadd.f32 %v4503_v52, %v2588_v60  ;;  %v3297_v25 = vld [vmem:[%s6328_s14 + $0x10] sm:$0xff]   ;;  %v3307_v52 = vld [vmem:[%s6328_s14 + $0x60] sm:$0xff]  }
 0x737   :  { %2854 = vmatprep.mubr.f32.mxu0 %v4535_v48  ;;  %v2276_v20 = vrot.slane %v2275_v55, 2  ;;  %4197 = vmatpush1.bf16.msra.mxu0 %v4344_v47  ;;  %v3299_v60 = vld [vmem:[%s6328_s14 + $0x20] sm:$0xff]  }
 0x738   :  { %v2590_v38 = vadd.f32 %v4501_v22, %v2589_v58  ;;  %4193 = vmatpush3.bf16.msra.mxu1 %v4192_v39  ;;  %4199 = vmatprep.subr.bf16.mxu0 %v4345_v32  ;;  %v3298_v22 = vld [vmem:[%s6328_s14 + $0x18] sm:$0xff]   ;;  %v3308_v39 = vld [vmem:[%s6328_s14 + $0x68] sm:$0xff]  }
 0x739   :  { %v2277_v30 = vadd.f32 %v2276_v20, %v2275_v55  ;;  %4227 = vmatprep.subr.bf16.mxu1 %v3303_v14  ;;  %v3300_v58 = vld [vmem:[%s6328_s14 + $0x28] sm:$0xff]  }
 0x73a   :  { %v2591_v44 = vrot.slane %v2590_v38, 4 }
 0x73b   :  { %3936 = vmatmul.mubr.f32.vlgmr.msra.gmra.mrb[22].mxu1 %v2598_v53  ;;  %v2278_v9 = vrot.slane %v2277_v30, 1  ;;  %v3309_v53 = vld [vmem:[%s6328_s14 + $0x70] sm:$0xff]  }
 0x73c   :  { %v2592_v23 = vadd.f32 %v2591_v44, %v2590_v38  ;;  %4229 = vmatpush3.bf16.msra.mxu1 %v3191_v3  ;;  %v51_v44 = vld [vmem:[%s6320_s4 + $0x8] sm:$0x1f] }
 0x73d   :  { %v2279_v2 = vadd.f32 %v2278_v9, %v2277_v30  ;;  %4231 = vmatprep.subr.bf16.mxu1 %v3304_v46  ;;  %v2740_v20 = vrot.slane %v51_v44, %v5105_v12  ;;  %v2898_v34 = vrot.slane %v51_v44, %v479_v11  ;;  %v2986_v11 = vrot.slane %v51_v44, %v570_v27 }
 0x73e   :  { %v2593_v19 = vrot.slane %v2592_v23, 2 }
 0x73f   :  { %4504 = vrcp.f32 %v2279_v2  ;;  %v3301_v2 = vld [vmem:[%s6328_s14 + $0x30] sm:$0xff]  }
 0x740   :  { %v2594_v17 = vadd.f32 %v2593_v19, %v2592_v23  ;;  %4233 = vmatpush3.bf16.msra.mxu1 %v3296_v29  ;;  %v2745_v19 = vrot.slane %v51_v44, %v5115_v24 }
 0x741   :  { %4235 = vmatprep.subr.bf16.mxu1 %v3305_v31 }
 0x742   :  { %v2595_v61 = vrot.slane %v2594_v17, 1 }
 0x744   :  { %v2596_v33 = vadd.f32 %v2595_v61, %v2594_v17  ;;  %4237 = vmatpush3.bf16.msra.mxu1 %v3297_v25  ;;  %v3310_v61 = vld [vmem:[%s6328_s14 + $0x78] sm:$0xff]  }
 0x745   :  { %4239 = vmatprep.subr.bf16.mxu1 %v3306_v16 }
 0x746   :  { %4506 = vrcp.f32 %v2596_v33  ;;  %v3302_v33 = vld [vmem:[%s6328_s14 + $0x38] sm:$0xff]  }
 0x748   :  { %4241 = vmatpush3.bf16.msra.mxu1 %v3298_v22 }
 0x749   :  { %v4505_v7 = vpop.eup %4504  ;;  %4243 = vmatprep.subr.bf16.mxu1 %v3307_v52 }
 0x74c   :  { %4245 = vmatpush3.bf16.msra.mxu1 %v3299_v60 }
 0x74d   :  { %4247 = vmatprep.subr.bf16.mxu1 %v3308_v39 }
 0x750   :  { %v4507_v50 = vpop.eup %4506  ;;  %4249 = vmatpush3.bf16.msra.mxu1 %v3300_v58 }
 0x751   :  { %4251 = vmatprep.subr.bf16.mxu1 %v3309_v53 }
 0x754   :  { %4253 = vmatpush3.bf16.msra.mxu1 %v3301_v2 }
 0x755   :  { %4255 = vmatprep.subr.bf16.mxu1 %v3310_v61 }
 0x758   :  { %4257 = vmatpush3.bf16.msra.mxu1 %v3302_v33 }
 0x809   :  { %v2346_v48 = vpop.f32.mrb[22].mxu0 }
 0x80a   :  { %v2351_v56 = vmul.f32 %v4505_v7, %v2346_v48  ;;  %v3902_v35 = vpop.f32.mrb[23].mxu0  ;;  %v2691_v7 = vld [vmem:[%s6329_s13] sm:$0x3] }
 0x80b   :  { %v2783_v48 = vrot.slane %v2691_v7, %v5105_v12 }
 0x80c   :  { %2352 = vst [vmem:[#allocation2] sm:$0x1] %v2351_v56  ;;  %v2787_v56 = vrot.slane %v2691_v7, %v5115_v24 }
 0x80e   :  { %v2666_v45 = vpop.f32.mrb[22].mxu1 }
 0x80f   :  { %v2671_v0 = vmul.f32 %v4507_v50, %v2666_v45  ;;  %v3937_v57 = vpop.f32.mrb[23].mxu1 }
 0x811   :  { %2672 = vst [vmem:[#allocation2 + $0x1] sm:$0x1] %v2671_v0 }
 0x818   :  { %v2673_v42 = vld [vmem:[#allocation2] sm:$0x3] }
 0x819   :  { %v6191_v18 = vadd.f32 %v2673_v42, %v5599_v26  ;;  %v4347_v26 = vld [vmem:[%s6327_s12 + $0x10] ss:$8 sps:$4 sm:$0xff]  }
 0x81a   :  { %4201 = vmatpush1.bf16.msra.mxu0 %v4347_v26 }
 0x81b   :  { %v2724_v5 = vsel %vm133_vm0, %v6191_v18, 0.0  ;;  %4203 = vmatprep.subr.bf16.mxu0 %v4348_v21 }
 0x81c   :  { %2725 = vadd.xlane.f32.xlu1 %v2724_v5 }
 0x81e   :  { %4205 = vmatpush1.bf16.msra.mxu0 %v4350_v37 }
 0x81f   :  { %4207 = vmatprep.subr.bf16.mxu0 %v4351_v10 }
 0x822   :  { %4209 = vmatpush1.bf16.msra.mxu0 %v4353_v63 }
 0x823   :  { %4211 = vmatprep.subr.bf16.mxu0 %v4354_v13 }
 0x826   :  { %4213 = vmatpush1.bf16.msra.mxu0 %v4356_v4 }
 0x827   :  { %4215 = vmatprep.subr.bf16.mxu0 %v4357_v6 }
 0x82a   :  { %4217 = vmatpush1.bf16.msra.mxu0 %v4359_v40 }
 0x82b   :  { %4219 = vmatprep.subr.bf16.mxu0 %v4360_v15 }
 0x82e   :  { %4221 = vmatpush1.bf16.msra.mxu0 %v4362_v62 }
 0x82f   :  { %4223 = vmatprep.subr.bf16.mxu0 %v4363_v1 }
 0x832   :  { %4225 = vmatpush1.bf16.msra.mxu0 %v4365_v36 }
 0x8a9   :  { %v2726_v8 = vpop.xlane.xlu1 %2725 }
 0x8aa   :  { %v2727_v59 = vmul.f32 0.0078125, %v2726_v8 }
 0x8ac   :  { %v2728_v41 = vsub.f32 %v6191_v18, %v2727_v59 }
 0x8ae   :  { %v2729_v43 = vmul.f32 %v2728_v41, %v2728_v41 }
 0x8b0   :  { %v2730_v51 = vsel %vm133_vm0, %v2729_v43, 0.0 }
 0x8b1   :  { %2731 = vadd.xlane.f32.xlu0 %v2730_v51 }
 0x93e   :  { %v2732_v38 = vpop.xlane.xlu0 %2731 }
 0x93f   :  { %v2733_v54 = vmul.f32 0.0078125, %v2732_v38 }
 0x941   :  { %v2734_v55 = vadd.f32 1e-05, %v2733_v54 }
 0x943   :  { %4508 = vrsqrt.f32 %v2734_v55 }
 0x94d   :  { %v4509_v23 = vpop.eup %4508 }
 0x94e   :  { %v2736_v30 = vmul.f32 %v4509_v23, %v2728_v41 }
 0x950   :  { %v2741_v9 = vmul.f32 %v2740_v20, %v2736_v30 }
 0x952   :  { %v2746_v17 = vadd.f32 %v2745_v19, %v2741_v9 }
 0x954   :  { %2855 = vmatmul.mubr.f32.vlgmr.msra.gmra.mrb[24].mxu0 %v2746_v17 }
 0xa27   :  { %v2856_v35 = vpop.f32.mrb[24].mxu0 }
 0xa28   :  { %v2857_v50 = vadd.f32 %v2856_v35, %v2783_v48  ;;  %v2858_v45 = vpop.f32.mrb[25].mxu0 }
 0xa29   :  { %v2859_v0 = vadd.f32 %v2858_v45, %v2787_v56 }
 0xa2a   :  { %v2861_v42 = vmax.f32 %v2857_v50, 0.0 }
 0xa2b   :  { %v2862_v57 = vmax.f32 %v2859_v0, 0.0 }
 0xa2d   :  { %2963 = vmatprep.mubr.f32.mxu1 %v2862_v57 }
 0xa2e   :  { %2964 = vmatmul.mubr.f32.vlgmr.msra.gmra.mrb[24].mxu1 %v2861_v42 }
 0xb01   :  { %v3543_v5 = vpop.f32.mrb[24].mxu1 }
 0xb02   :  { %v3544_v47 = vpop.f32.mrb[25].mxu1 }
 0xb03   :  { %v3545_v32 = vadd.f32 %v3544_v47, %v3543_v5 }
 0xb05   :  { %v2966_v26 = vadd.f32 %v3545_v32, %v2898_v34 }
 0xb07   :  { %v2969_v21 = vadd.f32 %v2966_v26, %v6191_v18  ;;  %v2991_v18 = vrot.slane %v51_v44, %v1605_v28 }
 0xb09   :  { %v2970_v12 = vsel %vm133_vm0, %v2969_v21, 0.0 }
 0xb0a   :  { %2971 = vadd.xlane.f32.xlu1 %v2970_v12 }
 0xb97   :  { %v2972_v24 = vpop.xlane.xlu1 %2971 }
 0xb98   :  { %v2973_v37 = vmul.f32 0.0078125, %v2972_v24 }
 0xb9a   :  { %v2974_v8 = vsub.f32 %v2969_v21, %v2973_v37 }
 0xb9c   :  { %v2975_v59 = vmul.f32 %v2974_v8, %v2974_v8 }
 0xb9e   :  { %v2976_v41 = vsel %vm133_vm0, %v2975_v59, 0.0 }
 0xb9f   :  { %2977 = vadd.xlane.f32.xlu0 %v2976_v41 }
 0xc2c   :  { %v2978_v43 = vpop.xlane.xlu0 %2977 }
 0xc2d   :  { %v2979_v51 = vmul.f32 0.0078125, %v2978_v43 }
 0xc2f   :  { %v2980_v10 = vadd.f32 1e-05, %v2979_v51 }
 0xc31   :  { %4510 = vrsqrt.f32 %v2980_v10 }
 0xc3b   :  { %v4511_v63 = vpop.eup %4510 }
 0xc3c   :  { %v2982_v13 = vmul.f32 %v4511_v63, %v2974_v8 }
 0xc3e   :  { %v2987_v4 = vmul.f32 %v2986_v11, %v2982_v13 }
 0xc40   :  { %v2992_v6 = vadd.f32 %v2991_v18, %v2987_v4 }
 0xc42   :  { %2993 = vst [vmem:[%s6330_s15] sm:$0x3] %v2992_v6 }

</bundles_post_ra>
